<compile_context>
chip_gen: v5e
topology: v5e:2x2
jax: 0.10.0
libtpu: 0.0.40
codegen_flags: <defaults>
</compile_context>

<pallas_src>
import math

import numpy as np
import jax
import jax.numpy as jnp
from jax.experimental import pallas as pl
from jax.experimental.pallas import tpu as pltpu

# Backbone configuration.
C_IN = 4
WIDTHS = (8, 16, 32, 64)
STRIDES = (1, 2, 2, 2)
NUM_CLASS = 32
BN_EPS = 1e-5


# ------------------------- init-time preprocessing ------------------------- #
# Everything in this section runs ONCE at model-setup time (plain numpy), never per step.

def _fold_bn(p):
    """Fold inference-mode BatchNorm3d into the preceding bias-free Conv3d."""
    w = np.asarray(p["w"], np.float32)
    scale = np.asarray(p["gamma"], np.float32) / np.sqrt(np.asarray(p["var"], np.float32) + BN_EPS)
    bias = np.asarray(p["beta"], np.float32) - np.asarray(p["mean"], np.float32) * scale
    return w * scale[:, None, None, None, None], bias


def _conv3d_dense(w, bias, in_dhw, stride, pad):
    """Dense per-sample operator of a Conv3d over the channels-last flattened vector.

    Activation layout: vec[((d*H + h)*W + w)*C + c]  (one vector per sample).
    Returns T:(S_in*C_in, S_out*C_out), bias:(1, S_out*C_out), out_dhw.
    Zero padding is handled by simply omitting out-of-range taps.
    """
    c_out, c_in, kd, kh, kw = w.shape
    d_in, h_in, w_in = in_dhw
    d_out = (d_in + 2 * pad - kd) // stride + 1
    h_out = (h_in + 2 * pad - kh) // stride + 1
    w_out = (w_in + 2 * pad - kw) // stride + 1
    T = np.zeros((d_in * h_in * w_in * c_in, d_out * h_out * w_out * c_out), np.float32)
    for do in range(d_out):
        for ho in range(h_out):
            for wo in range(w_out):
                ob = ((do * h_out + ho) * w_out + wo) * c_out
                for kz in range(kd):
                    di = do * stride + kz - pad
                    if di < 0 or di >= d_in:
                        continue
                    for ky in range(kh):
                        hi = ho * stride + ky - pad
                        if hi < 0 or hi >= h_in:
                            continue
                        for kx in range(kw):
                            wi = wo * stride + kx - pad
                            if wi < 0 or wi >= w_in:
                                continue
                            ib = ((di * h_in + hi) * w_in + wi) * c_in
                            T[ib:ib + c_in, ob:ob + c_out] += w[:, :, kz, ky, kx].T
    return T, np.tile(bias, d_out * h_out * w_out)[None, :], (d_out, h_out, w_out)


def _maxpool3d_selection(in_dhw, ch, k=3, stride=2, pad=1):
    """0/1 selection operator turning MaxPool3d(3,2,1) into one matmul + tap-wise max.

    Columns are tap-major: k^3 contiguous blocks of (S_out*ch) lanes.  Padding taps map
    to all-zero columns (value 0), exact because the pooled activation is post-ReLU.
    """
    d_in, h_in, w_in = in_dhw
    d_out = (d_in + 2 * pad - k) // stride + 1
    h_out = (h_in + 2 * pad - k) // stride + 1
    w_out = (w_in + 2 * pad - k) // stride + 1
    s_out = d_out * h_out * w_out
    P = np.zeros((d_in * h_in * w_in * ch, (k ** 3) * s_out * ch), np.float32)
    eye = np.eye(ch, dtype=np.float32)
    tap = 0
    for kz in range(k):
        for ky in range(k):
            for kx in range(k):
                for do in range(d_out):
                    di = do * stride + kz - pad
                    if di < 0 or di >= d_in:
                        continue
                    for ho in range(h_out):
                        hi = ho * stride + ky - pad
                        if hi < 0 or hi >= h_in:
                            continue
                        for wo in range(w_out):
                            wi = wo * stride + kx - pad
                            if wi < 0 or wi >= w_in:
                                continue
                            ib = ((di * h_in + hi) * w_in + wi) * ch
                            ob = (tap * s_out + ((do * h_out + ho) * w_out + wo)) * ch
                            P[ib:ib + ch, ob:ob + ch] = eye
                tap += 1
    return P, (d_out, h_out, w_out), k ** 3, s_out * ch


def prepare_operators(params, in_dhw):
    """BN folding, conv->dense operators, GAP folded into fc, bias reshapes, bf16 cast.

    Returns (order, mats, plan): `order` fixes the positional layout of kernel operands,
    `mats` holds the arrays, `plan` the static network structure.
    """
    mats, order = {}, []

    def add(name, T, bias=None):
        mats[name + "_w"] = jnp.asarray(T, jnp.bfloat16)        # matmul operands -> bf16
        order.append(name + "_w")
        if bias is not None:
            mats[name + "_b"] = jnp.asarray(bias, jnp.float32)  # accumulate / bias in f32
            order.append(name + "_b")

    # stem: Conv3d 7^3 / stride 2 / pad 3 (+ folded BN; ReLU applied in-kernel)
    w, b = _fold_bn(params["conv1"])
    T, bf, dhw = _conv3d_dense(w, b, in_dhw, stride=2, pad=3)
    add("stem", T, bf)

    # MaxPool3d 3^3 / stride 2 / pad 1
    P, dhw, n_taps, tap_len = _maxpool3d_selection(dhw, WIDTHS[0])
    add("pool", P)

    # 4 residual stages x 2 BasicBlocks
    has_down = {}
    for li, stride in enumerate(STRIDES, start=1):
        for bi in (0, 1):
            s = stride if bi == 0 else 1
            pre = f"l{li}b{bi}"
            w1, b1 = _fold_bn(params[pre]["conv1"])
            T1, bf1, out_dhw = _conv3d_dense(w1, b1, dhw, stride=s, pad=1)
            add(pre + "_c1", T1, bf1)
            w2, b2 = _fold_bn(params[pre]["conv2"])
            T2, bf2, _ = _conv3d_dense(w2, b2, out_dhw, stride=1, pad=1)
            add(pre + "_c2", T2, bf2)
            has_down[pre] = "down" in params[pre]
            if has_down[pre]:
                wd, bd = _fold_bn(params[pre]["down"])
                Td, bfd, _ = _conv3d_dense(wd, bd, dhw, stride=s, pad=0)
                add(pre + "_dn", Td, bfd)
            dhw = out_dhw

    # tail: global-average-pool folded into net_sm.fc (64 -> 32); li3_sm (32 -> 2)
    s_last = dhw[0] * dhw[1] * dhw[2]
    c_last = WIDTHS[-1]
    gap = np.kron(np.full((s_last, 1), 1.0 / s_last, np.float32),
                  np.eye(c_last, dtype=np.float32))             # (s_last*C, C)
    add("fc", gap @ np.asarray(params["fc"]["w"], np.float32).T,
        np.asarray(params["fc"]["b"], np.float32)[None, :])
    add("li3", np.asarray(params["li3"]["w"], np.float32).T,
        np.asarray(params["li3"]["b"], np.float32)[None, :])

    plan = dict(n_taps=n_taps, tap_len=tap_len, has_down=has_down)
    return order, mats, plan


# ------------------------------ fused kernel ------------------------------- #

def _make_fused_kernel(order, plan):
    n_taps, tap_len, has_down = plan["n_taps"], plan["tap_len"], plan["has_down"]

    def mm(a, w_ref, b_ref=None, relu=False):
        # bf16 operands, f32 accumulation on the MXU.
        acc = jnp.dot(a.astype(jnp.bfloat16), w_ref[...],
                      preferred_element_type=jnp.float32)
        if b_ref is not None:
            acc = acc + b_ref[...]
        if relu:
            acc = jnp.maximum(acc, 0.0)
        return acc

    def kernel(*refs):
        x_ref, o_ref = refs[0], refs[-1]
        w = dict(zip(order, refs[1:-1]))

        x = x_ref[0].astype(jnp.float32)                        # (1, S0*C_in)

        # stem conv + folded BN + ReLU
        h = mm(x, w["stem_w"], w["stem_b"], relu=True)

        # maxpool 3^3/s2/p1: one selection matmul, then max over the 27 tap blocks
        z = mm(h, w["pool_w"])
        h = z[:, 0:tap_len]
        for t in range(1, n_taps):
            h = jnp.maximum(h, z[:, t * tap_len:(t + 1) * tap_len])

        # residual stages (all activations stay resident on-chip)
        for li in range(1, 5):
            for bi in (0, 1):
                pre = f"l{li}b{bi}"
                out = mm(h, w[pre + "_c1_w"], w[pre + "_c1_b"], relu=True)
                out = mm(out, w[pre + "_c2_w"], w[pre + "_c2_b"])
                idn = mm(h, w[pre + "_dn_w"], w[pre + "_dn_b"]) if has_down[pre] else h
                h = jnp.maximum(out + idn, 0.0)

        # GAP + fc(64->32) fused, top-level F.relu, then li3_sm(32->2)
        h = mm(h, w["fc_w"], w["fc_b"], relu=True)
        o_ref[0] = mm(h, w["li3_w"], w["li3_b"]).astype(o_ref.dtype)

    return kernel


def make_forward(order, plan):
    """Returns a jitted forward(mats, data) running the whole network in one pallas_call."""

    def forward(mats, data):
        n = data.shape[0]
        # single one-time layout change: NCDHW -> per-sample channels-last flattened vector
        x = data.transpose(0, 2, 3, 4, 1).reshape(n, 1, -1).astype(jnp.float32)
        arrs = [mats[k] for k in order]
        in_specs = [pl.BlockSpec((1, 1, x.shape[-1]), lambda i: (i, 0, 0))]
        in_specs += [pl.BlockSpec(a.shape, lambda i: (0, 0)) for a in arrs]
        out = pl.pallas_call(
            _make_fused_kernel(order, plan),
            out_shape=jax.ShapeDtypeStruct((n, 1, 2), jnp.float32),
            grid_spec=pltpu.PrefetchScalarGridSpec(
                num_scalar_prefetch=0,
                grid=(n,),                                    # batch-parallel (2 TCs on v7x)
                in_specs=in_specs,
                out_specs=pl.BlockSpec((1, 1, 2), lambda i: (i, 0, 0)),
            ),
            compiler_params=pltpu.CompilerParams(
                dimension_semantics=("parallel",)),
        )(x, *arrs)
        return out.reshape(n, 2)

    return jax.jit(forward)


# ----------------------------- parameter init ------------------------------ #

def init_params(key):
    keys = iter(jax.random.split(key, 256))

    def conv_bn(co, ci, k):
        w = jax.random.normal(next(keys), (co, ci, k, k, k), jnp.float32) / math.sqrt(ci * k ** 3)
        return dict(
            w=w,
            gamma=1.0 + 0.1 * jax.random.normal(next(keys), (co,), jnp.float32),
            beta=0.1 * jax.random.normal(next(keys), (co,), jnp.float32),
            mean=0.05 * jax.random.normal(next(keys), (co,), jnp.float32),
            var=1.0 + 0.1 * jax.random.uniform(next(keys), (co,), jnp.float32),
        )

    def linear(co, ci):
        return dict(w=jax.random.normal(next(keys), (co, ci), jnp.float32) / math.sqrt(ci),
                    b=0.1 * jax.random.normal(next(keys), (co,), jnp.float32))

    params = {"conv1": conv_bn(WIDTHS[0], C_IN, 7)}
    prev = WIDTHS[0]
    for li, (width, stride) in enumerate(zip(WIDTHS, STRIDES), start=1):
        for bi in (0, 1):
            s = stride if bi == 0 else 1
            cin = prev if bi == 0 else width
            blk = {"conv1": conv_bn(width, cin, 3), "conv2": conv_bn(width, width, 3)}
            if s != 1 or cin != width:
                blk["down"] = conv_bn(width, cin, 1)
            params[f"l{li}b{bi}"] = blk
        prev = width
    params["fc"] = linear(NUM_CLASS, WIDTHS[-1])   # net_sm.fc : 64 -> 32
    params["li3"] = linear(2, NUM_CLASS)           # li3_sm    : 32 -> 2
    return params


# ---------------------------------- main ----------------------------------- #

if __name__ == "__main__":
    key = jax.random.PRNGKey(0)
    pkey, dkey = jax.random.split(key)
    params = init_params(pkey)

    # data: (batch=2, channels=4, depth=8, height=8, width=8) volumetric input, NCDHW.
    data = jax.random.normal(dkey, (2, C_IN, 8, 8, 8), jnp.float32)

    order, mats, plan = prepare_operators(params, in_dhw=(8, 8, 8))
    forward = make_forward(order, plan)

    z = forward(mats, data)
    jax.block_until_ready(z)
    assert z.shape == (2, 2) and z.dtype == jnp.float32
    print("KERNEL_OK")
</pallas_src>

<mosaic_0001>
module attributes {stable_mosaic.version = 11 : i64} {
  func.func @kernel(%arg0: i32, %arg1: memref<1x1x2048xf32, #tpu.memory_space<vmem>>, %arg2: memref<2048x512xbf16, #tpu.memory_space<vmem>>, %arg3: memref<1x512xf32, #tpu.memory_space<vmem>>, %arg4: memref<512x1728xbf16, #tpu.memory_space<vmem>>, %arg5: memref<64x64xbf16, #tpu.memory_space<vmem>>, %arg6: memref<1x64xf32, #tpu.memory_space<vmem>>, %arg7: memref<64x64xbf16, #tpu.memory_space<vmem>>, %arg8: memref<1x64xf32, #tpu.memory_space<vmem>>, %arg9: memref<64x64xbf16, #tpu.memory_space<vmem>>, %arg10: memref<1x64xf32, #tpu.memory_space<vmem>>, %arg11: memref<64x64xbf16, #tpu.memory_space<vmem>>, %arg12: memref<1x64xf32, #tpu.memory_space<vmem>>, %arg13: memref<64x16xbf16, #tpu.memory_space<vmem>>, %arg14: memref<1x16xf32, #tpu.memory_space<vmem>>, %arg15: memref<16x16xbf16, #tpu.memory_space<vmem>>, %arg16: memref<1x16xf32, #tpu.memory_space<vmem>>, %arg17: memref<64x16xbf16, #tpu.memory_space<vmem>>, %arg18: memref<1x16xf32, #tpu.memory_space<vmem>>, %arg19: memref<16x16xbf16, #tpu.memory_space<vmem>>, %arg20: memref<1x16xf32, #tpu.memory_space<vmem>>, %arg21: memref<16x16xbf16, #tpu.memory_space<vmem>>, %arg22: memref<1x16xf32, #tpu.memory_space<vmem>>, %arg23: memref<16x32xbf16, #tpu.memory_space<vmem>>, %arg24: memref<1x32xf32, #tpu.memory_space<vmem>>, %arg25: memref<32x32xbf16, #tpu.memory_space<vmem>>, %arg26: memref<1x32xf32, #tpu.memory_space<vmem>>, %arg27: memref<16x32xbf16, #tpu.memory_space<vmem>>, %arg28: memref<1x32xf32, #tpu.memory_space<vmem>>, %arg29: memref<32x32xbf16, #tpu.memory_space<vmem>>, %arg30: memref<1x32xf32, #tpu.memory_space<vmem>>, %arg31: memref<32x32xbf16, #tpu.memory_space<vmem>>, %arg32: memref<1x32xf32, #tpu.memory_space<vmem>>, %arg33: memref<32x64xbf16, #tpu.memory_space<vmem>>, %arg34: memref<1x64xf32, #tpu.memory_space<vmem>>, %arg35: memref<64x64xbf16, #tpu.memory_space<vmem>>, %arg36: memref<1x64xf32, #tpu.memory_space<vmem>>, %arg37: memref<32x64xbf16, #tpu.memory_space<vmem>>, %arg38: memref<1x64xf32, #tpu.memory_space<vmem>>, %arg39: memref<64x64xbf16, #tpu.memory_space<vmem>>, %arg40: memref<1x64xf32, #tpu.memory_space<vmem>>, %arg41: memref<64x64xbf16, #tpu.memory_space<vmem>>, %arg42: memref<1x64xf32, #tpu.memory_space<vmem>>, %arg43: memref<64x32xbf16, #tpu.memory_space<vmem>>, %arg44: memref<1x32xf32, #tpu.memory_space<vmem>>, %arg45: memref<32x2xbf16, #tpu.memory_space<vmem>>, %arg46: memref<1x2xf32, #tpu.memory_space<vmem>>, %arg47: memref<1x1x2xf32, #tpu.memory_space<vmem>>) attributes {dimension_semantics = [#tpu.dimension_semantics<parallel>], iteration_bounds = array<i64: 2>, scalar_prefetch = 0 : i64, scratch_operands = 0 : i64, tpu.core_type = #tpu.core_type<tc>, window_params = [{transform_indices = @transform_0, window_bounds = array<i64: 1, 1, 2048>}, {pipeline_mode = #tpu.pipeline_mode<synchronous>, transform_indices = @transform_1, window_bounds = array<i64: 2048, 512>}, {pipeline_mode = #tpu.pipeline_mode<synchronous>, transform_indices = @transform_2, window_bounds = array<i64: 1, 512>}, {pipeline_mode = #tpu.pipeline_mode<synchronous>, transform_indices = @transform_3, window_bounds = array<i64: 512, 1728>}, {pipeline_mode = #tpu.pipeline_mode<synchronous>, transform_indices = @transform_4, window_bounds = array<i64: 64, 64>}, {pipeline_mode = #tpu.pipeline_mode<synchronous>, transform_indices = @transform_5, window_bounds = array<i64: 1, 64>}, {pipeline_mode = #tpu.pipeline_mode<synchronous>, transform_indices = @transform_6, window_bounds = array<i64: 64, 64>}, {pipeline_mode = #tpu.pipeline_mode<synchronous>, transform_indices = @transform_7, window_bounds = array<i64: 1, 64>}, {pipeline_mode = #tpu.pipeline_mode<synchronous>, transform_indices = @transform_8, window_bounds = array<i64: 64, 64>}, {pipeline_mode = #tpu.pipeline_mode<synchronous>, transform_indices = @transform_9, window_bounds = array<i64: 1, 64>}, {pipeline_mode = #tpu.pipeline_mode<synchronous>, transform_indices = @transform_10, window_bounds = array<i64: 64, 64>}, {pipeline_mode = #tpu.pipeline_mode<synchronous>, transform_indices = @transform_11, window_bounds = array<i64: 1, 64>}, {pipeline_mode = #tpu.pipeline_mode<synchronous>, transform_indices = @transform_12, window_bounds = array<i64: 64, 16>}, {pipeline_mode = #tpu.pipeline_mode<synchronous>, transform_indices = @transform_13, window_bounds = array<i64: 1, 16>}, {pipeline_mode = #tpu.pipeline_mode<synchronous>, transform_indices = @transform_14, window_bounds = array<i64: 16, 16>}, {pipeline_mode = #tpu.pipeline_mode<synchronous>, transform_indices = @transform_15, window_bounds = array<i64: 1, 16>}, {pipeline_mode = #tpu.pipeline_mode<synchronous>, transform_indices = @transform_16, window_bounds = array<i64: 64, 16>}, {pipeline_mode = #tpu.pipeline_mode<synchronous>, transform_indices = @transform_17, window_bounds = array<i64: 1, 16>}, {pipeline_mode = #tpu.pipeline_mode<synchronous>, transform_indices = @transform_18, window_bounds = array<i64: 16, 16>}, {pipeline_mode = #tpu.pipeline_mode<synchronous>, transform_indices = @transform_19, window_bounds = array<i64: 1, 16>}, {pipeline_mode = #tpu.pipeline_mode<synchronous>, transform_indices = @transform_20, window_bounds = array<i64: 16, 16>}, {pipeline_mode = #tpu.pipeline_mode<synchronous>, transform_indices = @transform_21, window_bounds = array<i64: 1, 16>}, {pipeline_mode = #tpu.pipeline_mode<synchronous>, transform_indices = @transform_22, window_bounds = array<i64: 16, 32>}, {pipeline_mode = #tpu.pipeline_mode<synchronous>, transform_indices = @transform_23, window_bounds = array<i64: 1, 32>}, {pipeline_mode = #tpu.pipeline_mode<synchronous>, transform_indices = @transform_24, window_bounds = array<i64: 32, 32>}, {pipeline_mode = #tpu.pipeline_mode<synchronous>, transform_indices = @transform_25, window_bounds = array<i64: 1, 32>}, {pipeline_mode = #tpu.pipeline_mode<synchronous>, transform_indices = @transform_26, window_bounds = array<i64: 16, 32>}, {pipeline_mode = #tpu.pipeline_mode<synchronous>, transform_indices = @transform_27, window_bounds = array<i64: 1, 32>}, {pipeline_mode = #tpu.pipeline_mode<synchronous>, transform_indices = @transform_28, window_bounds = array<i64: 32, 32>}, {pipeline_mode = #tpu.pipeline_mode<synchronous>, transform_indices = @transform_29, window_bounds = array<i64: 1, 32>}, {pipeline_mode = #tpu.pipeline_mode<synchronous>, transform_indices = @transform_30, window_bounds = array<i64: 32, 32>}, {pipeline_mode = #tpu.pipeline_mode<synchronous>, transform_indices = @transform_31, window_bounds = array<i64: 1, 32>}, {pipeline_mode = #tpu.pipeline_mode<synchronous>, transform_indices = @transform_32, window_bounds = array<i64: 32, 64>}, {pipeline_mode = #tpu.pipeline_mode<synchronous>, transform_indices = @transform_33, window_bounds = array<i64: 1, 64>}, {pipeline_mode = #tpu.pipeline_mode<synchronous>, transform_indices = @transform_34, window_bounds = array<i64: 64, 64>}, {pipeline_mode = #tpu.pipeline_mode<synchronous>, transform_indices = @transform_35, window_bounds = array<i64: 1, 64>}, {pipeline_mode = #tpu.pipeline_mode<synchronous>, transform_indices = @transform_36, window_bounds = array<i64: 32, 64>}, {pipeline_mode = #tpu.pipeline_mode<synchronous>, transform_indices = @transform_37, window_bounds = array<i64: 1, 64>}, {pipeline_mode = #tpu.pipeline_mode<synchronous>, transform_indices = @transform_38, window_bounds = array<i64: 64, 64>}, {pipeline_mode = #tpu.pipeline_mode<synchronous>, transform_indices = @transform_39, window_bounds = array<i64: 1, 64>}, {pipeline_mode = #tpu.pipeline_mode<synchronous>, transform_indices = @transform_40, window_bounds = array<i64: 64, 64>}, {pipeline_mode = #tpu.pipeline_mode<synchronous>, transform_indices = @transform_41, window_bounds = array<i64: 1, 64>}, {pipeline_mode = #tpu.pipeline_mode<synchronous>, transform_indices = @transform_42, window_bounds = array<i64: 64, 32>}, {pipeline_mode = #tpu.pipeline_mode<synchronous>, transform_indices = @transform_43, window_bounds = array<i64: 1, 32>}, {pipeline_mode = #tpu.pipeline_mode<synchronous>, transform_indices = @transform_44, window_bounds = array<i64: 32, 2>}, {pipeline_mode = #tpu.pipeline_mode<synchronous>, transform_indices = @transform_45, window_bounds = array<i64: 1, 2>}, {transform_indices = @transform_46, window_bounds = array<i64: 1, 1, 2>}]} {
    %c0 = arith.constant 0 : index
    %c0_0 = arith.constant 0 : index
    %c0_1 = arith.constant 0 : index
    %0 = vector.load %arg1[%c0, %c0_0, %c0_1] : memref<1x1x2048xf32, #tpu.memory_space<vmem>>, vector<1x1x2048xf32>
    %1 = vector.shape_cast %0 : vector<1x1x2048xf32> to vector<1x2048xf32>
    %2 = arith.truncf %1 : vector<1x2048xf32> to vector<1x2048xbf16>
    %c0_2 = arith.constant 0 : index
    %c0_3 = arith.constant 0 : index
    %3 = vector.load %arg2[%c0_2, %c0_3] : memref<2048x512xbf16, #tpu.memory_space<vmem>>, vector<2048x512xbf16>
    %cst = arith.constant dense<0.000000e+00> : vector<1x512xf32>
    %4 = tpu.matmul %2, %3, %cst {dimension_numbers = #tpu.dot_dimension_numbers<[1], [0], [0], [1], [0, 0, 1, 1], [], []>} : vector<1x2048xbf16>, vector<2048x512xbf16>, vector<1x512xf32> -> vector<1x512xf32>
    %c0_4 = arith.constant 0 : index
    %c0_5 = arith.constant 0 : index
    %5 = vector.load %arg3[%c0_4, %c0_5] : memref<1x512xf32, #tpu.memory_space<vmem>>, vector<1x512xf32>
    %6 = arith.addf %4, %5 : vector<1x512xf32>
    %cst_6 = arith.constant 0.000000e+00 : f32
    %7 = vector.broadcast %cst_6 : f32 to vector<1x512xf32>
    %8 = arith.maximumf %6, %7 : vector<1x512xf32>
    %9 = arith.truncf %8 : vector<1x512xf32> to vector<1x512xbf16>
    %c0_7 = arith.constant 0 : index
    %c0_8 = arith.constant 0 : index
    %10 = vector.load %arg4[%c0_7, %c0_8] : memref<512x1728xbf16, #tpu.memory_space<vmem>>, vector<512x1728xbf16>
    %cst_9 = arith.constant dense<0.000000e+00> : vector<1x1728xf32>
    %11 = tpu.matmul %9, %10, %cst_9 {dimension_numbers = #tpu.dot_dimension_numbers<[1], [0], [0], [1], [0, 0, 1, 1], [], []>} : vector<1x512xbf16>, vector<512x1728xbf16>, vector<1x1728xf32> -> vector<1x1728xf32>
    %12 = vector.extract_strided_slice %11 {offsets = [0, 0], sizes = [1, 64], strides = [1, 1]} : vector<1x1728xf32> to vector<1x64xf32>
    %13 = vector.extract_strided_slice %11 {offsets = [0, 64], sizes = [1, 64], strides = [1, 1]} : vector<1x1728xf32> to vector<1x64xf32>
    %14 = arith.maximumf %12, %13 : vector<1x64xf32>
    %15 = vector.extract_strided_slice %11 {offsets = [0, 128], sizes = [1, 64], strides = [1, 1]} : vector<1x1728xf32> to vector<1x64xf32>
    %16 = arith.maximumf %14, %15 : vector<1x64xf32>
    %17 = vector.extract_strided_slice %11 {offsets = [0, 192], sizes = [1, 64], strides = [1, 1]} : vector<1x1728xf32> to vector<1x64xf32>
    %18 = arith.maximumf %16, %17 : vector<1x64xf32>
    %19 = vector.extract_strided_slice %11 {offsets = [0, 256], sizes = [1, 64], strides = [1, 1]} : vector<1x1728xf32> to vector<1x64xf32>
    %20 = arith.maximumf %18, %19 : vector<1x64xf32>
    %21 = vector.extract_strided_slice %11 {offsets = [0, 320], sizes = [1, 64], strides = [1, 1]} : vector<1x1728xf32> to vector<1x64xf32>
    %22 = arith.maximumf %20, %21 : vector<1x64xf32>
    %23 = vector.extract_strided_slice %11 {offsets = [0, 384], sizes = [1, 64], strides = [1, 1]} : vector<1x1728xf32> to vector<1x64xf32>
    %24 = arith.maximumf %22, %23 : vector<1x64xf32>
    %25 = vector.extract_strided_slice %11 {offsets = [0, 448], sizes = [1, 64], strides = [1, 1]} : vector<1x1728xf32> to vector<1x64xf32>
    %26 = arith.maximumf %24, %25 : vector<1x64xf32>
    %27 = vector.extract_strided_slice %11 {offsets = [0, 512], sizes = [1, 64], strides = [1, 1]} : vector<1x1728xf32> to vector<1x64xf32>
    %28 = arith.maximumf %26, %27 : vector<1x64xf32>
    %29 = vector.extract_strided_slice %11 {offsets = [0, 576], sizes = [1, 64], strides = [1, 1]} : vector<1x1728xf32> to vector<1x64xf32>
    %30 = arith.maximumf %28, %29 : vector<1x64xf32>
    %31 = vector.extract_strided_slice %11 {offsets = [0, 640], sizes = [1, 64], strides = [1, 1]} : vector<1x1728xf32> to vector<1x64xf32>
    %32 = arith.maximumf %30, %31 : vector<1x64xf32>
    %33 = vector.extract_strided_slice %11 {offsets = [0, 704], sizes = [1, 64], strides = [1, 1]} : vector<1x1728xf32> to vector<1x64xf32>
    %34 = arith.maximumf %32, %33 : vector<1x64xf32>
    %35 = vector.extract_strided_slice %11 {offsets = [0, 768], sizes = [1, 64], strides = [1, 1]} : vector<1x1728xf32> to vector<1x64xf32>
    %36 = arith.maximumf %34, %35 : vector<1x64xf32>
    %37 = vector.extract_strided_slice %11 {offsets = [0, 832], sizes = [1, 64], strides = [1, 1]} : vector<1x1728xf32> to vector<1x64xf32>
    %38 = arith.maximumf %36, %37 : vector<1x64xf32>
    %39 = vector.extract_strided_slice %11 {offsets = [0, 896], sizes = [1, 64], strides = [1, 1]} : vector<1x1728xf32> to vector<1x64xf32>
    %40 = arith.maximumf %38, %39 : vector<1x64xf32>
    %41 = vector.extract_strided_slice %11 {offsets = [0, 960], sizes = [1, 64], strides = [1, 1]} : vector<1x1728xf32> to vector<1x64xf32>
    %42 = arith.maximumf %40, %41 : vector<1x64xf32>
    %43 = vector.extract_strided_slice %11 {offsets = [0, 1024], sizes = [1, 64], strides = [1, 1]} : vector<1x1728xf32> to vector<1x64xf32>
    %44 = arith.maximumf %42, %43 : vector<1x64xf32>
    %45 = vector.extract_strided_slice %11 {offsets = [0, 1088], sizes = [1, 64], strides = [1, 1]} : vector<1x1728xf32> to vector<1x64xf32>
    %46 = arith.maximumf %44, %45 : vector<1x64xf32>
    %47 = vector.extract_strided_slice %11 {offsets = [0, 1152], sizes = [1, 64], strides = [1, 1]} : vector<1x1728xf32> to vector<1x64xf32>
    %48 = arith.maximumf %46, %47 : vector<1x64xf32>
    %49 = vector.extract_strided_slice %11 {offsets = [0, 1216], sizes = [1, 64], strides = [1, 1]} : vector<1x1728xf32> to vector<1x64xf32>
    %50 = arith.maximumf %48, %49 : vector<1x64xf32>
    %51 = vector.extract_strided_slice %11 {offsets = [0, 1280], sizes = [1, 64], strides = [1, 1]} : vector<1x1728xf32> to vector<1x64xf32>
    %52 = arith.maximumf %50, %51 : vector<1x64xf32>
    %53 = vector.extract_strided_slice %11 {offsets = [0, 1344], sizes = [1, 64], strides = [1, 1]} : vector<1x1728xf32> to vector<1x64xf32>
    %54 = arith.maximumf %52, %53 : vector<1x64xf32>
    %55 = vector.extract_strided_slice %11 {offsets = [0, 1408], sizes = [1, 64], strides = [1, 1]} : vector<1x1728xf32> to vector<1x64xf32>
    %56 = arith.maximumf %54, %55 : vector<1x64xf32>
    %57 = vector.extract_strided_slice %11 {offsets = [0, 1472], sizes = [1, 64], strides = [1, 1]} : vector<1x1728xf32> to vector<1x64xf32>
    %58 = arith.maximumf %56, %57 : vector<1x64xf32>
    %59 = vector.extract_strided_slice %11 {offsets = [0, 1536], sizes = [1, 64], strides = [1, 1]} : vector<1x1728xf32> to vector<1x64xf32>
    %60 = arith.maximumf %58, %59 : vector<1x64xf32>
    %61 = vector.extract_strided_slice %11 {offsets = [0, 1600], sizes = [1, 64], strides = [1, 1]} : vector<1x1728xf32> to vector<1x64xf32>
    %62 = arith.maximumf %60, %61 : vector<1x64xf32>
    %63 = vector.extract_strided_slice %11 {offsets = [0, 1664], sizes = [1, 64], strides = [1, 1]} : vector<1x1728xf32> to vector<1x64xf32>
    %64 = arith.maximumf %62, %63 : vector<1x64xf32>
    %65 = arith.truncf %64 : vector<1x64xf32> to vector<1x64xbf16>
    %c0_10 = arith.constant 0 : index
    %c0_11 = arith.constant 0 : index
    %66 = vector.load %arg5[%c0_10, %c0_11] : memref<64x64xbf16, #tpu.memory_space<vmem>>, vector<64x64xbf16>
    %cst_12 = arith.constant dense<0.000000e+00> : vector<1x64xf32>
    %67 = tpu.matmul %65, %66, %cst_12 {dimension_numbers = #tpu.dot_dimension_numbers<[1], [0], [0], [1], [0, 0, 1, 1], [], []>} : vector<1x64xbf16>, vector<64x64xbf16>, vector<1x64xf32> -> vector<1x64xf32>
    %c0_13 = arith.constant 0 : index
    %c0_14 = arith.constant 0 : index
    %68 = vector.load %arg6[%c0_13, %c0_14] : memref<1x64xf32, #tpu.memory_space<vmem>>, vector<1x64xf32>
    %69 = arith.addf %67, %68 : vector<1x64xf32>
    %cst_15 = arith.constant 0.000000e+00 : f32
    %70 = vector.broadcast %cst_15 : f32 to vector<1x64xf32>
    %71 = arith.maximumf %69, %70 : vector<1x64xf32>
    %72 = arith.truncf %71 : vector<1x64xf32> to vector<1x64xbf16>
    %c0_16 = arith.constant 0 : index
    %c0_17 = arith.constant 0 : index
    %73 = vector.load %arg7[%c0_16, %c0_17] : memref<64x64xbf16, #tpu.memory_space<vmem>>, vector<64x64xbf16>
    %cst_18 = arith.constant dense<0.000000e+00> : vector<1x64xf32>
    %74 = tpu.matmul %72, %73, %cst_18 {dimension_numbers = #tpu.dot_dimension_numbers<[1], [0], [0], [1], [0, 0, 1, 1], [], []>} : vector<1x64xbf16>, vector<64x64xbf16>, vector<1x64xf32> -> vector<1x64xf32>
    %c0_19 = arith.constant 0 : index
    %c0_20 = arith.constant 0 : index
    %75 = vector.load %arg8[%c0_19, %c0_20] : memref<1x64xf32, #tpu.memory_space<vmem>>, vector<1x64xf32>
    %76 = arith.addf %74, %75 : vector<1x64xf32>
    %77 = arith.addf %76, %64 : vector<1x64xf32>
    %cst_21 = arith.constant 0.000000e+00 : f32
    %78 = vector.broadcast %cst_21 : f32 to vector<1x64xf32>
    %79 = arith.maximumf %77, %78 : vector<1x64xf32>
    %80 = arith.truncf %79 : vector<1x64xf32> to vector<1x64xbf16>
    %c0_22 = arith.constant 0 : index
    %c0_23 = arith.constant 0 : index
    %81 = vector.load %arg9[%c0_22, %c0_23] : memref<64x64xbf16, #tpu.memory_space<vmem>>, vector<64x64xbf16>
    %cst_24 = arith.constant dense<0.000000e+00> : vector<1x64xf32>
    %82 = tpu.matmul %80, %81, %cst_24 {dimension_numbers = #tpu.dot_dimension_numbers<[1], [0], [0], [1], [0, 0, 1, 1], [], []>} : vector<1x64xbf16>, vector<64x64xbf16>, vector<1x64xf32> -> vector<1x64xf32>
    %c0_25 = arith.constant 0 : index
    %c0_26 = arith.constant 0 : index
    %83 = vector.load %arg10[%c0_25, %c0_26] : memref<1x64xf32, #tpu.memory_space<vmem>>, vector<1x64xf32>
    %84 = arith.addf %82, %83 : vector<1x64xf32>
    %cst_27 = arith.constant 0.000000e+00 : f32
    %85 = vector.broadcast %cst_27 : f32 to vector<1x64xf32>
    %86 = arith.maximumf %84, %85 : vector<1x64xf32>
    %87 = arith.truncf %86 : vector<1x64xf32> to vector<1x64xbf16>
    %c0_28 = arith.constant 0 : index
    %c0_29 = arith.constant 0 : index
    %88 = vector.load %arg11[%c0_28, %c0_29] : memref<64x64xbf16, #tpu.memory_space<vmem>>, vector<64x64xbf16>
    %cst_30 = arith.constant dense<0.000000e+00> : vector<1x64xf32>
    %89 = tpu.matmul %87, %88, %cst_30 {dimension_numbers = #tpu.dot_dimension_numbers<[1], [0], [0], [1], [0, 0, 1, 1], [], []>} : vector<1x64xbf16>, vector<64x64xbf16>, vector<1x64xf32> -> vector<1x64xf32>
    %c0_31 = arith.constant 0 : index
    %c0_32 = arith.constant 0 : index
    %90 = vector.load %arg12[%c0_31, %c0_32] : memref<1x64xf32, #tpu.memory_space<vmem>>, vector<1x64xf32>
    %91 = arith.addf %89, %90 : vector<1x64xf32>
    %92 = arith.addf %91, %79 : vector<1x64xf32>
    %cst_33 = arith.constant 0.000000e+00 : f32
    %93 = vector.broadcast %cst_33 : f32 to vector<1x64xf32>
    %94 = arith.maximumf %92, %93 : vector<1x64xf32>
    %95 = arith.truncf %94 : vector<1x64xf32> to vector<1x64xbf16>
    %c0_34 = arith.constant 0 : index
    %c0_35 = arith.constant 0 : index
    %96 = vector.load %arg13[%c0_34, %c0_35] : memref<64x16xbf16, #tpu.memory_space<vmem>>, vector<64x16xbf16>
    %cst_36 = arith.constant dense<0.000000e+00> : vector<1x16xf32>
    %97 = tpu.matmul %95, %96, %cst_36 {dimension_numbers = #tpu.dot_dimension_numbers<[1], [0], [0], [1], [0, 0, 1, 1], [], []>} : vector<1x64xbf16>, vector<64x16xbf16>, vector<1x16xf32> -> vector<1x16xf32>
    %c0_37 = arith.constant 0 : index
    %c0_38 = arith.constant 0 : index
    %98 = vector.load %arg14[%c0_37, %c0_38] : memref<1x16xf32, #tpu.memory_space<vmem>>, vector<1x16xf32>
    %99 = arith.addf %97, %98 : vector<1x16xf32>
    %cst_39 = arith.constant 0.000000e+00 : f32
    %100 = vector.broadcast %cst_39 : f32 to vector<1x16xf32>
    %101 = arith.maximumf %99, %100 : vector<1x16xf32>
    %102 = arith.truncf %101 : vector<1x16xf32> to vector<1x16xbf16>
    %c0_40 = arith.constant 0 : index
    %c0_41 = arith.constant 0 : index
    %103 = vector.load %arg15[%c0_40, %c0_41] : memref<16x16xbf16, #tpu.memory_space<vmem>>, vector<16x16xbf16>
    %cst_42 = arith.constant dense<0.000000e+00> : vector<1x16xf32>
    %104 = tpu.matmul %102, %103, %cst_42 {dimension_numbers = #tpu.dot_dimension_numbers<[1], [0], [0], [1], [0, 0, 1, 1], [], []>} : vector<1x16xbf16>, vector<16x16xbf16>, vector<1x16xf32> -> vector<1x16xf32>
    %c0_43 = arith.constant 0 : index
    %c0_44 = arith.constant 0 : index
    %105 = vector.load %arg16[%c0_43, %c0_44] : memref<1x16xf32, #tpu.memory_space<vmem>>, vector<1x16xf32>
    %106 = arith.addf %104, %105 : vector<1x16xf32>
    %107 = arith.truncf %94 : vector<1x64xf32> to vector<1x64xbf16>
    %c0_45 = arith.constant 0 : index
    %c0_46 = arith.constant 0 : index
    %108 = vector.load %arg17[%c0_45, %c0_46] : memref<64x16xbf16, #tpu.memory_space<vmem>>, vector<64x16xbf16>
    %cst_47 = arith.constant dense<0.000000e+00> : vector<1x16xf32>
    %109 = tpu.matmul %107, %108, %cst_47 {dimension_numbers = #tpu.dot_dimension_numbers<[1], [0], [0], [1], [0, 0, 1, 1], [], []>} : vector<1x64xbf16>, vector<64x16xbf16>, vector<1x16xf32> -> vector<1x16xf32>
    %c0_48 = arith.constant 0 : index
    %c0_49 = arith.constant 0 : index
    %110 = vector.load %arg18[%c0_48, %c0_49] : memref<1x16xf32, #tpu.memory_space<vmem>>, vector<1x16xf32>
    %111 = arith.addf %109, %110 : vector<1x16xf32>
    %112 = arith.addf %106, %111 : vector<1x16xf32>
    %cst_50 = arith.constant 0.000000e+00 : f32
    %113 = vector.broadcast %cst_50 : f32 to vector<1x16xf32>
    %114 = arith.maximumf %112, %113 : vector<1x16xf32>
    %115 = arith.truncf %114 : vector<1x16xf32> to vector<1x16xbf16>
    %c0_51 = arith.constant 0 : index
    %c0_52 = arith.constant 0 : index
    %116 = vector.load %arg19[%c0_51, %c0_52] : memref<16x16xbf16, #tpu.memory_space<vmem>>, vector<16x16xbf16>
    %cst_53 = arith.constant dense<0.000000e+00> : vector<1x16xf32>
    %117 = tpu.matmul %115, %116, %cst_53 {dimension_numbers = #tpu.dot_dimension_numbers<[1], [0], [0], [1], [0, 0, 1, 1], [], []>} : vector<1x16xbf16>, vector<16x16xbf16>, vector<1x16xf32> -> vector<1x16xf32>
    %c0_54 = arith.constant 0 : index
    %c0_55 = arith.constant 0 : index
    %118 = vector.load %arg20[%c0_54, %c0_55] : memref<1x16xf32, #tpu.memory_space<vmem>>, vector<1x16xf32>
    %119 = arith.addf %117, %118 : vector<1x16xf32>
    %cst_56 = arith.constant 0.000000e+00 : f32
    %120 = vector.broadcast %cst_56 : f32 to vector<1x16xf32>
    %121 = arith.maximumf %119, %120 : vector<1x16xf32>
    %122 = arith.truncf %121 : vector<1x16xf32> to vector<1x16xbf16>
    %c0_57 = arith.constant 0 : index
    %c0_58 = arith.constant 0 : index
    %123 = vector.load %arg21[%c0_57, %c0_58] : memref<16x16xbf16, #tpu.memory_space<vmem>>, vector<16x16xbf16>
    %cst_59 = arith.constant dense<0.000000e+00> : vector<1x16xf32>
    %124 = tpu.matmul %122, %123, %cst_59 {dimension_numbers = #tpu.dot_dimension_numbers<[1], [0], [0], [1], [0, 0, 1, 1], [], []>} : vector<1x16xbf16>, vector<16x16xbf16>, vector<1x16xf32> -> vector<1x16xf32>
    %c0_60 = arith.constant 0 : index
    %c0_61 = arith.constant 0 : index
    %125 = vector.load %arg22[%c0_60, %c0_61] : memref<1x16xf32, #tpu.memory_space<vmem>>, vector<1x16xf32>
    %126 = arith.addf %124, %125 : vector<1x16xf32>
    %127 = arith.addf %126, %114 : vector<1x16xf32>
    %cst_62 = arith.constant 0.000000e+00 : f32
    %128 = vector.broadcast %cst_62 : f32 to vector<1x16xf32>
    %129 = arith.maximumf %127, %128 : vector<1x16xf32>
    %130 = arith.truncf %129 : vector<1x16xf32> to vector<1x16xbf16>
    %c0_63 = arith.constant 0 : index
    %c0_64 = arith.constant 0 : index
    %131 = vector.load %arg23[%c0_63, %c0_64] : memref<16x32xbf16, #tpu.memory_space<vmem>>, vector<16x32xbf16>
    %cst_65 = arith.constant dense<0.000000e+00> : vector<1x32xf32>
    %132 = tpu.matmul %130, %131, %cst_65 {dimension_numbers = #tpu.dot_dimension_numbers<[1], [0], [0], [1], [0, 0, 1, 1], [], []>} : vector<1x16xbf16>, vector<16x32xbf16>, vector<1x32xf32> -> vector<1x32xf32>
    %c0_66 = arith.constant 0 : index
    %c0_67 = arith.constant 0 : index
    %133 = vector.load %arg24[%c0_66, %c0_67] : memref<1x32xf32, #tpu.memory_space<vmem>>, vector<1x32xf32>
    %134 = arith.addf %132, %133 : vector<1x32xf32>
    %cst_68 = arith.constant 0.000000e+00 : f32
    %135 = vector.broadcast %cst_68 : f32 to vector<1x32xf32>
    %136 = arith.maximumf %134, %135 : vector<1x32xf32>
    %137 = arith.truncf %136 : vector<1x32xf32> to vector<1x32xbf16>
    %c0_69 = arith.constant 0 : index
    %c0_70 = arith.constant 0 : index
    %138 = vector.load %arg25[%c0_69, %c0_70] : memref<32x32xbf16, #tpu.memory_space<vmem>>, vector<32x32xbf16>
    %cst_71 = arith.constant dense<0.000000e+00> : vector<1x32xf32>
    %139 = tpu.matmul %137, %138, %cst_71 {dimension_numbers = #tpu.dot_dimension_numbers<[1], [0], [0], [1], [0, 0, 1, 1], [], []>} : vector<1x32xbf16>, vector<32x32xbf16>, vector<1x32xf32> -> vector<1x32xf32>
    %c0_72 = arith.constant 0 : index
    %c0_73 = arith.constant 0 : index
    %140 = vector.load %arg26[%c0_72, %c0_73] : memref<1x32xf32, #tpu.memory_space<vmem>>, vector<1x32xf32>
    %141 = arith.addf %139, %140 : vector<1x32xf32>
    %142 = arith.truncf %129 : vector<1x16xf32> to vector<1x16xbf16>
    %c0_74 = arith.constant 0 : index
    %c0_75 = arith.constant 0 : index
    %143 = vector.load %arg27[%c0_74, %c0_75] : memref<16x32xbf16, #tpu.memory_space<vmem>>, vector<16x32xbf16>
    %cst_76 = arith.constant dense<0.000000e+00> : vector<1x32xf32>
    %144 = tpu.matmul %142, %143, %cst_76 {dimension_numbers = #tpu.dot_dimension_numbers<[1], [0], [0], [1], [0, 0, 1, 1], [], []>} : vector<1x16xbf16>, vector<16x32xbf16>, vector<1x32xf32> -> vector<1x32xf32>
    %c0_77 = arith.constant 0 : index
    %c0_78 = arith.constant 0 : index
    %145 = vector.load %arg28[%c0_77, %c0_78] : memref<1x32xf32, #tpu.memory_space<vmem>>, vector<1x32xf32>
    %146 = arith.addf %144, %145 : vector<1x32xf32>
    %147 = arith.addf %141, %146 : vector<1x32xf32>
    %cst_79 = arith.constant 0.000000e+00 : f32
    %148 = vector.broadcast %cst_79 : f32 to vector<1x32xf32>
    %149 = arith.maximumf %147, %148 : vector<1x32xf32>
    %150 = arith.truncf %149 : vector<1x32xf32> to vector<1x32xbf16>
    %c0_80 = arith.constant 0 : index
    %c0_81 = arith.constant 0 : index
    %151 = vector.load %arg29[%c0_80, %c0_81] : memref<32x32xbf16, #tpu.memory_space<vmem>>, vector<32x32xbf16>
    %cst_82 = arith.constant dense<0.000000e+00> : vector<1x32xf32>
    %152 = tpu.matmul %150, %151, %cst_82 {dimension_numbers = #tpu.dot_dimension_numbers<[1], [0], [0], [1], [0, 0, 1, 1], [], []>} : vector<1x32xbf16>, vector<32x32xbf16>, vector<1x32xf32> -> vector<1x32xf32>
    %c0_83 = arith.constant 0 : index
    %c0_84 = arith.constant 0 : index
    %153 = vector.load %arg30[%c0_83, %c0_84] : memref<1x32xf32, #tpu.memory_space<vmem>>, vector<1x32xf32>
    %154 = arith.addf %152, %153 : vector<1x32xf32>
    %cst_85 = arith.constant 0.000000e+00 : f32
    %155 = vector.broadcast %cst_85 : f32 to vector<1x32xf32>
    %156 = arith.maximumf %154, %155 : vector<1x32xf32>
    %157 = arith.truncf %156 : vector<1x32xf32> to vector<1x32xbf16>
    %c0_86 = arith.constant 0 : index
    %c0_87 = arith.constant 0 : index
    %158 = vector.load %arg31[%c0_86, %c0_87] : memref<32x32xbf16, #tpu.memory_space<vmem>>, vector<32x32xbf16>
    %cst_88 = arith.constant dense<0.000000e+00> : vector<1x32xf32>
    %159 = tpu.matmul %157, %158, %cst_88 {dimension_numbers = #tpu.dot_dimension_numbers<[1], [0], [0], [1], [0, 0, 1, 1], [], []>} : vector<1x32xbf16>, vector<32x32xbf16>, vector<1x32xf32> -> vector<1x32xf32>
    %c0_89 = arith.constant 0 : index
    %c0_90 = arith.constant 0 : index
    %160 = vector.load %arg32[%c0_89, %c0_90] : memref<1x32xf32, #tpu.memory_space<vmem>>, vector<1x32xf32>
    %161 = arith.addf %159, %160 : vector<1x32xf32>
    %162 = arith.addf %161, %149 : vector<1x32xf32>
    %cst_91 = arith.constant 0.000000e+00 : f32
    %163 = vector.broadcast %cst_91 : f32 to vector<1x32xf32>
    %164 = arith.maximumf %162, %163 : vector<1x32xf32>
    %165 = arith.truncf %164 : vector<1x32xf32> to vector<1x32xbf16>
    %c0_92 = arith.constant 0 : index
    %c0_93 = arith.constant 0 : index
    %166 = vector.load %arg33[%c0_92, %c0_93] : memref<32x64xbf16, #tpu.memory_space<vmem>>, vector<32x64xbf16>
    %cst_94 = arith.constant dense<0.000000e+00> : vector<1x64xf32>
    %167 = tpu.matmul %165, %166, %cst_94 {dimension_numbers = #tpu.dot_dimension_numbers<[1], [0], [0], [1], [0, 0, 1, 1], [], []>} : vector<1x32xbf16>, vector<32x64xbf16>, vector<1x64xf32> -> vector<1x64xf32>
    %c0_95 = arith.constant 0 : index
    %c0_96 = arith.constant 0 : index
    %168 = vector.load %arg34[%c0_95, %c0_96] : memref<1x64xf32, #tpu.memory_space<vmem>>, vector<1x64xf32>
    %169 = arith.addf %167, %168 : vector<1x64xf32>
    %cst_97 = arith.constant 0.000000e+00 : f32
    %170 = vector.broadcast %cst_97 : f32 to vector<1x64xf32>
    %171 = arith.maximumf %169, %170 : vector<1x64xf32>
    %172 = arith.truncf %171 : vector<1x64xf32> to vector<1x64xbf16>
    %c0_98 = arith.constant 0 : index
    %c0_99 = arith.constant 0 : index
    %173 = vector.load %arg35[%c0_98, %c0_99] : memref<64x64xbf16, #tpu.memory_space<vmem>>, vector<64x64xbf16>
    %cst_100 = arith.constant dense<0.000000e+00> : vector<1x64xf32>
    %174 = tpu.matmul %172, %173, %cst_100 {dimension_numbers = #tpu.dot_dimension_numbers<[1], [0], [0], [1], [0, 0, 1, 1], [], []>} : vector<1x64xbf16>, vector<64x64xbf16>, vector<1x64xf32> -> vector<1x64xf32>
    %c0_101 = arith.constant 0 : index
    %c0_102 = arith.constant 0 : index
    %175 = vector.load %arg36[%c0_101, %c0_102] : memref<1x64xf32, #tpu.memory_space<vmem>>, vector<1x64xf32>
    %176 = arith.addf %174, %175 : vector<1x64xf32>
    %177 = arith.truncf %164 : vector<1x32xf32> to vector<1x32xbf16>
    %c0_103 = arith.constant 0 : index
    %c0_104 = arith.constant 0 : index
    %178 = vector.load %arg37[%c0_103, %c0_104] : memref<32x64xbf16, #tpu.memory_space<vmem>>, vector<32x64xbf16>
    %cst_105 = arith.constant dense<0.000000e+00> : vector<1x64xf32>
    %179 = tpu.matmul %177, %178, %cst_105 {dimension_numbers = #tpu.dot_dimension_numbers<[1], [0], [0], [1], [0, 0, 1, 1], [], []>} : vector<1x32xbf16>, vector<32x64xbf16>, vector<1x64xf32> -> vector<1x64xf32>
    %c0_106 = arith.constant 0 : index
    %c0_107 = arith.constant 0 : index
    %180 = vector.load %arg38[%c0_106, %c0_107] : memref<1x64xf32, #tpu.memory_space<vmem>>, vector<1x64xf32>
    %181 = arith.addf %179, %180 : vector<1x64xf32>
    %182 = arith.addf %176, %181 : vector<1x64xf32>
    %cst_108 = arith.constant 0.000000e+00 : f32
    %183 = vector.broadcast %cst_108 : f32 to vector<1x64xf32>
    %184 = arith.maximumf %182, %183 : vector<1x64xf32>
    %185 = arith.truncf %184 : vector<1x64xf32> to vector<1x64xbf16>
    %c0_109 = arith.constant 0 : index
    %c0_110 = arith.constant 0 : index
    %186 = vector.load %arg39[%c0_109, %c0_110] : memref<64x64xbf16, #tpu.memory_space<vmem>>, vector<64x64xbf16>
    %cst_111 = arith.constant dense<0.000000e+00> : vector<1x64xf32>
    %187 = tpu.matmul %185, %186, %cst_111 {dimension_numbers = #tpu.dot_dimension_numbers<[1], [0], [0], [1], [0, 0, 1, 1], [], []>} : vector<1x64xbf16>, vector<64x64xbf16>, vector<1x64xf32> -> vector<1x64xf32>
    %c0_112 = arith.constant 0 : index
    %c0_113 = arith.constant 0 : index
    %188 = vector.load %arg40[%c0_112, %c0_113] : memref<1x64xf32, #tpu.memory_space<vmem>>, vector<1x64xf32>
    %189 = arith.addf %187, %188 : vector<1x64xf32>
    %cst_114 = arith.constant 0.000000e+00 : f32
    %190 = vector.broadcast %cst_114 : f32 to vector<1x64xf32>
    %191 = arith.maximumf %189, %190 : vector<1x64xf32>
    %192 = arith.truncf %191 : vector<1x64xf32> to vector<1x64xbf16>
    %c0_115 = arith.constant 0 : index
    %c0_116 = arith.constant 0 : index
    %193 = vector.load %arg41[%c0_115, %c0_116] : memref<64x64xbf16, #tpu.memory_space<vmem>>, vector<64x64xbf16>
    %cst_117 = arith.constant dense<0.000000e+00> : vector<1x64xf32>
    %194 = tpu.matmul %192, %193, %cst_117 {dimension_numbers = #tpu.dot_dimension_numbers<[1], [0], [0], [1], [0, 0, 1, 1], [], []>} : vector<1x64xbf16>, vector<64x64xbf16>, vector<1x64xf32> -> vector<1x64xf32>
    %c0_118 = arith.constant 0 : index
    %c0_119 = arith.constant 0 : index
    %195 = vector.load %arg42[%c0_118, %c0_119] : memref<1x64xf32, #tpu.memory_space<vmem>>, vector<1x64xf32>
    %196 = arith.addf %194, %195 : vector<1x64xf32>
    %197 = arith.addf %196, %184 : vector<1x64xf32>
    %cst_120 = arith.constant 0.000000e+00 : f32
    %198 = vector.broadcast %cst_120 : f32 to vector<1x64xf32>
    %199 = arith.maximumf %197, %198 : vector<1x64xf32>
    %200 = arith.truncf %199 : vector<1x64xf32> to vector<1x64xbf16>
    %c0_121 = arith.constant 0 : index
    %c0_122 = arith.constant 0 : index
    %201 = vector.load %arg43[%c0_121, %c0_122] : memref<64x32xbf16, #tpu.memory_space<vmem>>, vector<64x32xbf16>
    %cst_123 = arith.constant dense<0.000000e+00> : vector<1x32xf32>
    %202 = tpu.matmul %200, %201, %cst_123 {dimension_numbers = #tpu.dot_dimension_numbers<[1], [0], [0], [1], [0, 0, 1, 1], [], []>} : vector<1x64xbf16>, vector<64x32xbf16>, vector<1x32xf32> -> vector<1x32xf32>
    %c0_124 = arith.constant 0 : index
    %c0_125 = arith.constant 0 : index
    %203 = vector.load %arg44[%c0_124, %c0_125] : memref<1x32xf32, #tpu.memory_space<vmem>>, vector<1x32xf32>
    %204 = arith.addf %202, %203 : vector<1x32xf32>
    %cst_126 = arith.constant 0.000000e+00 : f32
    %205 = vector.broadcast %cst_126 : f32 to vector<1x32xf32>
    %206 = arith.maximumf %204, %205 : vector<1x32xf32>
    %207 = arith.truncf %206 : vector<1x32xf32> to vector<1x32xbf16>
    %c0_127 = arith.constant 0 : index
    %c0_128 = arith.constant 0 : index
    %208 = vector.load %arg45[%c0_127, %c0_128] : memref<32x2xbf16, #tpu.memory_space<vmem>>, vector<32x2xbf16>
    %cst_129 = arith.constant dense<0.000000e+00> : vector<1x2xf32>
    %209 = tpu.matmul %207, %208, %cst_129 {dimension_numbers = #tpu.dot_dimension_numbers<[1], [0], [0], [1], [0, 0, 1, 1], [], []>} : vector<1x32xbf16>, vector<32x2xbf16>, vector<1x2xf32> -> vector<1x2xf32>
    %c0_130 = arith.constant 0 : index
    %c0_131 = arith.constant 0 : index
    %210 = vector.load %arg46[%c0_130, %c0_131] : memref<1x2xf32, #tpu.memory_space<vmem>>, vector<1x2xf32>
    %211 = arith.addf %209, %210 : vector<1x2xf32>
    %c0_132 = arith.constant 0 : index
    %c0_133 = arith.constant 0 : index
    %c0_134 = arith.constant 0 : index
    %212 = vector.load %arg47[%c0_132, %c0_133, %c0_134] : memref<1x1x2xf32, #tpu.memory_space<vmem>>, vector<1x1x2xf32>
    %213 = vector.shape_cast %212 : vector<1x1x2xf32> to vector<1x2xf32>
    %214 = vector.shape_cast %211 : vector<1x2xf32> to vector<1x1x2xf32>
    tpu.vector_store %arg47[%c0_132, %c0_133, %c0_134], %214 {strides = array<i32>} : memref<1x1x2xf32, #tpu.memory_space<vmem>>, vector<1x1x2xf32>,
    return
  }
  func.func @transform_0(%arg0: i32) -> (i32, i32, i32) {
    %c0_i32 = arith.constant 0 : i32
    %c0_i32_0 = arith.constant 0 : i32
    %c0_i32_1 = arith.constant 0 : i32
    return %arg0, %c0_i32, %c0_i32_0 : i32, i32, i32
  }
  func.func @transform_1(%arg0: i32) -> (i32, i32) {
    %c0_i32 = arith.constant 0 : i32
    %c0_i32_0 = arith.constant 0 : i32
    %c0_i32_1 = arith.constant 0 : i32
    return %c0_i32, %c0_i32_0 : i32, i32
  }
  func.func @transform_2(%arg0: i32) -> (i32, i32) {
    %c0_i32 = arith.constant 0 : i32
    %c0_i32_0 = arith.constant 0 : i32
    %c0_i32_1 = arith.constant 0 : i32
    return %c0_i32, %c0_i32_0 : i32, i32
  }
  func.func @transform_3(%arg0: i32) -> (i32, i32) {
    %c0_i32 = arith.constant 0 : i32
    %c0_i32_0 = arith.constant 0 : i32
    %c0_i32_1 = arith.constant 0 : i32
    return %c0_i32, %c0_i32_0 : i32, i32
  }
  func.func @transform_4(%arg0: i32) -> (i32, i32) {
    %c0_i32 = arith.constant 0 : i32
    %c0_i32_0 = arith.constant 0 : i32
    %c0_i32_1 = arith.constant 0 : i32
    return %c0_i32, %c0_i32_0 : i32, i32
  }
  func.func @transform_5(%arg0: i32) -> (i32, i32) {
    %c0_i32 = arith.constant 0 : i32
    %c0_i32_0 = arith.constant 0 : i32
    %c0_i32_1 = arith.constant 0 : i32
    return %c0_i32, %c0_i32_0 : i32, i32
  }
  func.func @transform_6(%arg0: i32) -> (i32, i32) {
    %c0_i32 = arith.constant 0 : i32
    %c0_i32_0 = arith.constant 0 : i32
    %c0_i32_1 = arith.constant 0 : i32
    return %c0_i32, %c0_i32_0 : i32, i32
  }
  func.func @transform_7(%arg0: i32) -> (i32, i32) {
    %c0_i32 = arith.constant 0 : i32
    %c0_i32_0 = arith.constant 0 : i32
    %c0_i32_1 = arith.constant 0 : i32
    return %c0_i32, %c0_i32_0 : i32, i32
  }
  func.func @transform_8(%arg0: i32) -> (i32, i32) {
    %c0_i32 = arith.constant 0 : i32
    %c0_i32_0 = arith.constant 0 : i32
    %c0_i32_1 = arith.constant 0 : i32
    return %c0_i32, %c0_i32_0 : i32, i32
  }
  func.func @transform_9(%arg0: i32) -> (i32, i32) {
    %c0_i32 = arith.constant 0 : i32
    %c0_i32_0 = arith.constant 0 : i32
    %c0_i32_1 = arith.constant 0 : i32
    return %c0_i32, %c0_i32_0 : i32, i32
  }
  func.func @transform_10(%arg0: i32) -> (i32, i32) {
    %c0_i32 = arith.constant 0 : i32
    %c0_i32_0 = arith.constant 0 : i32
    %c0_i32_1 = arith.constant 0 : i32
    return %c0_i32, %c0_i32_0 : i32, i32
  }
  func.func @transform_11(%arg0: i32) -> (i32, i32) {
    %c0_i32 = arith.constant 0 : i32
    %c0_i32_0 = arith.constant 0 : i32
    %c0_i32_1 = arith.constant 0 : i32
    return %c0_i32, %c0_i32_0 : i32, i32
  }
  func.func @transform_12(%arg0: i32) -> (i32, i32) {
    %c0_i32 = arith.constant 0 : i32
    %c0_i32_0 = arith.constant 0 : i32
    %c0_i32_1 = arith.constant 0 : i32
    return %c0_i32, %c0_i32_0 : i32, i32
  }
  func.func @transform_13(%arg0: i32) -> (i32, i32) {
    %c0_i32 = arith.constant 0 : i32
    %c0_i32_0 = arith.constant 0 : i32
    %c0_i32_1 = arith.constant 0 : i32
    return %c0_i32, %c0_i32_0 : i32, i32
  }
  func.func @transform_14(%arg0: i32) -> (i32, i32) {
    %c0_i32 = arith.constant 0 : i32
    %c0_i32_0 = arith.constant 0 : i32
    %c0_i32_1 = arith.constant 0 : i32
    return %c0_i32, %c0_i32_0 : i32, i32
  }
  func.func @transform_15(%arg0: i32) -> (i32, i32) {
    %c0_i32 = arith.constant 0 : i32
    %c0_i32_0 = arith.constant 0 : i32
    %c0_i32_1 = arith.constant 0 : i32
    return %c0_i32, %c0_i32_0 : i32, i32
  }
  func.func @transform_16(%arg0: i32) -> (i32, i32) {
    %c0_i32 = arith.constant 0 : i32
    %c0_i32_0 = arith.constant 0 : i32
    %c0_i32_1 = arith.constant 0 : i32
    return %c0_i32, %c0_i32_0 : i32, i32
  }
  func.func @transform_17(%arg0: i32) -> (i32, i32) {
    %c0_i32 = arith.constant 0 : i32
    %c0_i32_0 = arith.constant 0 : i32
    %c0_i32_1 = arith.constant 0 : i32
    return %c0_i32, %c0_i32_0 : i32, i32
  }
  func.func @transform_18(%arg0: i32) -> (i32, i32) {
    %c0_i32 = arith.constant 0 : i32
    %c0_i32_0 = arith.constant 0 : i32
    %c0_i32_1 = arith.constant 0 : i32
    return %c0_i32, %c0_i32_0 : i32, i32
  }
  func.func @transform_19(%arg0: i32) -> (i32, i32) {
    %c0_i32 = arith.constant 0 : i32
    %c0_i32_0 = arith.constant 0 : i32
    %c0_i32_1 = arith.constant 0 : i32
    return %c0_i32, %c0_i32_0 : i32, i32
  }
  func.func @transform_20(%arg0: i32) -> (i32, i32) {
    %c0_i32 = arith.constant 0 : i32
    %c0_i32_0 = arith.constant 0 : i32
    %c0_i32_1 = arith.constant 0 : i32
    return %c0_i32, %c0_i32_0 : i32, i32
  }
  func.func @transform_21(%arg0: i32) -> (i32, i32) {
    %c0_i32 = arith.constant 0 : i32
    %c0_i32_0 = arith.constant 0 : i32
    %c0_i32_1 = arith.constant 0 : i32
    return %c0_i32, %c0_i32_0 : i32, i32
  }
  func.func @transform_22(%arg0: i32) -> (i32, i32) {
    %c0_i32 = arith.constant 0 : i32
    %c0_i32_0 = arith.constant 0 : i32
    %c0_i32_1 = arith.constant 0 : i32
    return %c0_i32, %c0_i32_0 : i32, i32
  }
  func.func @transform_23(%arg0: i32) -> (i32, i32) {
    %c0_i32 = arith.constant 0 : i32
    %c0_i32_0 = arith.constant 0 : i32
    %c0_i32_1 = arith.constant 0 : i32
    return %c0_i32, %c0_i32_0 : i32, i32
  }
  func.func @transform_24(%arg0: i32) -> (i32, i32) {
    %c0_i32 = arith.constant 0 : i32
    %c0_i32_0 = arith.constant 0 : i32
    %c0_i32_1 = arith.constant 0 : i32
    return %c0_i32, %c0_i32_0 : i32, i32
  }
  func.func @transform_25(%arg0: i32) -> (i32, i32) {
    %c0_i32 = arith.constant 0 : i32
    %c0_i32_0 = arith.constant 0 : i32
    %c0_i32_1 = arith.constant 0 : i32
    return %c0_i32, %c0_i32_0 : i32, i32
  }
  func.func @transform_26(%arg0: i32) -> (i32, i32) {
    %c0_i32 = arith.constant 0 : i32
    %c0_i32_0 = arith.constant 0 : i32
    %c0_i32_1 = arith.constant 0 : i32
    return %c0_i32, %c0_i32_0 : i32, i32
  }
  func.func @transform_27(%arg0: i32) -> (i32, i32) {
    %c0_i32 = arith.constant 0 : i32
    %c0_i32_0 = arith.constant 0 : i32
    %c0_i32_1 = arith.constant 0 : i32
    return %c0_i32, %c0_i32_0 : i32, i32
  }
  func.func @transform_28(%arg0: i32) -> (i32, i32) {
    %c0_i32 = arith.constant 0 : i32
    %c0_i32_0 = arith.constant 0 : i32
    %c0_i32_1 = arith.constant 0 : i32
    return %c0_i32, %c0_i32_0 : i32, i32
  }
  func.func @transform_29(%arg0: i32) -> (i32, i32) {
    %c0_i32 = arith.constant 0 : i32
    %c0_i32_0 = arith.constant 0 : i32
    %c0_i32_1 = arith.constant 0 : i32
    return %c0_i32, %c0_i32_0 : i32, i32
  }
  func.func @transform_30(%arg0: i32) -> (i32, i32) {
    %c0_i32 = arith.constant 0 : i32
    %c0_i32_0 = arith.constant 0 : i32
    %c0_i32_1 = arith.constant 0 : i32
    return %c0_i32, %c0_i32_0 : i32, i32
  }
  func.func @transform_31(%arg0: i32) -> (i32, i32) {
    %c0_i32 = arith.constant 0 : i32
    %c0_i32_0 = arith.constant 0 : i32
    %c0_i32_1 = arith.constant 0 : i32
    return %c0_i32, %c0_i32_0 : i32, i32
  }
  func.func @transform_32(%arg0: i32) -> (i32, i32) {
    %c0_i32 = arith.constant 0 : i32
    %c0_i32_0 = arith.constant 0 : i32
    %c0_i32_1 = arith.constant 0 : i32
    return %c0_i32, %c0_i32_0 : i32, i32
  }
  func.func @transform_33(%arg0: i32) -> (i32, i32) {
    %c0_i32 = arith.constant 0 : i32
    %c0_i32_0 = arith.constant 0 : i32
    %c0_i32_1 = arith.constant 0 : i32
    return %c0_i32, %c0_i32_0 : i32, i32
  }
  func.func @transform_34(%arg0: i32) -> (i32, i32) {
    %c0_i32 = arith.constant 0 : i32
    %c0_i32_0 = arith.constant 0 : i32
    %c0_i32_1 = arith.constant 0 : i32
    return %c0_i32, %c0_i32_0 : i32, i32
  }
  func.func @transform_35(%arg0: i32) -> (i32, i32) {
    %c0_i32 = arith.constant 0 : i32
    %c0_i32_0 = arith.constant 0 : i32
    %c0_i32_1 = arith.constant 0 : i32
    return %c0_i32, %c0_i32_0 : i32, i32
  }
  func.func @transform_36(%arg0: i32) -> (i32, i32) {
    %c0_i32 = arith.constant 0 : i32
    %c0_i32_0 = arith.constant 0 : i32
    %c0_i32_1 = arith.constant 0 : i32
    return %c0_i32, %c0_i32_0 : i32, i32
  }
  func.func @transform_37(%arg0: i32) -> (i32, i32) {
    %c0_i32 = arith.constant 0 : i32
    %c0_i32_0 = arith.constant 0 : i32
    %c0_i32_1 = arith.constant 0 : i32
    return %c0_i32, %c0_i32_0 : i32, i32
  }
  func.func @transform_38(%arg0: i32) -> (i32, i32) {
    %c0_i32 = arith.constant 0 : i32
    %c0_i32_0 = arith.constant 0 : i32
    %c0_i32_1 = arith.constant 0 : i32
    return %c0_i32, %c0_i32_0 : i32, i32
  }
  func.func @transform_39(%arg0: i32) -> (i32, i32) {
    %c0_i32 = arith.constant 0 : i32
    %c0_i32_0 = arith.constant 0 : i32
    %c0_i32_1 = arith.constant 0 : i32
    return %c0_i32, %c0_i32_0 : i32, i32
  }
  func.func @transform_40(%arg0: i32) -> (i32, i32) {
    %c0_i32 = arith.constant 0 : i32
    %c0_i32_0 = arith.constant 0 : i32
    %c0_i32_1 = arith.constant 0 : i32
    return %c0_i32, %c0_i32_0 : i32, i32
  }
  func.func @transform_41(%arg0: i32) -> (i32, i32) {
    %c0_i32 = arith.constant 0 : i32
    %c0_i32_0 = arith.constant 0 : i32
    %c0_i32_1 = arith.constant 0 : i32
    return %c0_i32, %c0_i32_0 : i32, i32
  }
  func.func @transform_42(%arg0: i32) -> (i32, i32) {
    %c0_i32 = arith.constant 0 : i32
    %c0_i32_0 = arith.constant 0 : i32
    %c0_i32_1 = arith.constant 0 : i32
    return %c0_i32, %c0_i32_0 : i32, i32
  }
  func.func @transform_43(%arg0: i32) -> (i32, i32) {
    %c0_i32 = arith.constant 0 : i32
    %c0_i32_0 = arith.constant 0 : i32
    %c0_i32_1 = arith.constant 0 : i32
    return %c0_i32, %c0_i32_0 : i32, i32
  }
  func.func @transform_44(%arg0: i32) -> (i32, i32) {
    %c0_i32 = arith.constant 0 : i32
    %c0_i32_0 = arith.constant 0 : i32
    %c0_i32_1 = arith.constant 0 : i32
    return %c0_i32, %c0_i32_0 : i32, i32
  }
  func.func @transform_45(%arg0: i32) -> (i32, i32) {
    %c0_i32 = arith.constant 0 : i32
    %c0_i32_0 = arith.constant 0 : i32
    %c0_i32_1 = arith.constant 0 : i32
    return %c0_i32, %c0_i32_0 : i32, i32
  }
  func.func @transform_46(%arg0: i32) -> (i32, i32, i32) {
    %c0_i32 = arith.constant 0 : i32
    %c0_i32_0 = arith.constant 0 : i32
    %c0_i32_1 = arith.constant 0 : i32
    return %arg0, %c0_i32, %c0_i32_0 : i32, i32, i32
  }
}

</mosaic_0001>

<bundles_post_ra>
// kernel: forward.1
= control target key start
LH: loop header
LB: loop body
LE: loop exit
PB: predicated region body
PF: predicated region fallthrough
CT: control target
= control target key end

     0   :  { %s15284_s6 = smov 1   ;;  %s15285_s10 = smov 2   ;;  %s18069_s0 = inlined_call_operand.smem [shape: u32[47], index: -1, kind: input, shape index: {}] }
   0x1   :  { %s15342_s5 = sld [smem:[%s18069_s0]]   ;;  %s15286_s14 = smov 3  }
   0x2   :  { %s15347_s9 = sld [smem:[%s18069_s0 + %s15284_s6]]   ;;  %s15287_s18 = smov 4  }
   0x3   :  { %s15352_s13 = sld [smem:[%s18069_s0 + %s15285_s10]]   ;;  %s15288_s22 = smov 5  }
   0x4   :  { %s15357_s17 = sld [smem:[%s18069_s0 + %s15286_s14]]   ;;  %s15289_s26 = smov 6  }
   0x5   :  { %s15362_s21 = sld [smem:[%s18069_s0 + %s15287_s18]]   ;;  %s15290_s30 = smov 7  }
   0x6   :  { %s15367_s25 = sld [smem:[%s18069_s0 + %s15288_s22]]   ;;  %s15291_s4 = smov 8  }
   0x7   :  { %18094 = sst [smem:[#allocation12_spill]] %s15342_s5  ;;  %s15292_s10 = smov 9  }
   0x8   :  { %18095 = sst [smem:[#allocation13_spill]] %s15347_s9  ;;  %s15293_s15 = smov 10  }
   0x9   :  { %s15372_s29 = sld [smem:[%s18069_s0 + %s15289_s26]]   ;;  %s15294_s20 = smov 11  }
   0xa   :  { %s15377_s3 = sld [smem:[%s18069_s0 + %s15290_s30]]   ;;  %s15295_s26 = smov 12  }
   0xb   :  { %s15382_s8 = sld [smem:[%s18069_s0 + %s15291_s4]]   ;;  %s15296_s1 = smov 13  }
   0xc   :  { %s15387_s14 = sld [smem:[%s18069_s0 + %s15292_s10]]   ;;  %s15297_s7 = smov 14  }
   0xd   :  { %s15392_s19 = sld [smem:[%s18069_s0 + %s15293_s15]]   ;;  %s15298_s15 = smov 15  }
   0xe   :  { %s15397_s24 = sld [smem:[%s18069_s0 + %s15294_s20]]   ;;  %s15299_s22 = smov 16  }
   0xf   :  { %s15402_s30 = sld [smem:[%s18069_s0 + %s15295_s26]]   ;;  %s15300_s28 = smov 17  }
  0x10   :  { %18096 = sst [smem:[#allocation14_spill]] %s15377_s3 }
  0x11   :  { %18097 = sst [smem:[#allocation15_spill]] %s15382_s8 }
  0x12   :  { %s15407_s6 = sld [smem:[%s18069_s0 + %s15296_s1]]  }
  0x13   :  { %s15412_s12 = sld [smem:[%s18069_s0 + %s15297_s7]]   ;;  %s15301_s7 = smov 18  }
  0x14   :  { %18098 = sst [smem:[#allocation16_spill]] %s15397_s24 }
  0x15   :  { %s15417_s20 = sld [smem:[%s18069_s0 + %s15298_s15]]   ;;  %s15302_s15 = smov 19  }
  0x16   :  { %s15422_s27 = sld [smem:[%s18069_s0 + %s15299_s22]]   ;;  %s15303_s22 = smov 20  }
  0x17   :  { %s15427_s4 = sld [smem:[%s18069_s0 + %s15300_s28]]   ;;  %s15304_s28 = smov 21  }
  0x18   :  { %18099 = sst [smem:[#allocation17_spill]] %s15407_s6 }
  0x19   :  { %18100 = sst [smem:[#allocation18_spill]] %s15412_s12 }
  0x1a   :  { %s15432_s6 = sld [smem:[%s18069_s0 + %s15301_s7]]   ;;  %s15305_s7 = smov 22  }
  0x1b   :  { %18101 = sst [smem:[#allocation19_spill]] %s15417_s20 }
  0x1c   :  { %s15437_s20 = sld [smem:[%s18069_s0 + %s15302_s15]]   ;;  %s15306_s15 = smov 23  }
  0x1d   :  { %18102 = sst [smem:[#allocation20_spill]] %s15427_s4 }
  0x1e   :  { %s15442_s24 = sld [smem:[%s18069_s0 + %s15303_s22]]   ;;  %s15307_s22 = smov 24  }
  0x1f   :  { %s15447_s4 = sld [smem:[%s18069_s0 + %s15304_s28]]   ;;  %s15308_s28 = smov 25  }
  0x20   :  { %18103 = sst [smem:[#allocation21_spill]] %s15432_s6 }
  0x21   :  { %s15452_s6 = sld [smem:[%s18069_s0 + %s15305_s7]]   ;;  %s15309_s7 = smov 26  }
  0x22   :  { %18104 = sst [smem:[#allocation22_spill]] %s15437_s20 }
  0x23   :  { %s15457_s20 = sld [smem:[%s18069_s0 + %s15306_s15]]   ;;  %s15310_s15 = smov 27  }
  0x24   :  { %18105 = sst [smem:[#allocation23_spill]] %s15442_s24 }
  0x25   :  { %18106 = sst [smem:[#allocation24_spill]] %s15447_s4 }
  0x26   :  { %s15462_s24 = sld [smem:[%s18069_s0 + %s15307_s22]]   ;;  %s15311_s22 = smov 28  }
  0x27   :  { %18107 = sst [smem:[#allocation25_spill]] %s15452_s6 }
  0x28   :  { %s15467_s4 = sld [smem:[%s18069_s0 + %s15308_s28]]   ;;  %s15312_s28 = smov 29  }
  0x29   :  { %18108 = sst [smem:[#allocation26_spill]] %s15457_s20 }
  0x2a   :  { %s15472_s6 = sld [smem:[%s18069_s0 + %s15309_s7]]   ;;  %s15313_s7 = smov 30  }
  0x2b   :  { %s15477_s20 = sld [smem:[%s18069_s0 + %s15310_s15]]   ;;  %s15314_s15 = smov 31  }
  0x2c   :  { %18109 = sst [smem:[#allocation27_spill]] %s15462_s24 }
  0x2d   :  { %s15482_s24 = sld [smem:[%s18069_s0 + %s15311_s22]]   ;;  %s15315_s22 = smov 32  }
  0x2e   :  { %18110 = sst [smem:[#allocation28_spill]] %s15467_s4 }
  0x2f   :  { %s15487_s4 = sld [smem:[%s18069_s0 + %s15312_s28]]   ;;  %s15316_s28 = smov 33  }
  0x30   :  { %18111 = sst [smem:[#allocation29_spill]] %s15472_s6 }
  0x31   :  { %18112 = sst [smem:[#allocation30_spill]] %s15477_s20 }
  0x32   :  { %s15492_s6 = sld [smem:[%s18069_s0 + %s15313_s7]]   ;;  %s15317_s7 = smov 34  }
  0x33   :  { %18113 = sst [smem:[#allocation31_spill]] %s15482_s24 }
  0x34   :  { %s15497_s20 = sld [smem:[%s18069_s0 + %s15314_s15]]   ;;  %s15318_s15 = smov 35  }
  0x35   :  { %18114 = sst [smem:[#allocation32_spill]] %s15487_s4 }
  0x36   :  { %s15502_s24 = sld [smem:[%s18069_s0 + %s15315_s22]]   ;;  %s15319_s22 = smov 36  }
  0x37   :  { %s15507_s4 = sld [smem:[%s18069_s0 + %s15316_s28]]   ;;  %s15320_s28 = smov 37  }
  0x38   :  { %18115 = sst [smem:[#allocation33_spill]] %s15492_s6 }
  0x39   :  { %s15512_s6 = sld [smem:[%s18069_s0 + %s15317_s7]]   ;;  %s15321_s7 = smov 38  }
  0x3a   :  { %18116 = sst [smem:[#allocation34_spill]] %s15497_s20 }
  0x3b   :  { %s15517_s20 = sld [smem:[%s18069_s0 + %s15318_s15]]   ;;  %s15322_s15 = smov 39  }
  0x3c   :  { %18117 = sst [smem:[#allocation35_spill]] %s15502_s24 }
  0x3d   :  { %18118 = sst [smem:[#allocation36_spill]] %s15507_s4 }
  0x3e   :  { %s15522_s24 = sld [smem:[%s18069_s0 + %s15319_s22]]   ;;  %s15323_s22 = smov 40  }
  0x3f   :  { %18119 = sst [smem:[#allocation37_spill]] %s15512_s6 }
  0x40   :  { %s15527_s4 = sld [smem:[%s18069_s0 + %s15320_s28]]   ;;  %s15324_s28 = smov 41  }
  0x41   :  { %18120 = sst [smem:[#allocation38_spill]] %s15517_s20 }
  0x42   :  { %s15532_s6 = sld [smem:[%s18069_s0 + %s15321_s7]]   ;;  %s15325_s7 = smov 42  }
  0x43   :  { %s15537_s20 = sld [smem:[%s18069_s0 + %s15322_s15]]   ;;  %s15326_s15 = smov 43  }
  0x44   :  { %18121 = sst [smem:[#allocation39_spill]] %s15522_s24 }
  0x45   :  { %s15542_s24 = sld [smem:[%s18069_s0 + %s15323_s22]]   ;;  %s15327_s22 = smov 44  }
  0x46   :  { %18122 = sst [smem:[#allocation40_spill]] %s15527_s4 }
  0x47   :  { %s15547_s4 = sld [smem:[%s18069_s0 + %s15324_s28]]   ;;  %s15328_s28 = smov 45  }
  0x48   :  { %18123 = sst [smem:[#allocation41_spill]] %s15532_s6 }
  0x49   :  { %18124 = sst [smem:[#allocation42_spill]] %s15537_s20 }
  0x4a   :  { %s15552_s6 = sld [smem:[%s18069_s0 + %s15325_s7]]   ;;  %s15329_s7 = smov 46  }
  0x4b   :  { %18125 = sst [smem:[#allocation43_spill]] %s15542_s24 }
  0x4c   :  { %s15557_s20 = sld [smem:[%s18069_s0 + %s15326_s15]]  }
  0x4d   :  { %18126 = sst [smem:[#allocation44_spill]] %s15547_s4 }
  0x4e   :  { %s15562_s24 = sld [smem:[%s18069_s0 + %s15327_s22]]  }
  0x4f   :  { %s15567_s12 = sld [smem:[%s18069_s0 + %s15328_s28]]  }
  0x50   :  { %18127 = sst [smem:[#allocation45_spill]] %s15552_s6 }
  0x51   :  { %s15572_s6 = sld [smem:[%s18069_s0 + %s15329_s7]]  }
  0x52   :  { %98 = vsyncpa [#allocation3], 0 }
  0x53   :  { %99 = vsyncpa [#allocation6], 0 }
  0x54   :  { %100 = vsyncpa [#allocation4], 0 }
  0x55   :  { %102 = vsyncpa [#allocation4 + $0x1], 0  ;;  %s15574_s15 = smov 0   ;;  %s15576_s16 = smov 0  }
  0x56   :  { %s15578_s18 = smov 0   ;;  %s15580_s22 = smov 0  }
  0x57 LB: > { %s18128_s9 = sld [smem:[#allocation13_spill]]  ;;  %s15595_s0 = sadd.s32 4294967295, %s15282_s22   ;;  %s15278_s18 = sphi %s15578_s18, %s18183_s18   ;;  %s15274_s16 = sphi %s15576_s16, %s18185_s16   ;;  %s15270_s15 = sphi %s15574_s15, %s18184_s15   ;;  %s15282_s22 = sphi %s15580_s22, %s18181_s22  }
  0x58   : > { %s18129_s8 = sld [smem:[#allocation15_spill]]  ;;  %s9883_s23 = sadd.s32 4294967294, %s15282_s22  }
  0x59   : > { %s18130_s4 = sld [smem:[#allocation44_spill]]  ;;  %s15599_s26 = sadd.s32 1, %s15282_s22  }
  0x5a   : > { %18131 = sst [smem:[#allocation46_spill]] %s15270_s15  ;;  %s1086_s28 = sadd.s32 1, %s15278_s18 }
  0x5b   : > { %18132 = sst [smem:[#allocation47_spill]] %s15278_s18  ;;  %s1083_s1 = ssub.s32 %s15282_s22, %s15599_s26 }
  0x5c   : > { %18133 = sst [smem:[#allocation48_spill]] %s15282_s22  ;;  %p1096_p0 = scmp.ne.s32.totalorder %s15278_s18, %s15274_s16 }
  0x5d   : > { %18134 = sst [smem:[#allocation49_spill]] %s15599_s26  ;;  %p1084_p1 = scmp.eq.s32.totalorder %s1083_s1, 0 }
  0x5e   : > { %p1097_p2 = scmp.eq.s32.totalorder %s15595_s0, 1  ;;  %p1102_p3 = scmp.ne.s32.totalorder %s15274_s16, %s15270_s15 }
  0x5f   : > { %p1103_p4 = scmp.eq.s32.totalorder %s9883_s23, 1  ;;  %p9884_p7 = scmp.ge.s32.totalorder %s15282_s22, 1 }
  0x60   : > { %s15610_s2 = scalar_select %p1084_p1, %s15278_s18, %s1086_s28  }
  0x61   : > { %p15612_p5 = por %p1097_p2, %p1096_p0  ;;  %p15616_p6 = por %p1103_p4, %p1102_p3 }
  0x62   : > { %18135 = sst [smem:[#allocation50_spill]] %s15610_s2  ;;  %p1110_p8 = scmp.lt.s32.totalorder %s15282_s22, 3 }
  0x63   : > { %s18136_s7 = scalar_select %p15612_p5, 1, 0 }
  0x64   : > { %s18138_s10 = scalar_select %p15616_p6, 1, 0 }
  0x65   : > { %18137 = sst [smem:[#allocation51_spill]] %s18136_s7  ;;  %p15030_p9 = scmp.eq.s32.totalorder %s15595_s0, 0 }
  0x66   : > { %18139 = sst [smem:[#allocation52_spill]] %s18138_s10  ;;  %p15623_p10 = pnand %p9884_p7, %p1110_p8 }
  0x67   : > { %s1257_s23 = sshll.u32 %s15557_s20, 4  ;;  %s15330_s28 = smov [#allocation5]   ;;  %s1258_s23 = int_to_ptr.hbm [resolvable:$true] %s1257_s23 }
  0x68   : > { %p15016_p11 = pneg %p15623_p10  ;;  %s1259_s1 = sshll.u32 %s15330_s28, 4  ;;  %s1260_s1 = int_to_ptr.vmem [resolvable:$true] %s1259_s1 }
  0x69   : > { %s1242_s2 = sshll.u32 %s18130_s4, 4  ;;  %s15331_s10 = smov [#allocation2]   ;;  %s15637_s2 = int_to_ptr.hbm [resolvable:$true] %s1242_s2 }
  0x6a   : > { %p15633_p12 = pnand %p15030_p9, %p15016_p11  ;;  %s15640_s15 = sshll.u32 %s15331_s10, 4  ;;  %s1245_s15 = int_to_ptr.vmem [resolvable:$true] %s15640_s15 }
  0x6b   : > { %s15122_s22 = sshra.s32 %s1258_s23, 4  ;;  %s15129_s28 = scalar_lea.hbm %s15557_s20, 1  ;;  %s15123_s22 = int_to_ptr.hbm [resolvable:$true] %s15122_s22 }
  0x6c   : > { %s15124_s7 = scalar_lea.hbm %s15123_s22, 1  ;;  %p15126_p0 = pneg %p15633_p12 }
  0x6d   : > { %p15125_p13 = scmp.ne.s32.totalorder %s15123_s22, %s15124_s7  ;;  %p15130_p3 = scmp.lt.s32.totalorder %s15123_s22, %s15557_s20 }
  0x6e   : > { %p15131_p4 = scmp.lt.s32.totalorder %s15129_s28, %s15124_s7 }
  0x6f   : > { %p15127_p1 = pnand %p15126_p0, %p15125_p13 }
  0x70   : > { %p15132_p7 = por %p15131_p4, %p15130_p3 }
  0x71   : > { %p15128_p2 = pneg %p15127_p1 }
  0x73   : > { %p15133_p8 = pnand %p15132_p7, %p15128_p2 }
  0x75   : > { %15136 = shalt.err (!%p15133_p8)
}
  0x76   : > { %15022 = dma.hbm_to_vmem [thread:$0]  (!%p15633_p12), %s1258_s23, 16, %s1260_s1, [#allocation6]  }
  0x77   : > { %s15152_s10 = sshra.s32 %s15637_s2, 4  ;;  %s15159_s22 = scalar_lea.hbm %s18130_s4, 1  ;;  %s15153_s10 = int_to_ptr.hbm [resolvable:$true] %s15152_s10 }
  0x78   : > { %s15154_s26 = scalar_lea.hbm %s15153_s10, 1  ;;  %p15160_p2 = scmp.lt.s32.totalorder %s15153_s10, %s18130_s4 }
  0x79   : > { %p15155_p11 = scmp.ne.s32.totalorder %s15153_s10, %s15154_s26  ;;  %p15161_p3 = scmp.lt.s32.totalorder %s15159_s22, %s15154_s26 }
  0x7b   : > { %p15157_p13 = pnand %p15155_p11, %p15126_p0  ;;  %p15162_p4 = por %p15161_p3, %p15160_p2 }
  0x7d   : > { %p15158_p1 = pneg %p15157_p13 }
  0x7f   : > { %p15163_p7 = pnand %p15162_p4, %p15158_p1 }
  0x81   : > { %15166 = shalt.err (!%p15163_p7)
}
  0x82   : > { %15019 = dma.hbm_to_vmem [thread:$0]  (!%p15633_p12), %s15637_s2, 16, %s1245_s15, [#allocation3]  }
  0x83   : > { %s18142_s7 = sshll.u32 %s15567_s12, 4  ;;  %s15332_s23 = smov [#allocation7]   ;;  %s1273_s7 = int_to_ptr.hbm [resolvable:$true] %s18142_s7 }
  0x84   : > { %s1274_s1 = sshll.u32 %s15332_s23, 4  ;;  %s15182_s28 = sshra.s32 %s1273_s7, 4  ;;  %s1275_s1 = int_to_ptr.vmem [resolvable:$true] %s1274_s1  ;;  %s15183_s28 = int_to_ptr.hbm [resolvable:$true] %s15182_s28 }
  0x85   : > { %s15184_s10 = scalar_lea.hbm %s15183_s28, 1  ;;  %s15189_s26 = scalar_lea.hbm %s15567_s12, 1 }
  0x86   : > { %p15185_p8 = scmp.ne.s32.totalorder %s15183_s28, %s15184_s10  ;;  %p15190_p1 = scmp.lt.s32.totalorder %s15183_s28, %s15567_s12 }
  0x87   : > { %p15191_p2 = scmp.lt.s32.totalorder %s15189_s26, %s15184_s10 }
  0x88   : > { %p15187_p11 = pnand %p15185_p8, %p15126_p0 }
  0x89   : > { %p15192_p3 = por %p15191_p2, %p15190_p1 }
  0x8a   : > { %p15188_p13 = pneg %p15187_p11 }
  0x8c   : > { %p15193_p4 = pnand %p15192_p3, %p15188_p13 }
  0x8e   : > { %15196 = shalt.err (!%p15193_p4)
}
  0x8f   : > { %15025 = dma.hbm_to_vmem [thread:$0]  (!%p15633_p12), %s1273_s7, 16, %s1275_s1, [#allocation6]  }
  0x90   : > { %1294 = sbr.rel (%p15623_p10) target bundleno = 3860 (0xf14), region = 204 }
  0x95   : > { %15257 = dma.done.wait (%p15030_p9), [#allocation3], 16  }
  0x96   : > { %15259 = vsyncadd (%p15030_p9), [#allocation3], 4294967280 }
  0x97   : > { %15261 = dma.done.wait (%p15030_p9), [#allocation6], 32  }
  0x98   : > { %15263 = vsyncadd (%p15030_p9), [#allocation6], 4294967264  ;;  %v10008_v0 = vld [vmem:[%s18128_s9 + $0xe0] sm:$0xf]  ;;  %v14015_v1 = vld [vmem:[%s18128_s9 + $0xec] sm:$0xf0] }
  0x99   : > { %v10136_v2 = vld [vmem:[%s18128_s9 + $0x1e0] sm:$0xf]  ;;  %v10009_v3 = vor.u32 %v14015_v1, %v10008_v0  ;;  %v14047_v4 = vld [vmem:[%s18128_s9 + $0x1ec] sm:$0xf0]  ;;  %p1413_p9 = scmp.lt.s32.totalorder %s15595_s0, 1  ;;  %s18143_s5 = sld [smem:[#allocation12_spill]] }
  0x9a   : > { %v10264_v5 = vld [vmem:[%s18128_s9 + $0x2e0] sm:$0xf]  ;;  %v14079_v6 = vld [vmem:[%s18128_s9 + $0x2ec] sm:$0xf0]  ;;  %v10137_v7 = vor.u32 %v14047_v4, %v10136_v2  ;;  %s15333_s11 = smov 64   ;;  %vm8920_vm0 = vcmask 523264  }
  0x9b   : > { %v10265_v8 = vor.u32 %v14079_v6, %v10264_v5  ;;  %v10392_v9 = vld [vmem:[%s18128_s9 + $0x3e0] sm:$0xf]  ;;  %v14111_v10 = vld [vmem:[%s18128_s9 + $0x3ec] sm:$0xf0]  ;;  %4552 = vmatpush.bf16.msra.mxu0 %v10009_v3  ;;  %s15742_s15 = scalar_select %p1413_p9, %s15595_s0, 1  ;;  %vm9154_vm1 = vcmask 130048  }
  0x9c   : > { %v9992_v11 = vld [vmem:[%s18128_s9 + $0xc0] sm:$0xf]  ;;  %v10393_v12 = vor.u32 %v14111_v10, %v10392_v9  ;;  %v14011_v13 = vld [vmem:[%s18128_s9 + $0xcc] sm:$0xf0]  ;;  %4565 = vmatpush.bf16.msra.mxu1 %v10137_v7  ;;  %s18144_s3 = sld [smem:[#allocation14_spill]]  ;;  %vm9319_vm2 = vcmask 261120  }
  0x9d   : > { %v10120_v14 = vld [vmem:[%s18128_s9 + $0x1c0] sm:$0xf]  ;;  %v14043_v15 = vld [vmem:[%s18128_s9 + $0x1cc] sm:$0xf0]  ;;  %4578 = vmatpush.bf16.msra.mxu2 %v10265_v8  ;;  %v9993_v16 = vor.u32 %v14011_v13, %v9992_v11  ;;  %s9893_s18 = sshll.u32 %s15742_s15, 4  ;;  %s18145_s22 = sld [smem:[#allocation18_spill]] }
  0x9e   : > { %v10121_v17 = vor.u32 %v14043_v15, %v10120_v14  ;;  %v10248_v18 = vld [vmem:[%s18128_s9 + $0x2c0] sm:$0xf]  ;;  %v14075_v19 = vld [vmem:[%s18128_s9 + $0x2cc] sm:$0xf0]  ;;  %4591 = vmatpush.bf16.msra.mxu3 %v10393_v12  ;;  %s18146_s7 = sld [smem:[#allocation16_spill]]  ;;  %vm9736_vm3 = vcmask 8192  }
  0x9f   : > { %v10376_v20 = vld [vmem:[%s18128_s9 + $0x3c0] sm:$0xf]  ;;  %v10249_v21 = vor.u32 %v14075_v19, %v10248_v18  ;;  %v14107_v22 = vld [vmem:[%s18128_s9 + $0x3cc] sm:$0xf0]  ;;  %4553 = vmatpush.bf16.msra.mxu0 %v9993_v16  ;;  %s15772_s2 = scalar_lea.vmem %s18143_s5, %s9893_s18  ;;  %s18147_s23 = sld [smem:[#allocation21_spill]] }
  0xa0   : > { %v9976_v23 = vld [vmem:[%s18128_s9 + $0xa0] sm:$0xf]  ;;  %v14007_v24 = vld [vmem:[%s18128_s9 + $0xac] sm:$0xf0]  ;;  %v10377_v25 = vor.u32 %v14107_v22, %v10376_v20  ;;  %4566 = vmatpush.bf16.msra.mxu1 %v10121_v17  ;;  %s18148_s1 = sld [smem:[#allocation17_spill]] }
  0xa1   : > { %v10104_v26 = vld [vmem:[%s18128_s9 + $0x1a0] sm:$0xf]  ;;  %v14039_v27 = vld [vmem:[%s18128_s9 + $0x1ac] sm:$0xf0]  ;;  %v9977_v29 = vor.u32 %v14007_v24, %v9976_v23  ;;  %4579 = vmatpush.bf16.msra.mxu2 %v10249_v21  ;;  %s18149_s28 = sld [smem:[#allocation23_spill]] }
  0xa2   : > { %v10232_v28 = vld [vmem:[%s18128_s9 + $0x2a0] sm:$0xf]  ;;  %v14071_v30 = vld [vmem:[%s18128_s9 + $0x2ac] sm:$0xf0]  ;;  %v10105_v33 = vor.u32 %v14039_v27, %v10104_v26  ;;  %4592 = vmatpush.bf16.msra.mxu3 %v10377_v25  ;;  %s18150_s10 = sld [smem:[#allocation20_spill]] }
  0xa3   : > { %v10360_v31 = vld [vmem:[%s18128_s9 + $0x3a0] sm:$0xf]  ;;  %v14103_v32 = vld [vmem:[%s18128_s9 + $0x3ac] sm:$0xf0]  ;;  %v10233_v34 = vor.u32 %v14071_v30, %v10232_v28  ;;  %4554 = vmatpush.bf16.msra.mxu0 %v9977_v29  ;;  %s18151_s26 = sld [smem:[#allocation19_spill]] }
  0xa4   : > { %v9960_v35 = vld [vmem:[%s18128_s9 + $0x80] sm:$0xf]  ;;  %v14003_v36 = vld [vmem:[%s18128_s9 + $0x8c] sm:$0xf0]  ;;  %v10361_v38 = vor.u32 %v14103_v32, %v10360_v31  ;;  %4567 = vmatpush.bf16.msra.mxu1 %v10105_v33  ;;  %s18152_s15 = sld [smem:[#allocation25_spill]] }
  0xa5   : > { %v10088_v37 = vld [vmem:[%s18128_s9 + $0x180] sm:$0xf]  ;;  %v14035_v39 = vld [vmem:[%s18128_s9 + $0x18c] sm:$0xf0]  ;;  %v9961_v44 = vor.u32 %v14003_v36, %v9960_v35  ;;  %4580 = vmatpush.bf16.msra.mxu2 %v10233_v34  ;;  %s18153_s18 = sld [smem:[#allocation22_spill]] }
  0xa6   : > { %v10216_v40 = vld [vmem:[%s18128_s9 + $0x280] sm:$0xf]  ;;  %v14067_v41 = vld [vmem:[%s18128_s9 + $0x28c] sm:$0xf0]  ;;  %v10089_v45 = vor.u32 %v14035_v39, %v10088_v37  ;;  %4593 = vmatpush.bf16.msra.mxu3 %v10361_v38 }
  0xa7   : > { %v10344_v42 = vld [vmem:[%s18128_s9 + $0x380] sm:$0xf]  ;;  %v14099_v43 = vld [vmem:[%s18128_s9 + $0x38c] sm:$0xf0]  ;;  %v10217_v46 = vor.u32 %v14067_v41, %v10216_v40  ;;  %4555 = vmatpush.bf16.msra.mxu0 %v9961_v44 }
  0xa8   : > { %v9944_v47 = vld [vmem:[%s18128_s9 + $0x60] sm:$0xf]  ;;  %v13999_v48 = vld [vmem:[%s18128_s9 + $0x6c] sm:$0xf0]  ;;  %v10345_v50 = vor.u32 %v14099_v43, %v10344_v42  ;;  %4568 = vmatpush.bf16.msra.mxu1 %v10089_v45 }
  0xa9   : > { %v10072_v49 = vld [vmem:[%s18128_s9 + $0x160] sm:$0xf]  ;;  %v14031_v51 = vld [vmem:[%s18128_s9 + $0x16c] sm:$0xf0]  ;;  %v9945_v56 = vor.u32 %v13999_v48, %v9944_v47  ;;  %4581 = vmatpush.bf16.msra.mxu2 %v10217_v46 }
  0xaa   : > { %v10200_v52 = vld [vmem:[%s18128_s9 + $0x260] sm:$0xf]  ;;  %v14063_v53 = vld [vmem:[%s18128_s9 + $0x26c] sm:$0xf0]  ;;  %v10073_v57 = vor.u32 %v14031_v51, %v10072_v49  ;;  %4594 = vmatpush.bf16.msra.mxu3 %v10345_v50 }
  0xab   : > { %v10328_v54 = vld [vmem:[%s18128_s9 + $0x360] sm:$0xf]  ;;  %v14095_v55 = vld [vmem:[%s18128_s9 + $0x36c] sm:$0xf0]  ;;  %v10201_v58 = vor.u32 %v14063_v53, %v10200_v52  ;;  %4556 = vmatpush.bf16.msra.mxu0 %v9945_v56 }
  0xac   : > { %v9928_v59 = vld [vmem:[%s18128_s9 + $0x40] sm:$0xf]  ;;  %v13995_v60 = vld [vmem:[%s18128_s9 + $0x4c] sm:$0xf0]  ;;  %v10329_v62 = vor.u32 %v14095_v55, %v10328_v54  ;;  %4569 = vmatpush.bf16.msra.mxu1 %v10073_v57 }
  0xad   : > { %v10056_v61 = vld [vmem:[%s18128_s9 + $0x140] sm:$0xf]  ;;  %v14027_v63 = vld [vmem:[%s18128_s9 + $0x14c] sm:$0xf0]  ;;  %v9929_v4 = vor.u32 %v13995_v60, %v9928_v59  ;;  %4582 = vmatpush.bf16.msra.mxu2 %v10201_v58 }
  0xae   : > { %v10184_v0 = vld [vmem:[%s18128_s9 + $0x240] sm:$0xf]  ;;  %v14059_v1 = vld [vmem:[%s18128_s9 + $0x24c] sm:$0xf0]  ;;  %v10057_v5 = vor.u32 %v14027_v63, %v10056_v61  ;;  %4595 = vmatpush.bf16.msra.mxu3 %v10329_v62 }
  0xaf   : > { %v10312_v2 = vld [vmem:[%s18128_s9 + $0x340] sm:$0xf]  ;;  %v14091_v3 = vld [vmem:[%s18128_s9 + $0x34c] sm:$0xf0]  ;;  %v10185_v6 = vor.u32 %v14059_v1, %v10184_v0  ;;  %4557 = vmatpush.bf16.msra.mxu0 %v9929_v4 }
  0xb0   : > { %v9912_v7 = vld [vmem:[%s18128_s9 + $0x20] sm:$0xf]  ;;  %v13991_v8 = vld [vmem:[%s18128_s9 + $0x2c] sm:$0xf0]  ;;  %v10313_v10 = vor.u32 %v14091_v3, %v10312_v2  ;;  %4570 = vmatpush.bf16.msra.mxu1 %v10057_v5 }
  0xb1   : > { %v10040_v9 = vld [vmem:[%s18128_s9 + $0x120] sm:$0xf]  ;;  %v14023_v11 = vld [vmem:[%s18128_s9 + $0x12c] sm:$0xf0]  ;;  %v9913_v16 = vor.u32 %v13991_v8, %v9912_v7  ;;  %4583 = vmatpush.bf16.msra.mxu2 %v10185_v6 }
  0xb2   : > { %v10168_v12 = vld [vmem:[%s18128_s9 + $0x220] sm:$0xf]  ;;  %v14055_v13 = vld [vmem:[%s18128_s9 + $0x22c] sm:$0xf0]  ;;  %v10041_v19 = vor.u32 %v14023_v11, %v10040_v9  ;;  %4596 = vmatpush.bf16.msra.mxu3 %v10313_v10 }
  0xb3   : > { %v10296_v14 = vld [vmem:[%s18128_s9 + $0x320] sm:$0xf]  ;;  %v14087_v15 = vld [vmem:[%s18128_s9 + $0x32c] sm:$0xf0]  ;;  %v10169_v20 = vor.u32 %v14055_v13, %v10168_v12  ;;  %4558 = vmatpush.bf16.msra.mxu0 %v9913_v16 }
  0xb4   : > { %v9896_v17 = vld [vmem:[%s18128_s9] sm:$0xf]  ;;  %v13987_v18 = vld [vmem:[%s18128_s9 + $0xc] sm:$0xf0]  ;;  %v10297_v24 = vor.u32 %v14087_v15, %v10296_v14  ;;  %4571 = vmatpush.bf16.msra.mxu1 %v10041_v19 }
  0xb5   : > { %v10024_v21 = vld [vmem:[%s18128_s9 + $0x100] sm:$0xf]  ;;  %v14019_v22 = vld [vmem:[%s18128_s9 + $0x10c] sm:$0xf0]  ;;  %v9897_v31 = vor.u32 %v13987_v18, %v9896_v17  ;;  %4584 = vmatpush.bf16.msra.mxu2 %v10169_v20 }
  0xb6   : > { %v10152_v23 = vld [vmem:[%s18128_s9 + $0x200] sm:$0xf]  ;;  %v14051_v25 = vld [vmem:[%s18128_s9 + $0x20c] sm:$0xf0]  ;;  %v10025_v35 = vor.u32 %v14019_v22, %v10024_v21  ;;  %4597 = vmatpush.bf16.msra.mxu3 %v10297_v24 }
  0xb7   : > { %v10280_v26 = vld [vmem:[%s18128_s9 + $0x300] sm:$0xf]  ;;  %v14083_v27 = vld [vmem:[%s18128_s9 + $0x30c] sm:$0xf0]  ;;  %v10153_v36 = vor.u32 %v14051_v25, %v10152_v23  ;;  %4559 = vmatpush.bf16.msra.mxu0 %v9897_v31 }
  0xb8   : > { %v10520_v28 = vld [vmem:[%s18128_s9 + $0x4e0] sm:$0xf]  ;;  %v14143_v29 = vld [vmem:[%s18128_s9 + $0x4ec] sm:$0xf0]  ;;  %v10281_v39 = vor.u32 %v14083_v27, %v10280_v26  ;;  %4572 = vmatpush.bf16.msra.mxu1 %v10025_v35 }
  0xb9   : > { %v10648_v30 = vld [vmem:[%s18128_s9 + $0x5e0] sm:$0xf]  ;;  %v14175_v32 = vld [vmem:[%s18128_s9 + $0x5ec] sm:$0xf0]  ;;  %v10521_v40 = vor.u32 %v14143_v29, %v10520_v28  ;;  %4585 = vmatpush.bf16.msra.mxu2 %v10153_v36 }
  0xba   : > { %v10776_v33 = vld [vmem:[%s18128_s9 + $0x6e0] sm:$0xf]  ;;  %v14207_v34 = vld [vmem:[%s18128_s9 + $0x6ec] sm:$0xf0]  ;;  %v10649_v41 = vor.u32 %v14175_v32, %v10648_v30  ;;  %4598 = vmatpush.bf16.msra.mxu3 %v10281_v39 }
  0xbb   : > { %v10904_v37 = vld [vmem:[%s18128_s9 + $0x7e0] sm:$0xf]  ;;  %v14239_v38 = vld [vmem:[%s18128_s9 + $0x7ec] sm:$0xf0]  ;;  %v10777_v42 = vor.u32 %v14207_v34, %v10776_v33  ;;  %4604 = vmatpush.bf16.msrb.mxu0 %v10521_v40 }
  0xbc   : > { %v10504_v43 = vld [vmem:[%s18128_s9 + $0x4c0] sm:$0xf]  ;;  %v14139_v44 = vld [vmem:[%s18128_s9 + $0x4cc] sm:$0xf0]  ;;  %v10905_v46 = vor.u32 %v14239_v38, %v10904_v37  ;;  %4617 = vmatpush.bf16.msrb.mxu1 %v10649_v41 }
  0xbd   : > { %v10632_v45 = vld [vmem:[%s18128_s9 + $0x5c0] sm:$0xf]  ;;  %v14171_v47 = vld [vmem:[%s18128_s9 + $0x5cc] sm:$0xf0]  ;;  %v10505_v52 = vor.u32 %v14139_v44, %v10504_v43  ;;  %4630 = vmatpush.bf16.msrb.mxu2 %v10777_v42 }
  0xbe   : > { %v10760_v48 = vld [vmem:[%s18128_s9 + $0x6c0] sm:$0xf]  ;;  %v14203_v49 = vld [vmem:[%s18128_s9 + $0x6cc] sm:$0xf0]  ;;  %v10633_v54 = vor.u32 %v14171_v47, %v10632_v45  ;;  %4643 = vmatpush.bf16.msrb.mxu3 %v10905_v46 }
  0xbf   : > { %v10888_v50 = vld [vmem:[%s18128_s9 + $0x7c0] sm:$0xf]  ;;  %v14235_v51 = vld [vmem:[%s18128_s9 + $0x7cc] sm:$0xf0]  ;;  %v10761_v55 = vor.u32 %v14203_v49, %v10760_v48  ;;  %4605 = vmatpush.bf16.msrb.mxu0 %v10505_v52 }
  0xc0   : > { %v10488_v53 = vld [vmem:[%s18128_s9 + $0x4a0] sm:$0xf]  ;;  %v14135_v56 = vld [vmem:[%s18128_s9 + $0x4ac] sm:$0xf0]  ;;  %v10889_v59 = vor.u32 %v14235_v51, %v10888_v50  ;;  %4618 = vmatpush.bf16.msrb.mxu1 %v10633_v54 }
  0xc1   : > { %v10616_v57 = vld [vmem:[%s18128_s9 + $0x5a0] sm:$0xf]  ;;  %v14167_v58 = vld [vmem:[%s18128_s9 + $0x5ac] sm:$0xf0]  ;;  %v10489_v0 = vor.u32 %v14135_v56, %v10488_v53  ;;  %4631 = vmatpush.bf16.msrb.mxu2 %v10761_v55 }
  0xc2   : > { %v10744_v60 = vld [vmem:[%s18128_s9 + $0x6a0] sm:$0xf]  ;;  %v14199_v61 = vld [vmem:[%s18128_s9 + $0x6ac] sm:$0xf0]  ;;  %v10617_v1 = vor.u32 %v14167_v58, %v10616_v57  ;;  %4644 = vmatpush.bf16.msrb.mxu3 %v10889_v59 }
  0xc3   : > { %v10872_v62 = vld [vmem:[%s18128_s9 + $0x7a0] sm:$0xf]  ;;  %v14231_v63 = vld [vmem:[%s18128_s9 + $0x7ac] sm:$0xf0]  ;;  %v10745_v5 = vor.u32 %v14199_v61, %v10744_v60  ;;  %4606 = vmatpush.bf16.msrb.mxu0 %v10489_v0 }
  0xc4   : > { %v10472_v2 = vld [vmem:[%s18128_s9 + $0x480] sm:$0xf]  ;;  %v14131_v3 = vld [vmem:[%s18128_s9 + $0x48c] sm:$0xf0]  ;;  %v10873_v10 = vor.u32 %v14231_v63, %v10872_v62  ;;  %4619 = vmatpush.bf16.msrb.mxu1 %v10617_v1 }
  0xc5   : > { %v15781_v4 = vld [vmem:[%s15772_s2] sm:$0xff]  ;;  %v14163_v11 = vld [vmem:[%s18128_s9 + $0x58c] sm:$0xf0]  ;;  %v10473_v19 = vor.u32 %v14131_v3, %v10472_v2  ;;  %4632 = vmatpush.bf16.msrb.mxu2 %v10745_v5 }
  0xc6   : > { %v10600_v6 = vld [vmem:[%s18128_s9 + $0x580] sm:$0xf]  ;;  %v1424_v7 = vperm.slane %v15781_v4, 2  ;;  %v1422_v8 = vperm.slane %v15781_v4, 0  ;;  %v1425_v9 = vperm.slane %v15781_v4, 3  ;;  %v1423_v20 = vperm.slane %v15781_v4, 1  ;;  %4645 = vmatpush.bf16.msrb.mxu3 %v10873_v10 }
  0xc7   : > { %v10728_v12 = vld [vmem:[%s18128_s9 + $0x680] sm:$0xf]  ;;  %v14195_v13 = vld [vmem:[%s18128_s9 + $0x68c] sm:$0xf0]  ;;  %v10601_v21 = vor.u32 %v14163_v11, %v10600_v6  ;;  %4607 = vmatpush.bf16.msrb.mxu0 %v10473_v19  ;;  %v1428_v60 = vperm.slane %v15781_v4, 6 }
  0xc8   : > { %v10856_v14 = vld [vmem:[%s18128_s9 + $0x780] sm:$0xf]  ;;  %v14227_v15 = vld [vmem:[%s18128_s9 + $0x78c] sm:$0xf0]  ;;  %v15792_v16 = vpack.c.bf16 %v1424_v7, %v1424_v7  ;;  %v15794_v17 = vpack.c.bf16 %v1422_v8, %v1422_v8  ;;  %v15796_v18 = vpack.c.bf16 %v1425_v9, %v1425_v9  ;;  %v10729_v22 = vor.u32 %v14195_v13, %v10728_v12 }
  0xc9   : > { %v10456_v23 = vld [vmem:[%s18128_s9 + $0x460] sm:$0xf]  ;;  %v14127_v24 = vld [vmem:[%s18128_s9 + $0x46c] sm:$0xf0]  ;;  %v10857_v26 = vor.u32 %v14227_v15, %v10856_v14  ;;  %v15806_v30 = vpack.c.bf16 %v1423_v20, %v1423_v20  ;;  %4620 = vmatpush.bf16.msrb.mxu1 %v10601_v21  ;;  %v1426_v21 = vperm.slane %v15781_v4, 4 }
  0xca   : > { %v10584_v25 = vld [vmem:[%s18128_s9 + $0x560] sm:$0xf]  ;;  %v14159_v27 = vld [vmem:[%s18128_s9 + $0x56c] sm:$0xf0]  ;;  %4586 = vmatmul.bf16.vlgmr.msra.gmra.mxu2 %v15792_v16  ;;  %4560 = vmatmul.bf16.vlgmr.msra.gmra.mxu0 %v15794_v17  ;;  %v10457_v33 = vor.u32 %v14127_v24, %v10456_v23 }
  0xcb   : > { %v10712_v28 = vld [vmem:[%s18128_s9 + $0x660] sm:$0xf]  ;;  %v14191_v29 = vld [vmem:[%s18128_s9 + $0x66c] sm:$0xf0]  ;;  %4599 = vmatmul.bf16.vlgmr.msra.gmra.mxu3 %v15796_v18  ;;  %4573 = vmatmul.bf16.vlgmr.msra.gmra.mxu1 %v15806_v30  ;;  %v10585_v34 = vor.u32 %v14159_v27, %v10584_v25  ;;  %v1427_v25 = vperm.slane %v15781_v4, 5 }
  0xcc   : > { %v10840_v31 = vld [vmem:[%s18128_s9 + $0x760] sm:$0xf]  ;;  %v14223_v32 = vld [vmem:[%s18128_s9 + $0x76c] sm:$0xf0]  ;;  %4633 = vmatpush.bf16.msrb.mxu2 %v10729_v22  ;;  %v10713_v35 = vor.u32 %v14191_v29, %v10712_v28  ;;  %4646 = vmatpush.bf16.msrb.mxu3 %v10857_v26  ;;  %v1429_v22 = vperm.slane %v15781_v4, 7  ;;  %v15859_v4 = vpack.c.bf16 %v1426_v21, %v1426_v21 }
  0xcd   : > { %v10440_v36 = vld [vmem:[%s18128_s9 + $0x440] sm:$0xf]  ;;  %v14123_v37 = vld [vmem:[%s18128_s9 + $0x44c] sm:$0xf0]  ;;  %v10841_v39 = vor.u32 %v14223_v32, %v10840_v31  ;;  %4608 = vmatpush.bf16.msrb.mxu0 %v10457_v33  ;;  %4621 = vmatpush.bf16.msrb.mxu1 %v10585_v34 }
  0xce   : > { %v10568_v38 = vld [vmem:[%s18128_s9 + $0x540] sm:$0xf]  ;;  %v14155_v40 = vld [vmem:[%s18128_s9 + $0x54c] sm:$0xf0]  ;;  %v10441_v45 = vor.u32 %v14123_v37, %v10440_v36  ;;  %v15855_v36 = vpack.c.bf16 %v1428_v60, %v1428_v60 }
  0xcf   : > { %v10696_v41 = vld [vmem:[%s18128_s9 + $0x640] sm:$0xf]  ;;  %v14187_v42 = vld [vmem:[%s18128_s9 + $0x64c] sm:$0xf0]  ;;  %v10569_v46 = vor.u32 %v14155_v40, %v10568_v38 }
  0xd0   : > { %v10824_v43 = vld [vmem:[%s18128_s9 + $0x740] sm:$0xf]  ;;  %v14219_v44 = vld [vmem:[%s18128_s9 + $0x74c] sm:$0xf0]  ;;  %4634 = vmatpush.bf16.msrb.mxu2 %v10713_v35  ;;  %v10697_v47 = vor.u32 %v14187_v42, %v10696_v41  ;;  %4647 = vmatpush.bf16.msrb.mxu3 %v10841_v39  ;;  %v15861_v39 = vpack.c.bf16 %v1429_v22, %v1429_v22  ;;  %v15863_v41 = vpack.c.bf16 %v1427_v25, %v1427_v25 }
  0xd1   : > { %v10424_v48 = vld [vmem:[%s18128_s9 + $0x420] sm:$0xf]  ;;  %v14119_v49 = vld [vmem:[%s18128_s9 + $0x42c] sm:$0xf0]  ;;  %v10825_v51 = vor.u32 %v14219_v44, %v10824_v43  ;;  %4609 = vmatpush.bf16.msrb.mxu0 %v10441_v45  ;;  %4622 = vmatpush.bf16.msrb.mxu1 %v10569_v46 }
  0xd2   : > { %v10552_v50 = vld [vmem:[%s18128_s9 + $0x520] sm:$0xf]  ;;  %v14151_v52 = vld [vmem:[%s18128_s9 + $0x52c] sm:$0xf0]  ;;  %v10425_v57 = vor.u32 %v14119_v49, %v10424_v48 }
  0xd3   : > { %v10680_v53 = vld [vmem:[%s18128_s9 + $0x620] sm:$0xf]  ;;  %v14183_v54 = vld [vmem:[%s18128_s9 + $0x62c] sm:$0xf0]  ;;  %v10553_v61 = vor.u32 %v14151_v52, %v10552_v50 }
  0xd4   : > { %v10808_v55 = vld [vmem:[%s18128_s9 + $0x720] sm:$0xf]  ;;  %v14215_v56 = vld [vmem:[%s18128_s9 + $0x72c] sm:$0xf0]  ;;  %4635 = vmatpush.bf16.msrb.mxu2 %v10697_v47  ;;  %v10681_v62 = vor.u32 %v14183_v54, %v10680_v53  ;;  %4648 = vmatpush.bf16.msrb.mxu3 %v10825_v51 }
  0xd5   : > { %v10408_v58 = vld [vmem:[%s18128_s9 + $0x400] sm:$0xf]  ;;  %v14115_v59 = vld [vmem:[%s18128_s9 + $0x40c] sm:$0xf0]  ;;  %v10809_v2 = vor.u32 %v14215_v56, %v10808_v55  ;;  %4610 = vmatpush.bf16.msrb.mxu0 %v10425_v57  ;;  %4623 = vmatpush.bf16.msrb.mxu1 %v10553_v61 }
  0xd6   : > { %v10536_v63 = vld [vmem:[%s18128_s9 + $0x500] sm:$0xf]  ;;  %v14147_v0 = vld [vmem:[%s18128_s9 + $0x50c] sm:$0xf0]  ;;  %v10409_v10 = vor.u32 %v14115_v59, %v10408_v58 }
  0xd7   : > { %v10664_v1 = vld [vmem:[%s18128_s9 + $0x600] sm:$0xf]  ;;  %v14179_v3 = vld [vmem:[%s18128_s9 + $0x60c] sm:$0xf0]  ;;  %v10537_v14 = vor.u32 %v14147_v0, %v10536_v63 }
  0xd8   : > { %v10792_v5 = vld [vmem:[%s18128_s9 + $0x700] sm:$0xf]  ;;  %v14211_v6 = vld [vmem:[%s18128_s9 + $0x70c] sm:$0xf0]  ;;  %4636 = vmatpush.bf16.msrb.mxu2 %v10681_v62  ;;  %v10665_v15 = vor.u32 %v14179_v3, %v10664_v1  ;;  %4649 = vmatpush.bf16.msrb.mxu3 %v10809_v2 }
  0xd9   : > { %v11032_v7 = vld [vmem:[%s18128_s9 + $0x8e0] sm:$0xf]  ;;  %v14271_v8 = vld [vmem:[%s18128_s9 + $0x8ec] sm:$0xf0]  ;;  %v10793_v23 = vor.u32 %v14211_v6, %v10792_v5  ;;  %4611 = vmatpush.bf16.msrb.mxu0 %v10409_v10  ;;  %4624 = vmatpush.bf16.msrb.mxu1 %v10537_v14 }
  0xda   : > { %v11160_v9 = vld [vmem:[%s18128_s9 + $0x9e0] sm:$0xf]  ;;  %v14303_v11 = vld [vmem:[%s18128_s9 + $0x9ec] sm:$0xf0]  ;;  %v11033_v24 = vor.u32 %v14271_v8, %v11032_v7 }
  0xdb   : > { %v11288_v12 = vld [vmem:[%s18128_s9 + $0xae0] sm:$0xf]  ;;  %v14335_v13 = vld [vmem:[%s18128_s9 + $0xaec] sm:$0xf0]  ;;  %v11161_v26 = vor.u32 %v14303_v11, %v11160_v9 }
  0xdc   : > { %v11416_v19 = vld [vmem:[%s18128_s9 + $0xbe0] sm:$0xf]  ;;  %v14367_v20 = vld [vmem:[%s18128_s9 + $0xbec] sm:$0xf0]  ;;  %v11289_v27 = vor.u32 %v14335_v13, %v11288_v12  ;;  %4637 = vmatpush.bf16.msrb.mxu2 %v10665_v15  ;;  %4650 = vmatpush.bf16.msrb.mxu3 %v10793_v23 }
  0xdd   : > { %v11016_v28 = vld [vmem:[%s18128_s9 + $0x8c0] sm:$0xf]  ;;  %v14267_v29 = vld [vmem:[%s18128_s9 + $0x8cc] sm:$0xf0]  ;;  %v11417_v32 = vor.u32 %v14367_v20, %v11416_v19  ;;  %4656 = vmatpush.bf16.msra.mxu0 %v11033_v24  ;;  %4669 = vmatpush.bf16.msra.mxu1 %v11161_v26 }
  0xde   : > { %v11144_v31 = vld [vmem:[%s18128_s9 + $0x9c0] sm:$0xf]  ;;  %v14299_v33 = vld [vmem:[%s18128_s9 + $0x9cc] sm:$0xf0]  ;;  %v11017_v40 = vor.u32 %v14267_v29, %v11016_v28  ;;  %4612 = vmatmul.bf16.vlgmr.msrb.gmra.mxu0 %v15859_v4  ;;  %4625 = vmatmul.bf16.vlgmr.msrb.gmra.mxu1 %v15863_v41 }
  0xdf   : > { %v11272_v34 = vld [vmem:[%s18128_s9 + $0xac0] sm:$0xf]  ;;  %v14331_v35 = vld [vmem:[%s18128_s9 + $0xacc] sm:$0xf0]  ;;  %v11145_v42 = vor.u32 %v14299_v33, %v11144_v31  ;;  %4638 = vmatmul.bf16.vlgmr.msrb.gmra.mxu2 %v15855_v36  ;;  %4651 = vmatmul.bf16.vlgmr.msrb.gmra.mxu3 %v15861_v39 }
  0xe0   : > { %v11400_v37 = vld [vmem:[%s18128_s9 + $0xbc0] sm:$0xf]  ;;  %v14363_v38 = vld [vmem:[%s18128_s9 + $0xbcc] sm:$0xf0]  ;;  %4682 = vmatpush.bf16.msra.mxu2 %v11289_v27  ;;  %v11273_v43 = vor.u32 %v14331_v35, %v11272_v34  ;;  %4695 = vmatpush.bf16.msra.mxu3 %v11417_v32 }
  0xe1   : > { %v11000_v44 = vld [vmem:[%s18128_s9 + $0x8a0] sm:$0xf]  ;;  %v14263_v45 = vld [vmem:[%s18128_s9 + $0x8ac] sm:$0xf0]  ;;  %v11401_v47 = vor.u32 %v14363_v38, %v11400_v37  ;;  %4657 = vmatpush.bf16.msra.mxu0 %v11017_v40  ;;  %4670 = vmatpush.bf16.msra.mxu1 %v11145_v42 }
  0xe2   : > { %v11128_v46 = vld [vmem:[%s18128_s9 + $0x9a0] sm:$0xf]  ;;  %v14295_v48 = vld [vmem:[%s18128_s9 + $0x9ac] sm:$0xf0]  ;;  %v11001_v53 = vor.u32 %v14263_v45, %v11000_v44 }
  0xe3   : > { %v11256_v49 = vld [vmem:[%s18128_s9 + $0xaa0] sm:$0xf]  ;;  %v14327_v50 = vld [vmem:[%s18128_s9 + $0xaac] sm:$0xf0]  ;;  %v11129_v54 = vor.u32 %v14295_v48, %v11128_v46 }
  0xe4   : > { %v11384_v51 = vld [vmem:[%s18128_s9 + $0xba0] sm:$0xf]  ;;  %v14359_v52 = vld [vmem:[%s18128_s9 + $0xbac] sm:$0xf0]  ;;  %4683 = vmatpush.bf16.msra.mxu2 %v11273_v43  ;;  %v11257_v55 = vor.u32 %v14327_v50, %v11256_v49  ;;  %4696 = vmatpush.bf16.msra.mxu3 %v11401_v47 }
  0xe5   : > { %v10984_v56 = vld [vmem:[%s18128_s9 + $0x880] sm:$0xf]  ;;  %v14259_v57 = vld [vmem:[%s18128_s9 + $0x88c] sm:$0xf0]  ;;  %v11385_v59 = vor.u32 %v14359_v52, %v11384_v51  ;;  %4658 = vmatpush.bf16.msra.mxu0 %v11001_v53  ;;  %4671 = vmatpush.bf16.msra.mxu1 %v11129_v54  ;;  %v15916_v54 = vld [vmem:[%s15772_s2 + $0x8] sm:$0xff]  ;;  %s18154_s2 = sld [smem:[#allocation29_spill]] }
  0xe6   : > { %v11112_v58 = vld [vmem:[%s18128_s9 + $0x980] sm:$0xf]  ;;  %v14291_v60 = vld [vmem:[%s18128_s9 + $0x98c] sm:$0xf0]  ;;  %v10985_v1 = vor.u32 %v14259_v57, %v10984_v56 }
  0xe7   : > { %v11240_v61 = vld [vmem:[%s18128_s9 + $0xa80] sm:$0xf]  ;;  %v14323_v62 = vld [vmem:[%s18128_s9 + $0xa8c] sm:$0xf0]  ;;  %v11113_v2 = vor.u32 %v14291_v60, %v11112_v58 }
  0xe8   : > { %v11368_v63 = vld [vmem:[%s18128_s9 + $0xb80] sm:$0xf]  ;;  %v14355_v0 = vld [vmem:[%s18128_s9 + $0xb8c] sm:$0xf0]  ;;  %4684 = vmatpush.bf16.msra.mxu2 %v11257_v55  ;;  %v11241_v3 = vor.u32 %v14323_v62, %v11240_v61  ;;  %4697 = vmatpush.bf16.msra.mxu3 %v11385_v59 }
  0xe9   : > { %v10968_v5 = vld [vmem:[%s18128_s9 + $0x860] sm:$0xf]  ;;  %v14255_v6 = vld [vmem:[%s18128_s9 + $0x86c] sm:$0xf0]  ;;  %v11369_v8 = vor.u32 %v14355_v0, %v11368_v63  ;;  %4659 = vmatpush.bf16.msra.mxu0 %v10985_v1  ;;  %4672 = vmatpush.bf16.msra.mxu1 %v11113_v2  ;;  %v1430_v1 = vperm.slane %v15916_v54, 0 }
  0xea   : > { %v11096_v7 = vld [vmem:[%s18128_s9 + $0x960] sm:$0xf]  ;;  %v14287_v9 = vld [vmem:[%s18128_s9 + $0x96c] sm:$0xf0]  ;;  %v10969_v14 = vor.u32 %v14255_v6, %v10968_v5 }
  0xeb   : > { %v11224_v10 = vld [vmem:[%s18128_s9 + $0xa60] sm:$0xf]  ;;  %v14319_v11 = vld [vmem:[%s18128_s9 + $0xa6c] sm:$0xf0]  ;;  %v11097_v15 = vor.u32 %v14287_v9, %v11096_v7  ;;  %v1432_v7 = vperm.slane %v15916_v54, 2 }
  0xec   : > { %v11352_v12 = vld [vmem:[%s18128_s9 + $0xb60] sm:$0xf]  ;;  %v14351_v13 = vld [vmem:[%s18128_s9 + $0xb6c] sm:$0xf0]  ;;  %4685 = vmatpush.bf16.msra.mxu2 %v11241_v3  ;;  %v11225_v19 = vor.u32 %v14319_v11, %v11224_v10  ;;  %4698 = vmatpush.bf16.msra.mxu3 %v11369_v8  ;;  %v1431_v8 = vperm.slane %v15916_v54, 1  ;;  %v1433_v11 = vperm.slane %v15916_v54, 3 }
  0xed   : > { %v10952_v20 = vld [vmem:[%s18128_s9 + $0x840] sm:$0xf]  ;;  %v14251_v21 = vld [vmem:[%s18128_s9 + $0x84c] sm:$0xf0]  ;;  %v11353_v23 = vor.u32 %v14351_v13, %v11352_v12  ;;  %4660 = vmatpush.bf16.msra.mxu0 %v10969_v14  ;;  %4673 = vmatpush.bf16.msra.mxu1 %v11097_v15 }
  0xee   : > { %v11080_v22 = vld [vmem:[%s18128_s9 + $0x940] sm:$0xf]  ;;  %v14283_v24 = vld [vmem:[%s18128_s9 + $0x94c] sm:$0xf0]  ;;  %v10953_v29 = vor.u32 %v14251_v21, %v10952_v20  ;;  %v15935_v21 = vpack.c.bf16 %v1430_v1, %v1430_v1 }
  0xef   : > { %v11208_v25 = vld [vmem:[%s18128_s9 + $0xa40] sm:$0xf]  ;;  %v14315_v26 = vld [vmem:[%s18128_s9 + $0xa4c] sm:$0xf0]  ;;  %v11081_v31 = vor.u32 %v14283_v24, %v11080_v22 }
  0xf0   : > { %v11336_v27 = vld [vmem:[%s18128_s9 + $0xb40] sm:$0xf]  ;;  %v14347_v28 = vld [vmem:[%s18128_s9 + $0xb4c] sm:$0xf0]  ;;  %4686 = vmatpush.bf16.msra.mxu2 %v11225_v19  ;;  %v11209_v32 = vor.u32 %v14315_v26, %v11208_v25  ;;  %4699 = vmatpush.bf16.msra.mxu3 %v11353_v23  ;;  %v15940_v25 = vpack.c.bf16 %v1432_v7, %v1432_v7  ;;  %v15942_v26 = vpack.c.bf16 %v1431_v8, %v1431_v8 }
  0xf1   : > { %v10936_v33 = vld [vmem:[%s18128_s9 + $0x820] sm:$0xf]  ;;  %v14247_v34 = vld [vmem:[%s18128_s9 + $0x82c] sm:$0xf0]  ;;  %v11337_v37 = vor.u32 %v14347_v28, %v11336_v27  ;;  %4661 = vmatpush.bf16.msra.mxu0 %v10953_v29  ;;  %4674 = vmatpush.bf16.msra.mxu1 %v11081_v31  ;;  %v15946_v29 = vpack.c.bf16 %v1433_v11, %v1433_v11 }
  0xf2   : > { %v11064_v35 = vld [vmem:[%s18128_s9 + $0x920] sm:$0xf]  ;;  %v14279_v38 = vld [vmem:[%s18128_s9 + $0x92c] sm:$0xf0]  ;;  %v10937_v46 = vor.u32 %v14247_v34, %v10936_v33 }
  0xf3   : > { %v11192_v40 = vld [vmem:[%s18128_s9 + $0xa20] sm:$0xf]  ;;  %v14311_v42 = vld [vmem:[%s18128_s9 + $0xa2c] sm:$0xf0]  ;;  %v11065_v50 = vor.u32 %v14279_v38, %v11064_v35 }
  0xf4   : > { %v11320_v43 = vld [vmem:[%s18128_s9 + $0xb20] sm:$0xf]  ;;  %v14343_v44 = vld [vmem:[%s18128_s9 + $0xb2c] sm:$0xf0]  ;;  %4687 = vmatpush.bf16.msra.mxu2 %v11209_v32  ;;  %v11193_v51 = vor.u32 %v14311_v42, %v11192_v40  ;;  %4700 = vmatpush.bf16.msra.mxu3 %v11337_v37 }
  0xf5   : > { %v10920_v45 = vld [vmem:[%s18128_s9 + $0x800] sm:$0xf]  ;;  %v14243_v47 = vld [vmem:[%s18128_s9 + $0x80c] sm:$0xf0]  ;;  %v11321_v55 = vor.u32 %v14343_v44, %v11320_v43  ;;  %4662 = vmatpush.bf16.msra.mxu0 %v10937_v46  ;;  %4675 = vmatpush.bf16.msra.mxu1 %v11065_v50 }
  0xf6   : > { %v11048_v48 = vld [vmem:[%s18128_s9 + $0x900] sm:$0xf]  ;;  %v14275_v49 = vld [vmem:[%s18128_s9 + $0x90c] sm:$0xf0]  ;;  %v10921_v62 = vor.u32 %v14243_v47, %v10920_v45 }
  0xf7   : > { %v11176_v52 = vld [vmem:[%s18128_s9 + $0xa00] sm:$0xf]  ;;  %v14307_v53 = vld [vmem:[%s18128_s9 + $0xa0c] sm:$0xf0]  ;;  %v11049_v2 = vor.u32 %v14275_v49, %v11048_v48 }
  0xf8   : > { %v11304_v56 = vld [vmem:[%s18128_s9 + $0xb00] sm:$0xf]  ;;  %v14339_v57 = vld [vmem:[%s18128_s9 + $0xb0c] sm:$0xf0]  ;;  %4688 = vmatpush.bf16.msra.mxu2 %v11193_v51  ;;  %v11177_v3 = vor.u32 %v14307_v53, %v11176_v52  ;;  %4701 = vmatpush.bf16.msra.mxu3 %v11321_v55 }
  0xf9   : > { %v11544_v58 = vld [vmem:[%s18128_s9 + $0xce0] sm:$0xf]  ;;  %v14399_v59 = vld [vmem:[%s18128_s9 + $0xcec] sm:$0xf0]  ;;  %v11305_v9 = vor.u32 %v14339_v57, %v11304_v56  ;;  %4663 = vmatpush.bf16.msra.mxu0 %v10921_v62  ;;  %4676 = vmatpush.bf16.msra.mxu1 %v11049_v2 }
  0xfa   : > { %v11672_v60 = vld [vmem:[%s18128_s9 + $0xde0] sm:$0xf]  ;;  %v14431_v61 = vld [vmem:[%s18128_s9 + $0xdec] sm:$0xf0]  ;;  %v11545_v10 = vor.u32 %v14399_v59, %v11544_v58 }
  0xfb   : > { %v11800_v63 = vld [vmem:[%s18128_s9 + $0xee0] sm:$0xf]  ;;  %v14463_v0 = vld [vmem:[%s18128_s9 + $0xeec] sm:$0xf0]  ;;  %v11673_v12 = vor.u32 %v14431_v61, %v11672_v60 }
  0xfc   : > { %v11928_v5 = vld [vmem:[%s18128_s9 + $0xfe0] sm:$0xf]  ;;  %v14495_v6 = vld [vmem:[%s18128_s9 + $0xfec] sm:$0xf0]  ;;  %v11801_v13 = vor.u32 %v14463_v0, %v11800_v63  ;;  %4689 = vmatpush.bf16.msra.mxu2 %v11177_v3  ;;  %4702 = vmatpush.bf16.msra.mxu3 %v11305_v9 }
  0xfd   : > { %v11528_v14 = vld [vmem:[%s18128_s9 + $0xcc0] sm:$0xf]  ;;  %v14395_v15 = vld [vmem:[%s18128_s9 + $0xccc] sm:$0xf0]  ;;  %v11929_v20 = vor.u32 %v14495_v6, %v11928_v5  ;;  %4708 = vmatpush.bf16.msrb.mxu0 %v11545_v10  ;;  %4721 = vmatpush.bf16.msrb.mxu1 %v11673_v12 }
  0xfe   : > { %v11656_v19 = vld [vmem:[%s18128_s9 + $0xdc0] sm:$0xf]  ;;  %v14427_v22 = vld [vmem:[%s18128_s9 + $0xdcc] sm:$0xf0]  ;;  %v11529_v31 = vor.u32 %v14395_v15, %v11528_v14  ;;  %4664 = vmatmul.bf16.vlgmr.msra.gmra.mxu0 %v15935_v21  ;;  %4677 = vmatmul.bf16.vlgmr.msra.gmra.mxu1 %v15942_v26 }
  0xff   : > { %v11784_v23 = vld [vmem:[%s18128_s9 + $0xec0] sm:$0xf]  ;;  %v14459_v24 = vld [vmem:[%s18128_s9 + $0xecc] sm:$0xf0]  ;;  %v11657_v32 = vor.u32 %v14427_v22, %v11656_v19  ;;  %4690 = vmatmul.bf16.vlgmr.msra.gmra.mxu2 %v15940_v25  ;;  %4703 = vmatmul.bf16.vlgmr.msra.gmra.mxu3 %v15946_v29 }
 0x100   : > { %v11912_v27 = vld [vmem:[%s18128_s9 + $0xfc0] sm:$0xf]  ;;  %v14491_v28 = vld [vmem:[%s18128_s9 + $0xfcc] sm:$0xf0]  ;;  %4734 = vmatpush.bf16.msrb.mxu2 %v11801_v13  ;;  %v11785_v33 = vor.u32 %v14459_v24, %v11784_v23  ;;  %4747 = vmatpush.bf16.msrb.mxu3 %v11929_v20 }
 0x101   : > { %v11512_v34 = vld [vmem:[%s18128_s9 + $0xca0] sm:$0xf]  ;;  %v14391_v35 = vld [vmem:[%s18128_s9 + $0xcac] sm:$0xf0]  ;;  %v11913_v38 = vor.u32 %v14491_v28, %v11912_v27  ;;  %4709 = vmatpush.bf16.msrb.mxu0 %v11529_v31  ;;  %4722 = vmatpush.bf16.msrb.mxu1 %v11657_v32 }
 0x102   : > { %v11640_v37 = vld [vmem:[%s18128_s9 + $0xda0] sm:$0xf]  ;;  %v14423_v40 = vld [vmem:[%s18128_s9 + $0xdac] sm:$0xf0]  ;;  %v11513_v46 = vor.u32 %v14391_v35, %v11512_v34 }
 0x103   : > { %v11768_v42 = vld [vmem:[%s18128_s9 + $0xea0] sm:$0xf]  ;;  %v14455_v43 = vld [vmem:[%s18128_s9 + $0xeac] sm:$0xf0]  ;;  %v11641_v47 = vor.u32 %v14423_v40, %v11640_v37 }
 0x104   : > { %v11896_v44 = vld [vmem:[%s18128_s9 + $0xfa0] sm:$0xf]  ;;  %v14487_v45 = vld [vmem:[%s18128_s9 + $0xfac] sm:$0xf0]  ;;  %4735 = vmatpush.bf16.msrb.mxu2 %v11785_v33  ;;  %v11769_v48 = vor.u32 %v14455_v43, %v11768_v42  ;;  %4748 = vmatpush.bf16.msrb.mxu3 %v11913_v38 }
 0x105   : > { %v11496_v49 = vld [vmem:[%s18128_s9 + $0xc80] sm:$0xf]  ;;  %v14387_v50 = vld [vmem:[%s18128_s9 + $0xc8c] sm:$0xf0]  ;;  %v11897_v52 = vor.u32 %v14487_v45, %v11896_v44  ;;  %4710 = vmatpush.bf16.msrb.mxu0 %v11513_v46  ;;  %4723 = vmatpush.bf16.msrb.mxu1 %v11641_v47 }
 0x106   : > { %v11624_v51 = vld [vmem:[%s18128_s9 + $0xd80] sm:$0xf]  ;;  %v14419_v53 = vld [vmem:[%s18128_s9 + $0xd8c] sm:$0xf0]  ;;  %v11497_v59 = vor.u32 %v14387_v50, %v11496_v49 }
 0x107   : > { %v11752_v55 = vld [vmem:[%s18128_s9 + $0xe80] sm:$0xf]  ;;  %v14451_v56 = vld [vmem:[%s18128_s9 + $0xe8c] sm:$0xf0]  ;;  %v11625_v60 = vor.u32 %v14419_v53, %v11624_v51 }
 0x108   : > { %v11880_v57 = vld [vmem:[%s18128_s9 + $0xf80] sm:$0xf]  ;;  %v14483_v58 = vld [vmem:[%s18128_s9 + $0xf8c] sm:$0xf0]  ;;  %4736 = vmatpush.bf16.msrb.mxu2 %v11769_v48  ;;  %v11753_v61 = vor.u32 %v14451_v56, %v11752_v55  ;;  %4749 = vmatpush.bf16.msrb.mxu3 %v11897_v52  ;;  %v14013_v56 = vld [vmem:[%s18128_s9 + $0xe4] sm:$0xf] }
 0x109   : > { %v11480_v62 = vld [vmem:[%s18128_s9 + $0xc60] sm:$0xf]  ;;  %v14383_v63 = vld [vmem:[%s18128_s9 + $0xc6c] sm:$0xf0]  ;;  %v11881_v1 = vor.u32 %v14483_v58, %v11880_v57  ;;  %4711 = vmatpush.bf16.msrb.mxu0 %v11497_v59  ;;  %4724 = vmatpush.bf16.msrb.mxu1 %v11625_v60  ;;  %v10010_v57 = vld [vmem:[%s18128_s9 + $0xf0] sm:$0xf0] }
 0x10a   : > { %v11608_v0 = vld [vmem:[%s18128_s9 + $0xd60] sm:$0xf]  ;;  %v14415_v2 = vld [vmem:[%s18128_s9 + $0xd6c] sm:$0xf0]  ;;  %v11481_v8 = vor.u32 %v14383_v63, %v11480_v62  ;;  %v14045_v58 = vld [vmem:[%s18128_s9 + $0x1e4] sm:$0xf] }
 0x10b   : > { %v11736_v3 = vld [vmem:[%s18128_s9 + $0xe60] sm:$0xf]  ;;  %v14447_v5 = vld [vmem:[%s18128_s9 + $0xe6c] sm:$0xf0]  ;;  %v11609_v9 = vor.u32 %v14415_v2, %v11608_v0  ;;  %v10138_v59 = vld [vmem:[%s18128_s9 + $0x1f0] sm:$0xf0] }
 0x10c   : > { %v11864_v6 = vld [vmem:[%s18128_s9 + $0xf60] sm:$0xf]  ;;  %v14479_v7 = vld [vmem:[%s18128_s9 + $0xf6c] sm:$0xf0]  ;;  %4737 = vmatpush.bf16.msrb.mxu2 %v11753_v61  ;;  %v11737_v10 = vor.u32 %v14447_v5, %v11736_v3  ;;  %4750 = vmatpush.bf16.msrb.mxu3 %v11881_v1  ;;  %v14077_v61 = vld [vmem:[%s18128_s9 + $0x2e4] sm:$0xf] }
 0x10d   : > { %v11464_v11 = vld [vmem:[%s18128_s9 + $0xc40] sm:$0xf]  ;;  %v14379_v12 = vld [vmem:[%s18128_s9 + $0xc4c] sm:$0xf0]  ;;  %v11865_v14 = vor.u32 %v14479_v7, %v11864_v6  ;;  %4712 = vmatpush.bf16.msrb.mxu0 %v11481_v8  ;;  %4725 = vmatpush.bf16.msrb.mxu1 %v11609_v9  ;;  %v10266_v62 = vld [vmem:[%s18128_s9 + $0x2f0] sm:$0xf0]  ;;  %v10013_v8 = vor.u32 %v14013_v56, %v10010_v57 }
 0x10e   : > { %v11592_v13 = vld [vmem:[%s18128_s9 + $0xd40] sm:$0xf]  ;;  %v14411_v15 = vld [vmem:[%s18128_s9 + $0xd4c] sm:$0xf0]  ;;  %v11465_v24 = vor.u32 %v14379_v12, %v11464_v11  ;;  %v1434_v63 = vperm.slane %v15916_v54, 4  ;;  %v1436_v5 = vperm.slane %v15916_v54, 6  ;;  %v10269_v11 = vor.u32 %v14077_v61, %v10266_v62 }
 0x10f   : > { %v11720_v19 = vld [vmem:[%s18128_s9 + $0xe40] sm:$0xf]  ;;  %v14443_v20 = vld [vmem:[%s18128_s9 + $0xe4c] sm:$0xf0]  ;;  %v11593_v27 = vor.u32 %v14411_v15, %v11592_v13  ;;  %v14109_v2 = vld [vmem:[%s18128_s9 + $0x3e4] sm:$0xf] }
 0x110   : > { %v11848_v22 = vld [vmem:[%s18128_s9 + $0xf40] sm:$0xf]  ;;  %v14475_v23 = vld [vmem:[%s18128_s9 + $0xf4c] sm:$0xf0]  ;;  %4738 = vmatpush.bf16.msrb.mxu2 %v11737_v10  ;;  %v11721_v28 = vor.u32 %v14443_v20, %v11720_v19  ;;  %4751 = vmatpush.bf16.msrb.mxu3 %v11865_v14  ;;  %v10394_v3 = vld [vmem:[%s18128_s9 + $0x3f0] sm:$0xf0]  ;;  %v10141_v10 = vor.u32 %v14045_v58, %v10138_v59  ;;  %v16015_v19 = vpack.c.bf16 %v1434_v63, %v1434_v63 }
 0x111   : > { %v11448_v31 = vld [vmem:[%s18128_s9 + $0xc20] sm:$0xf]  ;;  %v14375_v32 = vld [vmem:[%s18128_s9 + $0xc2c] sm:$0xf0]  ;;  %v11849_v34 = vor.u32 %v14475_v23, %v11848_v22  ;;  %4713 = vmatpush.bf16.msrb.mxu0 %v11465_v24  ;;  %4726 = vmatpush.bf16.msrb.mxu1 %v11593_v27  ;;  %v1435_v6 = vperm.slane %v15916_v54, 5  ;;  %v1437_v9 = vperm.slane %v15916_v54, 7  ;;  %v10397_v15 = vor.u32 %v14109_v2, %v10394_v3 }
 0x112   : > { %v11576_v33 = vld [vmem:[%s18128_s9 + $0xd20] sm:$0xf]  ;;  %v14407_v35 = vld [vmem:[%s18128_s9 + $0xd2c] sm:$0xf0]  ;;  %v11449_v43 = vor.u32 %v14375_v32, %v11448_v31  ;;  %v14009_v12 = vld [vmem:[%s18128_s9 + $0xc4] sm:$0xf]  ;;  %v16020_v54 = vpack.c.bf16 %v1436_v5, %v1436_v5 }
 0x113   : > { %v11704_v37 = vld [vmem:[%s18128_s9 + $0xe20] sm:$0xf]  ;;  %v14439_v38 = vld [vmem:[%s18128_s9 + $0xe2c] sm:$0xf0]  ;;  %v11577_v47 = vor.u32 %v14407_v35, %v11576_v33  ;;  %v9994_v13 = vld [vmem:[%s18128_s9 + $0xd0] sm:$0xf0]  ;;  %v16022_v24 = vpack.c.bf16 %v1435_v6, %v1435_v6  ;;  %v16026_v31 = vpack.c.bf16 %v1437_v9, %v1437_v9 }
 0x114   : > { %v11832_v40 = vld [vmem:[%s18128_s9 + $0xf20] sm:$0xf]  ;;  %v14471_v42 = vld [vmem:[%s18128_s9 + $0xf2c] sm:$0xf0]  ;;  %4739 = vmatpush.bf16.msrb.mxu2 %v11721_v28  ;;  %v11705_v48 = vor.u32 %v14439_v38, %v11704_v37  ;;  %4752 = vmatpush.bf16.msrb.mxu3 %v11849_v34  ;;  %v14041_v14 = vld [vmem:[%s18128_s9 + $0x1c4] sm:$0xf]  ;;  %v9997_v32 = vor.u32 %v14009_v12, %v9994_v13 }
 0x115   : > { %v11432_v44 = vld [vmem:[%s18128_s9 + $0xc00] sm:$0xf]  ;;  %v14371_v45 = vld [vmem:[%s18128_s9 + $0xc0c] sm:$0xf0]  ;;  %v11833_v52 = vor.u32 %v14471_v42, %v11832_v40  ;;  %4714 = vmatpush.bf16.msrb.mxu0 %v11449_v43  ;;  %4727 = vmatpush.bf16.msrb.mxu1 %v11577_v47  ;;  %v10122_v20 = vld [vmem:[%s18128_s9 + $0x1d0] sm:$0xf0] }
 0x116   : > { %v11560_v46 = vld [vmem:[%s18128_s9 + $0xd00] sm:$0xf]  ;;  %v14403_v49 = vld [vmem:[%s18128_s9 + $0xd0c] sm:$0xf0]  ;;  %v11433_v60 = vor.u32 %v14371_v45, %v11432_v44  ;;  %v14073_v22 = vld [vmem:[%s18128_s9 + $0x2c4] sm:$0xf]  ;;  %v10125_v33 = vor.u32 %v14041_v14, %v10122_v20 }
 0x117   : > { %v11688_v50 = vld [vmem:[%s18128_s9 + $0xe00] sm:$0xf]  ;;  %v14435_v51 = vld [vmem:[%s18128_s9 + $0xe0c] sm:$0xf0]  ;;  %v11561_v0 = vor.u32 %v14403_v49, %v11560_v46  ;;  %v10250_v23 = vld [vmem:[%s18128_s9 + $0x2d0] sm:$0xf0] }
 0x118   : > { %v11816_v53 = vld [vmem:[%s18128_s9 + $0xf00] sm:$0xf]  ;;  %v14467_v55 = vld [vmem:[%s18128_s9 + $0xf0c] sm:$0xf0]  ;;  %4740 = vmatpush.bf16.msrb.mxu2 %v11705_v48  ;;  %v11689_v1 = vor.u32 %v14435_v51, %v11688_v50  ;;  %4753 = vmatpush.bf16.msrb.mxu3 %v11833_v52  ;;  %v14105_v27 = vld [vmem:[%s18128_s9 + $0x3c4] sm:$0xf]  ;;  %v10253_v34 = vor.u32 %v14073_v22, %v10250_v23 }
 0x119   : > { %v11817_v7 = vor.u32 %v14467_v55, %v11816_v53  ;;  %4715 = vmatpush.bf16.msrb.mxu0 %v11433_v60  ;;  %4728 = vmatpush.bf16.msrb.mxu1 %v11561_v0  ;;  %v10378_v28 = vld [vmem:[%s18128_s9 + $0x3d0] sm:$0xf0]  ;;  %v14005_v35 = vld [vmem:[%s18128_s9 + $0xa4] sm:$0xf] }
 0x11a   : > { %v9978_v37 = vld [vmem:[%s18128_s9 + $0xb0] sm:$0xf0]  ;;  %v14037_v38 = vld [vmem:[%s18128_s9 + $0x1a4] sm:$0xf]  ;;  %v10381_v40 = vor.u32 %v14105_v27, %v10378_v28 }
 0x11b   : > { %v10106_v42 = vld [vmem:[%s18128_s9 + $0x1b0] sm:$0xf0]  ;;  %v14069_v43 = vld [vmem:[%s18128_s9 + $0x2a4] sm:$0xf]  ;;  %v9981_v47 = vor.u32 %v14005_v35, %v9978_v37 }
 0x11c   : > { %4741 = vmatpush.bf16.msrb.mxu2 %v11689_v1  ;;  %4754 = vmatpush.bf16.msrb.mxu3 %v11817_v7  ;;  %v10234_v44 = vld [vmem:[%s18128_s9 + $0x2b0] sm:$0xf0]  ;;  %v14101_v45 = vld [vmem:[%s18128_s9 + $0x3a4] sm:$0xf]  ;;  %v10109_v48 = vor.u32 %v14037_v38, %v10106_v42 }
 0x11d   : > { %4760 = vmatpush.bf16.msra.mxu0 %v10013_v8  ;;  %4773 = vmatpush.bf16.msra.mxu1 %v10141_v10  ;;  %v10362_v46 = vld [vmem:[%s18128_s9 + $0x3b0] sm:$0xf0]  ;;  %v10237_v49 = vor.u32 %v14069_v43, %v10234_v44  ;;  %v14001_v50 = vld [vmem:[%s18128_s9 + $0x84] sm:$0xf] }
 0x11e   : > { %4716 = vmatmul.bf16.vlgmr.msrb.gmra.mxu0 %v16015_v19  ;;  %4729 = vmatmul.bf16.vlgmr.msrb.gmra.mxu1 %v16022_v24  ;;  %v9962_v51 = vld [vmem:[%s18128_s9 + $0x90] sm:$0xf0]  ;;  %v14033_v52 = vld [vmem:[%s18128_s9 + $0x184] sm:$0xf]  ;;  %v10365_v53 = vor.u32 %v14101_v45, %v10362_v46 }
 0x11f   : > { %4742 = vmatmul.bf16.vlgmr.msrb.gmra.mxu2 %v16020_v54  ;;  %4755 = vmatmul.bf16.vlgmr.msrb.gmra.mxu3 %v16026_v31  ;;  %v10090_v55 = vld [vmem:[%s18128_s9 + $0x190] sm:$0xf0]  ;;  %v14065_v56 = vld [vmem:[%s18128_s9 + $0x284] sm:$0xf]  ;;  %v9965_v60 = vor.u32 %v14001_v50, %v9962_v51 }
 0x120   : > { %4786 = vmatpush.bf16.msra.mxu2 %v10269_v11  ;;  %4799 = vmatpush.bf16.msra.mxu3 %v10397_v15  ;;  %v10218_v57 = vld [vmem:[%s18128_s9 + $0x290] sm:$0xf0]  ;;  %v14097_v58 = vld [vmem:[%s18128_s9 + $0x384] sm:$0xf]  ;;  %v10093_v61 = vor.u32 %v14033_v52, %v10090_v55 }
 0x121   : > { %4761 = vmatpush.bf16.msra.mxu0 %v9997_v32  ;;  %4774 = vmatpush.bf16.msra.mxu1 %v10125_v33  ;;  %v10346_v59 = vld [vmem:[%s18128_s9 + $0x390] sm:$0xf0]  ;;  %v10221_v62 = vor.u32 %v14065_v56, %v10218_v57  ;;  %v13997_v63 = vld [vmem:[%s18128_s9 + $0x64] sm:$0xf] }
 0x122   : > { %v9946_v0 = vld [vmem:[%s18128_s9 + $0x70] sm:$0xf0]  ;;  %v14029_v1 = vld [vmem:[%s18128_s9 + $0x164] sm:$0xf]  ;;  %v10349_v2 = vor.u32 %v14097_v58, %v10346_v59 }
 0x123   : > { %v10074_v3 = vld [vmem:[%s18128_s9 + $0x170] sm:$0xf0]  ;;  %v14061_v5 = vld [vmem:[%s18128_s9 + $0x264] sm:$0xf]  ;;  %v9949_v9 = vor.u32 %v13997_v63, %v9946_v0 }
 0x124   : > { %4787 = vmatpush.bf16.msra.mxu2 %v10253_v34  ;;  %4800 = vmatpush.bf16.msra.mxu3 %v10381_v40  ;;  %v10202_v6 = vld [vmem:[%s18128_s9 + $0x270] sm:$0xf0]  ;;  %v14093_v7 = vld [vmem:[%s18128_s9 + $0x364] sm:$0xf]  ;;  %v10077_v10 = vor.u32 %v14029_v1, %v10074_v3 }
 0x125   : > { %4762 = vmatpush.bf16.msra.mxu0 %v9981_v47  ;;  %4775 = vmatpush.bf16.msra.mxu1 %v10109_v48  ;;  %v10330_v8 = vld [vmem:[%s18128_s9 + $0x370] sm:$0xf0]  ;;  %v10205_v11 = vor.u32 %v14061_v5, %v10202_v6  ;;  %v13993_v12 = vld [vmem:[%s18128_s9 + $0x44] sm:$0xf] }
 0x126   : > { %v9930_v13 = vld [vmem:[%s18128_s9 + $0x50] sm:$0xf0]  ;;  %v14025_v14 = vld [vmem:[%s18128_s9 + $0x144] sm:$0xf]  ;;  %v10333_v15 = vor.u32 %v14093_v7, %v10330_v8 }
 0x127   : > { %v10058_v20 = vld [vmem:[%s18128_s9 + $0x150] sm:$0xf0]  ;;  %v14057_v22 = vld [vmem:[%s18128_s9 + $0x244] sm:$0xf]  ;;  %v9933_v32 = vor.u32 %v13993_v12, %v9930_v13 }
 0x128   : > { %4788 = vmatpush.bf16.msra.mxu2 %v10237_v49  ;;  %4801 = vmatpush.bf16.msra.mxu3 %v10365_v53  ;;  %v10186_v23 = vld [vmem:[%s18128_s9 + $0x250] sm:$0xf0]  ;;  %v14089_v27 = vld [vmem:[%s18128_s9 + $0x344] sm:$0xf]  ;;  %v10061_v33 = vor.u32 %v14025_v14, %v10058_v20 }
 0x129   : > { %4763 = vmatpush.bf16.msra.mxu0 %v9965_v60  ;;  %4776 = vmatpush.bf16.msra.mxu1 %v10093_v61  ;;  %v10314_v28 = vld [vmem:[%s18128_s9 + $0x350] sm:$0xf0]  ;;  %v10189_v34 = vor.u32 %v14057_v22, %v10186_v23  ;;  %v13989_v35 = vld [vmem:[%s18128_s9 + $0x24] sm:$0xf] }
 0x12a   : > { %v9914_v37 = vld [vmem:[%s18128_s9 + $0x30] sm:$0xf0]  ;;  %v14021_v38 = vld [vmem:[%s18128_s9 + $0x124] sm:$0xf]  ;;  %v10317_v40 = vor.u32 %v14089_v27, %v10314_v28 }
 0x12b   : > { %v10042_v42 = vld [vmem:[%s18128_s9 + $0x130] sm:$0xf0]  ;;  %v14053_v43 = vld [vmem:[%s18128_s9 + $0x224] sm:$0xf]  ;;  %v9917_v47 = vor.u32 %v13989_v35, %v9914_v37 }
 0x12c   : > { %4789 = vmatpush.bf16.msra.mxu2 %v10221_v62  ;;  %4802 = vmatpush.bf16.msra.mxu3 %v10349_v2  ;;  %v10170_v44 = vld [vmem:[%s18128_s9 + $0x230] sm:$0xf0]  ;;  %v14085_v45 = vld [vmem:[%s18128_s9 + $0x324] sm:$0xf]  ;;  %v10045_v50 = vor.u32 %v14021_v38, %v10042_v42 }
 0x12d   : > { %4764 = vmatpush.bf16.msra.mxu0 %v9949_v9  ;;  %4777 = vmatpush.bf16.msra.mxu1 %v10077_v10  ;;  %v10298_v46 = vld [vmem:[%s18128_s9 + $0x330] sm:$0xf0]  ;;  %v13985_v48 = vld [vmem:[%s18128_s9 + $0x4] sm:$0xf]  ;;  %v10173_v51 = vor.u32 %v14053_v43, %v10170_v44 }
 0x12e   : > { %v9898_v49 = vld [vmem:[%s18128_s9 + $0x10] sm:$0xf0]  ;;  %v14017_v52 = vld [vmem:[%s18128_s9 + $0x104] sm:$0xf]  ;;  %v10301_v56 = vor.u32 %v14085_v45, %v10298_v46 }
 0x12f   : > { %v10026_v53 = vld [vmem:[%s18128_s9 + $0x110] sm:$0xf0]  ;;  %v14049_v55 = vld [vmem:[%s18128_s9 + $0x204] sm:$0xf]  ;;  %v9901_v63 = vor.u32 %v13985_v48, %v9898_v49 }
 0x130   : > { %4790 = vmatpush.bf16.msra.mxu2 %v10205_v11  ;;  %4803 = vmatpush.bf16.msra.mxu3 %v10333_v15  ;;  %v10154_v57 = vld [vmem:[%s18128_s9 + $0x210] sm:$0xf0]  ;;  %v14081_v58 = vld [vmem:[%s18128_s9 + $0x304] sm:$0xf]  ;;  %v10029_v3 = vor.u32 %v14017_v52, %v10026_v53 }
 0x131   : > { %4765 = vmatpush.bf16.msra.mxu0 %v9933_v32  ;;  %4778 = vmatpush.bf16.msra.mxu1 %v10061_v33  ;;  %v10282_v59 = vld [vmem:[%s18128_s9 + $0x310] sm:$0xf0]  ;;  %v14141_v60 = vld [vmem:[%s18128_s9 + $0x4e4] sm:$0xf]  ;;  %v10157_v5 = vor.u32 %v14049_v55, %v10154_v57 }
 0x132   : > { %v10522_v61 = vld [vmem:[%s18128_s9 + $0x4f0] sm:$0xf0]  ;;  %v14173_v62 = vld [vmem:[%s18128_s9 + $0x5e4] sm:$0xf]  ;;  %v10285_v8 = vor.u32 %v14081_v58, %v10282_v59 }
 0x133   : > { %v10650_v0 = vld [vmem:[%s18128_s9 + $0x5f0] sm:$0xf0]  ;;  %v14205_v1 = vld [vmem:[%s18128_s9 + $0x6e4] sm:$0xf]  ;;  %v10525_v9 = vor.u32 %v14141_v60, %v10522_v61 }
 0x134   : > { %4791 = vmatpush.bf16.msra.mxu2 %v10189_v34  ;;  %4804 = vmatpush.bf16.msra.mxu3 %v10317_v40  ;;  %v10778_v2 = vld [vmem:[%s18128_s9 + $0x6f0] sm:$0xf0]  ;;  %v14237_v6 = vld [vmem:[%s18128_s9 + $0x7e4] sm:$0xf]  ;;  %v10653_v10 = vor.u32 %v14173_v62, %v10650_v0 }
 0x135   : > { %4766 = vmatpush.bf16.msra.mxu0 %v9917_v47  ;;  %4779 = vmatpush.bf16.msra.mxu1 %v10045_v50  ;;  %v10906_v7 = vld [vmem:[%s18128_s9 + $0x7f0] sm:$0xf0]  ;;  %v10781_v11 = vor.u32 %v14205_v1, %v10778_v2  ;;  %v14137_v12 = vld [vmem:[%s18128_s9 + $0x4c4] sm:$0xf] }
 0x136   : > { %v10506_v13 = vld [vmem:[%s18128_s9 + $0x4d0] sm:$0xf0]  ;;  %v14169_v14 = vld [vmem:[%s18128_s9 + $0x5c4] sm:$0xf]  ;;  %v10909_v15 = vor.u32 %v14237_v6, %v10906_v7  ;;  %v1982_v7 = vld [vmem:[%s15352_s13] sm:$0xf] }
 0x137   : > { %v10634_v20 = vld [vmem:[%s18128_s9 + $0x5d0] sm:$0xf0]  ;;  %v14201_v22 = vld [vmem:[%s18128_s9 + $0x6c4] sm:$0xf]  ;;  %v10509_v32 = vor.u32 %v14137_v12, %v10506_v13 }
 0x138   : > { %4792 = vmatpush.bf16.msra.mxu2 %v10173_v51  ;;  %4805 = vmatpush.bf16.msra.mxu3 %v10301_v56  ;;  %v10762_v23 = vld [vmem:[%s18128_s9 + $0x6d0] sm:$0xf0]  ;;  %v14233_v27 = vld [vmem:[%s18128_s9 + $0x7c4] sm:$0xf]  ;;  %v10637_v33 = vor.u32 %v14169_v14, %v10634_v20  ;;  %v4544_v20 = vperm.slane %v1982_v7, 0 }
 0x139   : > { %4767 = vmatpush.bf16.msra.mxu0 %v9901_v63  ;;  %4780 = vmatpush.bf16.msra.mxu1 %v10029_v3  ;;  %v10890_v28 = vld [vmem:[%s18128_s9 + $0x7d0] sm:$0xf0]  ;;  %v10765_v34 = vor.u32 %v14201_v22, %v10762_v23  ;;  %v14133_v35 = vld [vmem:[%s18128_s9 + $0x4a4] sm:$0xf] }
 0x13a   : > { %v10490_v37 = vld [vmem:[%s18128_s9 + $0x4b0] sm:$0xf0]  ;;  %v14165_v38 = vld [vmem:[%s18128_s9 + $0x5a4] sm:$0xf]  ;;  %v10893_v40 = vor.u32 %v14233_v27, %v10890_v28 }
 0x13b   : > { %v10618_v42 = vld [vmem:[%s18128_s9 + $0x5b0] sm:$0xf0]  ;;  %v14197_v43 = vld [vmem:[%s18128_s9 + $0x6a4] sm:$0xf]  ;;  %v10493_v47 = vor.u32 %v14133_v35, %v10490_v37 }
 0x13c   : > { %4793 = vmatpush.bf16.msra.mxu2 %v10157_v5  ;;  %4806 = vmatpush.bf16.msra.mxu3 %v10285_v8  ;;  %v10746_v44 = vld [vmem:[%s18128_s9 + $0x6b0] sm:$0xf0]  ;;  %v14229_v45 = vld [vmem:[%s18128_s9 + $0x7a4] sm:$0xf]  ;;  %v10621_v48 = vor.u32 %v14165_v38, %v10618_v42 }
 0x13d   : > { %4812 = vmatpush.bf16.msrb.mxu0 %v10525_v9  ;;  %4825 = vmatpush.bf16.msrb.mxu1 %v10653_v10  ;;  %v10874_v46 = vld [vmem:[%s18128_s9 + $0x7b0] sm:$0xf0]  ;;  %v10749_v49 = vor.u32 %v14197_v43, %v10746_v44  ;;  %v14129_v50 = vld [vmem:[%s18128_s9 + $0x484] sm:$0xf] }
 0x13e   : > { %4768 = vmatmul.bf16.vlgmr.msra.gmra.mxu0 %v15794_v17  ;;  %4781 = vmatmul.bf16.vlgmr.msra.gmra.mxu1 %v15806_v30  ;;  %v10474_v51 = vld [vmem:[%s18128_s9 + $0x490] sm:$0xf0]  ;;  %v14161_v52 = vld [vmem:[%s18128_s9 + $0x584] sm:$0xf]  ;;  %v10877_v53 = vor.u32 %v14229_v45, %v10874_v46 }
 0x13f   : > { %4794 = vmatmul.bf16.vlgmr.msra.gmra.mxu2 %v15792_v16  ;;  %4807 = vmatmul.bf16.vlgmr.msra.gmra.mxu3 %v15796_v18  ;;  %v10602_v55 = vld [vmem:[%s18128_s9 + $0x590] sm:$0xf0]  ;;  %v14193_v56 = vld [vmem:[%s18128_s9 + $0x684] sm:$0xf]  ;;  %v10477_v60 = vor.u32 %v14129_v50, %v10474_v51 }
 0x140   : > { %4838 = vmatpush.bf16.msrb.mxu2 %v10781_v11  ;;  %4851 = vmatpush.bf16.msrb.mxu3 %v10909_v15  ;;  %v10730_v57 = vld [vmem:[%s18128_s9 + $0x690] sm:$0xf0]  ;;  %v14225_v58 = vld [vmem:[%s18128_s9 + $0x784] sm:$0xf]  ;;  %v10605_v62 = vor.u32 %v14161_v52, %v10602_v55 }
 0x141   : > { %4813 = vmatpush.bf16.msrb.mxu0 %v10509_v32  ;;  %4826 = vmatpush.bf16.msrb.mxu1 %v10637_v33  ;;  %v10858_v59 = vld [vmem:[%s18128_s9 + $0x790] sm:$0xf0]  ;;  %v14125_v61 = vld [vmem:[%s18128_s9 + $0x464] sm:$0xf]  ;;  %v10733_v63 = vor.u32 %v14193_v56, %v10730_v57 }
 0x142   : > { %v10458_v0 = vld [vmem:[%s18128_s9 + $0x470] sm:$0xf0]  ;;  %v14157_v1 = vld [vmem:[%s18128_s9 + $0x564] sm:$0xf]  ;;  %v10861_v3 = vor.u32 %v14225_v58, %v10858_v59 }
 0x143   : > { %v10586_v2 = vld [vmem:[%s18128_s9 + $0x570] sm:$0xf0]  ;;  %v14189_v5 = vld [vmem:[%s18128_s9 + $0x664] sm:$0xf]  ;;  %v10461_v10 = vor.u32 %v14125_v61, %v10458_v0 }
 0x144   : > { %4839 = vmatpush.bf16.msrb.mxu2 %v10765_v34  ;;  %4852 = vmatpush.bf16.msrb.mxu3 %v10893_v40  ;;  %v10714_v6 = vld [vmem:[%s18128_s9 + $0x670] sm:$0xf0]  ;;  %v14221_v8 = vld [vmem:[%s18128_s9 + $0x764] sm:$0xf]  ;;  %v10589_v12 = vor.u32 %v14157_v1, %v10586_v2 }
 0x145   : > { %4814 = vmatpush.bf16.msrb.mxu0 %v10493_v47  ;;  %4827 = vmatpush.bf16.msrb.mxu1 %v10621_v48  ;;  %v10842_v9 = vld [vmem:[%s18128_s9 + $0x770] sm:$0xf0]  ;;  %v14121_v11 = vld [vmem:[%s18128_s9 + $0x444] sm:$0xf]  ;;  %v10717_v13 = vor.u32 %v14189_v5, %v10714_v6 }
 0x146   : > { %v10442_v14 = vld [vmem:[%s18128_s9 + $0x450] sm:$0xf0]  ;;  %v14153_v15 = vld [vmem:[%s18128_s9 + $0x544] sm:$0xf]  ;;  %v10845_v22 = vor.u32 %v14221_v8, %v10842_v9 }
 0x147   : > { %v10570_v23 = vld [vmem:[%s18128_s9 + $0x550] sm:$0xf0]  ;;  %v14185_v27 = vld [vmem:[%s18128_s9 + $0x644] sm:$0xf]  ;;  %v10445_v34 = vor.u32 %v14121_v11, %v10442_v14  ;;  %v4561_v35 = vpop.f32.mrf.mxu0 }
 0x148   : > { %4840 = vmatpush.bf16.msrb.mxu2 %v10749_v49  ;;  %4853 = vmatpush.bf16.msrb.mxu3 %v10877_v53  ;;  %v10698_v28 = vld [vmem:[%s18128_s9 + $0x650] sm:$0xf0]  ;;  %v14217_v32 = vld [vmem:[%s18128_s9 + $0x744] sm:$0xf]  ;;  %v10573_v37 = vor.u32 %v14153_v15, %v10570_v23  ;;  %v4562_v44 = vadd.f32 %v4561_v35, %v4544_v20  ;;  %v4574_v45 = vpop.f32.mrf.mxu1 }
 0x149   : > { %4815 = vmatpush.bf16.msrb.mxu0 %v10477_v60  ;;  %4828 = vmatpush.bf16.msrb.mxu1 %v10605_v62  ;;  %v10826_v33 = vld [vmem:[%s18128_s9 + $0x750] sm:$0xf0]  ;;  %v10701_v38 = vor.u32 %v14185_v27, %v10698_v28  ;;  %v14117_v40 = vld [vmem:[%s18128_s9 + $0x424] sm:$0xf] }
 0x14a   : > { %v10426_v42 = vld [vmem:[%s18128_s9 + $0x430] sm:$0xf0]  ;;  %v14149_v43 = vld [vmem:[%s18128_s9 + $0x524] sm:$0xf]  ;;  %v10829_v46 = vor.u32 %v14217_v32, %v10826_v33  ;;  %v4575_v52 = vadd.f32 %v4574_v45, %v4562_v44 }
 0x14b   : > { %v10554_v47 = vld [vmem:[%s18128_s9 + $0x530] sm:$0xf0]  ;;  %v14181_v48 = vld [vmem:[%s18128_s9 + $0x624] sm:$0xf]  ;;  %v10429_v53 = vor.u32 %v14117_v40, %v10426_v42 }
 0x14c   : > { %4841 = vmatpush.bf16.msrb.mxu2 %v10733_v63  ;;  %4854 = vmatpush.bf16.msrb.mxu3 %v10861_v3  ;;  %v10682_v49 = vld [vmem:[%s18128_s9 + $0x630] sm:$0xf0]  ;;  %v14213_v50 = vld [vmem:[%s18128_s9 + $0x724] sm:$0xf]  ;;  %v10557_v57 = vor.u32 %v14149_v43, %v10554_v47 }
 0x14d   : > { %4816 = vmatpush.bf16.msrb.mxu0 %v10461_v10  ;;  %4829 = vmatpush.bf16.msrb.mxu1 %v10589_v12  ;;  %v10810_v51 = vld [vmem:[%s18128_s9 + $0x730] sm:$0xf0]  ;;  %v14113_v55 = vld [vmem:[%s18128_s9 + $0x404] sm:$0xf]  ;;  %v10685_v58 = vor.u32 %v14181_v48, %v10682_v49  ;;  %v4587_v62 = vpop.f32.mrf.mxu2 }
 0x14e   : > { %v10410_v56 = vld [vmem:[%s18128_s9 + $0x410] sm:$0xf0]  ;;  %v14145_v59 = vld [vmem:[%s18128_s9 + $0x504] sm:$0xf]  ;;  %v10813_v63 = vor.u32 %v14213_v50, %v10810_v51  ;;  %v4588_v3 = vadd.f32 %v4587_v62, %v4575_v52  ;;  %v4600_v5 = vpop.f32.mrf.mxu3 }
 0x14f   : > { %v10538_v60 = vld [vmem:[%s18128_s9 + $0x510] sm:$0xf0]  ;;  %v14177_v61 = vld [vmem:[%s18128_s9 + $0x604] sm:$0xf]  ;;  %v10413_v9 = vor.u32 %v14113_v55, %v10410_v56  ;;  %v4563_v14 = vpop.f32.mrf.mxu0 }
 0x150   : > { %4842 = vmatpush.bf16.msrb.mxu2 %v10717_v13  ;;  %4855 = vmatpush.bf16.msrb.mxu3 %v10845_v22  ;;  %v10666_v0 = vld [vmem:[%s18128_s9 + $0x610] sm:$0xf0]  ;;  %v14209_v1 = vld [vmem:[%s18128_s9 + $0x704] sm:$0xf]  ;;  %v16155_v13 = vadd.f32 %v4600_v5, %v4588_v3  ;;  %v10541_v15 = vor.u32 %v14145_v59, %v10538_v60  ;;  %v4576_v27 = vpop.f32.mrf.mxu1 }
 0x151   : > { %4817 = vmatpush.bf16.msrb.mxu0 %v10445_v34  ;;  %4830 = vmatpush.bf16.msrb.mxu1 %v10573_v37  ;;  %v10794_v2 = vld [vmem:[%s18128_s9 + $0x710] sm:$0xf0]  ;;  %v14269_v6 = vld [vmem:[%s18128_s9 + $0x8e4] sm:$0xf]  ;;  %v10669_v20 = vor.u32 %v14177_v61, %v10666_v0 }
 0x152   : > { %v11034_v7 = vld [vmem:[%s18128_s9 + $0x8f0] sm:$0xf0]  ;;  %v14301_v8 = vld [vmem:[%s18128_s9 + $0x9e4] sm:$0xf]  ;;  %v10797_v28 = vor.u32 %v14209_v1, %v10794_v2 }
 0x153   : > { %v11162_v10 = vld [vmem:[%s18128_s9 + $0x9f0] sm:$0xf0]  ;;  %v14333_v11 = vld [vmem:[%s18128_s9 + $0xae4] sm:$0xf]  ;;  %v11037_v32 = vor.u32 %v14269_v6, %v11034_v7 }
 0x154   : > { %4843 = vmatpush.bf16.msrb.mxu2 %v10701_v38  ;;  %4856 = vmatpush.bf16.msrb.mxu3 %v10829_v46  ;;  %v11290_v12 = vld [vmem:[%s18128_s9 + $0xaf0] sm:$0xf0]  ;;  %v14365_v22 = vld [vmem:[%s18128_s9 + $0xbe4] sm:$0xf]  ;;  %v11165_v33 = vor.u32 %v14301_v8, %v11162_v10 }
 0x155   : > { %4818 = vmatpush.bf16.msrb.mxu0 %v10429_v53  ;;  %4831 = vmatpush.bf16.msrb.mxu1 %v10557_v57  ;;  %v11418_v23 = vld [vmem:[%s18128_s9 + $0xbf0] sm:$0xf0]  ;;  %v11293_v34 = vor.u32 %v14333_v11, %v11290_v12  ;;  %v14265_v35 = vld [vmem:[%s18128_s9 + $0x8c4] sm:$0xf]  ;;  %v4589_v47 = vpop.f32.mrf.mxu2 }
 0x156   : > { %v11018_v37 = vld [vmem:[%s18128_s9 + $0x8d0] sm:$0xf0]  ;;  %v14297_v38 = vld [vmem:[%s18128_s9 + $0x9c4] sm:$0xf]  ;;  %v11421_v40 = vor.u32 %v14365_v22, %v11418_v23  ;;  %v4602_v49 = vpop.f32.mrf.mxu3 }
 0x157   : > { %v11146_v42 = vld [vmem:[%s18128_s9 + $0x9d0] sm:$0xf0]  ;;  %v14329_v43 = vld [vmem:[%s18128_s9 + $0xac4] sm:$0xf]  ;;  %v11021_v48 = vor.u32 %v14265_v35, %v11018_v37 }
 0x158   : > { %4844 = vmatpush.bf16.msrb.mxu2 %v10685_v58  ;;  %4857 = vmatpush.bf16.msrb.mxu3 %v10813_v63  ;;  %v11274_v44 = vld [vmem:[%s18128_s9 + $0xad0] sm:$0xf0]  ;;  %v14361_v45 = vld [vmem:[%s18128_s9 + $0xbc4] sm:$0xf]  ;;  %v11149_v50 = vor.u32 %v14297_v38, %v11146_v42 }
 0x159   : > { %4819 = vmatpush.bf16.msrb.mxu0 %v10413_v9  ;;  %4832 = vmatpush.bf16.msrb.mxu1 %v10541_v15  ;;  %v11402_v46 = vld [vmem:[%s18128_s9 + $0xbd0] sm:$0xf0]  ;;  %v11277_v51 = vor.u32 %v14329_v43, %v11274_v44  ;;  %v14261_v52 = vld [vmem:[%s18128_s9 + $0x8a4] sm:$0xf] }
 0x15a   : > { %v11002_v53 = vld [vmem:[%s18128_s9 + $0x8b0] sm:$0xf0]  ;;  %v14293_v55 = vld [vmem:[%s18128_s9 + $0x9a4] sm:$0xf]  ;;  %v11405_v56 = vor.u32 %v14361_v45, %v11402_v46 }
 0x15b   : > { %v11130_v57 = vld [vmem:[%s18128_s9 + $0x9b0] sm:$0xf0]  ;;  %v14325_v58 = vld [vmem:[%s18128_s9 + $0xaa4] sm:$0xf]  ;;  %v11005_v62 = vor.u32 %v14261_v52, %v11002_v53  ;;  %v4613_v12 = vpop.f32.mrf.mxu0 }
 0x15c   : > { %4845 = vmatpush.bf16.msrb.mxu2 %v10669_v20  ;;  %4858 = vmatpush.bf16.msrb.mxu3 %v10797_v28  ;;  %v11258_v59 = vld [vmem:[%s18128_s9 + $0xab0] sm:$0xf0]  ;;  %v14357_v60 = vld [vmem:[%s18128_s9 + $0xba4] sm:$0xf]  ;;  %v11133_v63 = vor.u32 %v14293_v55, %v11130_v57  ;;  %v4614_v27 = vadd.f32 %v4613_v12, %v16155_v13  ;;  %v4626_v28 = vpop.f32.mrf.mxu1 }
 0x15d   : > { %4864 = vmatpush.bf16.msra.mxu0 %v11037_v32  ;;  %4877 = vmatpush.bf16.msra.mxu1 %v11165_v33  ;;  %v11386_v61 = vld [vmem:[%s18128_s9 + $0xbb0] sm:$0xf0]  ;;  %v11261_v0 = vor.u32 %v14325_v58, %v11258_v59  ;;  %v14257_v1 = vld [vmem:[%s18128_s9 + $0x884] sm:$0xf] }
 0x15e   : > { %4820 = vmatmul.bf16.vlgmr.msrb.gmra.mxu0 %v15859_v4  ;;  %4833 = vmatmul.bf16.vlgmr.msrb.gmra.mxu1 %v15863_v41  ;;  %v10986_v2 = vld [vmem:[%s18128_s9 + $0x890] sm:$0xf0]  ;;  %v14289_v3 = vld [vmem:[%s18128_s9 + $0x984] sm:$0xf]  ;;  %v11389_v5 = vor.u32 %v14357_v60, %v11386_v61 }
 0x15f   : > { %4846 = vmatmul.bf16.vlgmr.msrb.gmra.mxu2 %v15855_v36  ;;  %4859 = vmatmul.bf16.vlgmr.msrb.gmra.mxu3 %v15861_v39  ;;  %v11114_v6 = vld [vmem:[%s18128_s9 + $0x990] sm:$0xf0]  ;;  %v14321_v7 = vld [vmem:[%s18128_s9 + $0xa84] sm:$0xf]  ;;  %v10989_v11 = vor.u32 %v14257_v1, %v10986_v2 }
 0x160   : > { %4890 = vmatpush.bf16.msra.mxu2 %v11293_v34  ;;  %4903 = vmatpush.bf16.msra.mxu3 %v11421_v40  ;;  %v11242_v8 = vld [vmem:[%s18128_s9 + $0xa90] sm:$0xf0]  ;;  %v14353_v9 = vld [vmem:[%s18128_s9 + $0xb84] sm:$0xf]  ;;  %v11117_v14 = vor.u32 %v14289_v3, %v11114_v6  ;;  %v4627_v40 = vadd.f32 %v4626_v28, %v4614_v27 }
 0x161   : > { %4865 = vmatpush.bf16.msra.mxu0 %v11021_v48  ;;  %4878 = vmatpush.bf16.msra.mxu1 %v11149_v50  ;;  %v11370_v10 = vld [vmem:[%s18128_s9 + $0xb90] sm:$0xf0]  ;;  %v11245_v15 = vor.u32 %v14321_v7, %v11242_v8  ;;  %v14253_v20 = vld [vmem:[%s18128_s9 + $0x864] sm:$0xf] }
 0x162   : > { %v10970_v22 = vld [vmem:[%s18128_s9 + $0x870] sm:$0xf0]  ;;  %v14285_v23 = vld [vmem:[%s18128_s9 + $0x964] sm:$0xf]  ;;  %v11373_v32 = vor.u32 %v14353_v9, %v11370_v10  ;;  %v4639_v47 = vpop.f32.mrf.mxu2  ;;  %v4652_v53 = vpop.f32.mrf.mxu3 }
 0x163   : > { %v11098_v33 = vld [vmem:[%s18128_s9 + $0x970] sm:$0xf0]  ;;  %v14317_v34 = vld [vmem:[%s18128_s9 + $0xa64] sm:$0xf]  ;;  %v10973_v42 = vor.u32 %v14253_v20, %v10970_v22  ;;  %v4640_v52 = vadd.f32 %v4639_v47, %v4627_v40  ;;  %v4615_v59 = vpop.f32.mrf.mxu0 }
 0x164   : > { %4891 = vmatpush.bf16.msra.mxu2 %v11277_v51  ;;  %4904 = vmatpush.bf16.msra.mxu3 %v11405_v56  ;;  %v11226_v35 = vld [vmem:[%s18128_s9 + $0xa70] sm:$0xf0]  ;;  %v14349_v37 = vld [vmem:[%s18128_s9 + $0xb64] sm:$0xf]  ;;  %v11101_v13 = vor.u32 %v14285_v23, %v11098_v33  ;;  %v4628_v1 = vpop.f32.mrf.mxu1 }
 0x165   : > { %4866 = vmatpush.bf16.msra.mxu0 %v11005_v62  ;;  %4879 = vmatpush.bf16.msra.mxu1 %v11133_v63  ;;  %v11354_v38 = vld [vmem:[%s18128_s9 + $0xb70] sm:$0xf0]  ;;  %v11229_v43 = vor.u32 %v14317_v34, %v11226_v35  ;;  %v14249_v44 = vld [vmem:[%s18128_s9 + $0x844] sm:$0xf]  ;;  %v16204_v58 = vadd.f32 %v4652_v53, %v4640_v52 }
 0x166   : > { %v10954_v45 = vld [vmem:[%s18128_s9 + $0x850] sm:$0xf0]  ;;  %v14281_v46 = vld [vmem:[%s18128_s9 + $0x944] sm:$0xf]  ;;  %v11357_v48 = vor.u32 %v14349_v37, %v11354_v38 }
 0x167   : > { %v11082_v49 = vld [vmem:[%s18128_s9 + $0x950] sm:$0xf0]  ;;  %v14313_v50 = vld [vmem:[%s18128_s9 + $0xa44] sm:$0xf]  ;;  %v10957_v57 = vor.u32 %v14249_v44, %v10954_v45 }
 0x168   : > { %4892 = vmatpush.bf16.msra.mxu2 %v11261_v0  ;;  %4905 = vmatpush.bf16.msra.mxu3 %v11389_v5  ;;  %v11210_v51 = vld [vmem:[%s18128_s9 + $0xa50] sm:$0xf0]  ;;  %v14345_v55 = vld [vmem:[%s18128_s9 + $0xb44] sm:$0xf]  ;;  %v11085_v60 = vor.u32 %v14281_v46, %v11082_v49 }
 0x169   : > { %4867 = vmatpush.bf16.msra.mxu0 %v10989_v11  ;;  %4880 = vmatpush.bf16.msra.mxu1 %v11117_v14  ;;  %v11338_v56 = vld [vmem:[%s18128_s9 + $0xb50] sm:$0xf0]  ;;  %v11213_v61 = vor.u32 %v14313_v50, %v11210_v51  ;;  %v14245_v62 = vld [vmem:[%s18128_s9 + $0x824] sm:$0xf] }
 0x16a   : > { %v10938_v63 = vld [vmem:[%s18128_s9 + $0x830] sm:$0xf0]  ;;  %v14277_v0 = vld [vmem:[%s18128_s9 + $0x924] sm:$0xf]  ;;  %v11341_v2 = vor.u32 %v14345_v55, %v11338_v56  ;;  %v4641_v23 = vpop.f32.mrf.mxu2  ;;  %v4654_v34 = vpop.f32.mrf.mxu3 }
 0x16b   : > { %v11066_v3 = vld [vmem:[%s18128_s9 + $0x930] sm:$0xf0]  ;;  %v14309_v5 = vld [vmem:[%s18128_s9 + $0xa24] sm:$0xf]  ;;  %v10941_v9 = vor.u32 %v14245_v62, %v10938_v63 }
 0x16c   : > { %4893 = vmatpush.bf16.msra.mxu2 %v11245_v15  ;;  %4906 = vmatpush.bf16.msra.mxu3 %v11373_v32  ;;  %v11194_v6 = vld [vmem:[%s18128_s9 + $0xa30] sm:$0xf0]  ;;  %v14341_v7 = vld [vmem:[%s18128_s9 + $0xb24] sm:$0xf]  ;;  %v11069_v12 = vor.u32 %v14277_v0, %v11066_v3 }
 0x16d   : > { %4868 = vmatpush.bf16.msra.mxu0 %v10973_v42  ;;  %4881 = vmatpush.bf16.msra.mxu1 %v11101_v13  ;;  %v11322_v8 = vld [vmem:[%s18128_s9 + $0xb30] sm:$0xf0]  ;;  %v14241_v10 = vld [vmem:[%s18128_s9 + $0x804] sm:$0xf]  ;;  %v11197_v14 = vor.u32 %v14309_v5, %v11194_v6 }
 0x16e   : > { %v10922_v11 = vld [vmem:[%s18128_s9 + $0x810] sm:$0xf0]  ;;  %v14273_v15 = vld [vmem:[%s18128_s9 + $0x904] sm:$0xf]  ;;  %v11325_v27 = vor.u32 %v14341_v7, %v11322_v8 }
 0x16f   : > { %v11050_v20 = vld [vmem:[%s18128_s9 + $0x910] sm:$0xf0]  ;;  %v14305_v22 = vld [vmem:[%s18128_s9 + $0xa04] sm:$0xf]  ;;  %v10925_v40 = vor.u32 %v14241_v10, %v10922_v11 }
 0x170   : > { %4894 = vmatpush.bf16.msra.mxu2 %v11229_v43  ;;  %4907 = vmatpush.bf16.msra.mxu3 %v11357_v48  ;;  %v11178_v28 = vld [vmem:[%s18128_s9 + $0xa10] sm:$0xf0]  ;;  %v14337_v32 = vld [vmem:[%s18128_s9 + $0xb04] sm:$0xf]  ;;  %v11053_v44 = vor.u32 %v14273_v15, %v11050_v20 }
 0x171   : > { %4869 = vmatpush.bf16.msra.mxu0 %v10957_v57  ;;  %4882 = vmatpush.bf16.msra.mxu1 %v11085_v60  ;;  %v11306_v33 = vld [vmem:[%s18128_s9 + $0xb10] sm:$0xf0]  ;;  %v14397_v35 = vld [vmem:[%s18128_s9 + $0xce4] sm:$0xf]  ;;  %v11181_v45 = vor.u32 %v14305_v22, %v11178_v28 }
 0x172   : > { %v11546_v37 = vld [vmem:[%s18128_s9 + $0xcf0] sm:$0xf0]  ;;  %v14429_v38 = vld [vmem:[%s18128_s9 + $0xde4] sm:$0xf]  ;;  %v11309_v48 = vor.u32 %v14337_v32, %v11306_v33 }
 0x173   : > { %v11674_v42 = vld [vmem:[%s18128_s9 + $0xdf0] sm:$0xf0]  ;;  %v14461_v13 = vld [vmem:[%s18128_s9 + $0xee4] sm:$0xf]  ;;  %v11549_v49 = vor.u32 %v14397_v35, %v11546_v37 }
 0x174   : > { %4895 = vmatpush.bf16.msra.mxu2 %v11213_v61  ;;  %4908 = vmatpush.bf16.msra.mxu3 %v11341_v2  ;;  %v11802_v43 = vld [vmem:[%s18128_s9 + $0xef0] sm:$0xf0]  ;;  %v14493_v46 = vld [vmem:[%s18128_s9 + $0xfe4] sm:$0xf]  ;;  %v11677_v50 = vor.u32 %v14429_v38, %v11674_v42 }
 0x175   : > { %4870 = vmatpush.bf16.msra.mxu0 %v10941_v9  ;;  %4883 = vmatpush.bf16.msra.mxu1 %v11069_v12  ;;  %v11930_v47 = vld [vmem:[%s18128_s9 + $0xff0] sm:$0xf0]  ;;  %v11805_v51 = vor.u32 %v14461_v13, %v11802_v43  ;;  %v14393_v52 = vld [vmem:[%s18128_s9 + $0xcc4] sm:$0xf] }
 0x176   : > { %v11530_v53 = vld [vmem:[%s18128_s9 + $0xcd0] sm:$0xf0]  ;;  %v14425_v55 = vld [vmem:[%s18128_s9 + $0xdc4] sm:$0xf]  ;;  %v11933_v56 = vor.u32 %v14493_v46, %v11930_v47 }
 0x177   : > { %v11658_v57 = vld [vmem:[%s18128_s9 + $0xdd0] sm:$0xf0]  ;;  %v14457_v59 = vld [vmem:[%s18128_s9 + $0xec4] sm:$0xf]  ;;  %v11533_v63 = vor.u32 %v14393_v52, %v11530_v53 }
 0x178   : > { %4896 = vmatpush.bf16.msra.mxu2 %v11197_v14  ;;  %4909 = vmatpush.bf16.msra.mxu3 %v11325_v27  ;;  %v11786_v60 = vld [vmem:[%s18128_s9 + $0xed0] sm:$0xf0]  ;;  %v14489_v61 = vld [vmem:[%s18128_s9 + $0xfc4] sm:$0xf]  ;;  %v11661_v0 = vor.u32 %v14425_v55, %v11658_v57 }
 0x179   : > { %4871 = vmatpush.bf16.msra.mxu0 %v10925_v40  ;;  %4884 = vmatpush.bf16.msra.mxu1 %v11053_v44  ;;  %v11914_v62 = vld [vmem:[%s18128_s9 + $0xfd0] sm:$0xf0]  ;;  %v11789_v1 = vor.u32 %v14457_v59, %v11786_v60  ;;  %v14389_v2 = vld [vmem:[%s18128_s9 + $0xca4] sm:$0xf] }
 0x17a   : > { %v11514_v3 = vld [vmem:[%s18128_s9 + $0xcb0] sm:$0xf0]  ;;  %v14421_v5 = vld [vmem:[%s18128_s9 + $0xda4] sm:$0xf]  ;;  %v11917_v6 = vor.u32 %v14489_v61, %v11914_v62 }
 0x17b   : > { %v11642_v7 = vld [vmem:[%s18128_s9 + $0xdb0] sm:$0xf0]  ;;  %v14453_v8 = vld [vmem:[%s18128_s9 + $0xea4] sm:$0xf]  ;;  %v11517_v12 = vor.u32 %v14389_v2, %v11514_v3  ;;  %v4665_v34 = vpop.f32.mrf.mxu0  ;;  %v4678_v42 = vpop.f32.mrf.mxu1 }
 0x17c   : > { %4897 = vmatpush.bf16.msra.mxu2 %v11181_v45  ;;  %4910 = vmatpush.bf16.msra.mxu3 %v11309_v48  ;;  %v11770_v9 = vld [vmem:[%s18128_s9 + $0xeb0] sm:$0xf0]  ;;  %v14485_v10 = vld [vmem:[%s18128_s9 + $0xfa4] sm:$0xf]  ;;  %v11645_v14 = vor.u32 %v14421_v5, %v11642_v7  ;;  %v4666_v38 = vadd.f32 %v4665_v34, %v16204_v58 }
 0x17d   : > { %4916 = vmatpush.bf16.msrb.mxu0 %v11549_v49  ;;  %4929 = vmatpush.bf16.msrb.mxu1 %v11677_v50  ;;  %v11898_v11 = vld [vmem:[%s18128_s9 + $0xfb0] sm:$0xf0]  ;;  %v11773_v15 = vor.u32 %v14453_v8, %v11770_v9  ;;  %v14385_v20 = vld [vmem:[%s18128_s9 + $0xc84] sm:$0xf] }
 0x17e   : > { %4872 = vmatmul.bf16.vlgmr.msra.gmra.mxu0 %v15935_v21  ;;  %4885 = vmatmul.bf16.vlgmr.msra.gmra.mxu1 %v15942_v26  ;;  %v11498_v22 = vld [vmem:[%s18128_s9 + $0xc90] sm:$0xf0]  ;;  %v14417_v23 = vld [vmem:[%s18128_s9 + $0xd84] sm:$0xf]  ;;  %v11901_v27 = vor.u32 %v14485_v10, %v11898_v11  ;;  %v4679_v48 = vadd.f32 %v4678_v42, %v4666_v38 }
 0x17f   : > { %4898 = vmatmul.bf16.vlgmr.msra.gmra.mxu2 %v15940_v25  ;;  %4911 = vmatmul.bf16.vlgmr.msra.gmra.mxu3 %v15946_v29  ;;  %v11626_v28 = vld [vmem:[%s18128_s9 + $0xd90] sm:$0xf0]  ;;  %v14449_v32 = vld [vmem:[%s18128_s9 + $0xe84] sm:$0xf]  ;;  %v11501_v40 = vor.u32 %v14385_v20, %v11498_v22 }
 0x180   : > { %4942 = vmatpush.bf16.msrb.mxu2 %v11805_v51  ;;  %4955 = vmatpush.bf16.msrb.mxu3 %v11933_v56  ;;  %v11754_v33 = vld [vmem:[%s18128_s9 + $0xe90] sm:$0xf0]  ;;  %v14481_v35 = vld [vmem:[%s18128_s9 + $0xf84] sm:$0xf]  ;;  %v11629_v13 = vor.u32 %v14417_v23, %v11626_v28 }
 0x181   : > { %4917 = vmatpush.bf16.msrb.mxu0 %v11533_v63  ;;  %4930 = vmatpush.bf16.msrb.mxu1 %v11661_v0  ;;  %v11882_v37 = vld [vmem:[%s18128_s9 + $0xf90] sm:$0xf0]  ;;  %v11757_v43 = vor.u32 %v14449_v32, %v11754_v33  ;;  %v14381_v44 = vld [vmem:[%s18128_s9 + $0xc64] sm:$0xf] }
 0x182   : > { %v11482_v45 = vld [vmem:[%s18128_s9 + $0xc70] sm:$0xf0]  ;;  %v14413_v46 = vld [vmem:[%s18128_s9 + $0xd64] sm:$0xf]  ;;  %v11885_v47 = vor.u32 %v14481_v35, %v11882_v37  ;;  %v4691_v62 = vpop.f32.mrf.mxu2  ;;  %v4704_v3 = vpop.f32.mrf.mxu3 }
 0x183   : > { %v11610_v49 = vld [vmem:[%s18128_s9 + $0xd70] sm:$0xf0]  ;;  %v14445_v50 = vld [vmem:[%s18128_s9 + $0xe64] sm:$0xf]  ;;  %v11485_v53 = vor.u32 %v14381_v44, %v11482_v45  ;;  %v4692_v2 = vadd.f32 %v4691_v62, %v4679_v48  ;;  %v4667_v7 = vpop.f32.mrf.mxu0  ;;  %v4680_v9 = vpop.f32.mrf.mxu1 }
 0x184   : > { %4943 = vmatpush.bf16.msrb.mxu2 %v11789_v1  ;;  %4956 = vmatpush.bf16.msrb.mxu3 %v11917_v6  ;;  %v11738_v58 = vld [vmem:[%s18128_s9 + $0xe70] sm:$0xf0]  ;;  %v14477_v51 = vld [vmem:[%s18128_s9 + $0xf64] sm:$0xf]  ;;  %v11613_v55 = vor.u32 %v14413_v46, %v11610_v49  ;;  %v10016_v49 = vld [vmem:[%s18128_s9 + $0xe8] sm:$0xf] }
 0x185   : > { %4918 = vmatpush.bf16.msrb.mxu0 %v11517_v12  ;;  %4931 = vmatpush.bf16.msrb.mxu1 %v11645_v14  ;;  %v11866_v52 = vld [vmem:[%s18128_s9 + $0xf70] sm:$0xf0]  ;;  %v11741_v56 = vor.u32 %v14445_v50, %v11738_v58  ;;  %v14377_v57 = vld [vmem:[%s18128_s9 + $0xc44] sm:$0xf]  ;;  %v16275_v10 = vadd.f32 %v4704_v3, %v4692_v2  ;;  %v14016_v50 = vld [vmem:[%s18128_s9 + $0xf4] sm:$0xf0] }
 0x186   : > { %v11466_v59 = vld [vmem:[%s18128_s9 + $0xc50] sm:$0xf0]  ;;  %v14409_v60 = vld [vmem:[%s18128_s9 + $0xd44] sm:$0xf]  ;;  %v11869_v61 = vor.u32 %v14477_v51, %v11866_v52  ;;  %v10144_v58 = vld [vmem:[%s18128_s9 + $0x1e8] sm:$0xf] }
 0x187   : > { %v11594_v63 = vld [vmem:[%s18128_s9 + $0xd50] sm:$0xf0]  ;;  %v14441_v0 = vld [vmem:[%s18128_s9 + $0xe44] sm:$0xf]  ;;  %v11469_v8 = vor.u32 %v14377_v57, %v11466_v59  ;;  %v10000_v2 = vld [vmem:[%s18128_s9 + $0xc8] sm:$0xf] }
 0x188   : > { %4944 = vmatpush.bf16.msrb.mxu2 %v11773_v15  ;;  %4957 = vmatpush.bf16.msrb.mxu3 %v11901_v27  ;;  %v11722_v1 = vld [vmem:[%s18128_s9 + $0xe50] sm:$0xf0]  ;;  %v14473_v5 = vld [vmem:[%s18128_s9 + $0xf44] sm:$0xf]  ;;  %v11597_v11 = vor.u32 %v14409_v60, %v11594_v63  ;;  %v10400_v60 = vld [vmem:[%s18128_s9 + $0x3e8] sm:$0xf]  ;;  %v10017_v63 = vor.u32 %v14016_v50, %v10016_v49 }
 0x189   : > { %4919 = vmatpush.bf16.msrb.mxu0 %v11501_v40  ;;  %4932 = vmatpush.bf16.msrb.mxu1 %v11629_v13  ;;  %v11850_v6 = vld [vmem:[%s18128_s9 + $0xf50] sm:$0xf0]  ;;  %v11725_v12 = vor.u32 %v14441_v0, %v11722_v1  ;;  %v14373_v14 = vld [vmem:[%s18128_s9 + $0xc24] sm:$0xf]  ;;  %v14012_v3 = vld [vmem:[%s18128_s9 + $0xd4] sm:$0xf0] }
 0x18a   : > { %v11450_v15 = vld [vmem:[%s18128_s9 + $0xc30] sm:$0xf0]  ;;  %v14405_v20 = vld [vmem:[%s18128_s9 + $0xd24] sm:$0xf]  ;;  %v11853_v22 = vor.u32 %v14473_v5, %v11850_v6  ;;  %v4693_v48 = vpop.f32.mrf.mxu2  ;;  %v4706_v51 = vpop.f32.mrf.mxu3  ;;  %v10128_v5 = vld [vmem:[%s18128_s9 + $0x1c8] sm:$0xf] }
 0x18b   : > { %v11578_v23 = vld [vmem:[%s18128_s9 + $0xd30] sm:$0xf0]  ;;  %v14437_v27 = vld [vmem:[%s18128_s9 + $0xe24] sm:$0xf]  ;;  %v11453_v34 = vor.u32 %v14373_v14, %v11450_v15  ;;  %v14044_v7 = vld [vmem:[%s18128_s9 + $0x1d4] sm:$0xf0]  ;;  %v10001_v14 = vor.u32 %v14012_v3, %v10000_v2 }
 0x18c   : > { %4945 = vmatpush.bf16.msrb.mxu2 %v11757_v43  ;;  %4958 = vmatpush.bf16.msrb.mxu3 %v11885_v47  ;;  %v11706_v28 = vld [vmem:[%s18128_s9 + $0xe30] sm:$0xf0]  ;;  %v14469_v32 = vld [vmem:[%s18128_s9 + $0xf24] sm:$0xf]  ;;  %v11581_v38 = vor.u32 %v14405_v20, %v11578_v23  ;;  %v14076_v9 = vld [vmem:[%s18128_s9 + $0x2d4] sm:$0xf0]  ;;  %v10129_v15 = vor.u32 %v14044_v7, %v10128_v5 }
 0x18d   : > { %4920 = vmatpush.bf16.msrb.mxu0 %v11485_v53  ;;  %4933 = vmatpush.bf16.msrb.mxu1 %v11613_v55  ;;  %v11834_v33 = vld [vmem:[%s18128_s9 + $0xf30] sm:$0xf0]  ;;  %v14369_v35 = vld [vmem:[%s18128_s9 + $0xc04] sm:$0xf]  ;;  %v11709_v40 = vor.u32 %v14437_v27, %v11706_v28  ;;  %v14048_v53 = vld [vmem:[%s18128_s9 + $0x1f4] sm:$0xf0] }
 0x18e   : > { %v11434_v37 = vld [vmem:[%s18128_s9 + $0xc10] sm:$0xf0]  ;;  %v14401_v42 = vld [vmem:[%s18128_s9 + $0xd04] sm:$0xf]  ;;  %v11837_v44 = vor.u32 %v14469_v32, %v11834_v33  ;;  %v10272_v55 = vld [vmem:[%s18128_s9 + $0x2e8] sm:$0xf]  ;;  %v10145_v0 = vor.u32 %v14048_v53, %v10144_v58 }
 0x18f   : > { %v11562_v13 = vld [vmem:[%s18128_s9 + $0xd10] sm:$0xf0]  ;;  %v14433_v43 = vld [vmem:[%s18128_s9 + $0xe04] sm:$0xf]  ;;  %v11437_v52 = vor.u32 %v14369_v35, %v11434_v37  ;;  %v14008_v23 = vld [vmem:[%s18128_s9 + $0xb4] sm:$0xf0] }
 0x190   : > { %4946 = vmatpush.bf16.msrb.mxu2 %v11741_v56  ;;  %4959 = vmatpush.bf16.msrb.mxu3 %v11869_v61  ;;  %v11690_v45 = vld [vmem:[%s18128_s9 + $0xe10] sm:$0xf0]  ;;  %v14465_v46 = vld [vmem:[%s18128_s9 + $0xf04] sm:$0xf]  ;;  %v14080_v56 = vld [vmem:[%s18128_s9 + $0x2f4] sm:$0xf0]  ;;  %v11565_v57 = vor.u32 %v14401_v42, %v11562_v13 }
 0x191   : > { %4921 = vmatpush.bf16.msrb.mxu0 %v11469_v8  ;;  %4934 = vmatpush.bf16.msrb.mxu1 %v11597_v11  ;;  %v11818_v47 = vld [vmem:[%s18128_s9 + $0xf10] sm:$0xf0]  ;;  %v11693_v59 = vor.u32 %v14433_v43, %v11690_v45  ;;  %v14112_v61 = vld [vmem:[%s18128_s9 + $0x3f4] sm:$0xf0]  ;;  %v10273_v1 = vor.u32 %v14080_v56, %v10272_v55  ;;  %v10256_v8 = vld [vmem:[%s18128_s9 + $0x2c8] sm:$0xf] }
 0x192   : > { %v11821_v62 = vor.u32 %v14465_v46, %v11818_v47  ;;  %v10401_v6 = vor.u32 %v14112_v61, %v10400_v60  ;;  %v10384_v11 = vld [vmem:[%s18128_s9 + $0x3c8] sm:$0xf]  ;;  %v10257_v20 = vor.u32 %v14076_v9, %v10256_v8  ;;  %v14040_v32 = vld [vmem:[%s18128_s9 + $0x1b4] sm:$0xf0] }
 0x193   : > { %v10112_v27 = vld [vmem:[%s18128_s9 + $0x1a8] sm:$0xf]  ;;  %v14104_v37 = vld [vmem:[%s18128_s9 + $0x3b4] sm:$0xf0] }
 0x194   : > { %4947 = vmatpush.bf16.msrb.mxu2 %v11725_v12  ;;  %4960 = vmatpush.bf16.msrb.mxu3 %v11853_v22  ;;  %v14108_v12 = vld [vmem:[%s18128_s9 + $0x3d4] sm:$0xf0]  ;;  %v9984_v22 = vld [vmem:[%s18128_s9 + $0xa8] sm:$0xf] }
 0x195   : > { %4922 = vmatpush.bf16.msrb.mxu0 %v11453_v34  ;;  %4935 = vmatpush.bf16.msrb.mxu1 %v11581_v38  ;;  %v10385_v28 = vor.u32 %v14108_v12, %v10384_v11  ;;  %v10240_v33 = vld [vmem:[%s18128_s9 + $0x2a8] sm:$0xf]  ;;  %v14072_v34 = vld [vmem:[%s18128_s9 + $0x2b4] sm:$0xf0]  ;;  %v9985_v38 = vor.u32 %v14008_v23, %v9984_v22 }
 0x196   : > { %v10368_v35 = vld [vmem:[%s18128_s9 + $0x3a8] sm:$0xf]  ;;  %v10241_v42 = vor.u32 %v14072_v34, %v10240_v33  ;;  %v14004_v43 = vld [vmem:[%s18128_s9 + $0x94] sm:$0xf0] }
 0x197   : > { %v9968_v13 = vld [vmem:[%s18128_s9 + $0x88] sm:$0xf]  ;;  %v10369_v45 = vor.u32 %v14104_v37, %v10368_v35  ;;  %v14036_v46 = vld [vmem:[%s18128_s9 + $0x194] sm:$0xf0] }
 0x198   : > { %4948 = vmatpush.bf16.msrb.mxu2 %v11709_v40  ;;  %4961 = vmatpush.bf16.msrb.mxu3 %v11837_v44  ;;  %v10113_v40 = vor.u32 %v14040_v32, %v10112_v27  ;;  %v10096_v44 = vld [vmem:[%s18128_s9 + $0x188] sm:$0xf]  ;;  %v14068_v48 = vld [vmem:[%s18128_s9 + $0x294] sm:$0xf0] }
 0x199   : > { %4923 = vmatpush.bf16.msrb.mxu0 %v11437_v52  ;;  %4936 = vmatpush.bf16.msrb.mxu1 %v11565_v57  ;;  %v10224_v47 = vld [vmem:[%s18128_s9 + $0x288] sm:$0xf]  ;;  %v14100_v58 = vld [vmem:[%s18128_s9 + $0x394] sm:$0xf0]  ;;  %v9969_v52 = vor.u32 %v14004_v43, %v9968_v13  ;;  %v10097_v55 = vor.u32 %v14036_v46, %v10096_v44 }
 0x19a   : > { %v10352_v50 = vld [vmem:[%s18128_s9 + $0x388] sm:$0xf]  ;;  %v10225_v56 = vor.u32 %v14068_v48, %v10224_v47  ;;  %v14096_v2 = vld [vmem:[%s18128_s9 + $0x374] sm:$0xf0] }
 0x19b   : > { %v4717_v49 = vpop.f32.mrf.mxu0  ;;  %v4730_v53 = vpop.f32.mrf.mxu1  ;;  %v9952_v57 = vld [vmem:[%s18128_s9 + $0x68] sm:$0xf]  ;;  %v10353_v61 = vor.u32 %v14100_v58, %v10352_v50  ;;  %v13996_v8 = vld [vmem:[%s18128_s9 + $0x54] sm:$0xf0] }
 0x19c   : > { %4949 = vmatpush.bf16.msrb.mxu2 %v11693_v59  ;;  %4962 = vmatpush.bf16.msrb.mxu3 %v11821_v62  ;;  %v4718_v51 = vadd.f32 %v4717_v49, %v16275_v10  ;;  %v14000_v59 = vld [vmem:[%s18128_s9 + $0x74] sm:$0xf0]  ;;  %v10080_v60 = vld [vmem:[%s18128_s9 + $0x168] sm:$0xf] }
 0x19d   : > { %4968 = vmatpush.bf16.msra.mxu0 %v10017_v63  ;;  %4981 = vmatpush.bf16.msra.mxu1 %v10145_v0  ;;  %v14032_v63 = vld [vmem:[%s18128_s9 + $0x174] sm:$0xf0]  ;;  %v10208_v0 = vld [vmem:[%s18128_s9 + $0x268] sm:$0xf]  ;;  %v9953_v3 = vor.u32 %v14000_v59, %v9952_v57 }
 0x19e   : > { %4924 = vmatmul.bf16.vlgmr.msrb.gmra.mxu0 %v16015_v19  ;;  %4937 = vmatmul.bf16.vlgmr.msrb.gmra.mxu1 %v16022_v24  ;;  %v4731_v62 = vadd.f32 %v4730_v53, %v4718_v51  ;;  %v14064_v10 = vld [vmem:[%s18128_s9 + $0x274] sm:$0xf0]  ;;  %v10081_v5 = vor.u32 %v14032_v63, %v10080_v60  ;;  %v9936_v7 = vld [vmem:[%s18128_s9 + $0x48] sm:$0xf] }
 0x19f   : > { %4950 = vmatmul.bf16.vlgmr.msrb.gmra.mxu2 %v16020_v54  ;;  %4963 = vmatmul.bf16.vlgmr.msrb.gmra.mxu3 %v16026_v31  ;;  %v10064_v9 = vld [vmem:[%s18128_s9 + $0x148] sm:$0xf]  ;;  %v9937_v33 = vor.u32 %v13996_v8, %v9936_v7  ;;  %v14024_v44 = vld [vmem:[%s18128_s9 + $0x134] sm:$0xf0] }
 0x1a0   : > { %4994 = vmatpush.bf16.msra.mxu2 %v10273_v1  ;;  %5007 = vmatpush.bf16.msra.mxu3 %v10401_v6  ;;  %v10336_v1 = vld [vmem:[%s18128_s9 + $0x368] sm:$0xf]  ;;  %v10209_v6 = vor.u32 %v14064_v10, %v10208_v0  ;;  %v14056_v46 = vld [vmem:[%s18128_s9 + $0x234] sm:$0xf0] }
 0x1a1   : > { %4969 = vmatpush.bf16.msra.mxu0 %v10001_v14  ;;  %4982 = vmatpush.bf16.msra.mxu1 %v10129_v15  ;;  %v10337_v11 = vor.u32 %v14096_v2, %v10336_v1  ;;  %v14028_v14 = vld [vmem:[%s18128_s9 + $0x154] sm:$0xf0]  ;;  %v10192_v15 = vld [vmem:[%s18128_s9 + $0x248] sm:$0xf] }
 0x1a2   : > { %v4743_v12 = vpop.f32.mrf.mxu2  ;;  %v4756_v23 = vpop.f32.mrf.mxu3  ;;  %v10320_v27 = vld [vmem:[%s18128_s9 + $0x348] sm:$0xf]  ;;  %v10065_v37 = vor.u32 %v14028_v14, %v10064_v9  ;;  %v14088_v48 = vld [vmem:[%s18128_s9 + $0x334] sm:$0xf0] }
 0x1a3   : > { %v4744_v22 = vadd.f32 %v4743_v12, %v4731_v62  ;;  %v4719_v32 = vpop.f32.mrf.mxu0  ;;  %v4732_v34 = vpop.f32.mrf.mxu1  ;;  %v10048_v13 = vld [vmem:[%s18128_s9 + $0x128] sm:$0xf]  ;;  %v13988_v58 = vld [vmem:[%s18128_s9 + $0x14] sm:$0xf0] }
 0x1a4   : > { %4995 = vmatpush.bf16.msra.mxu2 %v10257_v20  ;;  %5008 = vmatpush.bf16.msra.mxu3 %v10385_v28  ;;  %v14060_v20 = vld [vmem:[%s18128_s9 + $0x254] sm:$0xf0]  ;;  %v10304_v47 = vld [vmem:[%s18128_s9 + $0x328] sm:$0xf]  ;;  %v10049_v51 = vor.u32 %v14024_v44, %v10048_v13 }
 0x1a5   : > { %4970 = vmatpush.bf16.msra.mxu0 %v9985_v38  ;;  %4983 = vmatpush.bf16.msra.mxu1 %v10113_v40  ;;  %v14092_v28 = vld [vmem:[%s18128_s9 + $0x354] sm:$0xf0]  ;;  %v16346_v35 = vadd.f32 %v4756_v23, %v4744_v22  ;;  %v10193_v38 = vor.u32 %v14060_v20, %v10192_v15  ;;  %v9920_v40 = vld [vmem:[%s18128_s9 + $0x28] sm:$0xf]  ;;  %v10305_v57 = vor.u32 %v14088_v48, %v10304_v47 }
 0x1a6   : > { %v10321_v43 = vor.u32 %v14092_v28, %v10320_v27  ;;  %v9904_v50 = vld [vmem:[%s18128_s9 + $0x8] sm:$0xf]  ;;  %v14052_v59 = vld [vmem:[%s18128_s9 + $0x214] sm:$0xf0] }
 0x1a7   : > { %v10032_v53 = vld [vmem:[%s18128_s9 + $0x108] sm:$0xf]  ;;  %v14144_v0 = vld [vmem:[%s18128_s9 + $0x4f4] sm:$0xf0]  ;;  %v9905_v2 = vor.u32 %v13988_v58, %v9904_v50 }
 0x1a8   : > { %4996 = vmatpush.bf16.msra.mxu2 %v10241_v42  ;;  %5009 = vmatpush.bf16.msra.mxu3 %v10369_v45  ;;  %v13992_v42 = vld [vmem:[%s18128_s9 + $0x34] sm:$0xf0]  ;;  %v10176_v45 = vld [vmem:[%s18128_s9 + $0x228] sm:$0xf] }
 0x1a9   : > { %4971 = vmatpush.bf16.msra.mxu0 %v9969_v52  ;;  %4984 = vmatpush.bf16.msra.mxu1 %v10097_v55  ;;  %v9921_v49 = vor.u32 %v13992_v42, %v9920_v40  ;;  %v10177_v52 = vor.u32 %v14056_v46, %v10176_v45  ;;  %v14020_v55 = vld [vmem:[%s18128_s9 + $0x114] sm:$0xf0]  ;;  %v10288_v60 = vld [vmem:[%s18128_s9 + $0x308] sm:$0xf] }
 0x1aa   : > { %v4745_v62 = vpop.f32.mrf.mxu2  ;;  %v10528_v63 = vld [vmem:[%s18128_s9 + $0x4e8] sm:$0xf]  ;;  %v4758_v1 = vpop.f32.mrf.mxu3  ;;  %v10033_v7 = vor.u32 %v14020_v55, %v10032_v53  ;;  %v14140_v23 = vld [vmem:[%s18128_s9 + $0x4d4] sm:$0xf0] }
 0x1ab   : > { %v10656_v10 = vld [vmem:[%s18128_s9 + $0x5e8] sm:$0xf]  ;;  %v10529_v14 = vor.u32 %v14144_v0, %v10528_v63  ;;  %v14172_v32 = vld [vmem:[%s18128_s9 + $0x5d4] sm:$0xf0] }
 0x1ac   : > { %4997 = vmatpush.bf16.msra.mxu2 %v10225_v56  ;;  %5010 = vmatpush.bf16.msra.mxu3 %v10353_v61  ;;  %v10160_v56 = vld [vmem:[%s18128_s9 + $0x208] sm:$0xf]  ;;  %v14084_v61 = vld [vmem:[%s18128_s9 + $0x314] sm:$0xf0] }
 0x1ad   : > { %4972 = vmatpush.bf16.msra.mxu0 %v9953_v3  ;;  %4985 = vmatpush.bf16.msra.mxu1 %v10081_v5  ;;  %v14176_v3 = vld [vmem:[%s18128_s9 + $0x5f4] sm:$0xf0]  ;;  %v10784_v5 = vld [vmem:[%s18128_s9 + $0x6e8] sm:$0xf]  ;;  %v10161_v8 = vor.u32 %v14052_v59, %v10160_v56  ;;  %v10289_v12 = vor.u32 %v14084_v61, %v10288_v60  ;;  %v15119_v59 = vld [vmem:[%s15352_s13] sm:$0xf] }
 0x1ae   : > { %v10912_v9 = vld [vmem:[%s18128_s9 + $0x7e8] sm:$0xf]  ;;  %v10657_v15 = vor.u32 %v14176_v3, %v10656_v10  ;;  %v14204_v34 = vld [vmem:[%s18128_s9 + $0x6d4] sm:$0xf0]  ;;  %v4545_v60 = vperm.slane %v15119_v59, 1 }
 0x1af   : > { %v10512_v22 = vld [vmem:[%s18128_s9 + $0x4c8] sm:$0xf]  ;;  %v14136_v44 = vld [vmem:[%s18128_s9 + $0x4b4] sm:$0xf0] }
 0x1b0   : > { %4998 = vmatpush.bf16.msra.mxu2 %v10209_v6  ;;  %5011 = vmatpush.bf16.msra.mxu3 %v10337_v11  ;;  %v14208_v6 = vld [vmem:[%s18128_s9 + $0x6f4] sm:$0xf0]  ;;  %v10640_v27 = vld [vmem:[%s18128_s9 + $0x5c8] sm:$0xf]  ;;  %v10513_v40 = vor.u32 %v14140_v23, %v10512_v22 }
 0x1b1   : > { %4973 = vmatpush.bf16.msra.mxu0 %v9937_v33  ;;  %4986 = vmatpush.bf16.msra.mxu1 %v10065_v37  ;;  %v14240_v11 = vld [vmem:[%s18128_s9 + $0x7f4] sm:$0xf0]  ;;  %v10785_v20 = vor.u32 %v14208_v6, %v10784_v5  ;;  %v10768_v33 = vld [vmem:[%s18128_s9 + $0x6c8] sm:$0xf]  ;;  %v10641_v42 = vor.u32 %v14172_v32, %v10640_v27 }
 0x1b2   : > { %v10913_v28 = vor.u32 %v14240_v11, %v10912_v9  ;;  %v10896_v37 = vld [vmem:[%s18128_s9 + $0x7c8] sm:$0xf]  ;;  %v10769_v13 = vor.u32 %v14204_v34, %v10768_v33  ;;  %v14168_v47 = vld [vmem:[%s18128_s9 + $0x5b4] sm:$0xf0] }
 0x1b3   : > { %v10624_v45 = vld [vmem:[%s18128_s9 + $0x5a8] sm:$0xf]  ;;  %v14232_v58 = vld [vmem:[%s18128_s9 + $0x7b4] sm:$0xf0] }
 0x1b4   : > { %4999 = vmatpush.bf16.msra.mxu2 %v10193_v38  ;;  %5012 = vmatpush.bf16.msra.mxu3 %v10321_v43  ;;  %v14236_v38 = vld [vmem:[%s18128_s9 + $0x7d4] sm:$0xf0]  ;;  %v10496_v43 = vld [vmem:[%s18128_s9 + $0x4a8] sm:$0xf]  ;;  %v10625_v53 = vor.u32 %v14168_v47, %v10624_v45 }
 0x1b5   : > { %4974 = vmatpush.bf16.msra.mxu0 %v9921_v49  ;;  %4987 = vmatpush.bf16.msra.mxu1 %v10049_v51  ;;  %v10897_v46 = vor.u32 %v14236_v38, %v10896_v37  ;;  %v10752_v48 = vld [vmem:[%s18128_s9 + $0x6a8] sm:$0xf]  ;;  %v14200_v49 = vld [vmem:[%s18128_s9 + $0x6b4] sm:$0xf0]  ;;  %v10497_v51 = vor.u32 %v14136_v44, %v10496_v43 }
 0x1b6   : > { %v10880_v50 = vld [vmem:[%s18128_s9 + $0x7a8] sm:$0xf]  ;;  %v10753_v55 = vor.u32 %v14200_v49, %v10752_v48  ;;  %v14132_v56 = vld [vmem:[%s18128_s9 + $0x494] sm:$0xf0] }
 0x1b7   : > { %v10881_v61 = vor.u32 %v14232_v58, %v10880_v50  ;;  %v14164_v62 = vld [vmem:[%s18128_s9 + $0x594] sm:$0xf0]  ;;  %v10736_v63 = vld [vmem:[%s18128_s9 + $0x688] sm:$0xf] }
 0x1b8   : > { %5000 = vmatpush.bf16.msra.mxu2 %v10177_v52  ;;  %5013 = vmatpush.bf16.msra.mxu3 %v10305_v57  ;;  %v10480_v52 = vld [vmem:[%s18128_s9 + $0x488] sm:$0xf]  ;;  %v14196_v0 = vld [vmem:[%s18128_s9 + $0x694] sm:$0xf0] }
 0x1b9   : > { %4975 = vmatpush.bf16.msra.mxu0 %v9905_v2  ;;  %4988 = vmatpush.bf16.msra.mxu1 %v10033_v7  ;;  %v10608_v57 = vld [vmem:[%s18128_s9 + $0x588] sm:$0xf]  ;;  %v14228_v1 = vld [vmem:[%s18128_s9 + $0x794] sm:$0xf0]  ;;  %v10481_v2 = vor.u32 %v14132_v56, %v10480_v52  ;;  %v10737_v6 = vor.u32 %v14196_v0, %v10736_v63 }
 0x1ba   : > { %v10864_v10 = vld [vmem:[%s18128_s9 + $0x788] sm:$0xf]  ;;  %v10609_v5 = vor.u32 %v14164_v62, %v10608_v57  ;;  %v14192_v22 = vld [vmem:[%s18128_s9 + $0x674] sm:$0xf0] }
 0x1bb   : > { %v4769_v3 = vpop.f32.mrf.mxu0  ;;  %v10464_v7 = vld [vmem:[%s18128_s9 + $0x468] sm:$0xf]  ;;  %v14224_v27 = vld [vmem:[%s18128_s9 + $0x774] sm:$0xf0] }
 0x1bc   : > { %5001 = vmatpush.bf16.msra.mxu2 %v10161_v8  ;;  %5014 = vmatpush.bf16.msra.mxu3 %v10289_v12  ;;  %v14128_v8 = vld [vmem:[%s18128_s9 + $0x474] sm:$0xf0]  ;;  %v10592_v9 = vld [vmem:[%s18128_s9 + $0x568] sm:$0xf]  ;;  %v4770_v11 = vadd.f32 %v4769_v3, %v4545_v60  ;;  %v4782_v12 = vpop.f32.mrf.mxu1 }
 0x1bd   : > { %5020 = vmatpush.bf16.msrb.mxu0 %v10529_v14  ;;  %5033 = vmatpush.bf16.msrb.mxu1 %v10657_v15  ;;  %v10865_v14 = vor.u32 %v14228_v1, %v10864_v10  ;;  %v14160_v15 = vld [vmem:[%s18128_s9 + $0x574] sm:$0xf0]  ;;  %v10848_v23 = vld [vmem:[%s18128_s9 + $0x768] sm:$0xf]  ;;  %v10465_v32 = vor.u32 %v14128_v8, %v10464_v7 }
 0x1be   : > { %4976 = vmatmul.bf16.vlgmr.msra.gmra.mxu0 %v15794_v17  ;;  %4989 = vmatmul.bf16.vlgmr.msra.gmra.mxu1 %v15806_v30  ;;  %v10593_v33 = vor.u32 %v14160_v15, %v10592_v9  ;;  %v10448_v37 = vld [vmem:[%s18128_s9 + $0x448] sm:$0xf]  ;;  %v14124_v38 = vld [vmem:[%s18128_s9 + $0x454] sm:$0xf0] }
 0x1bf   : > { %5002 = vmatmul.bf16.vlgmr.msra.gmra.mxu2 %v15792_v16  ;;  %5015 = vmatmul.bf16.vlgmr.msra.gmra.mxu3 %v15796_v18  ;;  %v14156_v43 = vld [vmem:[%s18128_s9 + $0x554] sm:$0xf0]  ;;  %v10704_v44 = vld [vmem:[%s18128_s9 + $0x648] sm:$0xf]  ;;  %v10449_v50 = vor.u32 %v14124_v38, %v10448_v37 }
 0x1c0   : > { %5046 = vmatpush.bf16.msrb.mxu2 %v10785_v20  ;;  %5059 = vmatpush.bf16.msrb.mxu3 %v10913_v28  ;;  %v10720_v20 = vld [vmem:[%s18128_s9 + $0x668] sm:$0xf]  ;;  %v4783_v28 = vadd.f32 %v4782_v12, %v4770_v11  ;;  %v14188_v45 = vld [vmem:[%s18128_s9 + $0x654] sm:$0xf0] }
 0x1c1   : > { %5021 = vmatpush.bf16.msrb.mxu0 %v10513_v40  ;;  %5034 = vmatpush.bf16.msrb.mxu1 %v10641_v42  ;;  %v10721_v34 = vor.u32 %v14192_v22, %v10720_v20  ;;  %v10576_v40 = vld [vmem:[%s18128_s9 + $0x548] sm:$0xf]  ;;  %v14220_v49 = vld [vmem:[%s18128_s9 + $0x754] sm:$0xf0] }
 0x1c2   : > { %v4795_v42 = vpop.f32.mrf.mxu2  ;;  %v4808_v47 = vpop.f32.mrf.mxu3  ;;  %v10832_v48 = vld [vmem:[%s18128_s9 + $0x748] sm:$0xf]  ;;  %v10577_v52 = vor.u32 %v14156_v43, %v10576_v40  ;;  %v14120_v56 = vld [vmem:[%s18128_s9 + $0x434] sm:$0xf0] }
 0x1c3   : > { %v10560_v57 = vld [vmem:[%s18128_s9 + $0x528] sm:$0xf]  ;;  %v10833_v60 = vor.u32 %v14220_v49, %v10832_v48  ;;  %v14184_v63 = vld [vmem:[%s18128_s9 + $0x634] sm:$0xf0] }
 0x1c4   : > { %5047 = vmatpush.bf16.msrb.mxu2 %v10769_v13  ;;  %5060 = vmatpush.bf16.msrb.mxu3 %v10897_v46  ;;  %v10849_v13 = vor.u32 %v14224_v27, %v10848_v23  ;;  %v4796_v46 = vadd.f32 %v4795_v42, %v4783_v28  ;;  %v4784_v59 = vpop.f32.mrf.mxu1  ;;  %v10688_v62 = vld [vmem:[%s18128_s9 + $0x628] sm:$0xf]  ;;  %v14216_v10 = vld [vmem:[%s18128_s9 + $0x734] sm:$0xf0] }
 0x1c5   : > { %5022 = vmatpush.bf16.msrb.mxu0 %v10497_v51  ;;  %5035 = vmatpush.bf16.msrb.mxu1 %v10625_v53  ;;  %v4771_v51 = vpop.f32.mrf.mxu0  ;;  %v10705_v53 = vor.u32 %v14188_v45, %v10704_v44  ;;  %v10816_v0 = vld [vmem:[%s18128_s9 + $0x728] sm:$0xf]  ;;  %v14116_v3 = vld [vmem:[%s18128_s9 + $0x414] sm:$0xf0] }
 0x1c6   : > { %v16417_v58 = vadd.f32 %v4808_v47, %v4796_v46  ;;  %v10544_v7 = vld [vmem:[%s18128_s9 + $0x508] sm:$0xf]  ;;  %v14148_v8 = vld [vmem:[%s18128_s9 + $0x514] sm:$0xf0]  ;;  %v10817_v12 = vor.u32 %v14216_v10, %v10816_v0 }
 0x1c7   : > { %v10672_v9 = vld [vmem:[%s18128_s9 + $0x608] sm:$0xf]  ;;  %v14212_v20 = vld [vmem:[%s18128_s9 + $0x714] sm:$0xf0]  ;;  %v10545_v38 = vor.u32 %v14148_v8, %v10544_v7 }
 0x1c8   : > { %5048 = vmatpush.bf16.msrb.mxu2 %v10753_v55  ;;  %5061 = vmatpush.bf16.msrb.mxu3 %v10881_v61  ;;  %v10432_v55 = vld [vmem:[%s18128_s9 + $0x428] sm:$0xf]  ;;  %v14152_v61 = vld [vmem:[%s18128_s9 + $0x534] sm:$0xf0] }
 0x1c9   : > { %5023 = vmatpush.bf16.msrb.mxu0 %v10481_v2  ;;  %5036 = vmatpush.bf16.msrb.mxu1 %v10609_v5  ;;  %v10433_v1 = vor.u32 %v14120_v56, %v10432_v55  ;;  %v10416_v2 = vld [vmem:[%s18128_s9 + $0x408] sm:$0xf]  ;;  %v10561_v5 = vor.u32 %v14152_v61, %v10560_v57  ;;  %v14272_v27 = vld [vmem:[%s18128_s9 + $0x8f4] sm:$0xf0] }
 0x1ca   : > { %v4797_v11 = vpop.f32.mrf.mxu2  ;;  %v10800_v15 = vld [vmem:[%s18128_s9 + $0x708] sm:$0xf]  ;;  %v4810_v22 = vpop.f32.mrf.mxu3  ;;  %v14336_v37 = vld [vmem:[%s18128_s9 + $0xaf4] sm:$0xf0] }
 0x1cb   : > { %v11040_v23 = vld [vmem:[%s18128_s9 + $0x8e8] sm:$0xf]  ;;  %v10801_v43 = vor.u32 %v14212_v20, %v10800_v15  ;;  %v14268_v48 = vld [vmem:[%s18128_s9 + $0x8d4] sm:$0xf0] }
 0x1cc   : > { %5049 = vmatpush.bf16.msrb.mxu2 %v10737_v6  ;;  %5062 = vmatpush.bf16.msrb.mxu3 %v10865_v14  ;;  %v10689_v6 = vor.u32 %v14184_v63, %v10688_v62  ;;  %v14180_v14 = vld [vmem:[%s18128_s9 + $0x614] sm:$0xf0]  ;;  %v11168_v28 = vld [vmem:[%s18128_s9 + $0x9e8] sm:$0xf]  ;;  %v11041_v44 = vor.u32 %v14272_v27, %v11040_v23 }
 0x1cd   : > { %5024 = vmatpush.bf16.msrb.mxu0 %v10465_v32  ;;  %5037 = vmatpush.bf16.msrb.mxu1 %v10593_v33  ;;  %v10417_v32 = vor.u32 %v14116_v3, %v10416_v2  ;;  %v14304_v33 = vld [vmem:[%s18128_s9 + $0x9f4] sm:$0xf0]  ;;  %v10673_v40 = vor.u32 %v14180_v14, %v10672_v9  ;;  %v11424_v42 = vld [vmem:[%s18128_s9 + $0xbe8] sm:$0xf] }
 0x1ce   : > { %v11169_v45 = vor.u32 %v14304_v33, %v11168_v28  ;;  %v11024_v47 = vld [vmem:[%s18128_s9 + $0x8c8] sm:$0xf]  ;;  %v14300_v51 = vld [vmem:[%s18128_s9 + $0x9d4] sm:$0xf0] }
 0x1cf   : > { %v11152_v49 = vld [vmem:[%s18128_s9 + $0x9c8] sm:$0xf]  ;;  %v14364_v56 = vld [vmem:[%s18128_s9 + $0xbd4] sm:$0xf0]  ;;  %v11025_v57 = vor.u32 %v14268_v48, %v11024_v47 }
 0x1d0   : > { %5050 = vmatpush.bf16.msrb.mxu2 %v10721_v34  ;;  %5063 = vmatpush.bf16.msrb.mxu3 %v10849_v13  ;;  %v11296_v34 = vld [vmem:[%s18128_s9 + $0xae8] sm:$0xf]  ;;  %v14368_v13 = vld [vmem:[%s18128_s9 + $0xbf4] sm:$0xf0]  ;;  %v11153_v59 = vor.u32 %v14300_v51, %v11152_v49 }
 0x1d1   : > { %5025 = vmatpush.bf16.msrb.mxu0 %v10449_v50  ;;  %5038 = vmatpush.bf16.msrb.mxu1 %v10577_v52  ;;  %v11297_v46 = vor.u32 %v14336_v37, %v11296_v34  ;;  %v11425_v50 = vor.u32 %v14368_v13, %v11424_v42  ;;  %v11280_v52 = vld [vmem:[%s18128_s9 + $0xac8] sm:$0xf]  ;;  %v14264_v62 = vld [vmem:[%s18128_s9 + $0x8b4] sm:$0xf0] }
 0x1d2   : > { %v11408_v55 = vld [vmem:[%s18128_s9 + $0xbc8] sm:$0xf]  ;;  %v14296_v10 = vld [vmem:[%s18128_s9 + $0x9b4] sm:$0xf0] }
 0x1d3   : > { %v11008_v61 = vld [vmem:[%s18128_s9 + $0x8a8] sm:$0xf]  ;;  %v11409_v0 = vor.u32 %v14364_v56, %v11408_v55  ;;  %v14328_v2 = vld [vmem:[%s18128_s9 + $0xab4] sm:$0xf0] }
 0x1d4   : > { %5051 = vmatpush.bf16.msrb.mxu2 %v10705_v53  ;;  %5064 = vmatpush.bf16.msrb.mxu3 %v10833_v60  ;;  %v14332_v53 = vld [vmem:[%s18128_s9 + $0xad4] sm:$0xf0]  ;;  %v11136_v63 = vld [vmem:[%s18128_s9 + $0x9a8] sm:$0xf] }
 0x1d5   : > { %5026 = vmatpush.bf16.msrb.mxu0 %v10433_v1  ;;  %5039 = vmatpush.bf16.msrb.mxu1 %v10561_v5  ;;  %v11281_v60 = vor.u32 %v14332_v53, %v11280_v52  ;;  %v11264_v1 = vld [vmem:[%s18128_s9 + $0xaa8] sm:$0xf]  ;;  %v14360_v5 = vld [vmem:[%s18128_s9 + $0xbb4] sm:$0xf0]  ;;  %v11137_v7 = vor.u32 %v14296_v10, %v11136_v63 }
 0x1d6   : > { %v11392_v3 = vld [vmem:[%s18128_s9 + $0xba8] sm:$0xf]  ;;  %v11265_v8 = vor.u32 %v14328_v2, %v11264_v1  ;;  %v14260_v11 = vld [vmem:[%s18128_s9 + $0x894] sm:$0xf0] }
 0x1d7   : > { %v10992_v9 = vld [vmem:[%s18128_s9 + $0x888] sm:$0xf]  ;;  %v11393_v14 = vor.u32 %v14360_v5, %v11392_v3  ;;  %v14292_v15 = vld [vmem:[%s18128_s9 + $0x994] sm:$0xf0] }
 0x1d8   : > { %5052 = vmatpush.bf16.msrb.mxu2 %v10689_v6  ;;  %5065 = vmatpush.bf16.msrb.mxu3 %v10817_v12  ;;  %v11009_v6 = vor.u32 %v14264_v62, %v11008_v61  ;;  %v11120_v12 = vld [vmem:[%s18128_s9 + $0x988] sm:$0xf]  ;;  %v14324_v22 = vld [vmem:[%s18128_s9 + $0xa94] sm:$0xf0]  ;;  %v10993_v28 = vor.u32 %v14260_v11, %v10992_v9 }
 0x1d9   : > { %5027 = vmatpush.bf16.msrb.mxu0 %v10417_v32  ;;  %5040 = vmatpush.bf16.msrb.mxu1 %v10545_v38  ;;  %v11248_v20 = vld [vmem:[%s18128_s9 + $0xa88] sm:$0xf]  ;;  %v14356_v27 = vld [vmem:[%s18128_s9 + $0xb94] sm:$0xf0]  ;;  %v11121_v33 = vor.u32 %v14292_v15, %v11120_v12 }
 0x1da   : > { %v11376_v23 = vld [vmem:[%s18128_s9 + $0xb88] sm:$0xf]  ;;  %v11249_v34 = vor.u32 %v14324_v22, %v11248_v20  ;;  %v14256_v38 = vld [vmem:[%s18128_s9 + $0x874] sm:$0xf0] }
 0x1db   : > { %v4821_v32 = vpop.f32.mrf.mxu0  ;;  %v10976_v37 = vld [vmem:[%s18128_s9 + $0x868] sm:$0xf]  ;;  %v4834_v13 = vpop.f32.mrf.mxu1  ;;  %v14352_v48 = vld [vmem:[%s18128_s9 + $0xb74] sm:$0xf0] }
 0x1dc   : > { %5053 = vmatpush.bf16.msrb.mxu2 %v10673_v40  ;;  %5066 = vmatpush.bf16.msrb.mxu3 %v10801_v43  ;;  %v11104_v40 = vld [vmem:[%s18128_s9 + $0x968] sm:$0xf]  ;;  %v4822_v42 = vadd.f32 %v4821_v32, %v16417_v58  ;;  %v11377_v43 = vor.u32 %v14356_v27, %v11376_v23  ;;  %v14252_v53 = vld [vmem:[%s18128_s9 + $0x854] sm:$0xf0] }
 0x1dd   : > { %5072 = vmatpush.bf16.msra.mxu0 %v11041_v44  ;;  %5085 = vmatpush.bf16.msra.mxu1 %v11169_v45  ;;  %v14288_v44 = vld [vmem:[%s18128_s9 + $0x974] sm:$0xf0]  ;;  %v11232_v45 = vld [vmem:[%s18128_s9 + $0xa68] sm:$0xf] }
 0x1de   : > { %5028 = vmatmul.bf16.vlgmr.msrb.gmra.mxu0 %v15859_v4  ;;  %5041 = vmatmul.bf16.vlgmr.msrb.gmra.mxu1 %v15863_v41  ;;  %v11360_v47 = vld [vmem:[%s18128_s9 + $0xb68] sm:$0xf]  ;;  %v4835_v49 = vadd.f32 %v4834_v13, %v4822_v42  ;;  %v11105_v58 = vor.u32 %v14288_v44, %v11104_v40  ;;  %v14316_v61 = vld [vmem:[%s18128_s9 + $0xa54] sm:$0xf0] }
 0x1df   : > { %5054 = vmatmul.bf16.vlgmr.msrb.gmra.mxu2 %v15855_v36  ;;  %5067 = vmatmul.bf16.vlgmr.msrb.gmra.mxu3 %v15861_v39  ;;  %v10960_v52 = vld [vmem:[%s18128_s9 + $0x848] sm:$0xf]  ;;  %v14348_v10 = vld [vmem:[%s18128_s9 + $0xb54] sm:$0xf0] }
 0x1e0   : > { %5098 = vmatpush.bf16.msra.mxu2 %v11297_v46  ;;  %5111 = vmatpush.bf16.msra.mxu3 %v11425_v50  ;;  %v14320_v46 = vld [vmem:[%s18128_s9 + $0xa74] sm:$0xf0]  ;;  %v10977_v50 = vor.u32 %v14256_v38, %v10976_v37  ;;  %v11088_v55 = vld [vmem:[%s18128_s9 + $0x948] sm:$0xf]  ;;  %v10961_v1 = vor.u32 %v14252_v53, %v10960_v52 }
 0x1e1   : > { %5073 = vmatpush.bf16.msra.mxu0 %v11025_v57  ;;  %5086 = vmatpush.bf16.msra.mxu1 %v11153_v59  ;;  %v11233_v51 = vor.u32 %v14320_v46, %v11232_v45  ;;  %v11361_v57 = vor.u32 %v14352_v48, %v11360_v47  ;;  %v14284_v59 = vld [vmem:[%s18128_s9 + $0x954] sm:$0xf0]  ;;  %v11072_v9 = vld [vmem:[%s18128_s9 + $0x928] sm:$0xf] }
 0x1e2   : > { %v4847_v56 = vpop.f32.mrf.mxu2  ;;  %v4860_v63 = vpop.f32.mrf.mxu3  ;;  %v11089_v5 = vor.u32 %v14284_v59, %v11088_v55  ;;  %v11200_v15 = vld [vmem:[%s18128_s9 + $0xa28] sm:$0xf]  ;;  %v14312_v20 = vld [vmem:[%s18128_s9 + $0xa34] sm:$0xf0] }
 0x1e3   : > { %v4848_v62 = vadd.f32 %v4847_v56, %v4835_v49  ;;  %v4823_v3 = vpop.f32.mrf.mxu0  ;;  %v4836_v11 = vpop.f32.mrf.mxu1  ;;  %v11328_v22 = vld [vmem:[%s18128_s9 + $0xb28] sm:$0xf]  ;;  %v14344_v23 = vld [vmem:[%s18128_s9 + $0xb34] sm:$0xf0] }
 0x1e4   : > { %5099 = vmatpush.bf16.msra.mxu2 %v11281_v60  ;;  %5112 = vmatpush.bf16.msra.mxu3 %v11409_v0  ;;  %v11216_v60 = vld [vmem:[%s18128_s9 + $0xa48] sm:$0xf]  ;;  %v14244_v32 = vld [vmem:[%s18128_s9 + $0x814] sm:$0xf0]  ;;  %v11329_v13 = vor.u32 %v14344_v23, %v11328_v22 }
 0x1e5   : > { %5074 = vmatpush.bf16.msra.mxu0 %v11009_v6  ;;  %5087 = vmatpush.bf16.msra.mxu1 %v11137_v7  ;;  %v11344_v0 = vld [vmem:[%s18128_s9 + $0xb48] sm:$0xf]  ;;  %v16488_v2 = vadd.f32 %v4860_v63, %v4848_v62  ;;  %v11217_v6 = vor.u32 %v14316_v61, %v11216_v60  ;;  %v14276_v38 = vld [vmem:[%s18128_s9 + $0x914] sm:$0xf0] }
 0x1e6   : > { %v10944_v7 = vld [vmem:[%s18128_s9 + $0x828] sm:$0xf]  ;;  %v11345_v12 = vor.u32 %v14348_v10, %v11344_v0  ;;  %v14340_v45 = vld [vmem:[%s18128_s9 + $0xb14] sm:$0xf0] }
 0x1e7   : > { %v11056_v37 = vld [vmem:[%s18128_s9 + $0x908] sm:$0xf]  ;;  %v14400_v48 = vld [vmem:[%s18128_s9 + $0xcf4] sm:$0xf0] }
 0x1e8   : > { %5100 = vmatpush.bf16.msra.mxu2 %v11265_v8  ;;  %5113 = vmatpush.bf16.msra.mxu3 %v11393_v14  ;;  %v14248_v8 = vld [vmem:[%s18128_s9 + $0x834] sm:$0xf0]  ;;  %v11184_v40 = vld [vmem:[%s18128_s9 + $0xa08] sm:$0xf]  ;;  %v11057_v53 = vor.u32 %v14276_v38, %v11056_v37 }
 0x1e9   : > { %5075 = vmatpush.bf16.msra.mxu0 %v10993_v28  ;;  %5088 = vmatpush.bf16.msra.mxu1 %v11121_v33  ;;  %v14280_v14 = vld [vmem:[%s18128_s9 + $0x934] sm:$0xf0]  ;;  %v10945_v27 = vor.u32 %v14248_v8, %v10944_v7  ;;  %v10928_v28 = vld [vmem:[%s18128_s9 + $0x808] sm:$0xf] }
 0x1ea   : > { %v11073_v33 = vor.u32 %v14280_v14, %v11072_v9  ;;  %v4849_v42 = vpop.f32.mrf.mxu2  ;;  %v11312_v44 = vld [vmem:[%s18128_s9 + $0xb08] sm:$0xf]  ;;  %v4862_v46 = vpop.f32.mrf.mxu3  ;;  %v14464_v52 = vld [vmem:[%s18128_s9 + $0xef4] sm:$0xf0] }
 0x1eb   : > { %v11552_v47 = vld [vmem:[%s18128_s9 + $0xce8] sm:$0xf]  ;;  %v11313_v59 = vor.u32 %v14340_v45, %v11312_v44  ;;  %v14396_v0 = vld [vmem:[%s18128_s9 + $0xcd4] sm:$0xf0] }
 0x1ec   : > { %5101 = vmatpush.bf16.msra.mxu2 %v11249_v34  ;;  %5114 = vmatpush.bf16.msra.mxu3 %v11377_v43  ;;  %v11201_v34 = vor.u32 %v14312_v20, %v11200_v15  ;;  %v14308_v43 = vld [vmem:[%s18128_s9 + $0xa14] sm:$0xf0]  ;;  %v11680_v49 = vld [vmem:[%s18128_s9 + $0xde8] sm:$0xf]  ;;  %v11553_v60 = vor.u32 %v14400_v48, %v11552_v47 }
 0x1ed   : > { %5076 = vmatpush.bf16.msra.mxu0 %v10977_v50  ;;  %5089 = vmatpush.bf16.msra.mxu1 %v11105_v58  ;;  %v10929_v50 = vor.u32 %v14244_v32, %v10928_v28  ;;  %v14432_v58 = vld [vmem:[%s18128_s9 + $0xdf4] sm:$0xf0]  ;;  %v11185_v55 = vor.u32 %v14308_v43, %v11184_v40  ;;  %v11936_v56 = vld [vmem:[%s18128_s9 + $0xfe8] sm:$0xf] }
 0x1ee   : > { %v11681_v61 = vor.u32 %v14432_v58, %v11680_v49  ;;  %v11536_v63 = vld [vmem:[%s18128_s9 + $0xcc8] sm:$0xf]  ;;  %v14428_v3 = vld [vmem:[%s18128_s9 + $0xdd4] sm:$0xf0] }
 0x1ef   : > { %v11664_v10 = vld [vmem:[%s18128_s9 + $0xdc8] sm:$0xf]  ;;  %v14492_v8 = vld [vmem:[%s18128_s9 + $0xfd4] sm:$0xf0]  ;;  %v11537_v9 = vor.u32 %v14396_v0, %v11536_v63 }
 0x1f0   : > { %5102 = vmatpush.bf16.msra.mxu2 %v11233_v51  ;;  %5115 = vmatpush.bf16.msra.mxu3 %v11361_v57  ;;  %v11808_v51 = vld [vmem:[%s18128_s9 + $0xee8] sm:$0xf]  ;;  %v14496_v57 = vld [vmem:[%s18128_s9 + $0xff4] sm:$0xf0]  ;;  %v11665_v11 = vor.u32 %v14428_v3, %v11664_v10 }
 0x1f1   : > { %5077 = vmatpush.bf16.msra.mxu0 %v10961_v1  ;;  %5090 = vmatpush.bf16.msra.mxu1 %v11089_v5  ;;  %v11809_v62 = vor.u32 %v14464_v52, %v11808_v51  ;;  %v11937_v1 = vor.u32 %v14496_v57, %v11936_v56  ;;  %v11792_v5 = vld [vmem:[%s18128_s9 + $0xec8] sm:$0xf]  ;;  %v14392_v15 = vld [vmem:[%s18128_s9 + $0xcb4] sm:$0xf0] }
 0x1f2   : > { %v11920_v7 = vld [vmem:[%s18128_s9 + $0xfc8] sm:$0xf]  ;;  %v14424_v23 = vld [vmem:[%s18128_s9 + $0xdb4] sm:$0xf0] }
 0x1f3   : > { %v11520_v14 = vld [vmem:[%s18128_s9 + $0xca8] sm:$0xf]  ;;  %v11921_v22 = vor.u32 %v14492_v8, %v11920_v7  ;;  %v14456_v28 = vld [vmem:[%s18128_s9 + $0xeb4] sm:$0xf0] }
 0x1f4   : > { %5103 = vmatpush.bf16.msra.mxu2 %v11217_v6  ;;  %5116 = vmatpush.bf16.msra.mxu3 %v11345_v12  ;;  %v14460_v6 = vld [vmem:[%s18128_s9 + $0xed4] sm:$0xf0]  ;;  %v11648_v20 = vld [vmem:[%s18128_s9 + $0xda8] sm:$0xf] }
 0x1f5   : > { %5078 = vmatpush.bf16.msra.mxu0 %v10945_v27  ;;  %5091 = vmatpush.bf16.msra.mxu1 %v11073_v33  ;;  %v11793_v12 = vor.u32 %v14460_v6, %v11792_v5  ;;  %v11776_v27 = vld [vmem:[%s18128_s9 + $0xea8] sm:$0xf]  ;;  %v14488_v33 = vld [vmem:[%s18128_s9 + $0xfb4] sm:$0xf0]  ;;  %v11649_v37 = vor.u32 %v14424_v23, %v11648_v20 }
 0x1f6   : > { %v11904_v32 = vld [vmem:[%s18128_s9 + $0xfa8] sm:$0xf]  ;;  %v11777_v38 = vor.u32 %v14456_v28, %v11776_v27  ;;  %v14388_v42 = vld [vmem:[%s18128_s9 + $0xc94] sm:$0xf0] }
 0x1f7   : > { %v11504_v40 = vld [vmem:[%s18128_s9 + $0xc88] sm:$0xf]  ;;  %v11905_v43 = vor.u32 %v14488_v33, %v11904_v32  ;;  %v14420_v44 = vld [vmem:[%s18128_s9 + $0xd94] sm:$0xf0] }
 0x1f8   : > { %5104 = vmatpush.bf16.msra.mxu2 %v11201_v34  ;;  %5117 = vmatpush.bf16.msra.mxu3 %v11329_v13  ;;  %v11521_v34 = vor.u32 %v14392_v15, %v11520_v14  ;;  %v11632_v13 = vld [vmem:[%s18128_s9 + $0xd88] sm:$0xf]  ;;  %v14452_v46 = vld [vmem:[%s18128_s9 + $0xe94] sm:$0xf0]  ;;  %v11505_v58 = vor.u32 %v14388_v42, %v11504_v40 }
 0x1f9   : > { %5079 = vmatpush.bf16.msra.mxu0 %v10929_v50  ;;  %5092 = vmatpush.bf16.msra.mxu1 %v11057_v53  ;;  %v11760_v45 = vld [vmem:[%s18128_s9 + $0xe88] sm:$0xf]  ;;  %v14484_v49 = vld [vmem:[%s18128_s9 + $0xf94] sm:$0xf0]  ;;  %v11633_v52 = vor.u32 %v14420_v44, %v11632_v13 }
 0x1fa   : > { %v11888_v48 = vld [vmem:[%s18128_s9 + $0xf88] sm:$0xf]  ;;  %v11761_v53 = vor.u32 %v14452_v46, %v11760_v45  ;;  %v14384_v56 = vld [vmem:[%s18128_s9 + $0xc74] sm:$0xf0] }
 0x1fb   : > { %v4873_v47 = vpop.f32.mrf.mxu0  ;;  %v4886_v51 = vpop.f32.mrf.mxu1  ;;  %v11616_v57 = vld [vmem:[%s18128_s9 + $0xd68] sm:$0xf]  ;;  %v14480_v0 = vld [vmem:[%s18128_s9 + $0xf74] sm:$0xf0] }
 0x1fc   : > { %5105 = vmatpush.bf16.msra.mxu2 %v11185_v55  ;;  %5118 = vmatpush.bf16.msra.mxu3 %v11313_v59  ;;  %v4874_v50 = vadd.f32 %v4873_v47, %v16488_v2  ;;  %v11488_v55 = vld [vmem:[%s18128_s9 + $0xc68] sm:$0xf]  ;;  %v11889_v59 = vor.u32 %v14484_v49, %v11888_v48  ;;  %v14448_v2 = vld [vmem:[%s18128_s9 + $0xe74] sm:$0xf0] }
 0x1fd   : > { %5124 = vmatpush.bf16.msrb.mxu0 %v11553_v60  ;;  %5137 = vmatpush.bf16.msrb.mxu1 %v11681_v61  ;;  %v14416_v61 = vld [vmem:[%s18128_s9 + $0xd74] sm:$0xf0]  ;;  %v11872_v63 = vld [vmem:[%s18128_s9 + $0xf68] sm:$0xf]  ;;  %v11489_v10 = vor.u32 %v14384_v56, %v11488_v55 }
 0x1fe   : > { %5080 = vmatmul.bf16.vlgmr.msra.gmra.mxu0 %v15935_v21  ;;  %5093 = vmatmul.bf16.vlgmr.msra.gmra.mxu1 %v15942_v26  ;;  %v4887_v60 = vadd.f32 %v4886_v51, %v4874_v50  ;;  %v11472_v5 = vld [vmem:[%s18128_s9 + $0xc48] sm:$0xf]  ;;  %v14380_v6 = vld [vmem:[%s18128_s9 + $0xc54] sm:$0xf0]  ;;  %v11873_v8 = vor.u32 %v14480_v0, %v11872_v63  ;;  %v14046_v63 = vld [vmem:[%s18128_s9 + $0x1ec] sm:$0xf] }
 0x1ff   : > { %5106 = vmatmul.bf16.vlgmr.msra.gmra.mxu2 %v15940_v25  ;;  %5119 = vmatmul.bf16.vlgmr.msra.gmra.mxu3 %v15946_v29  ;;  %v11600_v7 = vld [vmem:[%s18128_s9 + $0xd48] sm:$0xf]  ;;  %v14444_v14 = vld [vmem:[%s18128_s9 + $0xe54] sm:$0xf0]  ;;  %v11473_v28 = vor.u32 %v14380_v6, %v11472_v5  ;;  %v10274_v5 = vld [vmem:[%s18128_s9 + $0x2f8] sm:$0xf0] }
 0x200   : > { %5150 = vmatpush.bf16.msrb.mxu2 %v11809_v62  ;;  %5163 = vmatpush.bf16.msrb.mxu3 %v11937_v1  ;;  %v11744_v62 = vld [vmem:[%s18128_s9 + $0xe68] sm:$0xf]  ;;  %v11617_v1 = vor.u32 %v14416_v61, %v11616_v57  ;;  %v14476_v23 = vld [vmem:[%s18128_s9 + $0xf54] sm:$0xf0] }
 0x201   : > { %5125 = vmatpush.bf16.msrb.mxu0 %v11537_v9  ;;  %5138 = vmatpush.bf16.msrb.mxu1 %v11665_v11  ;;  %v11745_v3 = vor.u32 %v14448_v2, %v11744_v62  ;;  %v14412_v11 = vld [vmem:[%s18128_s9 + $0xd54] sm:$0xf0]  ;;  %v11584_v42 = vld [vmem:[%s18128_s9 + $0xd28] sm:$0xf]  ;;  %v14014_v62 = vld [vmem:[%s18128_s9 + $0xec] sm:$0xf] }
 0x202   : > { %v4899_v9 = vpop.f32.mrf.mxu2  ;;  %v4912_v20 = vpop.f32.mrf.mxu3  ;;  %v14376_v40 = vld [vmem:[%s18128_s9 + $0xc34] sm:$0xf0]  ;;  %v11712_v44 = vld [vmem:[%s18128_s9 + $0xe28] sm:$0xf]  ;;  %v10018_v2 = vld [vmem:[%s18128_s9 + $0xf8] sm:$0xf0] }
 0x203   : > { %v4900_v15 = vadd.f32 %v4899_v9, %v4887_v60  ;;  %v4875_v27 = vpop.f32.mrf.mxu0  ;;  %v4888_v32 = vpop.f32.mrf.mxu1  ;;  %v14440_v45 = vld [vmem:[%s18128_s9 + $0xe34] sm:$0xf0]  ;;  %v11840_v46 = vld [vmem:[%s18128_s9 + $0xf28] sm:$0xf]  ;;  %v10402_v9 = vld [vmem:[%s18128_s9 + $0x3f8] sm:$0xf0] }
 0x204   : > { %5151 = vmatpush.bf16.msrb.mxu2 %v11793_v12  ;;  %5164 = vmatpush.bf16.msrb.mxu3 %v11921_v22  ;;  %v11728_v12 = vld [vmem:[%s18128_s9 + $0xe48] sm:$0xf]  ;;  %v14472_v47 = vld [vmem:[%s18128_s9 + $0xf34] sm:$0xf0]  ;;  %v11713_v51 = vor.u32 %v14440_v45, %v11712_v44  ;;  %v14074_v32 = vld [vmem:[%s18128_s9 + $0x2cc] sm:$0xf] }
 0x205   : > { %5126 = vmatpush.bf16.msrb.mxu0 %v11521_v34  ;;  %5139 = vmatpush.bf16.msrb.mxu1 %v11649_v37  ;;  %v11856_v22 = vld [vmem:[%s18128_s9 + $0xf48] sm:$0xf]  ;;  %v16559_v33 = vadd.f32 %v4912_v20, %v4900_v15  ;;  %v11601_v34 = vor.u32 %v14412_v11, %v11600_v7  ;;  %v11729_v37 = vor.u32 %v14444_v14, %v11728_v12  ;;  %v14372_v50 = vld [vmem:[%s18128_s9 + $0xc14] sm:$0xf0]  ;;  %v14010_v20 = vld [vmem:[%s18128_s9 + $0xcc] sm:$0xf] }
 0x206   : > { %v11857_v13 = vor.u32 %v14476_v23, %v11856_v22  ;;  %v11440_v49 = vld [vmem:[%s18128_s9 + $0xc08] sm:$0xf]  ;;  %v11841_v56 = vor.u32 %v14472_v47, %v11840_v46  ;;  %v14436_v57 = vld [vmem:[%s18128_s9 + $0xe14] sm:$0xf0]  ;;  %v10021_v12 = vor.u32 %v14014_v62, %v10018_v2  ;;  %v10002_v22 = vld [vmem:[%s18128_s9 + $0xd8] sm:$0xf0] }
 0x207   : > { %v11696_v55 = vld [vmem:[%s18128_s9 + $0xe08] sm:$0xf]  ;;  %v14468_v60 = vld [vmem:[%s18128_s9 + $0xf14] sm:$0xf0]  ;;  %v14042_v23 = vld [vmem:[%s18128_s9 + $0x1cc] sm:$0xf] }
 0x208   : > { %5152 = vmatpush.bf16.msrb.mxu2 %v11777_v38  ;;  %5165 = vmatpush.bf16.msrb.mxu3 %v11905_v43  ;;  %v11456_v38 = vld [vmem:[%s18128_s9 + $0xc28] sm:$0xf]  ;;  %v14408_v43 = vld [vmem:[%s18128_s9 + $0xd34] sm:$0xf0]  ;;  %v11697_v7 = vor.u32 %v14436_v57, %v11696_v55  ;;  %v9986_v44 = vld [vmem:[%s18128_s9 + $0xb8] sm:$0xf0] }
 0x209   : > { %5127 = vmatpush.bf16.msrb.mxu0 %v11505_v58  ;;  %5140 = vmatpush.bf16.msrb.mxu1 %v11633_v52  ;;  %v11457_v48 = vor.u32 %v14376_v40, %v11456_v38  ;;  %v11585_v58 = vor.u32 %v14408_v43, %v11584_v42  ;;  %v11568_v52 = vld [vmem:[%s18128_s9 + $0xd08] sm:$0xf]  ;;  %v10386_v38 = vld [vmem:[%s18128_s9 + $0x3d8] sm:$0xf0]  ;;  %v10005_v40 = vor.u32 %v14010_v20, %v10002_v22  ;;  %v14006_v43 = vld [vmem:[%s18128_s9 + $0xac] sm:$0xf] }
 0x20a   : > { %v4901_v61 = vpop.f32.mrf.mxu2  ;;  %v4914_v0 = vpop.f32.mrf.mxu3  ;;  %v14038_v45 = vld [vmem:[%s18128_s9 + $0x1ac] sm:$0xf]  ;;  %v10114_v47 = vld [vmem:[%s18128_s9 + $0x1b8] sm:$0xf0] }
 0x20b   : > { %v14002_v55 = vld [vmem:[%s18128_s9 + $0x8c] sm:$0xf]  ;;  %v10226_v62 = vld [vmem:[%s18128_s9 + $0x298] sm:$0xf0] }
 0x20c   : > { %5153 = vmatpush.bf16.msrb.mxu2 %v11761_v53  ;;  %5166 = vmatpush.bf16.msrb.mxu3 %v11889_v59  ;;  %v14404_v53 = vld [vmem:[%s18128_s9 + $0xd14] sm:$0xf0]  ;;  %v11824_v59 = vld [vmem:[%s18128_s9 + $0xf08] sm:$0xf]  ;;  %v14034_v57 = vld [vmem:[%s18128_s9 + $0x18c] sm:$0xf] }
 0x20d   : > { %5128 = vmatpush.bf16.msrb.mxu0 %v11489_v10  ;;  %5141 = vmatpush.bf16.msrb.mxu1 %v11617_v1  ;;  %v11441_v10 = vor.u32 %v14372_v50, %v11440_v49  ;;  %v10146_v1 = vld [vmem:[%s18128_s9 + $0x1f8] sm:$0xf0]  ;;  %v11569_v6 = vor.u32 %v14404_v53, %v11568_v52  ;;  %v11825_v11 = vor.u32 %v14468_v60, %v11824_v59  ;;  %v14102_v50 = vld [vmem:[%s18128_s9 + $0x3ac] sm:$0xf] }
 0x20e   : > { %v10149_v14 = vor.u32 %v14046_v63, %v10146_v1  ;;  %v10242_v49 = vld [vmem:[%s18128_s9 + $0x2b8] sm:$0xf0]  ;;  %v10117_v52 = vor.u32 %v14038_v45, %v10114_v47  ;;  %v14066_v61 = vld [vmem:[%s18128_s9 + $0x28c] sm:$0xf] }
 0x20f   : > { %v10098_v60 = vld [vmem:[%s18128_s9 + $0x198] sm:$0xf0]  ;;  %v14098_v63 = vld [vmem:[%s18128_s9 + $0x38c] sm:$0xf] }
 0x210   : > { %5154 = vmatpush.bf16.msrb.mxu2 %v11745_v3  ;;  %5167 = vmatpush.bf16.msrb.mxu3 %v11873_v8  ;;  %v14078_v3 = vld [vmem:[%s18128_s9 + $0x2ec] sm:$0xf]  ;;  %v10354_v0 = vld [vmem:[%s18128_s9 + $0x398] sm:$0xf0] }
 0x211   : > { %5129 = vmatpush.bf16.msrb.mxu0 %v11473_v28  ;;  %5142 = vmatpush.bf16.msrb.mxu1 %v11601_v34  ;;  %v14110_v8 = vld [vmem:[%s18128_s9 + $0x3ec] sm:$0xf]  ;;  %v10277_v15 = vor.u32 %v14078_v3, %v10274_v5  ;;  %v10130_v28 = vld [vmem:[%s18128_s9 + $0x1d8] sm:$0xf0]  ;;  %v10101_v5 = vor.u32 %v14034_v57, %v10098_v60 }
 0x212   : > { %v10405_v27 = vor.u32 %v14110_v8, %v10402_v9  ;;  %v10258_v34 = vld [vmem:[%s18128_s9 + $0x2d8] sm:$0xf0]  ;;  %v10133_v42 = vor.u32 %v14042_v23, %v10130_v28  ;;  %v14030_v9 = vld [vmem:[%s18128_s9 + $0x16c] sm:$0xf] }
 0x213   : > { %v9954_v8 = vld [vmem:[%s18128_s9 + $0x78] sm:$0xf0]  ;;  %v14094_v20 = vld [vmem:[%s18128_s9 + $0x36c] sm:$0xf] }
 0x214   : > { %5155 = vmatpush.bf16.msrb.mxu2 %v11729_v37  ;;  %5168 = vmatpush.bf16.msrb.mxu3 %v11857_v13  ;;  %v14106_v37 = vld [vmem:[%s18128_s9 + $0x3cc] sm:$0xf]  ;;  %v10261_v13 = vor.u32 %v14074_v32, %v10258_v34  ;;  %v10338_v22 = vld [vmem:[%s18128_s9 + $0x378] sm:$0xf0] }
 0x215   : > { %5130 = vmatpush.bf16.msrb.mxu0 %v11457_v48  ;;  %5143 = vmatpush.bf16.msrb.mxu1 %v11585_v58  ;;  %v10389_v46 = vor.u32 %v14106_v37, %v10386_v38  ;;  %v14070_v48 = vld [vmem:[%s18128_s9 + $0x2ac] sm:$0xf]  ;;  %v10370_v58 = vld [vmem:[%s18128_s9 + $0x3b8] sm:$0xf0]  ;;  %v10341_v38 = vor.u32 %v14094_v20, %v10338_v22 }
 0x216   : > { %v10245_v53 = vor.u32 %v14070_v48, %v10242_v49  ;;  %v10373_v59 = vor.u32 %v14102_v50, %v10370_v58  ;;  %v13994_v32 = vld [vmem:[%s18128_s9 + $0x4c] sm:$0xf]  ;;  %v9938_v34 = vld [vmem:[%s18128_s9 + $0x58] sm:$0xf0] }
 0x217   : > { %v14026_v37 = vld [vmem:[%s18128_s9 + $0x14c] sm:$0xf]  ;;  %v10322_v47 = vld [vmem:[%s18128_s9 + $0x358] sm:$0xf0]  ;;  %v9941_v49 = vor.u32 %v13994_v32, %v9938_v34 }
 0x218   : > { %5156 = vmatpush.bf16.msrb.mxu2 %v11713_v51  ;;  %5169 = vmatpush.bf16.msrb.mxu3 %v11841_v56  ;;  %v9989_v51 = vor.u32 %v14006_v43, %v9986_v44  ;;  %v9970_v56 = vld [vmem:[%s18128_s9 + $0x98] sm:$0xf0]  ;;  %v14054_v60 = vld [vmem:[%s18128_s9 + $0x22c] sm:$0xf] }
 0x219   : > { %5131 = vmatpush.bf16.msrb.mxu0 %v11441_v10  ;;  %5144 = vmatpush.bf16.msrb.mxu1 %v11569_v6  ;;  %v9973_v1 = vor.u32 %v14002_v55, %v9970_v56  ;;  %v10229_v6 = vor.u32 %v14066_v61, %v10226_v62  ;;  %v10194_v43 = vld [vmem:[%s18128_s9 + $0x258] sm:$0xf0]  ;;  %v14022_v56 = vld [vmem:[%s18128_s9 + $0x12c] sm:$0xf] }
 0x21a   : > { %v9922_v55 = vld [vmem:[%s18128_s9 + $0x38] sm:$0xf0]  ;;  %v14086_v62 = vld [vmem:[%s18128_s9 + $0x32c] sm:$0xf] }
 0x21b   : > { %v4925_v2 = vpop.f32.mrf.mxu0  ;;  %v4938_v3 = vpop.f32.mrf.mxu1  ;;  %v10178_v61 = vld [vmem:[%s18128_s9 + $0x238] sm:$0xf0]  ;;  %v14174_v20 = vld [vmem:[%s18128_s9 + $0x5ec] sm:$0xf] }
 0x21c   : > { %5157 = vmatpush.bf16.msrb.mxu2 %v11697_v7  ;;  %5170 = vmatpush.bf16.msrb.mxu3 %v11825_v11  ;;  %v4926_v10 = vadd.f32 %v4925_v2, %v16559_v33  ;;  %v13998_v7 = vld [vmem:[%s18128_s9 + $0x6c] sm:$0xf]  ;;  %v10357_v11 = vor.u32 %v14098_v63, %v10354_v0  ;;  %v10210_v33 = vld [vmem:[%s18128_s9 + $0x278] sm:$0xf0] }
 0x21d   : > { %5176 = vmatpush.bf16.msra.mxu0 %v10021_v12  ;;  %5189 = vmatpush.bf16.msra.mxu1 %v10149_v14  ;;  %v10082_v14 = vld [vmem:[%s18128_s9 + $0x178] sm:$0xf0]  ;;  %v9957_v23 = vor.u32 %v13998_v7, %v9954_v8  ;;  %v13986_v0 = vld [vmem:[%s18128_s9 + $0xc] sm:$0xf] }
 0x21e   : > { %5132 = vmatmul.bf16.vlgmr.msrb.gmra.mxu0 %v16015_v19  ;;  %5145 = vmatmul.bf16.vlgmr.msrb.gmra.mxu1 %v16022_v24  ;;  %v4939_v12 = vadd.f32 %v4938_v3, %v4926_v10  ;;  %v10306_v2 = vld [vmem:[%s18128_s9 + $0x338] sm:$0xf0]  ;;  %v10181_v3 = vor.u32 %v14054_v60, %v10178_v61  ;;  %v14050_v7 = vld [vmem:[%s18128_s9 + $0x20c] sm:$0xf] }
 0x21f   : > { %5158 = vmatmul.bf16.vlgmr.msrb.gmra.mxu2 %v16020_v54  ;;  %5171 = vmatmul.bf16.vlgmr.msrb.gmra.mxu3 %v16026_v31  ;;  %v9906_v10 = vld [vmem:[%s18128_s9 + $0x18] sm:$0xf0]  ;;  %v10309_v8 = vor.u32 %v14086_v62, %v10306_v2  ;;  %v14166_v61 = vld [vmem:[%s18128_s9 + $0x5ac] sm:$0xf] }
 0x220   : > { %5202 = vmatpush.bf16.msra.mxu2 %v10277_v15  ;;  %5215 = vmatpush.bf16.msra.mxu3 %v10405_v27  ;;  %v14062_v15 = vld [vmem:[%s18128_s9 + $0x26c] sm:$0xf]  ;;  %v10085_v27 = vor.u32 %v14030_v9, %v10082_v14  ;;  %v10162_v9 = vld [vmem:[%s18128_s9 + $0x218] sm:$0xf0] }
 0x221   : > { %5177 = vmatpush.bf16.msra.mxu0 %v10005_v40  ;;  %5190 = vmatpush.bf16.msra.mxu1 %v10133_v42  ;;  %v10213_v28 = vor.u32 %v14062_v15, %v10210_v33  ;;  %v10066_v42 = vld [vmem:[%s18128_s9 + $0x158] sm:$0xf0]  ;;  %v14142_v15 = vld [vmem:[%s18128_s9 + $0x4ec] sm:$0xf] }
 0x222   : > { %v4951_v40 = vpop.f32.mrf.mxu2  ;;  %v4964_v45 = vpop.f32.mrf.mxu3  ;;  %v10530_v33 = vld [vmem:[%s18128_s9 + $0x4f8] sm:$0xf0] }
 0x223   : > { %v4952_v44 = vadd.f32 %v4951_v40, %v4939_v12  ;;  %v4927_v48 = vpop.f32.mrf.mxu0  ;;  %v4940_v50 = vpop.f32.mrf.mxu1  ;;  %v10290_v12 = vld [vmem:[%s18128_s9 + $0x318] sm:$0xf0] }
 0x224   : > { %5203 = vmatpush.bf16.msra.mxu2 %v10261_v13  ;;  %5216 = vmatpush.bf16.msra.mxu3 %v10389_v46  ;;  %v14058_v13 = vld [vmem:[%s18128_s9 + $0x24c] sm:$0xf]  ;;  %v10786_v32 = vld [vmem:[%s18128_s9 + $0x6f8] sm:$0xf0] }
 0x225   : > { %5178 = vmatpush.bf16.msra.mxu0 %v9989_v51  ;;  %5191 = vmatpush.bf16.msra.mxu1 %v10117_v52  ;;  %v14090_v46 = vld [vmem:[%s18128_s9 + $0x34c] sm:$0xf]  ;;  %v16630_v58 = vadd.f32 %v4964_v45, %v4952_v44  ;;  %v10069_v51 = vor.u32 %v14026_v37, %v10066_v42  ;;  %v10197_v52 = vor.u32 %v14058_v13, %v10194_v43  ;;  %v10914_v40 = vld [vmem:[%s18128_s9 + $0x7f8] sm:$0xf0] }
 0x226   : > { %v10325_v57 = vor.u32 %v14090_v46, %v10322_v47  ;;  %v10165_v37 = vor.u32 %v14050_v7, %v10162_v9  ;;  %v10533_v13 = vor.u32 %v14142_v15, %v10530_v33  ;;  %v14138_v45 = vld [vmem:[%s18128_s9 + $0x4cc] sm:$0xf]  ;;  %v10514_v46 = vld [vmem:[%s18128_s9 + $0x4d8] sm:$0xf0]  ;;  %v15120_v9 = vld [vmem:[%s15352_s13] sm:$0xf] }
 0x227   : > { %v14170_v47 = vld [vmem:[%s18128_s9 + $0x5cc] sm:$0xf]  ;;  %v10498_v60 = vld [vmem:[%s18128_s9 + $0x4b8] sm:$0xf0] }
 0x228   : > { %5204 = vmatpush.bf16.msra.mxu2 %v10245_v53  ;;  %5217 = vmatpush.bf16.msra.mxu3 %v10373_v59  ;;  %v13990_v53 = vld [vmem:[%s18128_s9 + $0x2c] sm:$0xf]  ;;  %v10050_v59 = vld [vmem:[%s18128_s9 + $0x138] sm:$0xf0] }
 0x229   : > { %5179 = vmatpush.bf16.msra.mxu0 %v9973_v1  ;;  %5192 = vmatpush.bf16.msra.mxu1 %v10101_v5  ;;  %v9925_v63 = vor.u32 %v13990_v53, %v9922_v55  ;;  %v10053_v1 = vor.u32 %v14022_v56, %v10050_v59  ;;  %v14018_v5 = vld [vmem:[%s18128_s9 + $0x10c] sm:$0xf]  ;;  %v10898_v53 = vld [vmem:[%s18128_s9 + $0x7d8] sm:$0xf0]  ;;  %v10517_v55 = vor.u32 %v14138_v45, %v10514_v46 }
 0x22a   : > { %v4953_v14 = vpop.f32.mrf.mxu2  ;;  %v4966_v22 = vpop.f32.mrf.mxu3  ;;  %v14202_v50 = vld [vmem:[%s18128_s9 + $0x6cc] sm:$0xf]  ;;  %v10626_v2 = vld [vmem:[%s18128_s9 + $0x5b8] sm:$0xf0] }
 0x22b   : > { %v14134_v59 = vld [vmem:[%s18128_s9 + $0x4ac] sm:$0xf]  ;;  %v10482_v7 = vld [vmem:[%s18128_s9 + $0x498] sm:$0xf0] }
 0x22c   : > { %5205 = vmatpush.bf16.msra.mxu2 %v10229_v6  ;;  %5218 = vmatpush.bf16.msra.mxu3 %v10357_v11  ;;  %v10034_v6 = vld [vmem:[%s18128_s9 + $0x118] sm:$0xf0]  ;;  %v14082_v11 = vld [vmem:[%s18128_s9 + $0x30c] sm:$0xf] }
 0x22d   : > { %5180 = vmatpush.bf16.msra.mxu0 %v9957_v23  ;;  %5193 = vmatpush.bf16.msra.mxu1 %v10085_v27  ;;  %v9909_v23 = vor.u32 %v13986_v0, %v9906_v10  ;;  %v10658_v27 = vld [vmem:[%s18128_s9 + $0x5f8] sm:$0xf0]  ;;  %v10037_v34 = vor.u32 %v14018_v5, %v10034_v6  ;;  %v10293_v42 = vor.u32 %v14082_v11, %v10290_v12  ;;  %v14230_v10 = vld [vmem:[%s18128_s9 + $0x7ac] sm:$0xf] }
 0x22e   : > { %v10661_v43 = vor.u32 %v14174_v20, %v10658_v27  ;;  %v10754_v0 = vld [vmem:[%s18128_s9 + $0x6b8] sm:$0xf0]  ;;  %v14130_v5 = vld [vmem:[%s18128_s9 + $0x48c] sm:$0xf]  ;;  %v10629_v6 = vor.u32 %v14166_v61, %v10626_v2 }
 0x22f   : > { %v10610_v11 = vld [vmem:[%s18128_s9 + $0x598] sm:$0xf0]  ;;  %v14194_v12 = vld [vmem:[%s18128_s9 + $0x68c] sm:$0xf] }
 0x230   : > { %5206 = vmatpush.bf16.msra.mxu2 %v10213_v28  ;;  %5219 = vmatpush.bf16.msra.mxu3 %v10341_v38  ;;  %v14206_v28 = vld [vmem:[%s18128_s9 + $0x6ec] sm:$0xf]  ;;  %v10738_v14 = vld [vmem:[%s18128_s9 + $0x698] sm:$0xf0] }
 0x231   : > { %5181 = vmatpush.bf16.msra.mxu0 %v9941_v49  ;;  %5194 = vmatpush.bf16.msra.mxu1 %v10069_v51  ;;  %v14238_v38 = vld [vmem:[%s18128_s9 + $0x7ec] sm:$0xf]  ;;  %v10789_v44 = vor.u32 %v14206_v28, %v10786_v32  ;;  %v10642_v49 = vld [vmem:[%s18128_s9 + $0x5d8] sm:$0xf0] }
 0x232   : > { %v10917_v48 = vor.u32 %v14238_v38, %v10914_v40  ;;  %v10770_v51 = vld [vmem:[%s18128_s9 + $0x6d8] sm:$0xf0]  ;;  %v10645_v56 = vor.u32 %v14170_v47, %v10642_v49  ;;  %v14226_v15 = vld [vmem:[%s18128_s9 + $0x78c] sm:$0xf] }
 0x233   : > { %v10866_v33 = vld [vmem:[%s18128_s9 + $0x798] sm:$0xf0]  ;;  %v14126_v27 = vld [vmem:[%s18128_s9 + $0x46c] sm:$0xf] }
 0x234   : > { %5207 = vmatpush.bf16.msra.mxu2 %v10197_v52  ;;  %5220 = vmatpush.bf16.msra.mxu3 %v10325_v57  ;;  %v14234_v52 = vld [vmem:[%s18128_s9 + $0x7cc] sm:$0xf]  ;;  %v10773_v57 = vor.u32 %v14202_v50, %v10770_v51  ;;  %v10466_v28 = vld [vmem:[%s18128_s9 + $0x478] sm:$0xf0]  ;;  %v10869_v38 = vor.u32 %v14226_v15, %v10866_v33 }
 0x235   : > { %5182 = vmatpush.bf16.msra.mxu0 %v9925_v63  ;;  %5195 = vmatpush.bf16.msra.mxu1 %v10053_v1  ;;  %v10901_v62 = vor.u32 %v14234_v52, %v10898_v53  ;;  %v14198_v63 = vld [vmem:[%s18128_s9 + $0x6ac] sm:$0xf]  ;;  %v10882_v1 = vld [vmem:[%s18128_s9 + $0x7b8] sm:$0xf0]  ;;  %v10469_v46 = vor.u32 %v14126_v27, %v10466_v28 }
 0x236   : > { %v14158_v32 = vld [vmem:[%s18128_s9 + $0x56c] sm:$0xf]  ;;  %v10594_v40 = vld [vmem:[%s18128_s9 + $0x578] sm:$0xf0] }
 0x237   : > { %v10597_v47 = vor.u32 %v14158_v32, %v10594_v40  ;;  %v14122_v49 = vld [vmem:[%s18128_s9 + $0x44c] sm:$0xf]  ;;  %v10450_v50 = vld [vmem:[%s18128_s9 + $0x458] sm:$0xf0] }
 0x238   : > { %5208 = vmatpush.bf16.msra.mxu2 %v10181_v3  ;;  %5221 = vmatpush.bf16.msra.mxu3 %v10309_v8  ;;  %v10501_v3 = vor.u32 %v14134_v59, %v10498_v60  ;;  %v14162_v8 = vld [vmem:[%s18128_s9 + $0x58c] sm:$0xf]  ;;  %v10453_v2 = vor.u32 %v14122_v49, %v10450_v50  ;;  %v10418_v15 = vld [vmem:[%s18128_s9 + $0x418] sm:$0xf0] }
 0x239   : > { %5183 = vmatpush.bf16.msra.mxu0 %v9909_v23  ;;  %5196 = vmatpush.bf16.msra.mxu1 %v10037_v34  ;;  %v10613_v22 = vor.u32 %v14162_v8, %v10610_v11  ;;  %v10741_v23 = vor.u32 %v14194_v12, %v10738_v14  ;;  %v14154_v51 = vld [vmem:[%s18128_s9 + $0x54c] sm:$0xf]  ;;  %v10562_v8 = vld [vmem:[%s18128_s9 + $0x538] sm:$0xf0] }
 0x23a   : > { %v14218_v61 = vld [vmem:[%s18128_s9 + $0x74c] sm:$0xf]  ;;  %v10818_v11 = vld [vmem:[%s18128_s9 + $0x738] sm:$0xf0] }
 0x23b   : > { %v4977_v20 = vpop.f32.mrf.mxu0  ;;  %v14114_v14 = vld [vmem:[%s18128_s9 + $0x40c] sm:$0xf]  ;;  %v10674_v32 = vld [vmem:[%s18128_s9 + $0x618] sm:$0xf0] }
 0x23c   : > { %5209 = vmatpush.bf16.msra.mxu2 %v10165_v37  ;;  %5222 = vmatpush.bf16.msra.mxu3 %v10293_v42  ;;  %v4990_v37 = vpop.f32.mrf.mxu1  ;;  %v14190_v42 = vld [vmem:[%s18128_s9 + $0x66c] sm:$0xf]  ;;  %v11426_v50 = vld [vmem:[%s18128_s9 + $0xbf8] sm:$0xf0] }
 0x23d   : > { %5228 = vmatpush.bf16.msrb.mxu0 %v10533_v13  ;;  %5241 = vmatpush.bf16.msrb.mxu1 %v10661_v43  ;;  %v10722_v13 = vld [vmem:[%s18128_s9 + $0x678] sm:$0xf0]  ;;  %v14222_v43 = vld [vmem:[%s18128_s9 + $0x76c] sm:$0xf] }
 0x23e   : > { %5184 = vmatmul.bf16.vlgmr.msra.gmra.mxu0 %v15794_v17  ;;  %5197 = vmatmul.bf16.vlgmr.msra.gmra.mxu1 %v15806_v30  ;;  %v4546_v17 = vperm.slane %v15120_v9, 2  ;;  %v10485_v30 = vor.u32 %v14130_v5, %v10482_v7  ;;  %v10434_v5 = vld [vmem:[%s18128_s9 + $0x438] sm:$0xf0]  ;;  %v14182_v9 = vld [vmem:[%s18128_s9 + $0x62c] sm:$0xf] }
 0x23f   : > { %5210 = vmatmul.bf16.vlgmr.msra.gmra.mxu2 %v15792_v16  ;;  %5223 = vmatmul.bf16.vlgmr.msra.gmra.mxu3 %v15796_v18  ;;  %v10757_v16 = vor.u32 %v14198_v63, %v10754_v0  ;;  %v10885_v18 = vor.u32 %v14230_v10, %v10882_v1  ;;  %v14270_v40 = vld [vmem:[%s18128_s9 + $0x8ec] sm:$0xf] }
 0x240   : > { %5254 = vmatpush.bf16.msrb.mxu2 %v10789_v44  ;;  %5267 = vmatpush.bf16.msrb.mxu3 %v10917_v48  ;;  %v4978_v34 = vadd.f32 %v4977_v20, %v4546_v17  ;;  %v10850_v44 = vld [vmem:[%s18128_s9 + $0x778] sm:$0xf0]  ;;  %v10725_v48 = vor.u32 %v14190_v42, %v10722_v13  ;;  %v14146_v20 = vld [vmem:[%s18128_s9 + $0x50c] sm:$0xf] }
 0x241   : > { %5229 = vmatpush.bf16.msrb.mxu0 %v10517_v55  ;;  %5242 = vmatpush.bf16.msrb.mxu1 %v10645_v56  ;;  %v10853_v53 = vor.u32 %v14222_v43, %v10850_v44  ;;  %v10578_v55 = vld [vmem:[%s18128_s9 + $0x558] sm:$0xf0]  ;;  %v14186_v56 = vld [vmem:[%s18128_s9 + $0x64c] sm:$0xf]  ;;  %v10421_v43 = vor.u32 %v14114_v14, %v10418_v15 }
 0x242   : > { %v4991_v45 = vadd.f32 %v4990_v37, %v4978_v34  ;;  %v5003_v52 = vpop.f32.mrf.mxu2  ;;  %v5016_v60 = vpop.f32.mrf.mxu3  ;;  %v10581_v10 = vor.u32 %v14154_v51, %v10578_v55  ;;  %v10690_v17 = vld [vmem:[%s18128_s9 + $0x638] sm:$0xf0]  ;;  %v14210_v34 = vld [vmem:[%s18128_s9 + $0x70c] sm:$0xf] }
 0x243   : > { %v4979_v0 = vpop.f32.mrf.mxu0  ;;  %v10802_v37 = vld [vmem:[%s18128_s9 + $0x718] sm:$0xf0]  ;;  %v14302_v13 = vld [vmem:[%s18128_s9 + $0x9ec] sm:$0xf] }
 0x244   : > { %5255 = vmatpush.bf16.msrb.mxu2 %v10773_v57  ;;  %5268 = vmatpush.bf16.msrb.mxu3 %v10901_v62  ;;  %v10706_v57 = vld [vmem:[%s18128_s9 + $0x658] sm:$0xf0]  ;;  %v5004_v59 = vadd.f32 %v5003_v52, %v4991_v45  ;;  %v14334_v45 = vld [vmem:[%s18128_s9 + $0xaec] sm:$0xf]  ;;  %v10805_v51 = vor.u32 %v14210_v34, %v10802_v37 }
 0x245   : > { %5230 = vmatpush.bf16.msrb.mxu0 %v10501_v3  ;;  %5243 = vmatpush.bf16.msrb.mxu1 %v10629_v6  ;;  %v10834_v62 = vld [vmem:[%s18128_s9 + $0x758] sm:$0xf0]  ;;  %v10709_v1 = vor.u32 %v14186_v56, %v10706_v57  ;;  %v14118_v3 = vld [vmem:[%s18128_s9 + $0x42c] sm:$0xf] }
 0x246   : > { %v16701_v63 = vadd.f32 %v5016_v60, %v5004_v59  ;;  %v14150_v6 = vld [vmem:[%s18128_s9 + $0x52c] sm:$0xf]  ;;  %v10837_v7 = vor.u32 %v14218_v61, %v10834_v62  ;;  %v10437_v12 = vor.u32 %v14118_v3, %v10434_v5  ;;  %v11042_v42 = vld [vmem:[%s18128_s9 + $0x8f8] sm:$0xf0] }
 0x247   : > { %v10565_v33 = vor.u32 %v14150_v6, %v10562_v8  ;;  %v11170_v44 = vld [vmem:[%s18128_s9 + $0x9f8] sm:$0xf0]  ;;  %v14366_v49 = vld [vmem:[%s18128_s9 + $0xbec] sm:$0xf]  ;;  %v11045_v52 = vor.u32 %v14270_v40, %v11042_v42 }
 0x248   : > { %5256 = vmatpush.bf16.msrb.mxu2 %v10757_v16  ;;  %5269 = vmatpush.bf16.msrb.mxu3 %v10885_v18  ;;  %v4992_v16 = vpop.f32.mrf.mxu1  ;;  %v14214_v18 = vld [vmem:[%s18128_s9 + $0x72c] sm:$0xf]  ;;  %v11026_v57 = vld [vmem:[%s18128_s9 + $0x8d8] sm:$0xf0]  ;;  %v11429_v60 = vor.u32 %v14366_v49, %v11426_v50 }
 0x249   : > { %5231 = vmatpush.bf16.msrb.mxu0 %v10485_v30  ;;  %5244 = vmatpush.bf16.msrb.mxu1 %v10613_v22  ;;  %v10693_v30 = vor.u32 %v14182_v9, %v10690_v17  ;;  %v10546_v22 = vld [vmem:[%s18128_s9 + $0x518] sm:$0xf0]  ;;  %v10821_v28 = vor.u32 %v14214_v18, %v10818_v11  ;;  %v14266_v56 = vld [vmem:[%s18128_s9 + $0x8cc] sm:$0xf] }
 0x24a   : > { %v5005_v27 = vpop.f32.mrf.mxu2  ;;  %v14298_v59 = vld [vmem:[%s18128_s9 + $0x9cc] sm:$0xf]  ;;  %v11154_v61 = vld [vmem:[%s18128_s9 + $0x9d8] sm:$0xf0] }
 0x24b   : > { %v14330_v62 = vld [vmem:[%s18128_s9 + $0xacc] sm:$0xf]  ;;  %v11157_v3 = vor.u32 %v14298_v59, %v11154_v61  ;;  %v11010_v16 = vld [vmem:[%s18128_s9 + $0x8b8] sm:$0xf0] }
 0x24c   : > { %5257 = vmatpush.bf16.msrb.mxu2 %v10741_v23  ;;  %5270 = vmatpush.bf16.msrb.mxu3 %v10869_v38  ;;  %v14178_v23 = vld [vmem:[%s18128_s9 + $0x60c] sm:$0xf]  ;;  %v5018_v38 = vpop.f32.mrf.mxu3  ;;  %v11138_v9 = vld [vmem:[%s18128_s9 + $0x9b8] sm:$0xf0] }
 0x24d   : > { %5232 = vmatpush.bf16.msrb.mxu0 %v10469_v46  ;;  %5245 = vmatpush.bf16.msrb.mxu1 %v10597_v47  ;;  %v11298_v46 = vld [vmem:[%s18128_s9 + $0xaf8] sm:$0xf0]  ;;  %v10549_v47 = vor.u32 %v14146_v20, %v10546_v22  ;;  %v14362_v0 = vld [vmem:[%s18128_s9 + $0xbcc] sm:$0xf] }
 0x24e   : > { %v11301_v55 = vor.u32 %v14334_v45, %v11298_v46  ;;  %v14262_v6 = vld [vmem:[%s18128_s9 + $0x8ac] sm:$0xf]  ;;  %v11266_v18 = vld [vmem:[%s18128_s9 + $0xab8] sm:$0xf0] }
 0x24f   : > { %v14326_v17 = vld [vmem:[%s18128_s9 + $0xaac] sm:$0xf]  ;;  %v11013_v14 = vor.u32 %v14262_v6, %v11010_v16  ;;  %v11122_v22 = vld [vmem:[%s18128_s9 + $0x998] sm:$0xf0] }
 0x250   : > { %5258 = vmatpush.bf16.msrb.mxu2 %v10725_v48  ;;  %5271 = vmatpush.bf16.msrb.mxu3 %v10853_v53  ;;  %v10677_v48 = vor.u32 %v14178_v23, %v10674_v32  ;;  %v11173_v53 = vor.u32 %v14302_v13, %v11170_v44  ;;  %v14358_v11 = vld [vmem:[%s18128_s9 + $0xbac] sm:$0xf]  ;;  %v11269_v15 = vor.u32 %v14326_v17, %v11266_v18  ;;  %v11250_v23 = vld [vmem:[%s18128_s9 + $0xa98] sm:$0xf0] }
 0x251   : > { %5233 = vmatpush.bf16.msrb.mxu0 %v10453_v2  ;;  %5246 = vmatpush.bf16.msrb.mxu1 %v10581_v10  ;;  %v11282_v2 = vld [vmem:[%s18128_s9 + $0xad8] sm:$0xf0]  ;;  %v14290_v20 = vld [vmem:[%s18128_s9 + $0x98c] sm:$0xf] }
 0x252   : > { %v11410_v10 = vld [vmem:[%s18128_s9 + $0xbd8] sm:$0xf0]  ;;  %v11285_v5 = vor.u32 %v14330_v62, %v11282_v2  ;;  %v14354_v27 = vld [vmem:[%s18128_s9 + $0xb8c] sm:$0xf]  ;;  %v11125_v34 = vor.u32 %v14290_v20, %v11122_v22 }
 0x253   : > { %v11413_v8 = vor.u32 %v14362_v0, %v11410_v10  ;;  %v14254_v38 = vld [vmem:[%s18128_s9 + $0x86c] sm:$0xf]  ;;  %v10978_v40 = vld [vmem:[%s18128_s9 + $0x878] sm:$0xf0] }
 0x254   : > { %5259 = vmatpush.bf16.msrb.mxu2 %v10709_v1  ;;  %5272 = vmatpush.bf16.msrb.mxu3 %v10837_v7  ;;  %v11029_v1 = vor.u32 %v14266_v56, %v11026_v57  ;;  %v14294_v7 = vld [vmem:[%s18128_s9 + $0x9ac] sm:$0xf]  ;;  %v11106_v44 = vld [vmem:[%s18128_s9 + $0x978] sm:$0xf0]  ;;  %v10981_v49 = vor.u32 %v14254_v38, %v10978_v40 }
 0x255   : > { %5234 = vmatpush.bf16.msrb.mxu0 %v10437_v12  ;;  %5247 = vmatpush.bf16.msrb.mxu1 %v10565_v33  ;;  %v11394_v12 = vld [vmem:[%s18128_s9 + $0xbb8] sm:$0xf0]  ;;  %v14258_v33 = vld [vmem:[%s18128_s9 + $0x88c] sm:$0xf] }
 0x256   : > { %v14286_v42 = vld [vmem:[%s18128_s9 + $0x96c] sm:$0xf]  ;;  %v11234_v46 = vld [vmem:[%s18128_s9 + $0xa78] sm:$0xf0] }
 0x257   : > { %v14318_v45 = vld [vmem:[%s18128_s9 + $0xa6c] sm:$0xf]  ;;  %v11109_v50 = vor.u32 %v14286_v42, %v11106_v44  ;;  %v11090_v59 = vld [vmem:[%s18128_s9 + $0x958] sm:$0xf0] }
 0x258   : > { %5260 = vmatpush.bf16.msrb.mxu2 %v10693_v30  ;;  %5273 = vmatpush.bf16.msrb.mxu3 %v10821_v28  ;;  %v10994_v30 = vld [vmem:[%s18128_s9 + $0x898] sm:$0xf0]  ;;  %v14346_v2 = vld [vmem:[%s18128_s9 + $0xb4c] sm:$0xf] }
 0x259   : > { %5235 = vmatpush.bf16.msrb.mxu0 %v10421_v43  ;;  %5248 = vmatpush.bf16.msrb.mxu1 %v10549_v47  ;;  %v11378_v28 = vld [vmem:[%s18128_s9 + $0xb98] sm:$0xf0]  ;;  %v14350_v47 = vld [vmem:[%s18128_s9 + $0xb6c] sm:$0xf] }
 0x25a   : > { %v11381_v43 = vor.u32 %v14354_v27, %v11378_v28  ;;  %v11218_v61 = vld [vmem:[%s18128_s9 + $0xa58] sm:$0xf0]  ;;  %v14246_v6 = vld [vmem:[%s18128_s9 + $0x82c] sm:$0xf] }
 0x25b   : > { %v16755_v32 = vpop.f32.mrf.mxu0  ;;  %v16760_v13 = vpop.f32.mrf.mxu1  ;;  %v11346_v0 = vld [vmem:[%s18128_s9 + $0xb58] sm:$0xf0]  ;;  %v14310_v18 = vld [vmem:[%s18128_s9 + $0xa2c] sm:$0xf] }
 0x25c   : > { %5261 = vmatpush.bf16.msrb.mxu2 %v10677_v48  ;;  %5274 = vmatpush.bf16.msrb.mxu3 %v10805_v51  ;;  %v11362_v48 = vld [vmem:[%s18128_s9 + $0xb78] sm:$0xf0]  ;;  %v11237_v51 = vor.u32 %v14318_v45, %v11234_v46  ;;  %v14398_v38 = vld [vmem:[%s18128_s9 + $0xcec] sm:$0xf] }
 0x25d   : > { %5280 = vmatpush.bf16.msra.mxu0 %v11045_v52  ;;  %5293 = vmatpush.bf16.msra.mxu1 %v11173_v53  ;;  %v14250_v52 = vld [vmem:[%s18128_s9 + $0x84c] sm:$0xf]  ;;  %v10962_v53 = vld [vmem:[%s18128_s9 + $0x858] sm:$0xf0]  ;;  %v11365_v57 = vor.u32 %v14350_v47, %v11362_v48 }
 0x25e   : > { %5236 = vmatmul.bf16.vlgmr.msrb.gmra.mxu0 %v15859_v4  ;;  %5249 = vmatmul.bf16.vlgmr.msrb.gmra.mxu1 %v15863_v41  ;;  %v11397_v4 = vor.u32 %v14358_v11, %v11394_v12  ;;  %v10997_v41 = vor.u32 %v14258_v33, %v10994_v30  ;;  %v10965_v10 = vor.u32 %v14250_v52, %v10962_v53  ;;  %v10946_v16 = vld [vmem:[%s18128_s9 + $0x838] sm:$0xf0]  ;;  %v14342_v12 = vld [vmem:[%s18128_s9 + $0xb2c] sm:$0xf] }
 0x25f   : > { %5262 = vmatmul.bf16.vlgmr.msrb.gmra.mxu2 %v15855_v36  ;;  %5275 = vmatmul.bf16.vlgmr.msrb.gmra.mxu3 %v15861_v39  ;;  %v11141_v36 = vor.u32 %v14294_v7, %v11138_v9  ;;  %v14322_v39 = vld [vmem:[%s18128_s9 + $0xa8c] sm:$0xf]  ;;  %v11349_v9 = vor.u32 %v14346_v2, %v11346_v0  ;;  %v11074_v17 = vld [vmem:[%s18128_s9 + $0x938] sm:$0xf0] }
 0x260   : > { %5306 = vmatpush.bf16.msra.mxu2 %v11301_v55  ;;  %5319 = vmatpush.bf16.msra.mxu3 %v11429_v60  ;;  %v11253_v37 = vor.u32 %v14322_v39, %v11250_v23  ;;  %v14282_v55 = vld [vmem:[%s18128_s9 + $0x94c] sm:$0xf]  ;;  %v11202_v11 = vld [vmem:[%s18128_s9 + $0xa38] sm:$0xf0] }
 0x261   : > { %5281 = vmatpush.bf16.msra.mxu0 %v11029_v1  ;;  %5294 = vmatpush.bf16.msra.mxu1 %v11157_v3  ;;  %v14314_v60 = vld [vmem:[%s18128_s9 + $0xa4c] sm:$0xf]  ;;  %v11093_v3 = vor.u32 %v14282_v55, %v11090_v59  ;;  %v10930_v33 = vld [vmem:[%s18128_s9 + $0x818] sm:$0xf0]  ;;  %v11205_v20 = vor.u32 %v14310_v18, %v11202_v11 }
 0x262   : > { %v16770_v56 = vpop.f32.mrf.mxu2  ;;  %v16775_v62 = vpop.f32.mrf.mxu3  ;;  %v14278_v7 = vld [vmem:[%s18128_s9 + $0x92c] sm:$0xf]  ;;  %v11058_v22 = vld [vmem:[%s18128_s9 + $0x918] sm:$0xf0] }
 0x263   : > { %v5031_v1 = vpop.f32.mrf.mxu0  ;;  %v11077_v30 = vor.u32 %v14278_v7, %v11074_v17  ;;  %v14306_v39 = vld [vmem:[%s18128_s9 + $0xa0c] sm:$0xf]  ;;  %v11186_v28 = vld [vmem:[%s18128_s9 + $0xa18] sm:$0xf0] }
 0x264   : > { %5307 = vmatpush.bf16.msra.mxu2 %v11285_v5  ;;  %5320 = vmatpush.bf16.msra.mxu3 %v11413_v8  ;;  %v11221_v5 = vor.u32 %v14314_v60, %v11218_v61  ;;  %v5044_v8 = vpop.f32.mrf.mxu1  ;;  %v11554_v40 = vld [vmem:[%s18128_s9 + $0xcf8] sm:$0xf0]  ;;  %v14430_v42 = vld [vmem:[%s18128_s9 + $0xdec] sm:$0xf]  ;;  %v11189_v48 = vor.u32 %v14306_v39, %v11186_v28 }
 0x265   : > { %5282 = vmatpush.bf16.msra.mxu0 %v11013_v14  ;;  %5295 = vmatpush.bf16.msra.mxu1 %v11141_v36  ;;  %v11330_v14 = vld [vmem:[%s18128_s9 + $0xb38] sm:$0xf0]  ;;  %v10949_v36 = vor.u32 %v14246_v6, %v10946_v16  ;;  %v14462_v45 = vld [vmem:[%s18128_s9 + $0xeec] sm:$0xf]  ;;  %v11557_v52 = vor.u32 %v14398_v38, %v11554_v40 }
 0x266   : > { %v11333_v27 = vor.u32 %v14342_v12, %v11330_v14  ;;  %v11682_v44 = vld [vmem:[%s18128_s9 + $0xdf8] sm:$0xf0]  ;;  %v14426_v60 = vld [vmem:[%s18128_s9 + $0xdcc] sm:$0xf] }
 0x267   : > { %v11810_v46 = vld [vmem:[%s18128_s9 + $0xef8] sm:$0xf0]  ;;  %v11685_v53 = vor.u32 %v14430_v42, %v11682_v44  ;;  %v14458_v0 = vld [vmem:[%s18128_s9 + $0xecc] sm:$0xf] }
 0x268   : > { %5308 = vmatpush.bf16.msra.mxu2 %v11269_v15  ;;  %5321 = vmatpush.bf16.msra.mxu3 %v11397_v4  ;;  %v14242_v15 = vld [vmem:[%s18128_s9 + $0x80c] sm:$0xf]  ;;  %v11813_v55 = vor.u32 %v14462_v45, %v11810_v46  ;;  %v11538_v59 = vld [vmem:[%s18128_s9 + $0xcd8] sm:$0xf0] }
 0x269   : > { %5283 = vmatpush.bf16.msra.mxu0 %v10997_v41  ;;  %5296 = vmatpush.bf16.msra.mxu1 %v11125_v34  ;;  %v14274_v4 = vld [vmem:[%s18128_s9 + $0x90c] sm:$0xf]  ;;  %v11314_v34 = vld [vmem:[%s18128_s9 + $0xb18] sm:$0xf0] }
 0x26a   : > { %v5057_v23 = vpop.f32.mrf.mxu2  ;;  %v14338_v41 = vld [vmem:[%s18128_s9 + $0xb0c] sm:$0xf]  ;;  %v11061_v47 = vor.u32 %v14274_v4, %v11058_v22  ;;  %v11666_v2 = vld [vmem:[%s18128_s9 + $0xdd8] sm:$0xf0] }
 0x26b   : > { %v14490_v1 = vld [vmem:[%s18128_s9 + $0xfcc] sm:$0xf]  ;;  %v11669_v6 = vor.u32 %v14426_v60, %v11666_v2  ;;  %v11522_v8 = vld [vmem:[%s18128_s9 + $0xcb8] sm:$0xf0] }
 0x26c   : > { %5309 = vmatpush.bf16.msra.mxu2 %v11253_v37  ;;  %5322 = vmatpush.bf16.msra.mxu3 %v11381_v43  ;;  %v5070_v37 = vpop.f32.mrf.mxu3  ;;  %v10933_v43 = vor.u32 %v14242_v15, %v10930_v33  ;;  %v14390_v7 = vld [vmem:[%s18128_s9 + $0xcac] sm:$0xf]  ;;  %v11650_v18 = vld [vmem:[%s18128_s9 + $0xdb8] sm:$0xf0] }
 0x26d   : > { %5284 = vmatpush.bf16.msra.mxu0 %v10981_v49  ;;  %5297 = vmatpush.bf16.msra.mxu1 %v11109_v50  ;;  %v14494_v49 = vld [vmem:[%s18128_s9 + $0xfec] sm:$0xf]  ;;  %v11938_v50 = vld [vmem:[%s18128_s9 + $0xff8] sm:$0xf0] }
 0x26e   : > { %v11941_v61 = vor.u32 %v14494_v49, %v11938_v50  ;;  %v14454_v11 = vld [vmem:[%s18128_s9 + $0xeac] sm:$0xf]  ;;  %v11778_v12 = vld [vmem:[%s18128_s9 + $0xeb8] sm:$0xf0] }
 0x26f   : > { %v14486_v14 = vld [vmem:[%s18128_s9 + $0xfac] sm:$0xf]  ;;  %v11781_v33 = vor.u32 %v14454_v11, %v11778_v12  ;;  %v11634_v4 = vld [vmem:[%s18128_s9 + $0xd98] sm:$0xf0] }
 0x270   : > { %5310 = vmatpush.bf16.msra.mxu2 %v11237_v51  ;;  %5323 = vmatpush.bf16.msra.mxu3 %v11365_v57  ;;  %v11317_v51 = vor.u32 %v14338_v41, %v11314_v34  ;;  %v14394_v57 = vld [vmem:[%s18128_s9 + $0xccc] sm:$0xf]  ;;  %v11762_v39 = vld [vmem:[%s18128_s9 + $0xe98] sm:$0xf0] }
 0x271   : > { %5285 = vmatpush.bf16.msra.mxu0 %v10965_v10  ;;  %5298 = vmatpush.bf16.msra.mxu1 %v11093_v3  ;;  %v11794_v10 = vld [vmem:[%s18128_s9 + $0xed8] sm:$0xf0]  ;;  %v14450_v22 = vld [vmem:[%s18128_s9 + $0xe8c] sm:$0xf] }
 0x272   : > { %v11922_v3 = vld [vmem:[%s18128_s9 + $0xfd8] sm:$0xf0]  ;;  %v11797_v16 = vor.u32 %v14458_v0, %v11794_v10  ;;  %v14482_v23 = vld [vmem:[%s18128_s9 + $0xf8c] sm:$0xf]  ;;  %v11765_v37 = vor.u32 %v14450_v22, %v11762_v39 }
 0x273   : > { %v11925_v17 = vor.u32 %v14490_v1, %v11922_v3  ;;  %v14382_v38 = vld [vmem:[%s18128_s9 + $0xc6c] sm:$0xf]  ;;  %v11490_v40 = vld [vmem:[%s18128_s9 + $0xc78] sm:$0xf0] }
 0x274   : > { %5311 = vmatpush.bf16.msra.mxu2 %v11221_v5  ;;  %5324 = vmatpush.bf16.msra.mxu3 %v11349_v9  ;;  %v11541_v5 = vor.u32 %v14394_v57, %v11538_v59  ;;  %v14422_v9 = vld [vmem:[%s18128_s9 + $0xdac] sm:$0xf]  ;;  %v11618_v44 = vld [vmem:[%s18128_s9 + $0xd78] sm:$0xf0]  ;;  %v11493_v49 = vor.u32 %v14382_v38, %v11490_v40  ;;  %v12784_v38 = vld [vmem:[%s15357_s17 + $0x690] sm:$0xf] }
 0x275   : > { %5286 = vmatpush.bf16.msra.mxu0 %v10949_v36  ;;  %5299 = vmatpush.bf16.msra.mxu1 %v11077_v30  ;;  %v11906_v36 = vld [vmem:[%s18128_s9 + $0xfb8] sm:$0xf0]  ;;  %v11653_v15 = vor.u32 %v14422_v9, %v11650_v18  ;;  %v14386_v30 = vld [vmem:[%s18128_s9 + $0xc8c] sm:$0xf] }
 0x276   : > { %v14414_v42 = vld [vmem:[%s18128_s9 + $0xd6c] sm:$0xf]  ;;  %v11746_v46 = vld [vmem:[%s18128_s9 + $0xe78] sm:$0xf0] }
 0x277   : > { %v14446_v45 = vld [vmem:[%s18128_s9 + $0xe6c] sm:$0xf]  ;;  %v11621_v50 = vor.u32 %v14414_v42, %v11618_v44  ;;  %v11602_v60 = vld [vmem:[%s18128_s9 + $0xd58] sm:$0xf0]  ;;  %v14714_v44 = vld [vmem:[%s15357_s17 + $0x6c4] sm:$0xf0] }
 0x278   : > { %5312 = vmatpush.bf16.msra.mxu2 %v11205_v20  ;;  %5325 = vmatpush.bf16.msra.mxu3 %v11333_v27  ;;  %v11506_v20 = vld [vmem:[%s18128_s9 + $0xc98] sm:$0xf0]  ;;  %v14474_v10 = vld [vmem:[%s18128_s9 + $0xf4c] sm:$0xf] }
 0x279   : > { %5287 = vmatpush.bf16.msra.mxu0 %v10933_v43  ;;  %5300 = vmatpush.bf16.msra.mxu1 %v11061_v47  ;;  %v11890_v27 = vld [vmem:[%s18128_s9 + $0xf98] sm:$0xf0]  ;;  %v11509_v28 = vor.u32 %v14386_v30, %v11506_v20  ;;  %v14478_v47 = vld [vmem:[%s18128_s9 + $0xf6c] sm:$0xf] }
 0x27a   : > { %v11893_v43 = vor.u32 %v14482_v23, %v11890_v27  ;;  %v11730_v2 = vld [vmem:[%s18128_s9 + $0xe58] sm:$0xf0]  ;;  %v14374_v9 = vld [vmem:[%s18128_s9 + $0xc2c] sm:$0xf] }
 0x27b   : > { %v16833_v41 = vpop.f32.mrf.mxu1  ;;  %v11858_v1 = vld [vmem:[%s18128_s9 + $0xf58] sm:$0xf0]  ;;  %v14406_v18 = vld [vmem:[%s18128_s9 + $0xd2c] sm:$0xf] }
 0x27c   : > { %5313 = vmatpush.bf16.msra.mxu2 %v11189_v48  ;;  %5326 = vmatpush.bf16.msra.mxu3 %v11317_v51  ;;  %v11874_v48 = vld [vmem:[%s18128_s9 + $0xf78] sm:$0xf0]  ;;  %v11749_v51 = vor.u32 %v14446_v45, %v11746_v46  ;;  %v11861_v11 = vor.u32 %v14474_v10, %v11858_v1  ;;  %v14434_v22 = vld [vmem:[%s18128_s9 + $0xe0c] sm:$0xf]  ;;  %v13232_v45 = vld [vmem:[%s15357_s17 + $0xa10] sm:$0xf] }
 0x27d   : > { %5332 = vmatpush.bf16.msrb.mxu0 %v11557_v52  ;;  %5345 = vmatpush.bf16.msrb.mxu1 %v11685_v53  ;;  %v14378_v52 = vld [vmem:[%s18128_s9 + $0xc4c] sm:$0xf]  ;;  %v11474_v53 = vld [vmem:[%s18128_s9 + $0xc58] sm:$0xf0]  ;;  %v11877_v57 = vor.u32 %v14478_v47, %v11874_v48  ;;  %v14826_v46 = vld [vmem:[%s15357_s17 + $0xa44] sm:$0xf0] }
 0x27e   : > { %5288 = vmatmul.bf16.vlgmr.msra.gmra.mxu0 %v15935_v21  ;;  %5301 = vmatmul.bf16.vlgmr.msra.gmra.mxu1 %v15942_v26  ;;  %v11525_v21 = vor.u32 %v14390_v7, %v11522_v8  ;;  %v11909_v26 = vor.u32 %v14486_v14, %v11906_v36  ;;  %v11586_v12 = vld [vmem:[%s18128_s9 + $0xd38] sm:$0xf0]  ;;  %v14470_v14 = vld [vmem:[%s18128_s9 + $0xf2c] sm:$0xf] }
 0x27f   : > { %5314 = vmatmul.bf16.vlgmr.msra.gmra.mxu2 %v15940_v25  ;;  %5327 = vmatmul.bf16.vlgmr.msra.gmra.mxu3 %v15946_v29  ;;  %v14418_v25 = vld [vmem:[%s18128_s9 + $0xd8c] sm:$0xf]  ;;  %v16829_v29 = vpop.f32.mrf.mxu0  ;;  %v11842_v36 = vld [vmem:[%s18128_s9 + $0xf38] sm:$0xf0]  ;;  %v11589_v20 = vor.u32 %v14406_v18, %v11586_v12  ;;  %v12616_v12 = vld [vmem:[%s15357_s17 + $0x540] sm:$0xf] }
 0x280   : > { %5358 = vmatpush.bf16.msrb.mxu2 %v11813_v55  ;;  %5371 = vmatpush.bf16.msrb.mxu3 %v11941_v61  ;;  %v11637_v34 = vor.u32 %v14418_v25, %v11634_v4  ;;  %v14410_v55 = vld [vmem:[%s18128_s9 + $0xd4c] sm:$0xf]  ;;  %v11442_v30 = vld [vmem:[%s18128_s9 + $0xc18] sm:$0xf0] }
 0x281   : > { %5333 = vmatpush.bf16.msrb.mxu0 %v11541_v5  ;;  %5346 = vmatpush.bf16.msrb.mxu1 %v11669_v6  ;;  %v14442_v61 = vld [vmem:[%s18128_s9 + $0xe4c] sm:$0xf]  ;;  %v5030_v5 = vadd.f32 %v16755_v32, %v16701_v63  ;;  %v11477_v6 = vor.u32 %v14378_v52, %v11474_v53  ;;  %v11605_v7 = vor.u32 %v14410_v55, %v11602_v60  ;;  %v11714_v32 = vld [vmem:[%s18128_s9 + $0xe38] sm:$0xf0]  ;;  %v14588_v53 = vld [vmem:[%s15357_s17 + $0x2d4] sm:$0xf0] }
 0x282   : > { %v16846_v59 = vpop.f32.mrf.mxu2  ;;  %v16851_v0 = vpop.f32.mrf.mxu3  ;;  %v11733_v8 = vor.u32 %v14442_v61, %v11730_v2  ;;  %v14438_v63 = vld [vmem:[%s18128_s9 + $0xe2c] sm:$0xf]  ;;  %v11570_v4 = vld [vmem:[%s18128_s9 + $0xd18] sm:$0xf0]  ;;  %v13233_v52 = vor.u32 %v14826_v46, %v13232_v45  ;;  %v12728_v55 = vld [vmem:[%s15357_s17 + $0x620] sm:$0xf] }
 0x283   : > { %v11717_v25 = vor.u32 %v14438_v63, %v11714_v32  ;;  %v11698_v39 = vld [vmem:[%s18128_s9 + $0xe18] sm:$0xf0]  ;;  %v14466_v23 = vld [vmem:[%s18128_s9 + $0xf0c] sm:$0xf]  ;;  %v14700_v60 = vld [vmem:[%s15357_s17 + $0x654] sm:$0xf0] }
 0x284   : > { %5359 = vmatpush.bf16.msrb.mxu2 %v11797_v16  ;;  %5372 = vmatpush.bf16.msrb.mxu3 %v11925_v17  ;;  %v5096_v16 = vpop.f32.mrf.mxu1  ;;  %v11458_v17 = vld [vmem:[%s18128_s9 + $0xc38] sm:$0xf0]  ;;  %v11701_v48 = vor.u32 %v14434_v22, %v11698_v39  ;;  %v13176_v61 = vld [vmem:[%s15357_s17 + $0x9a0] sm:$0xf]  ;;  %v14812_v2 = vld [vmem:[%s15357_s17 + $0x9d4] sm:$0xf0] }
 0x285   : > { %5334 = vmatpush.bf16.msrb.mxu0 %v11525_v21  ;;  %5347 = vmatpush.bf16.msrb.mxu1 %v11653_v15  ;;  %v5043_v21 = vadd.f32 %v16760_v13, %v5030_v5  ;;  %v11461_v15 = vor.u32 %v14374_v9, %v11458_v17  ;;  %v11845_v13 = vor.u32 %v14470_v14, %v11842_v36  ;;  %v11826_v27 = vld [vmem:[%s18128_s9 + $0xf18] sm:$0xf0]  ;;  %v12224_v5 = vld [vmem:[%s15357_s17 + $0x230] sm:$0xf] }
 0x286   : > { %v12672_v16 = vld [vmem:[%s15357_s17 + $0x5b0] sm:$0xf] }
 0x287   : > { %v5083_v3 = vpop.f32.mrf.mxu0  ;;  %v5056_v42 = vadd.f32 %v16770_v56, %v5043_v21  ;;  %v12280_v56 = vld [vmem:[%s15357_s17 + $0x2a0] sm:$0xf] }
 0x288   : > { %5360 = vmatpush.bf16.msrb.mxu2 %v11781_v33  ;;  %5373 = vmatpush.bf16.msrb.mxu3 %v11909_v26  ;;  %v14370_v33 = vld [vmem:[%s18128_s9 + $0xc0c] sm:$0xf]  ;;  %v12281_v1 = vor.u32 %v14588_v53, %v12280_v56  ;;  %v12729_v3 = vor.u32 %v14700_v60, %v12728_v55  ;;  %v14630_v56 = vld [vmem:[%s15357_s17 + $0x424] sm:$0xf0]  ;;  %v12896_v53 = vld [vmem:[%s15357_s17 + $0x770] sm:$0xf] }
 0x289   : > { %5335 = vmatpush.bf16.msrb.mxu0 %v11509_v28  ;;  %5348 = vmatpush.bf16.msrb.mxu1 %v11637_v34  ;;  %v14402_v26 = vld [vmem:[%s18128_s9 + $0xd0c] sm:$0xf]  ;;  %v12336_v34 = vld [vmem:[%s15357_s17 + $0x310] sm:$0xf]  ;;  %v14742_v55 = vld [vmem:[%s15357_s17 + $0x7a4] sm:$0xf0] }
 0x28a   : > { %v5109_v28 = vpop.f32.mrf.mxu2  ;;  %v5122_v40 = vpop.f32.mrf.mxu3  ;;  %v11573_v47 = vor.u32 %v14402_v26, %v11570_v4  ;;  %v13008_v26 = vld [vmem:[%s15357_s17 + $0x850] sm:$0xf]  ;;  %v14770_v4 = vld [vmem:[%s15357_s17 + $0x884] sm:$0xf0]  ;;  %v11944_v60 = vld [vmem:[%s15357_s17] sm:$0xf] }
 0x28b   : > { %v14532_v28 = vld [vmem:[%s15357_s17 + $0x114] sm:$0xf0] }
 0x28c   : > { %5361 = vmatpush.bf16.msrb.mxu2 %v11765_v37  ;;  %5374 = vmatpush.bf16.msrb.mxu3 %v11893_v43  ;;  %v14602_v37 = vld [vmem:[%s15357_s17 + $0x344] sm:$0xf0]  ;;  %v11445_v43 = vor.u32 %v14370_v33, %v11442_v30  ;;  %v12112_v33 = vld [vmem:[%s15357_s17 + $0x150] sm:$0xf]  ;;  %v14756_v40 = vld [vmem:[%s15357_s17 + $0x814] sm:$0xf0] }
 0x28d   : > { %5336 = vmatpush.bf16.msrb.mxu0 %v11493_v49  ;;  %5349 = vmatpush.bf16.msrb.mxu1 %v11621_v50  ;;  %v11829_v49 = vor.u32 %v14466_v23, %v11826_v27  ;;  %v12337_v50 = vor.u32 %v14602_v37, %v12336_v34  ;;  %v14546_v30 = vld [vmem:[%s15357_s17 + $0x184] sm:$0xf0]  ;;  %v13009_v23 = vor.u32 %v14770_v4, %v13008_v26  ;;  %v12056_v27 = vld [vmem:[%s15357_s17 + $0xe0] sm:$0xf]  ;;  %v14567_v4 = vld [vmem:[%s15357_s17 + $0x234] sm:$0xf] }
 0x28e   : > { %v12504_v34 = vld [vmem:[%s15357_s17 + $0x460] sm:$0xf]  ;;  %v12057_v45 = vor.u32 %v14532_v28, %v12056_v27  ;;  %v14791_v27 = vld [vmem:[%s15357_s17 + $0x934] sm:$0xf]  ;;  %v13122_v28 = vld [vmem:[%s15357_s17 + $0x968] sm:$0xf0] }
 0x290   : > { %5362 = vmatpush.bf16.msrb.mxu2 %v11749_v51  ;;  %5375 = vmatpush.bf16.msrb.mxu3 %v11877_v57  ;;  %v12785_v51 = vor.u32 %v14714_v44, %v12784_v38  ;;  %v5069_v57 = vadd.f32 %v16775_v62, %v5056_v42  ;;  %v13177_v62 = vor.u32 %v14812_v2, %v13176_v61  ;;  %v12952_v38 = vld [vmem:[%s15357_s17 + $0x7e0] sm:$0xf] }
 0x291   : > { %5337 = vmatpush.bf16.msrb.mxu0 %v11477_v6  ;;  %5350 = vmatpush.bf16.msrb.mxu1 %v11605_v7  ;;  %v14574_v6 = vld [vmem:[%s15357_s17 + $0x264] sm:$0xf0]  ;;  %v12897_v2 = vor.u32 %v14742_v55, %v12896_v53  ;;  %v14651_v53 = vld [vmem:[%s15357_s17 + $0x4d4] sm:$0xf]  ;;  %v12562_v55 = vld [vmem:[%s15357_s17 + $0x508] sm:$0xf0] }
 0x292   : > { %v5082_v10 = vadd.f32 %v16829_v29, %v5069_v57  ;;  %v14686_v7 = vld [vmem:[%s15357_s17 + $0x5e4] sm:$0xf0]  ;;  %v13120_v29 = vld [vmem:[%s15357_s17 + $0x930] sm:$0xf]  ;;  %v12225_v17 = vor.u32 %v14574_v6, %v12224_v5  ;;  %v12840_v5 = vld [vmem:[%s15357_s17 + $0x700] sm:$0xf] }
 0x293   : > { %v14728_v6 = vld [vmem:[%s15357_s17 + $0x734] sm:$0xf0] }
 0x294   : > { %5363 = vmatpush.bf16.msrb.mxu2 %v11733_v8  ;;  %5376 = vmatpush.bf16.msrb.mxu3 %v11861_v11  ;;  %v14798_v8 = vld [vmem:[%s15357_s17 + $0x964] sm:$0xf0]  ;;  %v5095_v9 = vadd.f32 %v16833_v41, %v5082_v10  ;;  %v14560_v11 = vld [vmem:[%s15357_s17 + $0x1f4] sm:$0xf0] }
 0x295   : > { %5338 = vmatpush.bf16.msrb.mxu0 %v11461_v15  ;;  %5351 = vmatpush.bf16.msrb.mxu1 %v11589_v20  ;;  %v13121_v18 = vor.u32 %v14798_v8, %v13120_v29  ;;  %v14784_v41 = vld [vmem:[%s15357_s17 + $0x8f4] sm:$0xf0]  ;;  %v12338_v29 = vld [vmem:[%s15357_s17 + $0x348] sm:$0xf0]  ;;  %v14707_v8 = vld [vmem:[%s15357_s17 + $0x694] sm:$0xf] }
 0x296   : > { %v5108_v63 = vadd.f32 %v16846_v59, %v5095_v9  ;;  %v12560_v59 = vld [vmem:[%s15357_s17 + $0x4d0] sm:$0xf]  ;;  %v14504_v10 = vld [vmem:[%s15357_s17 + $0x34] sm:$0xf0]  ;;  %v12786_v9 = vld [vmem:[%s15357_s17 + $0x6c8] sm:$0xf0] }
 0x298   : > { %5364 = vmatpush.bf16.msrb.mxu2 %v11717_v25  ;;  %5377 = vmatpush.bf16.msrb.mxu3 %v11845_v13  ;;  %v5121_v20 = vadd.f32 %v16851_v0, %v5108_v63  ;;  %v14658_v25 = vld [vmem:[%s15357_s17 + $0x504] sm:$0xf0]  ;;  %v12113_v13 = vor.u32 %v14546_v30, %v12112_v33  ;;  %v14644_v0 = vld [vmem:[%s15357_s17 + $0x494] sm:$0xf0]  ;;  %v12730_v33 = vld [vmem:[%s15357_s17 + $0x658] sm:$0xf0] }
 0x299   : > { %5339 = vmatpush.bf16.msrb.mxu0 %v11445_v43  ;;  %5352 = vmatpush.bf16.msrb.mxu1 %v11573_v47  ;;  %v12561_v39 = vor.u32 %v14658_v25, %v12560_v59  ;;  %v12505_v47 = vor.u32 %v14644_v0, %v12504_v34  ;;  %v14805_v30 = vld [vmem:[%s15357_s17 + $0x9a4] sm:$0xf] }
 0x29a   : > { %v14553_v0 = vld [vmem:[%s15357_s17 + $0x1c4] sm:$0xf] }
 0x29b   : > { %v5133_v32 = vpop.f32.mrf.mxu0  ;;  %v5146_v36 = vpop.f32.mrf.mxu1 }
 0x29c   : > { %5365 = vmatpush.bf16.msrb.mxu2 %v11701_v48  ;;  %5378 = vmatpush.bf16.msrb.mxu3 %v11829_v49  ;;  %v5134_v22 = vadd.f32 %v5133_v32, %v5121_v20  ;;  %v12953_v48 = vor.u32 %v14756_v40, %v12952_v38  ;;  %v12000_v49 = vld [vmem:[%s15357_s17 + $0x70] sm:$0xf]  ;;  %v12789_v32 = vor.u32 %v14707_v8, %v12786_v9  ;;  %v12170_v38 = vld [vmem:[%s15357_s17 + $0x1f8] sm:$0xf0]  ;;  %v14749_v8 = vld [vmem:[%s15357_s17 + $0x7e4] sm:$0xf] }
 0x29d   : > { %8080 = vmatpush.bf16.msra.mxu0 %v12337_v50  ;;  %8093 = vmatpush.bf16.msra.mxu1 %v12785_v51  ;;  %v14518_v50 = vld [vmem:[%s15357_s17 + $0xa4] sm:$0xf0]  ;;  %v12448_v51 = vld [vmem:[%s15357_s17 + $0x3f0] sm:$0xf]  ;;  %v13125_v40 = vor.u32 %v14791_v27, %v13122_v28  ;;  %v12954_v9 = vld [vmem:[%s15357_s17 + $0x818] sm:$0xf0] }
 0x29e   : > { %5340 = vmatmul.bf16.vlgmr.msrb.gmra.mxu0 %v16015_v19  ;;  %5353 = vmatmul.bf16.vlgmr.msrb.gmra.mxu1 %v16022_v24  ;;  %v12673_v19 = vor.u32 %v14686_v7, %v12672_v16  ;;  %v12168_v24 = vld [vmem:[%s15357_s17 + $0x1c0] sm:$0xf]  ;;  %v5147_v44 = vadd.f32 %v5146_v36, %v5134_v22  ;;  %v12001_v57 = vor.u32 %v14518_v50, %v12000_v49  ;;  %v14595_v16 = vld [vmem:[%s15357_s17 + $0x314] sm:$0xf]  ;;  %v14938_v27 = vld [vmem:[%s15357_s17 + $0xdc4] sm:$0xf0] }
 0x29f   : > { %5366 = vmatmul.bf16.vlgmr.msrb.gmra.mxu2 %v16020_v54  ;;  %5379 = vmatmul.bf16.vlgmr.msrb.gmra.mxu3 %v16026_v31  ;;  %v14672_v54 = vld [vmem:[%s15357_s17 + $0x574] sm:$0xf0]  ;;  %v13064_v31 = vld [vmem:[%s15357_s17 + $0x8c0] sm:$0xf]  ;;  %v12169_v14 = vor.u32 %v14560_v11, %v12168_v24  ;;  %v12449_v61 = vor.u32 %v14630_v56, %v12448_v51  ;;  %v13234_v24 = vld [vmem:[%s15357_s17 + $0xa48] sm:$0xf0] }
 0x2a0   : > { %8106 = vmatpush.bf16.msra.mxu2 %v13233_v52  ;;  %v12617_v21 = vor.u32 %v14672_v54, %v12616_v12  ;;  %v13065_v15 = vor.u32 %v14784_v41, %v13064_v31  ;;  %v5384_v11 = vmax.f32 %v16346_v35, 0.0  ;;  %v5385_v12 = vmax.f32 %v16630_v58, 0.0  ;;  %v13178_v35 = vld [vmem:[%s15357_s17 + $0x9d8] sm:$0xf0]  ;;  %v14539_v50 = vld [vmem:[%s15357_s17 + $0x154] sm:$0xf] }
 0x2a1   : > { %8081 = vmatpush.bf16.msra.mxu0 %v12281_v1  ;;  %8094 = vmatpush.bf16.msra.mxu1 %v12729_v3  ;;  %v12392_v1 = vld [vmem:[%s15357_s17 + $0x380] sm:$0xf]  ;;  %v14616_v3 = vld [vmem:[%s15357_s17 + $0x3b4] sm:$0xf0]  ;;  %v12841_v54 = vor.u32 %v14728_v6, %v12840_v5  ;;  %v12341_v41 = vor.u32 %v14595_v16, %v12338_v29  ;;  %v13181_v22 = vor.u32 %v14805_v30, %v13178_v35  ;;  %v12114_v56 = vld [vmem:[%s15357_s17 + $0x188] sm:$0xf0] }
 0x2a2   : > { %v5159_v37 = vpop.f32.mrf.mxu2  ;;  %v5172_v42 = vpop.f32.mrf.mxu3  ;;  %v12393_v63 = vor.u32 %v14616_v3, %v12392_v1  ;;  %v16946_v58 = vpack.c.bf16 %v5384_v11, %v5384_v11  ;;  %v16948_v59 = vpack.c.bf16 %v5385_v12, %v5385_v12  ;;  %v12117_v1 = vor.u32 %v14539_v50, %v12114_v56  ;;  %v12058_v6 = vld [vmem:[%s15357_s17 + $0x118] sm:$0xf0]  ;;  %v14637_v16 = vld [vmem:[%s15357_s17 + $0x464] sm:$0xf]  ;;  %v14511_v11 = vld [vmem:[%s15357_s17 + $0x74] sm:$0xf] }
 0x2a3   : > { %v5135_v43 = vpop.f32.mrf.mxu0  ;;  %v5148_v46 = vpop.f32.mrf.mxu1  ;;  %v5160_v52 = vadd.f32 %v5159_v37, %v5147_v44  ;;  %v15121_v44 = vld [vmem:[%s15352_s13] sm:$0xf]  ;;  %v12565_v3 = vor.u32 %v14651_v53, %v12562_v55  ;;  %v12344_v28 = vld [vmem:[%s15357_s17 + $0x318] sm:$0xf] }
 0x2a4   : > { %8107 = vmatpush.bf16.msra.mxu2 %v13177_v62  ;;  %v12618_v43 = vld [vmem:[%s15357_s17 + $0x578] sm:$0xf0]  ;;  %v14777_v46 = vld [vmem:[%s15357_s17 + $0x8c4] sm:$0xf]  ;;  %v13624_v56 = vld [vmem:[%s15357_s17 + $0xd20] sm:$0xf] }
 0x2a5   : > { %8082 = vmatpush.bf16.msra.mxu0 %v12225_v17  ;;  %8095 = vmatpush.bf16.msra.mxu1 %v12673_v19  ;;  %v5173_v62 = vadd.f32 %v5172_v42, %v5160_v52  ;;  %v11945_v19 = vor.u32 %v14504_v10, %v11944_v60  ;;  %v14665_v42 = vld [vmem:[%s15357_s17 + $0x544] sm:$0xf]  ;;  %v14924_v53 = vld [vmem:[%s15357_s17 + $0xd54] sm:$0xf0]  ;;  %v14701_v55 = vld [vmem:[%s15357_s17 + $0x65c] sm:$0xf0] }
 0x2a6   : > { %v12621_v49 = vor.u32 %v14665_v42, %v12618_v43  ;;  %v13240_v42 = vld [vmem:[%s15357_s17 + $0xa18] sm:$0xf]  ;;  %v14827_v43 = vld [vmem:[%s15357_s17 + $0xa4c] sm:$0xf0] }
 0x2a7   : > { %v5386_v31 = vmax.f32 %v5173_v62, 0.0  ;;  %v14525_v62 = vld [vmem:[%s15357_s17 + $0xe4] sm:$0xf] }
 0x2a8   : > { %8108 = vmatpush.bf16.msra.mxu2 %v13121_v18  ;;  %v14819_v18 = vld [vmem:[%s15357_s17 + $0xa14] sm:$0xf] }
 0x2a9   : > { %8083 = vmatpush.bf16.msra.mxu0 %v12169_v14  ;;  %8096 = vmatpush.bf16.msra.mxu1 %v12617_v21  ;;  %v14581_v14 = vld [vmem:[%s15357_s17 + $0x2a4] sm:$0xf]  ;;  %v13237_v36 = vor.u32 %v14819_v18, %v13234_v24  ;;  %v12282_v21 = vld [vmem:[%s15357_s17 + $0x2d8] sm:$0xf0]  ;;  %v16950_v20 = vpack.c.bf16 %v5386_v31, %v5386_v31  ;;  %v12061_v18 = vor.u32 %v14525_v62, %v12058_v6  ;;  %v12002_v31 = vld [vmem:[%s15357_s17 + $0xa8] sm:$0xf0] }
 0x2aa   : > { %v5161_v7 = vpop.f32.mrf.mxu2  ;;  %v5174_v17 = vpop.f32.mrf.mxu3  ;;  %v12285_v25 = vor.u32 %v14581_v14, %v12282_v21  ;;  %v12898_v21 = vld [vmem:[%s15357_s17 + $0x7a8] sm:$0xf0]  ;;  %v12005_v30 = vor.u32 %v14511_v11, %v12002_v31  ;;  %v14687_v6 = vld [vmem:[%s15357_s17 + $0x5ec] sm:$0xf0]  ;;  %v14896_v31 = vld [vmem:[%s15357_s17 + $0xc74] sm:$0xf0] }
 0x2ab   : > { %v12506_v7 = vld [vmem:[%s15357_s17 + $0x498] sm:$0xf0] }
 0x2ac   : > { %8109 = vmatpush.bf16.msra.mxu2 %v13065_v15  ;;  %v14693_v15 = vld [vmem:[%s15357_s17 + $0x624] sm:$0xf]  ;;  %v12509_v24 = vor.u32 %v14637_v16, %v12506_v7  ;;  %v13128_v16 = vld [vmem:[%s15357_s17 + $0x938] sm:$0xf]  ;;  %v14799_v7 = vld [vmem:[%s15357_s17 + $0x96c] sm:$0xf0] }
 0x2ad   : > { %8084 = vmatpush.bf16.msra.mxu0 %v12113_v13  ;;  %8097 = vmatpush.bf16.msra.mxu1 %v12561_v39  ;;  %v12733_v26 = vor.u32 %v14693_v15, %v12730_v33  ;;  %v12226_v13 = vld [vmem:[%s15357_s17 + $0x268] sm:$0xf0]  ;;  %v14679_v39 = vld [vmem:[%s15357_s17 + $0x5b4] sm:$0xf]  ;;  %v14497_v15 = vld [vmem:[%s15357_s17 + $0x4] sm:$0xf]  ;;  %v13129_v11 = vor.u32 %v14799_v7, %v13128_v16 }
 0x2ae   : > { %v12229_v34 = vor.u32 %v14567_v4, %v12226_v13  ;;  %v11946_v33 = vld [vmem:[%s15357_s17 + $0x38] sm:$0xf0]  ;;  %v14721_v4 = vld [vmem:[%s15357_s17 + $0x704] sm:$0xf] }
 0x2af   : > { %v12842_v13 = vld [vmem:[%s15357_s17 + $0x738] sm:$0xf0] }
 0x2b0   : > { %8110 = vmatpush.bf16.msra.mxu2 %v13009_v23  ;;  %v12674_v23 = vld [vmem:[%s15357_s17 + $0x5e8] sm:$0xf0] }
 0x2b1   : > { %8085 = vmatpush.bf16.msra.mxu0 %v12057_v45  ;;  %8098 = vmatpush.bf16.msra.mxu1 %v12505_v47  ;;  %v12677_v37 = vor.u32 %v14679_v39, %v12674_v23  ;;  %v4547_v45 = vperm.slane %v15121_v44, 3  ;;  %v13066_v47 = vld [vmem:[%s15357_s17 + $0x8f8] sm:$0xf0]  ;;  %v13680_v23 = vld [vmem:[%s15357_s17 + $0xd90] sm:$0xf]  ;;  %v11949_v44 = vor.u32 %v14497_v15, %v11946_v33 }
 0x2b2   : > { %v13069_v52 = vor.u32 %v14777_v46, %v13066_v47  ;;  %v12845_v46 = vor.u32 %v14721_v4, %v12842_v13  ;;  %v12120_v15 = vld [vmem:[%s15357_s17 + $0x158] sm:$0xf]  ;;  %v14547_v33 = vld [vmem:[%s15357_s17 + $0x18c] sm:$0xf0] }
 0x2b3   : > { %v13456_v4 = vld [vmem:[%s15357_s17 + $0xbd0] sm:$0xf] }
 0x2b4   : > { %8111 = vmatpush.bf16.msra.mxu2 %v12953_v48  ;;  %v12173_v48 = vor.u32 %v14553_v0, %v12170_v38  ;;  %v13681_v38 = vor.u32 %v14938_v27, %v13680_v23  ;;  %v14659_v13 = vld [vmem:[%s15357_s17 + $0x50c] sm:$0xf0] }
 0x2b5   : > { %8086 = vmatpush.bf16.msra.mxu0 %v12001_v57  ;;  %8099 = vmatpush.bf16.msra.mxu1 %v12449_v61  ;;  %v14763_v61 = vld [vmem:[%s15357_s17 + $0x854] sm:$0xf]  ;;  %v14771_v23 = vld [vmem:[%s15357_s17 + $0x88c] sm:$0xf0] }
 0x2b6   : > { %8119 = vmatpush.bf16.msra.mxu3 %v13681_v38 }
 0x2b8   : > { %8112 = vmatpush.bf16.msra.mxu2 %v12897_v2  ;;  %v13010_v2 = vld [vmem:[%s15357_s17 + $0x888] sm:$0xf0] }
 0x2b9   : > { %8087 = vmatpush.bf16.msra.mxu0 %v11945_v19  ;;  %8100 = vmatpush.bf16.msra.mxu1 %v12393_v63  ;;  %v13013_v5 = vor.u32 %v14763_v61, %v13010_v2  ;;  %v13625_v61 = vor.u32 %v14924_v53, %v13624_v56  ;;  %v14519_v56 = vld [vmem:[%s15357_s17 + $0xac] sm:$0xf0] }
 0x2bb   : > { %v5185_v51 = vpop.f32.mrf.mxu0  ;;  %v5198_v60 = vpop.f32.mrf.mxu1  ;;  %8120 = vmatpush.bf16.msra.mxu3 %v13625_v61  ;;  %v12904_v61 = vld [vmem:[%s15357_s17 + $0x778] sm:$0xf] }
 0x2bc   : > { %8113 = vmatpush.bf16.msra.mxu2 %v12841_v54  ;;  %8088 = vmatmul.bf16.vlgmr.msra.gmra.mxu0 %v16946_v58  ;;  %v5186_v57 = vadd.f32 %v5185_v51, %v4547_v45  ;;  %v12957_v54 = vor.u32 %v14749_v8, %v12954_v9  ;;  %v13241_v51 = vor.u32 %v14827_v43, %v13240_v42  ;;  %v14910_v8 = vld [vmem:[%s15357_s17 + $0xce4] sm:$0xf0]  ;;  %v13400_v43 = vld [vmem:[%s15357_s17 + $0xb60] sm:$0xf] }
 0x2bd   : > { %8132 = vmatpush.bf16.msrb.mxu0 %v12341_v41  ;;  %8145 = vmatpush.bf16.msrb.mxu1 %v12789_v32  ;;  %v14623_v41 = vld [vmem:[%s15357_s17 + $0x3f4] sm:$0xf]  ;;  %v12450_v32 = vld [vmem:[%s15357_s17 + $0x428] sm:$0xf0]  ;;  %v12512_v42 = vld [vmem:[%s15357_s17 + $0x468] sm:$0xf] }
 0x2be   : > { %8101 = vmatmul.bf16.vlgmr.msra.gmra.mxu1 %v16948_v59  ;;  %v5199_v10 = vadd.f32 %v5198_v60, %v5186_v57  ;;  %v12453_v35 = vor.u32 %v14623_v41, %v12450_v32  ;;  %v13184_v57 = vld [vmem:[%s15357_s17 + $0x9a8] sm:$0xf]  ;;  %v14813_v60 = vld [vmem:[%s15357_s17 + $0x9dc] sm:$0xf0] }
 0x2bf   : > { %8114 = vmatmul.bf16.vlgmr.msra.gmra.mxu2 %v16950_v20  ;;  %v13185_v62 = vor.u32 %v14813_v60, %v13184_v57  ;;  %v14673_v41 = vld [vmem:[%s15357_s17 + $0x57c] sm:$0xf0]  ;;  %v13072_v32 = vld [vmem:[%s15357_s17 + $0x8c8] sm:$0xf]  ;;  %v12456_v57 = vld [vmem:[%s15357_s17 + $0x3f8] sm:$0xf] }
 0x2c0   : > { %8158 = vmatpush.bf16.msrb.mxu2 %v13237_v36  ;;  %v14735_v36 = vld [vmem:[%s15357_s17 + $0x774] sm:$0xf]  ;;  %v14631_v60 = vld [vmem:[%s15357_s17 + $0x42c] sm:$0xf0] }
 0x2c1   : > { %8133 = vmatpush.bf16.msrb.mxu0 %v12285_v25  ;;  %8146 = vmatpush.bf16.msrb.mxu1 %v12733_v26  ;;  %v14609_v25 = vld [vmem:[%s15357_s17 + $0x384] sm:$0xf]  ;;  %v12394_v26 = vld [vmem:[%s15357_s17 + $0x3b8] sm:$0xf0] }
 0x2c2   : > { %v5211_v29 = vpop.f32.mrf.mxu2  ;;  %v5224_v19 = vpop.f32.mrf.mxu3  ;;  %v12397_v45 = vor.u32 %v14609_v25, %v12394_v26  ;;  %v12568_v25 = vld [vmem:[%s15357_s17 + $0x4d8] sm:$0xf] }
 0x2c3   : > { %v5212_v17 = vadd.f32 %v5211_v29, %v5199_v10  ;;  %v5187_v63 = vpop.f32.mrf.mxu0  ;;  %v5200_v14 = vpop.f32.mrf.mxu1  ;;  %v12232_v10 = vld [vmem:[%s15357_s17 + $0x238] sm:$0xf]  ;;  %v13568_v29 = vld [vmem:[%s15357_s17 + $0xcb0] sm:$0xf]  ;;  %v12569_v38 = vor.u32 %v14659_v13, %v12568_v25 }
 0x2c4   : > { %8159 = vmatpush.bf16.msrb.mxu2 %v13181_v22  ;;  %v12901_v22 = vor.u32 %v14735_v36, %v12898_v21  ;;  %v13569_v9 = vor.u32 %v14910_v8, %v13568_v29  ;;  %v12624_v63 = vld [vmem:[%s15357_s17 + $0x548] sm:$0xf]  ;;  %v14785_v14 = vld [vmem:[%s15357_s17 + $0x8fc] sm:$0xf0] }
 0x2c5   : > { %8134 = vmatpush.bf16.msrb.mxu0 %v12229_v34  ;;  %8147 = vmatpush.bf16.msrb.mxu1 %v12677_v37  ;;  %v16981_v12 = vadd.f32 %v5224_v19, %v5212_v17  ;;  %v14603_v34 = vld [vmem:[%s15357_s17 + $0x34c] sm:$0xf0]  ;;  %v12792_v37 = vld [vmem:[%s15357_s17 + $0x698] sm:$0xf]  ;;  %v12176_v19 = vld [vmem:[%s15357_s17 + $0x1c8] sm:$0xf] }
 0x2c6   : > { %v12345_v47 = vor.u32 %v14603_v34, %v12344_v28  ;;  %8121 = vmatpush.bf16.msra.mxu3 %v13569_v9  ;;  %v12121_v34 = vor.u32 %v14547_v33, %v12120_v15  ;;  %v12400_v29 = vld [vmem:[%s15357_s17 + $0x388] sm:$0xf]  ;;  %v14617_v8 = vld [vmem:[%s15357_s17 + $0x3bc] sm:$0xf0] }
 0x2c7   : > { %v12848_v9 = vld [vmem:[%s15357_s17 + $0x708] sm:$0xf] }
 0x2c8   : > { %8160 = vmatpush.bf16.msrb.mxu2 %v13125_v40  ;;  %v14715_v40 = vld [vmem:[%s15357_s17 + $0x6cc] sm:$0xf0] }
 0x2c9   : > { %8135 = vmatpush.bf16.msrb.mxu0 %v12173_v48  ;;  %8148 = vmatpush.bf16.msrb.mxu1 %v12621_v49  ;;  %v12288_v48 = vld [vmem:[%s15357_s17 + $0x2a8] sm:$0xf]  ;;  %v14589_v49 = vld [vmem:[%s15357_s17 + $0x2dc] sm:$0xf0]  ;;  %v12793_v50 = vor.u32 %v14715_v40, %v12792_v37 }
 0x2ca   : > { %v5213_v39 = vpop.f32.mrf.mxu2  ;;  %v5226_v0 = vpop.f32.mrf.mxu3  ;;  %v12289_v2 = vor.u32 %v14589_v49, %v12288_v48  ;;  %v12064_v37 = vld [vmem:[%s15357_s17 + $0xe8] sm:$0xf] }
 0x2cb   : > { %v13016_v39 = vld [vmem:[%s15357_s17 + $0x858] sm:$0xf]  ;;  %v14533_v0 = vld [vmem:[%s15357_s17 + $0x11c] sm:$0xf0] }
 0x2cc   : > { %8161 = vmatpush.bf16.msrb.mxu2 %v13069_v52  ;;  %v12736_v52 = vld [vmem:[%s15357_s17 + $0x628] sm:$0xf]  ;;  %v13017_v40 = vor.u32 %v14771_v23, %v13016_v39  ;;  %v14582_v23 = vld [vmem:[%s15357_s17 + $0x2ac] sm:$0xf] }
 0x2cd   : > { %8136 = vmatpush.bf16.msrb.mxu0 %v12117_v1  ;;  %8149 = vmatpush.bf16.msrb.mxu1 %v12565_v3  ;;  %v14575_v1 = vld [vmem:[%s15357_s17 + $0x26c] sm:$0xf0]  ;;  %v12737_v3 = vor.u32 %v14701_v55, %v12736_v52  ;;  %v12008_v52 = vld [vmem:[%s15357_s17 + $0x78] sm:$0xf] }
 0x2ce   : > { %v12233_v17 = vor.u32 %v14575_v1, %v12232_v10  ;;  %v14743_v10 = vld [vmem:[%s15357_s17 + $0x7ac] sm:$0xf0]  ;;  %v12009_v7 = vor.u32 %v14519_v56, %v12008_v52  ;;  %v12682_v56 = vld [vmem:[%s15357_s17 + $0x5f0] sm:$0xf0] }
 0x2d0   : > { %8162 = vmatpush.bf16.msrb.mxu2 %v13013_v5  ;;  %v12680_v5 = vld [vmem:[%s15357_s17 + $0x5b8] sm:$0xf] }
 0x2d1   : > { %8137 = vmatpush.bf16.msrb.mxu0 %v12061_v18  ;;  %8150 = vmatpush.bf16.msrb.mxu1 %v12509_v24  ;;  %v14561_v18 = vld [vmem:[%s15357_s17 + $0x1fc] sm:$0xf0]  ;;  %v12681_v24 = vor.u32 %v14687_v6, %v12680_v5  ;;  %v11952_v5 = vld [vmem:[%s15357_s17 + $0x8] sm:$0xf] }
 0x2d2   : > { %v12177_v21 = vor.u32 %v14561_v18, %v12176_v19  ;;  %v14505_v6 = vld [vmem:[%s15357_s17 + $0x3c] sm:$0xf0]  ;;  %v12905_v19 = vor.u32 %v14743_v10, %v12904_v61 }
 0x2d3   : > { %v14729_v18 = vld [vmem:[%s15357_s17 + $0x73c] sm:$0xf0]  ;;  %v11953_v33 = vor.u32 %v14505_v6, %v11952_v5  ;;  %v12178_v6 = vld [vmem:[%s15357_s17 + $0x200] sm:$0xf0] }
 0x2d4   : > { %8163 = vmatpush.bf16.msrb.mxu2 %v12957_v54  ;;  %v13512_v54 = vld [vmem:[%s15357_s17 + $0xc40] sm:$0xf] }
 0x2d5   : > { %8138 = vmatpush.bf16.msrb.mxu0 %v12005_v30  ;;  %8151 = vmatpush.bf16.msrb.mxu1 %v12453_v35  ;;  %v13513_v36 = vor.u32 %v14896_v31, %v13512_v54  ;;  %v12625_v30 = vor.u32 %v14673_v41, %v12624_v63  ;;  %v13073_v35 = vor.u32 %v14785_v14, %v13072_v32  ;;  %v14596_v63 = vld [vmem:[%s15357_s17 + $0x31c] sm:$0xf]  ;;  %v14931_v31 = vld [vmem:[%s15357_s17 + $0xd94] sm:$0xf]  ;;  %v13682_v41 = vld [vmem:[%s15357_s17 + $0xdc8] sm:$0xf0] }
 0x2d6   : > { %v12346_v32 = vld [vmem:[%s15357_s17 + $0x350] sm:$0xf0]  ;;  %v14708_v14 = vld [vmem:[%s15357_s17 + $0x69c] sm:$0xf]  ;;  %v13685_v25 = vor.u32 %v14931_v31, %v13682_v41 }
 0x2d7   : > { %8122 = vmatpush.bf16.msra.mxu3 %v13513_v36  ;;  %v12794_v36 = vld [vmem:[%s15357_s17 + $0x6d0] sm:$0xf0]  ;;  %v12349_v13 = vor.u32 %v14596_v63, %v12346_v32  ;;  %v14652_v63 = vld [vmem:[%s15357_s17 + $0x4dc] sm:$0xf] }
 0x2d8   : > { %8164 = vmatpush.bf16.msrb.mxu2 %v12901_v22  ;;  %v14882_v22 = vld [vmem:[%s15357_s17 + $0xc04] sm:$0xf0]  ;;  %v12797_v39 = vor.u32 %v14708_v14, %v12794_v36  ;;  %v12570_v41 = vld [vmem:[%s15357_s17 + $0x510] sm:$0xf0]  ;;  %v13458_v14 = vld [vmem:[%s15357_s17 + $0xc08] sm:$0xf0] }
 0x2d9   : > { %8139 = vmatpush.bf16.msrb.mxu0 %v11949_v44  ;;  %8152 = vmatpush.bf16.msrb.mxu1 %v12397_v45  ;;  %v13457_v28 = vor.u32 %v14882_v22, %v13456_v4  ;;  %v14868_v44 = vld [vmem:[%s15357_s17 + $0xb94] sm:$0xf0]  ;;  %v14645_v45 = vld [vmem:[%s15357_s17 + $0x49c] sm:$0xf0]  ;;  %v12401_v4 = vor.u32 %v14617_v8, %v12400_v29  ;;  %v12849_v22 = vor.u32 %v14729_v18, %v12848_v9  ;;  %v14778_v29 = vld [vmem:[%s15357_s17 + $0x8cc] sm:$0xf] }
 0x2da   : > { %v12513_v53 = vor.u32 %v14645_v45, %v12512_v42  ;;  %v14806_v42 = vld [vmem:[%s15357_s17 + $0x9ac] sm:$0xf]  ;;  %v13074_v8 = vld [vmem:[%s15357_s17 + $0x900] sm:$0xf0]  ;;  %v14875_v32 = vld [vmem:[%s15357_s17 + $0xbd4] sm:$0xf] }
 0x2db   : > { %v17032_v26 = vpop.f32.mrf.mxu0  ;;  %v17039_v27 = vpop.f32.mrf.mxu1  ;;  %8123 = vmatpush.bf16.msra.mxu3 %v13457_v28  ;;  %v12290_v28 = vld [vmem:[%s15357_s17 + $0x2e0] sm:$0xf0]  ;;  %v14764_v36 = vld [vmem:[%s15357_s17 + $0x85c] sm:$0xf] }
 0x2dc   : > { %8165 = vmatpush.bf16.msrb.mxu2 %v12845_v46  ;;  %8140 = vmatmul.bf16.vlgmr.msrb.gmra.mxu0 %v16946_v58  ;;  %v12960_v46 = vld [vmem:[%s15357_s17 + $0x7e8] sm:$0xf]  ;;  %v12293_v45 = vor.u32 %v14582_v23, %v12290_v28  ;;  %v12514_v23 = vld [vmem:[%s15357_s17 + $0x4a0] sm:$0xf0]  ;;  %v5238_v28 = vadd.f32 %v17032_v26, %v16981_v12  ;;  %v14512_v12 = vld [vmem:[%s15357_s17 + $0x7c] sm:$0xf] }
 0x2dd   : > { %8184 = vmatpush.bf16.msra.mxu0 %v12345_v47  ;;  %8197 = vmatpush.bf16.msra.mxu1 %v12793_v50  ;;  %v14757_v47 = vld [vmem:[%s15357_s17 + $0x81c] sm:$0xf0]  ;;  %v13401_v50 = vor.u32 %v14868_v44, %v13400_v43  ;;  %v13186_v43 = vld [vmem:[%s15357_s17 + $0x9e0] sm:$0xf0]  ;;  %v12010_v26 = vld [vmem:[%s15357_s17 + $0xb0] sm:$0xf0] }
 0x2de   : > { %8153 = vmatmul.bf16.vlgmr.msrb.gmra.mxu1 %v16948_v59  ;;  %v12961_v55 = vor.u32 %v14757_v47, %v12960_v46  ;;  %v14568_v47 = vld [vmem:[%s15357_s17 + $0x23c] sm:$0xf]  ;;  %v13189_v52 = vor.u32 %v14806_v42, %v13186_v43 }
 0x2df   : > { %8166 = vmatmul.bf16.vlgmr.msrb.gmra.mxu2 %v16950_v20  ;;  %8124 = vmatpush.bf16.msra.mxu3 %v13401_v50  ;;  %v12234_v50 = vld [vmem:[%s15357_s17 + $0x270] sm:$0xf0] }
 0x2e0   : > { %8210 = vmatpush.bf16.msra.mxu2 %v13241_v51  ;;  %v12065_v51 = vor.u32 %v14533_v0, %v12064_v37  ;;  %v12738_v0 = vld [vmem:[%s15357_s17 + $0x660] sm:$0xf0] }
 0x2e1   : > { %8185 = vmatpush.bf16.msra.mxu0 %v12289_v2  ;;  %8198 = vmatpush.bf16.msra.mxu1 %v12737_v3  ;;  %v13344_v3 = vld [vmem:[%s15357_s17 + $0xaf0] sm:$0xf] }
 0x2e2   : > { %v17049_v48 = vpop.f32.mrf.mxu2  ;;  %v17051_v49 = vpop.f32.mrf.mxu3 }
 0x2e3   : > { %v5239_v2 = vpop.f32.mrf.mxu0  ;;  %v5252_v1 = vpop.f32.mrf.mxu1 }
 0x2e4   : > { %8211 = vmatpush.bf16.msra.mxu2 %v13185_v62  ;;  %v14854_v62 = vld [vmem:[%s15357_s17 + $0xb24] sm:$0xf0]  ;;  %v12237_v2 = vor.u32 %v14568_v47, %v12234_v50  ;;  %v14554_v1 = vld [vmem:[%s15357_s17 + $0x1cc] sm:$0xf]  ;;  %v12458_v47 = vld [vmem:[%s15357_s17 + $0x430] sm:$0xf0] }
 0x2e5   : > { %8186 = vmatpush.bf16.msra.mxu0 %v12233_v17  ;;  %8199 = vmatpush.bf16.msra.mxu1 %v12681_v24  ;;  %v13345_v16 = vor.u32 %v14854_v62, %v13344_v3  ;;  %v12457_v17 = vor.u32 %v14631_v60, %v12456_v57  ;;  %v13288_v24 = vld [vmem:[%s15357_s17 + $0xa80] sm:$0xf]  ;;  %v14792_v57 = vld [vmem:[%s15357_s17 + $0x93c] sm:$0xf]  ;;  %v13130_v60 = vld [vmem:[%s15357_s17 + $0x970] sm:$0xf0] }
 0x2e6   : > { %v14889_v3 = vld [vmem:[%s15357_s17 + $0xc44] sm:$0xf]  ;;  %v13514_v62 = vld [vmem:[%s15357_s17 + $0xc78] sm:$0xf0]  ;;  %v13133_v5 = vor.u32 %v14792_v57, %v13130_v60  ;;  %v14498_v57 = vld [vmem:[%s15357_s17 + $0xc] sm:$0xf] }
 0x2e7   : > { %8125 = vmatpush.bf16.msra.mxu3 %v13345_v16  ;;  %v14666_v16 = vld [vmem:[%s15357_s17 + $0x54c] sm:$0xf]  ;;  %v13517_v9 = vor.u32 %v14889_v3, %v13514_v62  ;;  %v11954_v60 = vld [vmem:[%s15357_s17 + $0x40] sm:$0xf0] }
 0x2e8   : > { %8212 = vmatpush.bf16.msra.mxu2 %v13129_v11  ;;  %v14840_v11 = vld [vmem:[%s15357_s17 + $0xab4] sm:$0xf0]  ;;  %v14722_v3 = vld [vmem:[%s15357_s17 + $0x70c] sm:$0xf] }
 0x2e9   : > { %8187 = vmatpush.bf16.msra.mxu0 %v12177_v21  ;;  %8200 = vmatpush.bf16.msra.mxu1 %v12625_v30  ;;  %v13289_v15 = vor.u32 %v14840_v11, %v13288_v24  ;;  %v14820_v30 = vld [vmem:[%s15357_s17 + $0xa1c] sm:$0xf]  ;;  %v12122_v11 = vld [vmem:[%s15357_s17 + $0x190] sm:$0xf0] }
 0x2ea   : > { %v5265_v54 = vpop.f32.mrf.mxu2  ;;  %v5278_v21 = vpop.f32.mrf.mxu3  ;;  %v14540_v24 = vld [vmem:[%s15357_s17 + $0x15c] sm:$0xf] }
 0x2eb   : > { %8126 = vmatpush.bf16.msra.mxu3 %v13289_v15  ;;  %v13077_v54 = vor.u32 %v14778_v29, %v13074_v8  ;;  %v13018_v21 = vld [vmem:[%s15357_s17 + $0x890] sm:$0xf0]  ;;  %v13461_v15 = vor.u32 %v14875_v32, %v13458_v14  ;;  %v12352_v29 = vld [vmem:[%s15357_s17 + $0x320] sm:$0xf]  ;;  %v14604_v8 = vld [vmem:[%s15357_s17 + $0x354] sm:$0xf0] }
 0x2ec   : > { %8213 = vmatpush.bf16.msra.mxu2 %v13073_v35  ;;  %v13242_v35 = vld [vmem:[%s15357_s17 + $0xa50] sm:$0xf0]  ;;  %v12353_v14 = vor.u32 %v14604_v8, %v12352_v29  ;;  %v12520_v29 = vld [vmem:[%s15357_s17 + $0x470] sm:$0xf]  ;;  %v14646_v8 = vld [vmem:[%s15357_s17 + $0x4a4] sm:$0xf0] }
 0x2ed   : > { %8188 = vmatpush.bf16.msra.mxu0 %v12121_v34  ;;  %8201 = vmatpush.bf16.msra.mxu1 %v12569_v38  ;;  %v14694_v34 = vld [vmem:[%s15357_s17 + $0x62c] sm:$0xf]  ;;  %v13245_v37 = vor.u32 %v14820_v30, %v13242_v35  ;;  %v14917_v38 = vld [vmem:[%s15357_s17 + $0xd24] sm:$0xf]  ;;  %v12573_v30 = vor.u32 %v14652_v63, %v12570_v41 }
 0x2ee   : > { %v12741_v46 = vor.u32 %v14694_v34, %v12738_v0  ;;  %v14526_v35 = vld [vmem:[%s15357_s17 + $0xec] sm:$0xf] }
 0x2ef   : > { %8171 = vmatpush.bf16.msrb.mxu3 %v13685_v25  ;;  %v14861_v25 = vld [vmem:[%s15357_s17 + $0xb64] sm:$0xf]  ;;  %v14750_v34 = vld [vmem:[%s15357_s17 + $0x7ec] sm:$0xf] }
 0x2f0   : > { %8214 = vmatpush.bf16.msra.mxu2 %v13017_v40  ;;  %v13626_v40 = vld [vmem:[%s15357_s17 + $0xd58] sm:$0xf0] }
 0x2f1   : > { %8189 = vmatpush.bf16.msra.mxu0 %v12065_v51  ;;  %8202 = vmatpush.bf16.msra.mxu1 %v12513_v53  ;;  %v13629_v44 = vor.u32 %v14917_v38, %v13626_v40  ;;  %v14680_v51 = vld [vmem:[%s15357_s17 + $0x5bc] sm:$0xf]  ;;  %v14903_v53 = vld [vmem:[%s15357_s17 + $0xcb4] sm:$0xf] }
 0x2f2   : > { %v12685_v10 = vor.u32 %v14680_v51, %v12682_v56  ;;  %v14847_v51 = vld [vmem:[%s15357_s17 + $0xaf4] sm:$0xf]  ;;  %v5251_v56 = vadd.f32 %v17039_v27, %v5238_v28  ;;  %v14610_v27 = vld [vmem:[%s15357_s17 + $0x38c] sm:$0xf]  ;;  %v12240_v28 = vld [vmem:[%s15357_s17 + $0x240] sm:$0xf] }
 0x2f3   : > { %8172 = vmatpush.bf16.msrb.mxu3 %v13629_v44  ;;  %v14624_v44 = vld [vmem:[%s15357_s17 + $0x3fc] sm:$0xf] }
 0x2f4   : > { %8215 = vmatpush.bf16.msra.mxu2 %v12961_v55  ;;  %v13570_v55 = vld [vmem:[%s15357_s17 + $0xce8] sm:$0xf0] }
 0x2f5   : > { %8190 = vmatpush.bf16.msra.mxu0 %v12009_v7  ;;  %8203 = vmatpush.bf16.msra.mxu1 %v12457_v17  ;;  %v13573_v61 = vor.u32 %v14903_v53, %v13570_v55  ;;  %v12626_v7 = vld [vmem:[%s15357_s17 + $0x580] sm:$0xf0]  ;;  %v14736_v53 = vld [vmem:[%s15357_s17 + $0x77c] sm:$0xf]  ;;  %v12906_v55 = vld [vmem:[%s15357_s17 + $0x7b0] sm:$0xf0] }
 0x2f6   : > { %v12629_v18 = vor.u32 %v14666_v16, %v12626_v7  ;;  %v12909_v62 = vor.u32 %v14736_v53, %v12906_v55  ;;  %v13290_v16 = vld [vmem:[%s15357_s17 + $0xab8] sm:$0xf0]  ;;  %v5264_v7 = vadd.f32 %v17049_v48, %v5251_v56 }
 0x2f7   : > { %8173 = vmatpush.bf16.msrb.mxu3 %v13573_v61 }
 0x2f8   : > { %8216 = vmatpush.bf16.msra.mxu2 %v12905_v19  ;;  %v12181_v19 = vor.u32 %v14554_v1, %v12178_v6  ;;  %v12402_v1 = vld [vmem:[%s15357_s17 + $0x3c0] sm:$0xf0] }
 0x2f9   : > { %8191 = vmatpush.bf16.msra.mxu0 %v11953_v33  ;;  %8204 = vmatpush.bf16.msra.mxu1 %v12401_v4  ;;  %v12125_v33 = vor.u32 %v14540_v24, %v12122_v11  ;;  %v13402_v4 = vld [vmem:[%s15357_s17 + $0xb98] sm:$0xf0]  ;;  %v14833_v6 = vld [vmem:[%s15357_s17 + $0xa84] sm:$0xf]  ;;  %v14828_v24 = vld [vmem:[%s15357_s17 + $0xa54] sm:$0xf0]  ;;  %v12405_v41 = vor.u32 %v14610_v27, %v12402_v1 }
 0x2fa   : > { %v13405_v38 = vor.u32 %v14861_v25, %v13402_v4  ;;  %v13293_v63 = vor.u32 %v14833_v6, %v13290_v16  ;;  %v14702_v25 = vld [vmem:[%s15357_s17 + $0x664] sm:$0xf0]  ;;  %v13192_v4 = vld [vmem:[%s15357_s17 + $0x9b0] sm:$0xf]  ;;  %v14660_v27 = vld [vmem:[%s15357_s17 + $0x514] sm:$0xf0] }
 0x2fb   : > { %v17104_v17 = vpop.f32.mrf.mxu0  ;;  %v17109_v31 = vpop.f32.mrf.mxu1  ;;  %8174 = vmatpush.bf16.msrb.mxu3 %v13517_v9  ;;  %v12800_v9 = vld [vmem:[%s15357_s17 + $0x6a0] sm:$0xf]  ;;  %v12072_v16 = vld [vmem:[%s15357_s17 + $0xf0] sm:$0xf] }
 0x2fc   : > { %8217 = vmatpush.bf16.msra.mxu2 %v12849_v22  ;;  %8192 = vmatmul.bf16.vlgmr.msra.gmra.mxu0 %v16946_v58  ;;  %v13021_v22 = vor.u32 %v14764_v36, %v13018_v21  ;;  %v5277_v36 = vadd.f32 %v17051_v49, %v5264_v7  ;;  %v13024_v1 = vld [vmem:[%s15357_s17 + $0x860] sm:$0xf]  ;;  %v14534_v7 = vld [vmem:[%s15357_s17 + $0x124] sm:$0xf0] }
 0x2fd   : > { %8236 = vmatpush.bf16.msrb.mxu0 %v12349_v13  ;;  %8249 = vmatpush.bf16.msrb.mxu1 %v12797_v39  ;;  %v12066_v13 = vld [vmem:[%s15357_s17 + $0x120] sm:$0xf0]  ;;  %v14638_v39 = vld [vmem:[%s15357_s17 + $0x46c] sm:$0xf] }
 0x2fe   : > { %8205 = vmatmul.bf16.vlgmr.msra.gmra.mxu1 %v16948_v59  ;;  %v12069_v42 = vor.u32 %v14526_v35, %v12066_v13  ;;  %v12517_v43 = vor.u32 %v14638_v39, %v12514_v23  ;;  %v12744_v35 = vld [vmem:[%s15357_s17 + $0x630] sm:$0xf]  ;;  %v5290_v13 = vadd.f32 %v17104_v17, %v5277_v36  ;;  %v14688_v17 = vld [vmem:[%s15357_s17 + $0x5f4] sm:$0xf0]  ;;  %v12016_v36 = vld [vmem:[%s15357_s17 + $0x80] sm:$0xf] }
 0x2ff   : > { %8218 = vmatmul.bf16.vlgmr.msra.gmra.mxu2 %v16950_v20  ;;  %8175 = vmatpush.bf16.msrb.mxu3 %v13461_v15  ;;  %v12745_v39 = vor.u32 %v14702_v25, %v12744_v35  ;;  %v14744_v35 = vld [vmem:[%s15357_s17 + $0x7b4] sm:$0xf0] }
 0x300   : > { %8262 = vmatpush.bf16.msrb.mxu2 %v13245_v37  ;;  %v12962_v37 = vld [vmem:[%s15357_s17 + $0x820] sm:$0xf0] }
 0x301   : > { %8237 = vmatpush.bf16.msrb.mxu0 %v12293_v45  ;;  %8250 = vmatpush.bf16.msrb.mxu1 %v12741_v46  ;;  %v12965_v46 = vor.u32 %v14750_v34, %v12962_v37  ;;  %v14576_v34 = vld [vmem:[%s15357_s17 + $0x274] sm:$0xf0]  ;;  %v12688_v37 = vld [vmem:[%s15357_s17 + $0x5c0] sm:$0xf] }
 0x302   : > { %v17126_v0 = vpop.f32.mrf.mxu2  ;;  %v17128_v40 = vpop.f32.mrf.mxu3 }
 0x303   : > { %v5291_v45 = vpop.f32.mrf.mxu0  ;;  %v5304_v50 = vpop.f32.mrf.mxu1  ;;  %8176 = vmatpush.bf16.msrb.mxu3 %v13405_v38  ;;  %v13136_v38 = vld [vmem:[%s15357_s17 + $0x940] sm:$0xf] }
 0x304   : > { %8263 = vmatpush.bf16.msrb.mxu2 %v13189_v52  ;;  %v13346_v52 = vld [vmem:[%s15357_s17 + $0xb28] sm:$0xf0]  ;;  %v12632_v50 = vld [vmem:[%s15357_s17 + $0x550] sm:$0xf] }
 0x305   : > { %8238 = vmatpush.bf16.msrb.mxu0 %v12237_v2  ;;  %8251 = vmatpush.bf16.msrb.mxu1 %v12685_v10  ;;  %v13349_v61 = vor.u32 %v14847_v51, %v13346_v52  ;;  %v12013_v2 = vor.u32 %v14512_v12, %v12010_v26  ;;  %v12461_v10 = vor.u32 %v14624_v44, %v12458_v47  ;;  %v14562_v47 = vld [vmem:[%s15357_s17 + $0x204] sm:$0xf0] }
 0x306   : > { %v12241_v12 = vor.u32 %v14576_v34, %v12240_v28  ;;  %v12689_v44 = vor.u32 %v14688_v17, %v12688_v37  ;;  %v14674_v51 = vld [vmem:[%s15357_s17 + $0x584] sm:$0xf0] }
 0x307   : > { %8177 = vmatpush.bf16.msrb.mxu3 %v13349_v61  ;;  %v14786_v52 = vld [vmem:[%s15357_s17 + $0x904] sm:$0xf0]  ;;  %v12128_v61 = vld [vmem:[%s15357_s17 + $0x160] sm:$0xf] }
 0x308   : > { %8264 = vmatpush.bf16.msrb.mxu2 %v13133_v5  ;;  %v12850_v5 = vld [vmem:[%s15357_s17 + $0x740] sm:$0xf0]  ;;  %v14618_v17 = vld [vmem:[%s15357_s17 + $0x3c4] sm:$0xf0] }
 0x309   : > { %8239 = vmatpush.bf16.msrb.mxu0 %v12181_v19  ;;  %8252 = vmatpush.bf16.msrb.mxu1 %v12629_v18  ;;  %v14716_v19 = vld [vmem:[%s15357_s17 + $0x6d4] sm:$0xf0]  ;;  %v13248_v18 = vld [vmem:[%s15357_s17 + $0xa20] sm:$0xf]  ;;  %v12853_v32 = vor.u32 %v14722_v3, %v12850_v5 }
 0x30a   : > { %v5317_v11 = vpop.f32.mrf.mxu2  ;;  %v5330_v48 = vpop.f32.mrf.mxu3  ;;  %v12801_v21 = vor.u32 %v14716_v19, %v12800_v9  ;;  %v13249_v15 = vor.u32 %v14828_v24, %v13248_v18  ;;  %v14772_v3 = vld [vmem:[%s15357_s17 + $0x894] sm:$0xf0]  ;;  %v12968_v9 = vld [vmem:[%s15357_s17 + $0x7f0] sm:$0xf]  ;;  %v14758_v19 = vld [vmem:[%s15357_s17 + $0x824] sm:$0xf0] }
 0x30b   : > { %8178 = vmatpush.bf16.msrb.mxu3 %v13293_v63  ;;  %v13025_v6 = vor.u32 %v14772_v3, %v13024_v1  ;;  %v12073_v63 = vor.u32 %v14534_v7, %v12072_v16  ;;  %v14695_v1 = vld [vmem:[%s15357_s17 + $0x634] sm:$0xf]  ;;  %v12746_v3 = vld [vmem:[%s15357_s17 + $0x668] sm:$0xf0] }
 0x30c   : > { %8265 = vmatpush.bf16.msrb.mxu2 %v13077_v54  ;;  %v11957_v54 = vor.u32 %v14498_v57, %v11954_v60  ;;  %v12633_v57 = vor.u32 %v14674_v51, %v12632_v50  ;;  %v12749_v7 = vor.u32 %v14695_v1, %v12746_v3 }
 0x30d   : > { %8240 = vmatpush.bf16.msrb.mxu0 %v12125_v33  ;;  %8253 = vmatpush.bf16.msrb.mxu1 %v12573_v30  ;;  %v12296_v33 = vld [vmem:[%s15357_s17 + $0x2b0] sm:$0xf]  ;;  %v14590_v30 = vld [vmem:[%s15357_s17 + $0x2e4] sm:$0xf0] }
 0x30e   : > { %v12297_v49 = vor.u32 %v14590_v30, %v12296_v33  ;;  %v14632_v33 = vld [vmem:[%s15357_s17 + $0x434] sm:$0xf0]  ;;  %v12912_v30 = vld [vmem:[%s15357_s17 + $0x780] sm:$0xf] }
 0x30f   : > { %v12913_v37 = vor.u32 %v14744_v35, %v12912_v30  ;;  %v12634_v30 = vld [vmem:[%s15357_s17 + $0x588] sm:$0xf0]  ;;  %v14779_v35 = vld [vmem:[%s15357_s17 + $0x8d4] sm:$0xf] }
 0x310   : > { %8266 = vmatpush.bf16.msrb.mxu2 %v13021_v22  ;;  %v14814_v22 = vld [vmem:[%s15357_s17 + $0x9e4] sm:$0xf0] }
 0x311   : > { %8241 = vmatpush.bf16.msrb.mxu0 %v12069_v42  ;;  %8254 = vmatpush.bf16.msrb.mxu1 %v12517_v43  ;;  %v13193_v23 = vor.u32 %v14814_v22, %v13192_v4  ;;  %v14800_v42 = vld [vmem:[%s15357_s17 + $0x974] sm:$0xf0]  ;;  %v5303_v43 = vadd.f32 %v17109_v31, %v5290_v13  ;;  %v13080_v31 = vld [vmem:[%s15357_s17 + $0x8d0] sm:$0xf] }
 0x312   : > { %v13137_v45 = vor.u32 %v14800_v42, %v13136_v38  ;;  %v13081_v60 = vor.u32 %v14786_v52, %v13080_v31  ;;  %v13688_v4 = vld [vmem:[%s15357_s17 + $0xd98] sm:$0xf]  ;;  %v14939_v22 = vld [vmem:[%s15357_s17 + $0xdcc] sm:$0xf0]  ;;  %v14730_v42 = vld [vmem:[%s15357_s17 + $0x744] sm:$0xf0] }
 0x313   : > { %v5316_v26 = vadd.f32 %v17126_v0, %v5303_v43  ;;  %v12856_v38 = vld [vmem:[%s15357_s17 + $0x710] sm:$0xf]  ;;  %v14597_v43 = vld [vmem:[%s15357_s17 + $0x324] sm:$0xf]  ;;  %v13250_v52 = vld [vmem:[%s15357_s17 + $0xa58] sm:$0xf0] }
 0x314   : > { %8267 = vmatpush.bf16.msrb.mxu2 %v12965_v46  ;;  %v12184_v46 = vld [vmem:[%s15357_s17 + $0x1d0] sm:$0xf] }
 0x315   : > { %8242 = vmatpush.bf16.msrb.mxu0 %v12013_v2  ;;  %8255 = vmatpush.bf16.msrb.mxu1 %v12461_v10  ;;  %v12185_v56 = vor.u32 %v14562_v47, %v12184_v46  ;;  %v5329_v0 = vadd.f32 %v17128_v40, %v5316_v26  ;;  %v14548_v2 = vld [vmem:[%s15357_s17 + $0x194] sm:$0xf0]  ;;  %v12576_v10 = vld [vmem:[%s15357_s17 + $0x4e0] sm:$0xf]  ;;  %v12802_v46 = vld [vmem:[%s15357_s17 + $0x6d8] sm:$0xf0] }
 0x316   : > { %v12129_v40 = vor.u32 %v14548_v2, %v12128_v61  ;;  %v12577_v5 = vor.u32 %v14660_v27, %v12576_v10  ;;  %v14821_v47 = vld [vmem:[%s15357_s17 + $0xa24] sm:$0xf]  ;;  %v14583_v61 = vld [vmem:[%s15357_s17 + $0x2b4] sm:$0xf]  ;;  %v12298_v2 = vld [vmem:[%s15357_s17 + $0x2e8] sm:$0xf0] }
 0x317   : > { %v13253_v10 = vor.u32 %v14821_v47, %v13250_v52  ;;  %v12301_v16 = vor.u32 %v14583_v61, %v12298_v2  ;;  %v12074_v52 = vld [vmem:[%s15357_s17 + $0x128] sm:$0xf0]  ;;  %v13352_v61 = vld [vmem:[%s15357_s17 + $0xaf8] sm:$0xf]  ;;  %v14855_v2 = vld [vmem:[%s15357_s17 + $0xb2c] sm:$0xf0] }
 0x318   : > { %8268 = vmatpush.bf16.msrb.mxu2 %v12909_v62 }
 0x319   : > { %8243 = vmatpush.bf16.msrb.mxu0 %v11957_v54  ;;  %8256 = vmatpush.bf16.msrb.mxu1 %v12405_v41 }
 0x31b   : > { %v5341_v53 = vpop.f32.mrf.mxu0  ;;  %v5354_v55 = vpop.f32.mrf.mxu1 }
 0x31c   : > { %8269 = vmatpush.bf16.msrb.mxu2 %v12853_v32  ;;  %8244 = vmatmul.bf16.vlgmr.msrb.gmra.mxu0 %v16946_v58  ;;  %v5342_v62 = vadd.f32 %v5341_v53, %v5329_v0  ;;  %v12521_v32 = vor.u32 %v14646_v8, %v12520_v29  ;;  %v14925_v0 = vld [vmem:[%s15357_s17 + $0xd5c] sm:$0xf0]  ;;  %v14569_v29 = vld [vmem:[%s15357_s17 + $0x244] sm:$0xf]  ;;  %v12242_v8 = vld [vmem:[%s15357_s17 + $0x278] sm:$0xf0] }
 0x31d   : > { %8288 = vmatpush.bf16.msra.mxu0 %v12353_v14  ;;  %8301 = vmatpush.bf16.msra.mxu1 %v12801_v21  ;;  %v12969_v14 = vor.u32 %v14758_v19, %v12968_v9  ;;  %v14520_v21 = vld [vmem:[%s15357_s17 + $0xb4] sm:$0xf0] }
 0x31e   : > { %8257 = vmatmul.bf16.vlgmr.msrb.gmra.mxu1 %v16948_v59  ;;  %v5355_v18 = vadd.f32 %v5354_v55, %v5342_v62  ;;  %v12017_v13 = vor.u32 %v14520_v21, %v12016_v36  ;;  %v12857_v55 = vor.u32 %v14730_v42, %v12856_v38  ;;  %v14807_v62 = vld [vmem:[%s15357_s17 + $0x9b4] sm:$0xf]  ;;  %v12578_v38 = vld [vmem:[%s15357_s17 + $0x518] sm:$0xf0] }
 0x31f   : > { %8270 = vmatmul.bf16.vlgmr.msrb.gmra.mxu2 %v16950_v20 }
 0x320   : > { %8314 = vmatpush.bf16.msra.mxu2 %v13249_v15  ;;  %v12464_v15 = vld [vmem:[%s15357_s17 + $0x400] sm:$0xf] }
 0x321   : > { %8289 = vmatpush.bf16.msra.mxu0 %v12297_v49  ;;  %8302 = vmatpush.bf16.msra.mxu1 %v12745_v39  ;;  %v11960_v49 = vld [vmem:[%s15357_s17 + $0x10] sm:$0xf]  ;;  %v14506_v39 = vld [vmem:[%s15357_s17 + $0x44] sm:$0xf0]  ;;  %v12465_v34 = vor.u32 %v14632_v33, %v12464_v15  ;;  %v12186_v15 = vld [vmem:[%s15357_s17 + $0x208] sm:$0xf0] }
 0x322   : > { %v5367_v24 = vpop.f32.mrf.mxu2  ;;  %v5380_v11 = vpop.f32.mrf.mxu3  ;;  %v11961_v31 = vor.u32 %v14506_v39, %v11960_v49  ;;  %v14667_v33 = vld [vmem:[%s15357_s17 + $0x554] sm:$0xf] }
 0x323   : > { %v5368_v54 = vadd.f32 %v5367_v24, %v5355_v18  ;;  %v5343_v41 = vpop.f32.mrf.mxu0  ;;  %v5356_v48 = vpop.f32.mrf.mxu1  ;;  %v14681_v18 = vld [vmem:[%s15357_s17 + $0x5c4] sm:$0xf]  ;;  %v12690_v24 = vld [vmem:[%s15357_s17 + $0x5f8] sm:$0xf0]  ;;  %v12637_v39 = vor.u32 %v14667_v33, %v12634_v30  ;;  %v12858_v33 = vld [vmem:[%s15357_s17 + $0x748] sm:$0xf0] }
 0x324   : > { %8315 = vmatpush.bf16.msra.mxu2 %v13193_v23  ;;  %v12408_v23 = vld [vmem:[%s15357_s17 + $0x390] sm:$0xf]  ;;  %v14897_v41 = vld [vmem:[%s15357_s17 + $0xc7c] sm:$0xf0]  ;;  %v12245_v48 = vor.u32 %v14569_v29, %v12242_v8  ;;  %v13353_v29 = vor.u32 %v14855_v2, %v13352_v61  ;;  %v14737_v8 = vld [vmem:[%s15357_s17 + $0x784] sm:$0xf] }
 0x325   : > { %8290 = vmatpush.bf16.msra.mxu0 %v12241_v12  ;;  %8303 = vmatpush.bf16.msra.mxu1 %v12689_v44  ;;  %v5381_v25 = vadd.f32 %v5380_v11, %v5368_v54  ;;  %v12354_v12 = vld [vmem:[%s15357_s17 + $0x358] sm:$0xf0]  ;;  %v13689_v44 = vor.u32 %v14939_v22, %v13688_v4  ;;  %v12409_v53 = vor.u32 %v14618_v17, %v12408_v23  ;;  %v14793_v11 = vld [vmem:[%s15357_s17 + $0x944] sm:$0xf]  ;;  %v13520_v54 = vld [vmem:[%s15357_s17 + $0xc48] sm:$0xf] }
 0x326   : > { %v13521_v21 = vor.u32 %v14897_v41, %v13520_v54  ;;  %v13464_v4 = vld [vmem:[%s15357_s17 + $0xbd8] sm:$0xf]  ;;  %v14883_v22 = vld [vmem:[%s15357_s17 + $0xc0c] sm:$0xf0]  ;;  %v14541_v23 = vld [vmem:[%s15357_s17 + $0x164] sm:$0xf] }
 0x327   : > { %v5387_v28 = vmax.f32 %v5381_v25, 0.0  ;;  %v13082_v25 = vld [vmem:[%s15357_s17 + $0x908] sm:$0xf0]  ;;  %v14653_v17 = vld [vmem:[%s15357_s17 + $0x4e4] sm:$0xf] }
 0x328   : > { %8316 = vmatpush.bf16.msra.mxu2 %v13137_v45  ;;  %v14709_v45 = vld [vmem:[%s15357_s17 + $0x6a4] sm:$0xf]  ;;  %v13690_v54 = vld [vmem:[%s15357_s17 + $0xdd0] sm:$0xf0]  ;;  %v12360_v30 = vld [vmem:[%s15357_s17 + $0x328] sm:$0xf] }
 0x329   : > { %8291 = vmatpush.bf16.msra.mxu0 %v12185_v56  ;;  %8304 = vmatpush.bf16.msra.mxu1 %v12633_v57  ;;  %v17208_v26 = vpack.c.bf16 %v5387_v28, %v5387_v28  ;;  %v13632_v56 = vld [vmem:[%s15357_s17 + $0xd28] sm:$0xf]  ;;  %v12357_v57 = vor.u32 %v14597_v43, %v12354_v12  ;;  %v13465_v43 = vor.u32 %v14883_v22, %v13464_v4  ;;  %v14765_v12 = vld [vmem:[%s15357_s17 + $0x864] sm:$0xf]  ;;  %v14499_v41 = vld [vmem:[%s15357_s17 + $0x14] sm:$0xf] }
 0x32a   : > { %v5369_v50 = vpop.f32.mrf.mxu2  ;;  %v5382_v51 = vpop.f32.mrf.mxu3  ;;  %v13633_v27 = vor.u32 %v14925_v0, %v13632_v56  ;;  %v14639_v56 = vld [vmem:[%s15357_s17 + $0x474] sm:$0xf]  ;;  %v12522_v0 = vld [vmem:[%s15357_s17 + $0x4a8] sm:$0xf0]  ;;  %v12808_v22 = vld [vmem:[%s15357_s17 + $0x6a8] sm:$0xf] }
 0x32b   : > { %8127 = vmatmul.bf16.vlgmr.msra.gmra.mxu3 %v17208_v26  ;;  %v12581_v50 = vor.u32 %v14653_v17, %v12578_v38  ;;  %v14527_v51 = vld [vmem:[%s15357_s17 + $0xf4] sm:$0xf]  ;;  %v12525_v3 = vor.u32 %v14639_v56, %v12522_v0  ;;  %v12696_v61 = vld [vmem:[%s15357_s17 + $0x5c8] sm:$0xf]  ;;  %v14689_v2 = vld [vmem:[%s15357_s17 + $0x5fc] sm:$0xf0] }
 0x32c   : > { %8317 = vmatpush.bf16.msra.mxu2 %v13081_v60  ;;  %v12805_v60 = vor.u32 %v14709_v45, %v12802_v46  ;;  %8223 = vmatpush.bf16.msra.mxu3 %v13689_v44  ;;  %v13026_v44 = vld [vmem:[%s15357_s17 + $0x898] sm:$0xf0]  ;;  %v13408_v45 = vld [vmem:[%s15357_s17 + $0xb68] sm:$0xf]  ;;  %v14869_v46 = vld [vmem:[%s15357_s17 + $0xb9c] sm:$0xf0]  ;;  %v12077_v1 = vor.u32 %v14527_v51, %v12074_v52 }
 0x32d   : > { %8292 = vmatpush.bf16.msra.mxu0 %v12129_v40  ;;  %8305 = vmatpush.bf16.msra.mxu1 %v12577_v5  ;;  %v13194_v40 = vld [vmem:[%s15357_s17 + $0x9e8] sm:$0xf0]  ;;  %v13576_v5 = vld [vmem:[%s15357_s17 + $0xcb8] sm:$0xf]  ;;  %v14815_v51 = vld [vmem:[%s15357_s17 + $0x9ec] sm:$0xf0] }
 0x32e   : > { %v13197_v9 = vor.u32 %v14807_v62, %v13194_v40  ;;  %v14513_v62 = vld [vmem:[%s15357_s17 + $0x84] sm:$0xf]  ;;  %v13578_v52 = vld [vmem:[%s15357_s17 + $0xcf0] sm:$0xf0] }
 0x330   : > { %8318 = vmatpush.bf16.msra.mxu2 %v13025_v6  ;;  %v14911_v6 = vld [vmem:[%s15357_s17 + $0xcec] sm:$0xf0]  ;;  %8224 = vmatpush.bf16.msra.mxu3 %v13633_v27 }
 0x331   : > { %8293 = vmatpush.bf16.msra.mxu0 %v12073_v63  ;;  %8306 = vmatpush.bf16.msra.mxu1 %v12521_v32  ;;  %v13577_v19 = vor.u32 %v14911_v6, %v13576_v5  ;;  %v13138_v63 = vld [vmem:[%s15357_s17 + $0x978] sm:$0xf0]  ;;  %v12693_v32 = vor.u32 %v14681_v18, %v12690_v24  ;;  %v14841_v18 = vld [vmem:[%s15357_s17 + $0xabc] sm:$0xf0] }
 0x332   : > { %v13141_v36 = vor.u32 %v14793_v11, %v13138_v63  ;;  %v12018_v6 = vld [vmem:[%s15357_s17 + $0xb8] sm:$0xf0] }
 0x333   : > { %v14932_v24 = vld [vmem:[%s15357_s17 + $0xd9c] sm:$0xf]  ;;  %v12021_v11 = vor.u32 %v14513_v62, %v12018_v6  ;;  %v13522_v62 = vld [vmem:[%s15357_s17 + $0xc80] sm:$0xf0]  ;;  %v12192_v6 = vld [vmem:[%s15357_s17 + $0x1d8] sm:$0xf] }
 0x334   : > { %8319 = vmatpush.bf16.msra.mxu2 %v12969_v14  ;;  %v14555_v14 = vld [vmem:[%s15357_s17 + $0x1d4] sm:$0xf]  ;;  %8225 = vmatpush.bf16.msra.mxu3 %v13577_v19  ;;  %v13296_v19 = vld [vmem:[%s15357_s17 + $0xa88] sm:$0xf]  ;;  %v13693_v4 = vor.u32 %v14932_v24, %v13690_v54  ;;  %v14876_v24 = vld [vmem:[%s15357_s17 + $0xbdc] sm:$0xf] }
 0x335   : > { %8294 = vmatpush.bf16.msra.mxu0 %v12017_v13  ;;  %8307 = vmatpush.bf16.msra.mxu1 %v12465_v34  ;;  %v12189_v49 = vor.u32 %v14555_v14, %v12186_v15  ;;  %v13085_v34 = vor.u32 %v14779_v35, %v13082_v25  ;;  %v14611_v14 = vld [vmem:[%s15357_s17 + $0x394] sm:$0xf]  ;;  %v13297_v15 = vor.u32 %v14841_v18, %v13296_v19  ;;  %v14605_v35 = vld [vmem:[%s15357_s17 + $0x35c] sm:$0xf0]  ;;  %v13088_v19 = vld [vmem:[%s15357_s17 + $0x8d8] sm:$0xf] }
 0x336   : > { %v12361_v38 = vor.u32 %v14605_v35, %v12360_v30  ;;  %v14787_v18 = vld [vmem:[%s15357_s17 + $0x90c] sm:$0xf0]  ;;  %v14661_v30 = vld [vmem:[%s15357_s17 + $0x51c] sm:$0xf0]  ;;  %v13032_v35 = vld [vmem:[%s15357_s17 + $0x868] sm:$0xf] }
 0x338   : > { %8320 = vmatpush.bf16.msra.mxu2 %v12913_v37  ;;  %8226 = vmatpush.bf16.msra.mxu3 %v13521_v21  ;;  %v12130_v37 = vld [vmem:[%s15357_s17 + $0x198] sm:$0xf0]  ;;  %v14723_v21 = vld [vmem:[%s15357_s17 + $0x714] sm:$0xf] }
 0x339   : > { %8295 = vmatpush.bf16.msra.mxu0 %v11961_v31  ;;  %8308 = vmatpush.bf16.msra.mxu1 %v12409_v53  ;;  %v8089_v13 = vpop.f32.mrf.mxu0  ;;  %v12133_v47 = vor.u32 %v14541_v23, %v12130_v37  ;;  %v13029_v31 = vor.u32 %v14765_v12, %v13026_v44  ;;  %v13409_v53 = vor.u32 %v14869_v46, %v13408_v45  ;;  %v13634_v37 = vld [vmem:[%s15357_s17 + $0xd60] sm:$0xf0]  ;;  %v14591_v12 = vld [vmem:[%s15357_s17 + $0x2ec] sm:$0xf0]  ;;  %v12752_v46 = vld [vmem:[%s15357_s17 + $0x638] sm:$0xf] }
 0x33a   : > { %v12861_v17 = vor.u32 %v14723_v21, %v12858_v33  ;;  %v13089_v21 = vor.u32 %v14787_v18, %v13088_v19  ;;  %v12584_v33 = vld [vmem:[%s15357_s17 + $0x4e8] sm:$0xf]  ;;  %v14731_v19 = vld [vmem:[%s15357_s17 + $0x74c] sm:$0xf0]  ;;  %v14598_v18 = vld [vmem:[%s15357_s17 + $0x32c] sm:$0xf] }
 0x33b   : > { %v8102_v28 = vpop.f32.mrf.mxu1  ;;  %8179 = vmatmul.bf16.vlgmr.msrb.gmra.mxu3 %v17208_v26 }
 0x33c   : > { %8321 = vmatpush.bf16.msra.mxu2 %v12857_v55  ;;  %8296 = vmatmul.bf16.vlgmr.msra.gmra.mxu0 %v16946_v58  ;;  %v8103_v42 = vadd.f32 %v8102_v28, %v8089_v13  ;;  %v14751_v55 = vld [vmem:[%s15357_s17 + $0x7f4] sm:$0xf]  ;;  %v14717_v13 = vld [vmem:[%s15357_s17 + $0x6dc] sm:$0xf0] }
 0x33d   : > { %8340 = vmatpush.bf16.msrb.mxu0 %v12357_v57  ;;  %8353 = vmatpush.bf16.msrb.mxu1 %v12805_v60  ;;  %v12970_v57 = vld [vmem:[%s15357_s17 + $0x828] sm:$0xf0]  ;;  %v14829_v28 = vld [vmem:[%s15357_s17 + $0xa5c] sm:$0xf0] }
 0x33e   : > { %8309 = vmatmul.bf16.vlgmr.msra.gmra.mxu1 %v16948_v59  ;;  %8227 = vmatpush.bf16.msra.mxu3 %v13465_v43  ;;  %v12973_v5 = vor.u32 %v14751_v55, %v12970_v57  ;;  %v12304_v43 = vld [vmem:[%s15357_s17 + $0x2b8] sm:$0xf]  ;;  %v14577_v55 = vld [vmem:[%s15357_s17 + $0x27c] sm:$0xf0] }
 0x33f   : > { %8322 = vmatmul.bf16.vlgmr.msra.gmra.mxu2 %v16950_v20  ;;  %v12305_v56 = vor.u32 %v14591_v12, %v12304_v43  ;;  %v14848_v43 = vld [vmem:[%s15357_s17 + $0xafc] sm:$0xf]  ;;  %v13354_v12 = vld [vmem:[%s15357_s17 + $0xb30] sm:$0xf0] }
 0x340   : > { %8366 = vmatpush.bf16.msrb.mxu2 %v13253_v10 }
 0x341   : > { %8341 = vmatpush.bf16.msrb.mxu0 %v12301_v16  ;;  %8354 = vmatpush.bf16.msrb.mxu1 %v12749_v7  ;;  %v8091_v27 = vpop.f32.mrf.mxu0  ;;  %v14625_v16 = vld [vmem:[%s15357_s17 + $0x404] sm:$0xf]  ;;  %v12466_v7 = vld [vmem:[%s15357_s17 + $0x438] sm:$0xf0] }
 0x342   : > { %v8115_v60 = vpop.f32.mrf.mxu2  ;;  %8228 = vmatpush.bf16.msra.mxu3 %v13409_v53  ;;  %v12469_v63 = vor.u32 %v14625_v16, %v12466_v7  ;;  %v12248_v53 = vld [vmem:[%s15357_s17 + $0x248] sm:$0xf]  ;;  %v14563_v16 = vld [vmem:[%s15357_s17 + $0x20c] sm:$0xf0] }
 0x343   : > { %v17261_v10 = vadd.f32 %v8115_v60, %v8103_v42  ;;  %v8104_v40 = vpop.f32.mrf.mxu1  ;;  %v12809_v42 = vor.u32 %v14717_v13, %v12808_v22  ;;  %v13144_v27 = vld [vmem:[%s15357_s17 + $0x948] sm:$0xf]  ;;  %v13410_v22 = vld [vmem:[%s15357_s17 + $0xba0] sm:$0xf0] }
 0x344   : > { %8367 = vmatpush.bf16.msrb.mxu2 %v13197_v9  ;;  %v12914_v9 = vld [vmem:[%s15357_s17 + $0x7b8] sm:$0xf0]  ;;  %v12249_v40 = vor.u32 %v14577_v55, %v12248_v53  ;;  %v12472_v53 = vld [vmem:[%s15357_s17 + $0x408] sm:$0xf]  ;;  %v14633_v55 = vld [vmem:[%s15357_s17 + $0x43c] sm:$0xf0] }
 0x345   : > { %8342 = vmatpush.bf16.msrb.mxu0 %v12245_v48  ;;  %8355 = vmatpush.bf16.msrb.mxu1 %v12693_v32  ;;  %v11962_v48 = vld [vmem:[%s15357_s17 + $0x48] sm:$0xf0]  ;;  %v12917_v32 = vor.u32 %v14737_v8, %v12914_v9  ;;  %v12640_v8 = vld [vmem:[%s15357_s17 + $0x558] sm:$0xf]  ;;  %v14675_v9 = vld [vmem:[%s15357_s17 + $0x58c] sm:$0xf0] }
 0x346   : > { %8229 = vmatpush.bf16.msra.mxu3 %v13353_v29 }
 0x348   : > { %8368 = vmatpush.bf16.msrb.mxu2 %v13141_v36  ;;  %v12410_v36 = vld [vmem:[%s15357_s17 + $0x3c8] sm:$0xf0] }
 0x349   : > { %8343 = vmatpush.bf16.msrb.mxu0 %v12189_v49  ;;  %8356 = vmatpush.bf16.msrb.mxu1 %v12637_v39  ;;  %v13256_v49 = vld [vmem:[%s15357_s17 + $0xa28] sm:$0xf]  ;;  %v11965_v39 = vor.u32 %v14499_v41, %v11962_v48  ;;  %v12413_v23 = vor.u32 %v14611_v14, %v12410_v36  ;;  %v12193_v41 = vor.u32 %v14563_v16, %v12192_v6  ;;  %v14549_v14 = vld [vmem:[%s15357_s17 + $0x19c] sm:$0xf0] }
 0x34a   : > { %v8117_v25 = vpop.f32.mrf.mxu2  ;;  %8230 = vmatpush.bf16.msra.mxu3 %v13297_v15  ;;  %v13257_v44 = vor.u32 %v14829_v28, %v13256_v49  ;;  %v12641_v48 = vor.u32 %v14675_v9, %v12640_v8  ;;  %v12585_v49 = vor.u32 %v14661_v30, %v12584_v33  ;;  %v12864_v8 = vld [vmem:[%s15357_s17 + $0x718] sm:$0xf] }
 0x34b   : > { %v14773_v25 = vld [vmem:[%s15357_s17 + $0x89c] sm:$0xf0] }
 0x34c   : > { %8369 = vmatpush.bf16.msrb.mxu2 %v13085_v34  ;;  %v14918_v34 = vld [vmem:[%s15357_s17 + $0xd2c] sm:$0xf]  ;;  %v13033_v28 = vor.u32 %v14773_v25, %v13032_v35  ;;  %v14584_v35 = vld [vmem:[%s15357_s17 + $0x2bc] sm:$0xf]  ;;  %v12306_v25 = vld [vmem:[%s15357_s17 + $0x2f0] sm:$0xf0] }
 0x34d   : > { %8344 = vmatpush.bf16.msrb.mxu0 %v12133_v47  ;;  %8357 = vmatpush.bf16.msrb.mxu1 %v12581_v50  ;;  %v13637_v45 = vor.u32 %v14918_v34, %v13634_v37  ;;  %v14703_v47 = vld [vmem:[%s15357_s17 + $0x66c] sm:$0xf0]  ;;  %v13200_v50 = vld [vmem:[%s15357_s17 + $0x9b8] sm:$0xf] }
 0x34e   : > { %8275 = vmatpush.bf16.msrb.mxu3 %v13693_v4  ;;  %v12753_v0 = vor.u32 %v14703_v47, %v12752_v46  ;;  %v13201_v57 = vor.u32 %v14815_v51, %v13200_v50  ;;  %v14862_v4 = vld [vmem:[%s15357_s17 + $0xb6c] sm:$0xf]  ;;  %v12528_v37 = vld [vmem:[%s15357_s17 + $0x478] sm:$0xf] }
 0x34f   : > { %8231 = vmatmul.bf16.vlgmr.msra.gmra.mxu3 %v17208_v26  ;;  %v13413_v34 = vor.u32 %v14862_v4, %v13410_v22 }
 0x350   : > { %8370 = vmatpush.bf16.msrb.mxu2 %v13029_v31  ;;  %v14904_v31 = vld [vmem:[%s15357_s17 + $0xcbc] sm:$0xf] }
 0x351   : > { %8345 = vmatpush.bf16.msrb.mxu0 %v12077_v1  ;;  %8358 = vmatpush.bf16.msrb.mxu1 %v12525_v3  ;;  %v13581_v60 = vor.u32 %v14904_v31, %v13578_v52  ;;  %v14801_v1 = vld [vmem:[%s15357_s17 + $0x97c] sm:$0xf0]  ;;  %v14890_v3 = vld [vmem:[%s15357_s17 + $0xc4c] sm:$0xf]  ;;  %v12024_v31 = vld [vmem:[%s15357_s17 + $0x88] sm:$0xf] }
 0x352   : > { %8276 = vmatpush.bf16.msrb.mxu3 %v13637_v45  ;;  %v13145_v7 = vor.u32 %v14801_v1, %v13144_v27  ;;  %v13525_v29 = vor.u32 %v14890_v3, %v13522_v62  ;;  %v14521_v52 = vld [vmem:[%s15357_s17 + $0xbc] sm:$0xf0]  ;;  %v14940_v1 = vld [vmem:[%s15357_s17 + $0xdd4] sm:$0xf0]  ;;  %v12473_v62 = vor.u32 %v14633_v55, %v12472_v53  ;;  %v12194_v53 = vld [vmem:[%s15357_s17 + $0x210] sm:$0xf0] }
 0x353   : > { %v13696_v27 = vld [vmem:[%s15357_s17 + $0xda0] sm:$0xf]  ;;  %v12025_v3 = vor.u32 %v14521_v52, %v12024_v31  ;;  %v14898_v31 = vld [vmem:[%s15357_s17 + $0xc84] sm:$0xf0] }
 0x354   : > { %8371 = vmatpush.bf16.msrb.mxu2 %v12973_v5  ;;  %v12697_v5 = vor.u32 %v14689_v2, %v12696_v61  ;;  %v14834_v61 = vld [vmem:[%s15357_s17 + $0xa8c] sm:$0xf]  ;;  %v13298_v2 = vld [vmem:[%s15357_s17 + $0xac0] sm:$0xf0]  ;;  %v13697_v9 = vor.u32 %v14940_v1, %v13696_v27  ;;  %v13090_v27 = vld [vmem:[%s15357_s17 + $0x910] sm:$0xf0] }
 0x355   : > { %8346 = vmatpush.bf16.msrb.mxu0 %v12021_v11  ;;  %8359 = vmatpush.bf16.msrb.mxu1 %v12469_v63  ;;  %v13466_v11 = vld [vmem:[%s15357_s17 + $0xc10] sm:$0xf0]  ;;  %v13301_v16 = vor.u32 %v14834_v61, %v13298_v2  ;;  %v14780_v2 = vld [vmem:[%s15357_s17 + $0x8dc] sm:$0xf]  ;;  %v13472_v1 = vld [vmem:[%s15357_s17 + $0xbe0] sm:$0xf] }
 0x356   : > { %8277 = vmatpush.bf16.msrb.mxu3 %v13581_v60  ;;  %v13469_v15 = vor.u32 %v14876_v24, %v13466_v11  ;;  %v14745_v60 = vld [vmem:[%s15357_s17 + $0x7bc] sm:$0xf0]  ;;  %v12362_v24 = vld [vmem:[%s15357_s17 + $0x360] sm:$0xf0]  ;;  %v12642_v61 = vld [vmem:[%s15357_s17 + $0x590] sm:$0xf0] }
 0x357   : > { %v12365_v33 = vor.u32 %v14598_v18, %v12362_v24  ;;  %v12586_v18 = vld [vmem:[%s15357_s17 + $0x520] sm:$0xf0]  ;;  %v14766_v24 = vld [vmem:[%s15357_s17 + $0x86c] sm:$0xf] }
 0x358   : > { %8372 = vmatpush.bf16.msrb.mxu2 %v12917_v32  ;;  %v12136_v32 = vld [vmem:[%s15357_s17 + $0x168] sm:$0xf] }
 0x359   : > { %8347 = vmatpush.bf16.msrb.mxu0 %v11965_v39  ;;  %8360 = vmatpush.bf16.msrb.mxu1 %v12413_v23  ;;  %v8141_v63 = vpop.f32.mrf.mxu0  ;;  %v12137_v13 = vor.u32 %v14549_v14, %v12136_v32  ;;  %v12080_v39 = vld [vmem:[%s15357_s17 + $0xf8] sm:$0xf]  ;;  %v14535_v23 = vld [vmem:[%s15357_s17 + $0x12c] sm:$0xf0]  ;;  %v13258_v32 = vld [vmem:[%s15357_s17 + $0xa60] sm:$0xf0] }
 0x35a   : > { %8278 = vmatpush.bf16.msrb.mxu3 %v13525_v29  ;;  %v12081_v50 = vor.u32 %v14535_v23, %v12080_v39  ;;  %v14619_v29 = vld [vmem:[%s15357_s17 + $0x3cc] sm:$0xf0]  ;;  %v14808_v39 = vld [vmem:[%s15357_s17 + $0x9bc] sm:$0xf]  ;;  %v13202_v23 = vld [vmem:[%s15357_s17 + $0x9f0] sm:$0xf0] }
 0x35b   : > { %v8154_v54 = vpop.f32.mrf.mxu1  ;;  %v13640_v14 = vld [vmem:[%s15357_s17 + $0xd30] sm:$0xf] }
 0x35c   : > { %8373 = vmatpush.bf16.msrb.mxu2 %v12861_v17  ;;  %8348 = vmatmul.bf16.vlgmr.msrb.gmra.mxu0 %v16946_v58  ;;  %v8155_v36 = vadd.f32 %v8154_v54, %v8141_v63  ;;  %v14647_v17 = vld [vmem:[%s15357_s17 + $0x4ac] sm:$0xf0]  ;;  %v14710_v63 = vld [vmem:[%s15357_s17 + $0x6ac] sm:$0xf]  ;;  %v12810_v54 = vld [vmem:[%s15357_s17 + $0x6e0] sm:$0xf0] }
 0x35d   : > { %8392 = vmatpush.bf16.msra.mxu0 %v12361_v38  ;;  %8405 = vmatpush.bf16.msra.mxu1 %v12809_v42  ;;  %v12976_v38 = vld [vmem:[%s15357_s17 + $0x7f8] sm:$0xf]  ;;  %v14759_v42 = vld [vmem:[%s15357_s17 + $0x82c] sm:$0xf0]  ;;  %v12529_v51 = vor.u32 %v14647_v17, %v12528_v37  ;;  %v12813_v30 = vor.u32 %v14710_v63, %v12810_v54  ;;  %v12309_v37 = vor.u32 %v14584_v35, %v12306_v25  ;;  %v14870_v54 = vld [vmem:[%s15357_s17 + $0xba4] sm:$0xf0] }
 0x35e   : > { %8361 = vmatmul.bf16.vlgmr.msrb.gmra.mxu1 %v16948_v59  ;;  %8279 = vmatpush.bf16.msrb.mxu3 %v13469_v15  ;;  %v12865_v15 = vor.u32 %v14731_v19, %v12864_v8  ;;  %v13093_v8 = vor.u32 %v14780_v2, %v13090_v27  ;;  %v14654_v19 = vld [vmem:[%s15357_s17 + $0x4ec] sm:$0xf]  ;;  %v13416_v63 = vld [vmem:[%s15357_s17 + $0xb70] sm:$0xf]  ;;  %v12978_v25 = vld [vmem:[%s15357_s17 + $0x830] sm:$0xf0] }
 0x35f   : > { %8374 = vmatmul.bf16.vlgmr.msrb.gmra.mxu2 %v16950_v20 }
 0x360   : > { %8418 = vmatpush.bf16.msra.mxu2 %v13257_v44 }
 0x361   : > { %8393 = vmatpush.bf16.msra.mxu0 %v12305_v56  ;;  %8406 = vmatpush.bf16.msra.mxu1 %v12753_v0  ;;  %v8143_v46 = vpop.f32.mrf.mxu0  ;;  %v12977_v56 = vor.u32 %v14759_v42, %v12976_v38  ;;  %v13357_v0 = vor.u32 %v14848_v43, %v13354_v12  ;;  %v14570_v38 = vld [vmem:[%s15357_s17 + $0x24c] sm:$0xf]  ;;  %v12250_v42 = vld [vmem:[%s15357_s17 + $0x280] sm:$0xf0]  ;;  %v13205_v43 = vor.u32 %v14808_v39, %v13202_v23 }
 0x362   : > { %v8167_v44 = vpop.f32.mrf.mxu2  ;;  %8280 = vmatpush.bf16.msrb.mxu3 %v13413_v34  ;;  %v14912_v34 = vld [vmem:[%s15357_s17 + $0xcf4] sm:$0xf0]  ;;  %v12698_v46 = vld [vmem:[%s15357_s17 + $0x600] sm:$0xf0]  ;;  %v12253_v52 = vor.u32 %v14570_v38, %v12250_v42  ;;  %v14626_v42 = vld [vmem:[%s15357_s17 + $0x40c] sm:$0xf] }
 0x363   : > { %v17331_v45 = vadd.f32 %v8167_v44, %v8155_v36  ;;  %v8156_v47 = vpop.f32.mrf.mxu1  ;;  %v14926_v36 = vld [vmem:[%s15357_s17 + $0xd64] sm:$0xf0]  ;;  %v14682_v44 = vld [vmem:[%s15357_s17 + $0x5cc] sm:$0xf] }
 0x364   : > { %8419 = vmatpush.bf16.msra.mxu2 %v13201_v57  ;;  %v12920_v57 = vld [vmem:[%s15357_s17 + $0x788] sm:$0xf]  ;;  %v13641_v22 = vor.u32 %v14926_v36, %v13640_v14  ;;  %v14794_v47 = vld [vmem:[%s15357_s17 + $0x94c] sm:$0xf]  ;;  %v12082_v14 = vld [vmem:[%s15357_s17 + $0x130] sm:$0xf0] }
 0x365   : > { %8394 = vmatpush.bf16.msra.mxu0 %v12249_v40  ;;  %8407 = vmatpush.bf16.msra.mxu1 %v12697_v5  ;;  %v11968_v40 = vld [vmem:[%s15357_s17 + $0x18] sm:$0xf]  ;;  %v14507_v5 = vld [vmem:[%s15357_s17 + $0x4c] sm:$0xf0]  ;;  %v12921_v6 = vor.u32 %v14745_v60, %v12920_v57  ;;  %v14668_v60 = vld [vmem:[%s15357_s17 + $0x55c] sm:$0xf] }
 0x366   : > { %8281 = vmatpush.bf16.msrb.mxu3 %v13357_v0  ;;  %v14556_v0 = vld [vmem:[%s15357_s17 + $0x1dc] sm:$0xf] }
 0x368   : > { %8420 = vmatpush.bf16.msra.mxu2 %v13145_v7  ;;  %v12416_v7 = vld [vmem:[%s15357_s17 + $0x398] sm:$0xf] }
 0x369   : > { %8395 = vmatpush.bf16.msra.mxu0 %v12193_v41  ;;  %8408 = vmatpush.bf16.msra.mxu1 %v12641_v48  ;;  %v14822_v41 = vld [vmem:[%s15357_s17 + $0xa2c] sm:$0xf]  ;;  %v11969_v48 = vor.u32 %v14507_v5, %v11968_v40  ;;  %v12197_v5 = vor.u32 %v14556_v0, %v12194_v53  ;;  %v11970_v0 = vld [vmem:[%s15357_s17 + $0x50] sm:$0xf0] }
 0x36a   : > { %v8169_v11 = vpop.f32.mrf.mxu2  ;;  %8282 = vmatpush.bf16.msrb.mxu3 %v13301_v16  ;;  %v13261_v4 = vor.u32 %v14822_v41, %v13258_v32  ;;  %v14542_v16 = vld [vmem:[%s15357_s17 + $0x16c] sm:$0xf]  ;;  %v14528_v32 = vld [vmem:[%s15357_s17 + $0xfc] sm:$0xf] }
 0x36b   : > { %v13034_v11 = vld [vmem:[%s15357_s17 + $0x8a0] sm:$0xf0]  ;;  %v12085_v23 = vor.u32 %v14528_v32, %v12082_v14  ;;  %v14704_v32 = vld [vmem:[%s15357_s17 + $0x674] sm:$0xf0]  ;;  %v13208_v14 = vld [vmem:[%s15357_s17 + $0x9c0] sm:$0xf] }
 0x36c   : > { %8421 = vmatpush.bf16.msra.mxu2 %v13089_v21  ;;  %v12417_v21 = vor.u32 %v14619_v29, %v12416_v7  ;;  %v12138_v7 = vld [vmem:[%s15357_s17 + $0x1a0] sm:$0xf0]  ;;  %v13037_v36 = vor.u32 %v14766_v24, %v13034_v11  ;;  %v12312_v11 = vld [vmem:[%s15357_s17 + $0x2c0] sm:$0xf] }
 0x36d   : > { %8396 = vmatpush.bf16.msra.mxu0 %v12137_v13  ;;  %8409 = vmatpush.bf16.msra.mxu1 %v12585_v49  ;;  %v14696_v13 = vld [vmem:[%s15357_s17 + $0x63c] sm:$0xf]  ;;  %v12754_v49 = vld [vmem:[%s15357_s17 + $0x670] sm:$0xf0]  ;;  %v12141_v41 = vor.u32 %v14542_v16, %v12138_v7  ;;  %v14830_v7 = vld [vmem:[%s15357_s17 + $0xa64] sm:$0xf0] }
 0x36e   : > { %8327 = vmatpush.bf16.msra.mxu3 %v13697_v9  ;;  %v12757_v17 = vor.u32 %v14696_v13, %v12754_v49 }
 0x36f   : > { %8283 = vmatmul.bf16.vlgmr.msrb.gmra.mxu3 %v17208_v26 }
 0x370   : > { %8422 = vmatpush.bf16.msra.mxu2 %v13033_v28  ;;  %v13584_v28 = vld [vmem:[%s15357_s17 + $0xcc0] sm:$0xf] }
 0x371   : > { %8397 = vmatpush.bf16.msra.mxu0 %v12081_v50  ;;  %8410 = vmatpush.bf16.msra.mxu1 %v12529_v51  ;;  %v13585_v12 = vor.u32 %v14912_v34, %v13584_v28  ;;  %v13146_v50 = vld [vmem:[%s15357_s17 + $0x980] sm:$0xf0]  ;;  %v13528_v51 = vld [vmem:[%s15357_s17 + $0xc50] sm:$0xf]  ;;  %v14514_v34 = vld [vmem:[%s15357_s17 + $0x8c] sm:$0xf] }
 0x372   : > { %8328 = vmatpush.bf16.msra.mxu3 %v13641_v22  ;;  %v13149_v55 = vor.u32 %v14794_v47, %v13146_v50  ;;  %v13529_v57 = vor.u32 %v14898_v31, %v13528_v51  ;;  %v14856_v22 = vld [vmem:[%s15357_s17 + $0xb34] sm:$0xf0]  ;;  %v14842_v47 = vld [vmem:[%s15357_s17 + $0xac4] sm:$0xf0]  ;;  %v14933_v50 = vld [vmem:[%s15357_s17 + $0xda4] sm:$0xf] }
 0x373   : > { %v13698_v51 = vld [vmem:[%s15357_s17 + $0xdd8] sm:$0xf0] }
 0x374   : > { %8423 = vmatpush.bf16.msra.mxu2 %v12977_v56  ;;  %v12701_v56 = vor.u32 %v14682_v44, %v12698_v46  ;;  %v12922_v44 = vld [vmem:[%s15357_s17 + $0x7c0] sm:$0xf0]  ;;  %v13304_v46 = vld [vmem:[%s15357_s17 + $0xa90] sm:$0xf]  ;;  %v13701_v27 = vor.u32 %v14933_v50, %v13698_v51  ;;  %v13096_v50 = vld [vmem:[%s15357_s17 + $0x8e0] sm:$0xf] }
 0x375   : > { %8398 = vmatpush.bf16.msra.mxu0 %v12025_v3  ;;  %8411 = vmatpush.bf16.msra.mxu1 %v12473_v62  ;;  %v14884_v3 = vld [vmem:[%s15357_s17 + $0xc14] sm:$0xf0] }
 0x376   : > { %8329 = vmatpush.bf16.msra.mxu3 %v13585_v12  ;;  %v13473_v9 = vor.u32 %v14884_v3, %v13472_v1  ;;  %v14738_v12 = vld [vmem:[%s15357_s17 + $0x78c] sm:$0xf]  ;;  %v12866_v1 = vld [vmem:[%s15357_s17 + $0x750] sm:$0xf0]  ;;  %v12368_v3 = vld [vmem:[%s15357_s17 + $0x330] sm:$0xf] }
 0x377   : > { %v12925_v53 = vor.u32 %v14738_v12, %v12922_v44  ;;  %v14788_v51 = vld [vmem:[%s15357_s17 + $0x914] sm:$0xf0] }
 0x378   : > { %8424 = vmatpush.bf16.msra.mxu2 %v12921_v6  ;;  %v12645_v6 = vor.u32 %v14668_v60, %v12642_v61  ;;  %v12418_v60 = vld [vmem:[%s15357_s17 + $0x3d0] sm:$0xf0]  ;;  %v14724_v61 = vld [vmem:[%s15357_s17 + $0x71c] sm:$0xf] }
 0x379   : > { %8399 = vmatpush.bf16.msra.mxu0 %v11969_v48  ;;  %8412 = vmatpush.bf16.msra.mxu1 %v12417_v21  ;;  %v8193_v62 = vpop.f32.mrf.mxu0  ;;  %v12589_v48 = vor.u32 %v14654_v19, %v12586_v18  ;;  %v13417_v21 = vor.u32 %v14870_v54, %v13416_v63  ;;  %v12869_v19 = vor.u32 %v14724_v61, %v12866_v1  ;;  %v14592_v63 = vld [vmem:[%s15357_s17 + $0x2f4] sm:$0xf0]  ;;  %v14550_v61 = vld [vmem:[%s15357_s17 + $0x1a4] sm:$0xf0]  ;;  %v12592_v1 = vld [vmem:[%s15357_s17 + $0x4f0] sm:$0xf] }
 0x37a   : > { %8330 = vmatpush.bf16.msra.mxu3 %v13529_v57  ;;  %v14612_v57 = vld [vmem:[%s15357_s17 + $0x39c] sm:$0xf] }
 0x37b   : > { %v8206_v40 = vpop.f32.mrf.mxu1 }
 0x37c   : > { %8425 = vmatpush.bf16.msra.mxu2 %v12865_v15  ;;  %8400 = vmatmul.bf16.vlgmr.msra.gmra.mxu0 %v16946_v58  ;;  %v8207_v29 = vadd.f32 %v8206_v40, %v8193_v62  ;;  %v14640_v15 = vld [vmem:[%s15357_s17 + $0x47c] sm:$0xf]  ;;  %v14606_v62 = vld [vmem:[%s15357_s17 + $0x364] sm:$0xf0]  ;;  %v12816_v40 = vld [vmem:[%s15357_s17 + $0x6b0] sm:$0xf] }
 0x37d   : > { %8444 = vmatpush.bf16.msrb.mxu0 %v12365_v33  ;;  %8457 = vmatpush.bf16.msrb.mxu1 %v12813_v30  ;;  %v12530_v33 = vld [vmem:[%s15357_s17 + $0x4b0] sm:$0xf0]  ;;  %v14752_v30 = vld [vmem:[%s15357_s17 + $0x7fc] sm:$0xf]  ;;  %v12369_v18 = vor.u32 %v14606_v62, %v12368_v3  ;;  %v14662_v3 = vld [vmem:[%s15357_s17 + $0x524] sm:$0xf0] }
 0x37e   : > { %8413 = vmatmul.bf16.vlgmr.msra.gmra.mxu1 %v16948_v59  ;;  %8331 = vmatpush.bf16.msra.mxu3 %v13473_v9  ;;  %v12533_v28 = vor.u32 %v14640_v15, %v12530_v33  ;;  %v12421_v9 = vor.u32 %v14612_v57, %v12418_v60  ;;  %v13586_v15 = vld [vmem:[%s15357_s17 + $0xcf8] sm:$0xf0]  ;;  %v12313_v33 = vor.u32 %v14592_v63, %v12312_v11  ;;  %v12144_v60 = vld [vmem:[%s15357_s17 + $0x170] sm:$0xf]  ;;  %v12984_v11 = vld [vmem:[%s15357_s17 + $0x800] sm:$0xf] }
 0x37f   : > { %8426 = vmatmul.bf16.vlgmr.msra.gmra.mxu2 %v16950_v20  ;;  %v13040_v62 = vld [vmem:[%s15357_s17 + $0x870] sm:$0xf] }
 0x380   : > { %8470 = vmatpush.bf16.msrb.mxu2 %v13261_v4  ;;  %v13360_v4 = vld [vmem:[%s15357_s17 + $0xb00] sm:$0xf] }
 0x381   : > { %8445 = vmatpush.bf16.msrb.mxu0 %v12309_v37  ;;  %8458 = vmatpush.bf16.msrb.mxu1 %v12757_v17  ;;  %v8195_v49 = vpop.f32.mrf.mxu0  ;;  %v12026_v37 = vld [vmem:[%s15357_s17 + $0xc0] sm:$0xf0]  ;;  %v12981_v17 = vor.u32 %v14752_v30, %v12978_v25  ;;  %v13361_v38 = vor.u32 %v14856_v22, %v13360_v4  ;;  %v14578_v25 = vld [vmem:[%s15357_s17 + $0x284] sm:$0xf0] }
 0x382   : > { %v8219_v35 = vpop.f32.mrf.mxu2  ;;  %8332 = vmatpush.bf16.msra.mxu3 %v13417_v21  ;;  %v12029_v31 = vor.u32 %v14514_v34, %v12026_v37  ;;  %v14905_v21 = vld [vmem:[%s15357_s17 + $0xcc4] sm:$0xf]  ;;  %v12704_v49 = vld [vmem:[%s15357_s17 + $0x5d0] sm:$0xf]  ;;  %v14891_v34 = vld [vmem:[%s15357_s17 + $0xc54] sm:$0xf] }
 0x383   : > { %v17401_v13 = vadd.f32 %v8219_v35, %v8207_v29  ;;  %v8208_v39 = vpop.f32.mrf.mxu1  ;;  %v14919_v29 = vld [vmem:[%s15357_s17 + $0xd34] sm:$0xf]  ;;  %v12256_v35 = vld [vmem:[%s15357_s17 + $0x250] sm:$0xf]  ;;  %v13589_v22 = vor.u32 %v14905_v21, %v13586_v15  ;;  %v13530_v37 = vld [vmem:[%s15357_s17 + $0xc88] sm:$0xf0] }
 0x384   : > { %8471 = vmatpush.bf16.msrb.mxu2 %v13205_v43  ;;  %v12474_v43 = vld [vmem:[%s15357_s17 + $0x440] sm:$0xf0]  ;;  %v14690_v39 = vld [vmem:[%s15357_s17 + $0x604] sm:$0xf0]  ;;  %v13533_v44 = vor.u32 %v14891_v34, %v13530_v37  ;;  %v14941_v37 = vld [vmem:[%s15357_s17 + $0xddc] sm:$0xf0] }
 0x385   : > { %8446 = vmatpush.bf16.msrb.mxu0 %v12253_v52  ;;  %8459 = vmatpush.bf16.msrb.mxu1 %v12701_v56  ;;  %v12477_v52 = vor.u32 %v14626_v42, %v12474_v43  ;;  %v14500_v56 = vld [vmem:[%s15357_s17 + $0x1c] sm:$0xf]  ;;  %v12200_v42 = vld [vmem:[%s15357_s17 + $0x1e0] sm:$0xf]  ;;  %v14564_v43 = vld [vmem:[%s15357_s17 + $0x214] sm:$0xf0] }
 0x386   : > { %8333 = vmatpush.bf16.msra.mxu3 %v13361_v38  ;;  %v11973_v16 = vor.u32 %v14500_v56, %v11970_v0  ;;  %v12705_v38 = vor.u32 %v14690_v39, %v12704_v49  ;;  %v12928_v49 = vld [vmem:[%s15357_s17 + $0x790] sm:$0xf]  ;;  %v14746_v39 = vld [vmem:[%s15357_s17 + $0x7c4] sm:$0xf0] }
 0x387   : > { %v13704_v34 = vld [vmem:[%s15357_s17 + $0xda8] sm:$0xf] }
 0x388   : > { %8472 = vmatpush.bf16.msrb.mxu2 %v13149_v55  ;;  %v13305_v55 = vor.u32 %v14842_v47, %v13304_v46  ;;  %v12648_v46 = vld [vmem:[%s15357_s17 + $0x560] sm:$0xf]  ;;  %v14676_v47 = vld [vmem:[%s15357_s17 + $0x594] sm:$0xf0] }
 0x389   : > { %8447 = vmatpush.bf16.msrb.mxu0 %v12197_v5  ;;  %8460 = vmatpush.bf16.msrb.mxu1 %v12645_v6  ;;  %v14718_v5 = vld [vmem:[%s15357_s17 + $0x6e4] sm:$0xf0]  ;;  %v13264_v6 = vld [vmem:[%s15357_s17 + $0xa30] sm:$0xf]  ;;  %v12649_v57 = vor.u32 %v14676_v47, %v12648_v46  ;;  %v12424_v46 = vld [vmem:[%s15357_s17 + $0x3a0] sm:$0xf] }
 0x38a   : > { %v8221_v2 = vpop.f32.mrf.mxu2  ;;  %8334 = vmatpush.bf16.msra.mxu3 %v13305_v55  ;;  %v12817_v24 = vor.u32 %v14718_v5, %v12816_v40  ;;  %v13265_v54 = vor.u32 %v14830_v7, %v13264_v6  ;;  %v12201_v55 = vor.u32 %v14564_v43, %v12200_v42  ;;  %v14774_v40 = vld [vmem:[%s15357_s17 + $0x8a4] sm:$0xf0]  ;;  %v14863_v5 = vld [vmem:[%s15357_s17 + $0xb74] sm:$0xf]  ;;  %v13418_v6 = vld [vmem:[%s15357_s17 + $0xba8] sm:$0xf0]  ;;  %v12593_v7 = vor.u32 %v14662_v3, %v12592_v1 }
 0x38b   : > { %v13097_v2 = vor.u32 %v14788_v51, %v13096_v50  ;;  %v11976_v42 = vld [vmem:[%s15357_s17 + $0x20] sm:$0xf]  ;;  %v14508_v43 = vld [vmem:[%s15357_s17 + $0x54] sm:$0xf0] }
 0x38c   : > { %8473 = vmatpush.bf16.msrb.mxu2 %v13093_v8  ;;  %v13642_v8 = vld [vmem:[%s15357_s17 + $0xd68] sm:$0xf0]  ;;  %v14620_v47 = vld [vmem:[%s15357_s17 + $0x3d4] sm:$0xf0]  ;;  %v12872_v50 = vld [vmem:[%s15357_s17 + $0x720] sm:$0xf] }
 0x38d   : > { %8448 = vmatpush.bf16.msrb.mxu0 %v12141_v41  ;;  %8461 = vmatpush.bf16.msrb.mxu1 %v12589_v48  ;;  %v13645_v41 = vor.u32 %v14919_v29, %v13642_v8  ;;  %v12760_v48 = vld [vmem:[%s15357_s17 + $0x640] sm:$0xf]  ;;  %v14536_v8 = vld [vmem:[%s15357_s17 + $0x134] sm:$0xf0]  ;;  %v12425_v1 = vor.u32 %v14620_v47, %v12424_v46 }
 0x38e   : > { %8379 = vmatpush.bf16.msrb.mxu3 %v13701_v27  ;;  %v12761_v30 = vor.u32 %v14704_v32, %v12760_v48  ;;  %v12088_v29 = vld [vmem:[%s15357_s17 + $0x100] sm:$0xf]  ;;  %v13362_v48 = vld [vmem:[%s15357_s17 + $0xb38] sm:$0xf0] }
 0x38f   : > { %8335 = vmatmul.bf16.vlgmr.msra.gmra.mxu3 %v17208_v26  ;;  %v12089_v21 = vor.u32 %v14536_v8, %v12088_v29  ;;  %v14697_v29 = vld [vmem:[%s15357_s17 + $0x644] sm:$0xf]  ;;  %v12762_v8 = vld [vmem:[%s15357_s17 + $0x678] sm:$0xf0] }
 0x390   : > { %8474 = vmatpush.bf16.msrb.mxu2 %v13037_v36  ;;  %v14816_v36 = vld [vmem:[%s15357_s17 + $0x9f4] sm:$0xf0] }
 0x391   : > { %8449 = vmatpush.bf16.msrb.mxu0 %v12085_v23  ;;  %8462 = vmatpush.bf16.msrb.mxu1 %v12533_v28  ;;  %v13209_v4 = vor.u32 %v14816_v36, %v13208_v14  ;;  %v13152_v23 = vld [vmem:[%s15357_s17 + $0x950] sm:$0xf]  ;;  %v14802_v28 = vld [vmem:[%s15357_s17 + $0x984] sm:$0xf0] }
 0x392   : > { %8380 = vmatpush.bf16.msrb.mxu3 %v13645_v41  ;;  %v13153_v12 = vor.u32 %v14802_v28, %v13152_v23  ;;  %v14849_v41 = vld [vmem:[%s15357_s17 + $0xb04] sm:$0xf]  ;;  %v14835_v23 = vld [vmem:[%s15357_s17 + $0xa94] sm:$0xf]  ;;  %v13306_v28 = vld [vmem:[%s15357_s17 + $0xac8] sm:$0xf0] }
 0x394   : > { %8475 = vmatpush.bf16.msrb.mxu2 %v12981_v17  ;;  %v12257_v17 = vor.u32 %v14578_v25, %v12256_v35  ;;  %v13365_v25 = vor.u32 %v14849_v41, %v13362_v48  ;;  %v12258_v41 = vld [vmem:[%s15357_s17 + $0x288] sm:$0xf0] }
 0x395   : > { %8450 = vmatpush.bf16.msrb.mxu0 %v12029_v31  ;;  %8463 = vmatpush.bf16.msrb.mxu1 %v12477_v52  ;;  %v14877_v31 = vld [vmem:[%s15357_s17 + $0xbe4] sm:$0xf]  ;;  %v13474_v52 = vld [vmem:[%s15357_s17 + $0xc18] sm:$0xf0] }
 0x396   : > { %8381 = vmatpush.bf16.msrb.mxu3 %v13589_v22  ;;  %v13477_v27 = vor.u32 %v14877_v31, %v13474_v52  ;;  %v14634_v22 = vld [vmem:[%s15357_s17 + $0x444] sm:$0xf0]  ;;  %v13705_v31 = vor.u32 %v14941_v37, %v13704_v34  ;;  %v14732_v52 = vld [vmem:[%s15357_s17 + $0x754] sm:$0xf0]  ;;  %v12650_v34 = vld [vmem:[%s15357_s17 + $0x598] sm:$0xf0] }
 0x397   : > { %v12873_v3 = vor.u32 %v14732_v52, %v12872_v50  ;;  %v14781_v37 = vld [vmem:[%s15357_s17 + $0x8e4] sm:$0xf] }
 0x398   : > { %8476 = vmatpush.bf16.msrb.mxu2 %v12925_v53 }
 0x399   : > { %8451 = vmatpush.bf16.msrb.mxu0 %v11973_v16  ;;  %8464 = vmatpush.bf16.msrb.mxu1 %v12421_v9  ;;  %v8245_v56 = vpop.f32.mrf.mxu0  ;;  %v12145_v16 = vor.u32 %v14550_v61, %v12144_v60  ;;  %v13041_v9 = vor.u32 %v14774_v40, %v13040_v62  ;;  %v11977_v60 = vor.u32 %v14508_v43, %v11976_v42  ;;  %v13266_v61 = vld [vmem:[%s15357_s17 + $0xa68] sm:$0xf0]  ;;  %v14885_v42 = vld [vmem:[%s15357_s17 + $0xc1c] sm:$0xf0] }
 0x39a   : > { %8382 = vmatpush.bf16.msrb.mxu3 %v13533_v44  ;;  %v13309_v44 = vor.u32 %v14835_v23, %v13306_v28  ;;  %v14669_v28 = vld [vmem:[%s15357_s17 + $0x564] sm:$0xf] }
 0x39b   : > { %v8258_v0 = vpop.f32.mrf.mxu1  ;;  %v12653_v50 = vor.u32 %v14669_v28, %v12650_v34  ;;  %v11978_v28 = vld [vmem:[%s15357_s17 + $0x58] sm:$0xf0] }
 0x39c   : > { %8477 = vmatpush.bf16.msrb.mxu2 %v12869_v19  ;;  %8452 = vmatmul.bf16.vlgmr.msrb.gmra.mxu0 %v16946_v58  ;;  %v8259_v53 = vadd.f32 %v8258_v0, %v8245_v56  ;;  %v13421_v19 = vor.u32 %v14863_v5, %v13418_v6  ;;  %v14599_v56 = vld [vmem:[%s15357_s17 + $0x334] sm:$0xf]  ;;  %v12370_v0 = vld [vmem:[%s15357_s17 + $0x368] sm:$0xf0]  ;;  %v14585_v5 = vld [vmem:[%s15357_s17 + $0x2c4] sm:$0xf] }
 0x39d   : > { %8496 = vmatpush.bf16.msra.mxu0 %v12369_v18  ;;  %8509 = vmatpush.bf16.msra.mxu1 %v12817_v24  ;;  %v12536_v18 = vld [vmem:[%s15357_s17 + $0x480] sm:$0xf]  ;;  %v14648_v24 = vld [vmem:[%s15357_s17 + $0x4b4] sm:$0xf0]  ;;  %v12373_v62 = vor.u32 %v14599_v56, %v12370_v0  ;;  %v12314_v6 = vld [vmem:[%s15357_s17 + $0x2f8] sm:$0xf0] }
 0x39e   : > { %8465 = vmatmul.bf16.vlgmr.msrb.gmra.mxu1 %v16948_v59  ;;  %8383 = vmatpush.bf16.msrb.mxu3 %v13477_v27  ;;  %v12537_v15 = vor.u32 %v14648_v24, %v12536_v18  ;;  %v14927_v27 = vld [vmem:[%s15357_s17 + $0xd6c] sm:$0xf0]  ;;  %v13592_v18 = vld [vmem:[%s15357_s17 + $0xcc8] sm:$0xf]  ;;  %v14913_v24 = vld [vmem:[%s15357_s17 + $0xcfc] sm:$0xf0] }
 0x39f   : > { %8478 = vmatmul.bf16.vlgmr.msrb.gmra.mxu2 %v16950_v20 }
 0x3a0   : > { %8522 = vmatpush.bf16.msra.mxu2 %v13265_v54  ;;  %v14760_v54 = vld [vmem:[%s15357_s17 + $0x834] sm:$0xf0] }
 0x3a1   : > { %8497 = vmatpush.bf16.msra.mxu0 %v12313_v33  ;;  %8510 = vmatpush.bf16.msra.mxu1 %v12761_v30  ;;  %v8247_v14 = vpop.f32.mrf.mxu0  ;;  %v12032_v33 = vld [vmem:[%s15357_s17 + $0x90] sm:$0xf]  ;;  %v14522_v30 = vld [vmem:[%s15357_s17 + $0xc4] sm:$0xf0]  ;;  %v12985_v35 = vor.u32 %v14760_v54, %v12984_v11  ;;  %v12317_v11 = vor.u32 %v14585_v5, %v12314_v6  ;;  %v14571_v54 = vld [vmem:[%s15357_s17 + $0x254] sm:$0xf] }
 0x3a2   : > { %v8271_v63 = vpop.f32.mrf.mxu2  ;;  %8384 = vmatpush.bf16.msrb.mxu3 %v13421_v19  ;;  %v13210_v19 = vld [vmem:[%s15357_s17 + $0x9f8] sm:$0xf0]  ;;  %v13593_v14 = vor.u32 %v14913_v24, %v13592_v18  ;;  %v14641_v5 = vld [vmem:[%s15357_s17 + $0x484] sm:$0xf] }
 0x3a3   : > { %v17471_v32 = vadd.f32 %v8271_v63, %v8259_v53  ;;  %v8260_v36 = vpop.f32.mrf.mxu1  ;;  %v14711_v53 = vld [vmem:[%s15357_s17 + $0x6b4] sm:$0xf]  ;;  %v12765_v63 = vor.u32 %v14697_v29, %v12762_v8  ;;  %v12538_v6 = vld [vmem:[%s15357_s17 + $0x4b8] sm:$0xf0]  ;;  %v13368_v8 = vld [vmem:[%s15357_s17 + $0xb08] sm:$0xf] }
 0x3a4   : > { %8523 = vmatpush.bf16.msra.mxu2 %v13209_v4  ;;  %v12480_v4 = vld [vmem:[%s15357_s17 + $0x410] sm:$0xf]  ;;  %v14683_v36 = vld [vmem:[%s15357_s17 + $0x5d4] sm:$0xf]  ;;  %v12986_v29 = vld [vmem:[%s15357_s17 + $0x838] sm:$0xf0] }
 0x3a5   : > { %8498 = vmatpush.bf16.msra.mxu0 %v12257_v17  ;;  %8511 = vmatpush.bf16.msra.mxu1 %v12705_v38  ;;  %v12033_v17 = vor.u32 %v14522_v30, %v12032_v33  ;;  %v12481_v38 = vor.u32 %v14634_v22, %v12480_v4  ;;  %v13154_v33 = vld [vmem:[%s15357_s17 + $0x988] sm:$0xf0]  ;;  %v13536_v30 = vld [vmem:[%s15357_s17 + $0xc58] sm:$0xf]  ;;  %v14557_v22 = vld [vmem:[%s15357_s17 + $0x1e4] sm:$0xf] }
 0x3a6   : > { %8385 = vmatpush.bf16.msrb.mxu3 %v13365_v25  ;;  %v12261_v25 = vor.u32 %v14571_v54, %v12258_v41  ;;  %v12541_v54 = vor.u32 %v14641_v5, %v12538_v6  ;;  %v14515_v41 = vld [vmem:[%s15357_s17 + $0x94] sm:$0xf]  ;;  %v14705_v6 = vld [vmem:[%s15357_s17 + $0x67c] sm:$0xf0] }
 0x3a8   : > { %8524 = vmatpush.bf16.msra.mxu2 %v13153_v12  ;;  %v12929_v12 = vor.u32 %v14746_v39, %v12928_v49  ;;  %v12202_v49 = vld [vmem:[%s15357_s17 + $0x218] sm:$0xf0] }
 0x3a9   : > { %8499 = vmatpush.bf16.msra.mxu0 %v12201_v55  ;;  %8512 = vmatpush.bf16.msra.mxu1 %v12649_v57  ;;  %v12818_v55 = vld [vmem:[%s15357_s17 + $0x6e8] sm:$0xf0]  ;;  %v14823_v57 = vld [vmem:[%s15357_s17 + $0xa34] sm:$0xf]  ;;  %v12205_v47 = vor.u32 %v14557_v22, %v12202_v49  ;;  %v13706_v22 = vld [vmem:[%s15357_s17 + $0xde0] sm:$0xf0] }
 0x3aa   : > { %v8273_v51 = vpop.f32.mrf.mxu2  ;;  %8386 = vmatpush.bf16.msrb.mxu3 %v13309_v44  ;;  %v12821_v40 = vor.u32 %v14711_v53, %v12818_v55  ;;  %v14655_v53 = vld [vmem:[%s15357_s17 + $0x4f4] sm:$0xf]  ;;  %v12594_v55 = vld [vmem:[%s15357_s17 + $0x528] sm:$0xf0] }
 0x3ab   : > { %v14543_v51 = vld [vmem:[%s15357_s17 + $0x174] sm:$0xf] }
 0x3ac   : > { %8525 = vmatpush.bf16.msra.mxu2 %v13097_v2  ;;  %v13648_v2 = vld [vmem:[%s15357_s17 + $0xd38] sm:$0xf] }
 0x3ad   : > { %8500 = vmatpush.bf16.msra.mxu0 %v12145_v16  ;;  %8513 = vmatpush.bf16.msra.mxu1 %v12593_v7  ;;  %v13269_v16 = vor.u32 %v14823_v57, %v13266_v61  ;;  %v13649_v7 = vor.u32 %v14927_v27, %v13648_v2  ;;  %v14767_v57 = vld [vmem:[%s15357_s17 + $0x874] sm:$0xf]  ;;  %v13424_v61 = vld [vmem:[%s15357_s17 + $0xb78] sm:$0xf]  ;;  %v14871_v2 = vld [vmem:[%s15357_s17 + $0xbac] sm:$0xf0]  ;;  %v12597_v27 = vor.u32 %v14655_v53, %v12594_v55 }
 0x3ae   : > { %8431 = vmatpush.bf16.msra.mxu3 %v13705_v31  ;;  %v8128_v46 = vpop.f32.mrf.mxu3  ;;  %v12146_v31 = vld [vmem:[%s15357_s17 + $0x1a8] sm:$0xf0]  ;;  %v14831_v53 = vld [vmem:[%s15357_s17 + $0xa6c] sm:$0xf0]  ;;  %v14920_v55 = vld [vmem:[%s15357_s17 + $0xd3c] sm:$0xf] }
 0x3af   : > { %8387 = vmatmul.bf16.vlgmr.msrb.gmra.mxu3 %v17208_v26  ;;  %v17528_v52 = vadd.f32 %v8128_v46, %v17261_v10  ;;  %v12149_v10 = vor.u32 %v14543_v51, %v12146_v31  ;;  %v12376_v46 = vld [vmem:[%s15357_s17 + $0x338] sm:$0xf]  ;;  %v14719_v51 = vld [vmem:[%s15357_s17 + $0x6ec] sm:$0xf0] }
 0x3b0   : > { %8526 = vmatpush.bf16.msra.mxu2 %v13041_v9  ;;  %v14809_v9 = vld [vmem:[%s15357_s17 + $0x9c4] sm:$0xf]  ;;  %v13272_v31 = vld [vmem:[%s15357_s17 + $0xa38] sm:$0xf] }
 0x3b1   : > { %8501 = vmatpush.bf16.msra.mxu0 %v12089_v21  ;;  %8514 = vmatpush.bf16.msra.mxu1 %v12537_v15  ;;  %v13213_v48 = vor.u32 %v14809_v9, %v13210_v19  ;;  %v12706_v21 = vld [vmem:[%s15357_s17 + $0x608] sm:$0xf0]  ;;  %v14795_v15 = vld [vmem:[%s15357_s17 + $0x954] sm:$0xf]  ;;  %v14857_v9 = vld [vmem:[%s15357_s17 + $0xb3c] sm:$0xf0] }
 0x3b2   : > { %8432 = vmatpush.bf16.msra.mxu3 %v13649_v7  ;;  %v12709_v4 = vor.u32 %v14683_v36, %v12706_v21  ;;  %v13157_v39 = vor.u32 %v14795_v15, %v13154_v33  ;;  %8809 = vrot.lane.b32.xlu0 %v17528_v52, %s15333_s11  ;;  %v13369_v36 = vor.u32 %v14857_v9, %v13368_v8  ;;  %v14627_v21 = vld [vmem:[%s15357_s17 + $0x414] sm:$0xf]  ;;  %v12482_v15 = vld [vmem:[%s15357_s17 + $0x448] sm:$0xf0]  ;;  %v13594_v8 = vld [vmem:[%s15357_s17 + $0xd00] sm:$0xf0] }
 0x3b3   : > { %v14739_v33 = vld [vmem:[%s15357_s17 + $0x794] sm:$0xf] }
 0x3b4   : > { %8527 = vmatpush.bf16.msra.mxu2 %v12985_v35  ;;  %v14899_v35 = vld [vmem:[%s15357_s17 + $0xc8c] sm:$0xf0] }
 0x3b5   : > { %8502 = vmatpush.bf16.msra.mxu0 %v12033_v17  ;;  %8515 = vmatpush.bf16.msra.mxu1 %v12481_v38  ;;  %v13537_v23 = vor.u32 %v14899_v35, %v13536_v30  ;;  %v13098_v17 = vld [vmem:[%s15357_s17 + $0x918] sm:$0xf0]  ;;  %v13480_v38 = vld [vmem:[%s15357_s17 + $0xbe8] sm:$0xf]  ;;  %v12930_v30 = vld [vmem:[%s15357_s17 + $0x7c8] sm:$0xf0] }
 0x3b6   : > { %8433 = vmatpush.bf16.msra.mxu3 %v13593_v14  ;;  %v13101_v56 = vor.u32 %v14781_v37, %v13098_v17  ;;  %v13481_v0 = vor.u32 %v14885_v42, %v13480_v38  ;;  %v13312_v35 = vld [vmem:[%s15357_s17 + $0xa98] sm:$0xf]  ;;  %v12933_v34 = vor.u32 %v14739_v33, %v12930_v30  ;;  %v14613_v17 = vld [vmem:[%s15357_s17 + $0x3a4] sm:$0xf]  ;;  %v12426_v38 = vld [vmem:[%s15357_s17 + $0x3d8] sm:$0xf0] }
 0x3b7   : > { %v14725_v42 = vld [vmem:[%s15357_s17 + $0x724] sm:$0xf]  ;;  %v13538_v33 = vld [vmem:[%s15357_s17 + $0xc90] sm:$0xf0] }
 0x3b8   : > { %8528 = vmatpush.bf16.msra.mxu2 %v12929_v12 }
 0x3b9   : > { %8503 = vmatpush.bf16.msra.mxu0 %v11977_v60  ;;  %8516 = vmatpush.bf16.msra.mxu1 %v12425_v1  ;;  %v8297_v43 = vpop.f32.mrf.mxu0  ;;  %v13042_v60 = vld [vmem:[%s15357_s17 + $0x8a8] sm:$0xf0]  ;;  %v14529_v1 = vld [vmem:[%s15357_s17 + $0x104] sm:$0xf] }
 0x3ba   : > { %8434 = vmatpush.bf16.msra.mxu3 %v13537_v23  ;;  %v14501_v23 = vld [vmem:[%s15357_s17 + $0x24] sm:$0xf] }
 0x3bb   : > { %v8310_v12 = vpop.f32.mrf.mxu1 }
 0x3bc   : > { %8529 = vmatpush.bf16.msra.mxu2 %v12873_v3  ;;  %8504 = vmatmul.bf16.vlgmr.msra.gmra.mxu0 %v16946_v58  ;;  %v8311_v44 = vadd.f32 %v8310_v12, %v8297_v43  ;;  %v12090_v3 = vld [vmem:[%s15357_s17 + $0x138] sm:$0xf0] }
 0x3bd   : > { %8548 = vmatpush.bf16.msrb.mxu0 %v12373_v62  ;;  %8561 = vmatpush.bf16.msrb.mxu1 %v12821_v40  ;;  %v13045_v62 = vor.u32 %v14767_v57, %v13042_v60  ;;  %v13425_v40 = vor.u32 %v14871_v2, %v13424_v61  ;;  %v13650_v57 = vld [vmem:[%s15357_s17 + $0xd70] sm:$0xf0]  ;;  %v12429_v61 = vor.u32 %v14613_v17, %v12426_v38  ;;  %v13482_v17 = vld [vmem:[%s15357_s17 + $0xc20] sm:$0xf0] }
 0x3be   : > { %8517 = vmatmul.bf16.vlgmr.msra.gmra.mxu1 %v16948_v59  ;;  %8435 = vmatpush.bf16.msra.mxu3 %v13481_v0  ;;  %v11981_v0 = vor.u32 %v14501_v23, %v11978_v28  ;;  %v13653_v5 = vor.u32 %v14920_v55, %v13650_v57  ;;  %v14677_v23 = vld [vmem:[%s15357_s17 + $0x59c] sm:$0xf0]  ;;  %v13104_v28 = vld [vmem:[%s15357_s17 + $0x8e8] sm:$0xf]  ;;  %v14775_v55 = vld [vmem:[%s15357_s17 + $0x8ac] sm:$0xf0] }
 0x3bf   : > { %8530 = vmatmul.bf16.vlgmr.msra.gmra.mxu2 %v16950_v20  ;;  %v14864_v57 = vld [vmem:[%s15357_s17 + $0xb7c] sm:$0xf] }
 0x3c0   : > { %8574 = vmatpush.bf16.msrb.mxu2 %v13269_v16  ;;  %v14753_v16 = vld [vmem:[%s15357_s17 + $0x804] sm:$0xf] }
 0x3c1   : > { %8549 = vmatpush.bf16.msrb.mxu0 %v12317_v11  ;;  %8562 = vmatpush.bf16.msrb.mxu1 %v12765_v63  ;;  %v8299_v18 = vpop.f32.mrf.mxu0  ;;  %v8130_v11 = vpop.f32.mrf.mxu3  ;;  %v12093_v63 = vor.u32 %v14529_v1, %v12090_v3  ;;  %v12989_v14 = vor.u32 %v14753_v16, %v12986_v29  ;;  %v12320_v1 = vld [vmem:[%s15357_s17 + $0x2c8] sm:$0xf]  ;;  %v14593_v3 = vld [vmem:[%s15357_s17 + $0x2fc] sm:$0xf0]  ;;  %v14906_v29 = vld [vmem:[%s15357_s17 + $0xccc] sm:$0xf] }
 0x3c2   : > { %v8323_v7 = vpop.f32.mrf.mxu2  ;;  %8436 = vmatpush.bf16.msra.mxu3 %v13425_v40  ;;  %v13273_v40 = vor.u32 %v14831_v53, %v13272_v31  ;;  %v13216_v16 = vld [vmem:[%s15357_s17 + $0x9c8] sm:$0xf]  ;;  %v12321_v9 = vor.u32 %v14593_v3, %v12320_v1  ;;  %v14579_v11 = vld [vmem:[%s15357_s17 + $0x28c] sm:$0xf0]  ;;  %v12600_v31 = vld [vmem:[%s15357_s17 + $0x4f8] sm:$0xf] }
 0x3c3   : > { %v17546_v19 = vadd.f32 %v8323_v7, %v8311_v44  ;;  %v8312_v24 = vpop.f32.mrf.mxu1  ;;  %v12874_v44 = vld [vmem:[%s15357_s17 + $0x758] sm:$0xf0]  ;;  %v14817_v7 = vld [vmem:[%s15357_s17 + $0x9fc] sm:$0xf0]  ;;  %v12096_v1 = vld [vmem:[%s15357_s17 + $0x108] sm:$0xf] }
 0x3c4   : > { %8575 = vmatpush.bf16.msrb.mxu2 %v13213_v48  ;;  %v12034_v48 = vld [vmem:[%s15357_s17 + $0xc8] sm:$0xf0]  ;;  %v12877_v2 = vor.u32 %v14725_v42, %v12874_v44  ;;  %v12264_v24 = vld [vmem:[%s15357_s17 + $0x258] sm:$0xf]  ;;  %v14537_v3 = vld [vmem:[%s15357_s17 + $0x13c] sm:$0xf0] }
 0x3c5   : > { %8550 = vmatpush.bf16.msrb.mxu0 %v12261_v25  ;;  %8563 = vmatpush.bf16.msrb.mxu1 %v12709_v4  ;;  %v14843_v25 = vld [vmem:[%s15357_s17 + $0xacc] sm:$0xf0]  ;;  %v14934_v4 = vld [vmem:[%s15357_s17 + $0xdac] sm:$0xf]  ;;  %v12037_v49 = vor.u32 %v14515_v41, %v12034_v48  ;;  %v12712_v41 = vld [vmem:[%s15357_s17 + $0x5d8] sm:$0xf]  ;;  %v12265_v30 = vor.u32 %v14579_v11, %v12264_v24 }
 0x3c6   : > { %8437 = vmatpush.bf16.msra.mxu3 %v13369_v36  ;;  %v13313_v37 = vor.u32 %v14843_v25, %v13312_v35  ;;  %v13709_v12 = vor.u32 %v14934_v4, %v13706_v22  ;;  %v14691_v48 = vld [vmem:[%s15357_s17 + $0x60c] sm:$0xf0]  ;;  %v12208_v25 = vld [vmem:[%s15357_s17 + $0x1e8] sm:$0xf]  ;;  %v14565_v4 = vld [vmem:[%s15357_s17 + $0x21c] sm:$0xf0] }
 0x3c7   : > { %v12713_v35 = vor.u32 %v14691_v48, %v12712_v41  ;;  %v12040_v11 = vld [vmem:[%s15357_s17 + $0x98] sm:$0xf] }
 0x3c8   : > { %8576 = vmatpush.bf16.msrb.mxu2 %v13157_v39  ;;  %v12485_v39 = vor.u32 %v14627_v21, %v12482_v15  ;;  %v14803_v21 = vld [vmem:[%s15357_s17 + $0x98c] sm:$0xf0]  ;;  %v14892_v15 = vld [vmem:[%s15357_s17 + $0xc5c] sm:$0xf]  ;;  %v12488_v48 = vld [vmem:[%s15357_s17 + $0x418] sm:$0xf] }
 0x3c9   : > { %8551 = vmatpush.bf16.msrb.mxu0 %v12205_v47  ;;  %8564 = vmatpush.bf16.msrb.mxu1 %v12653_v50  ;;  %v14607_v47 = vld [vmem:[%s15357_s17 + $0x36c] sm:$0xf0]  ;;  %v12824_v50 = vld [vmem:[%s15357_s17 + $0x6b8] sm:$0xf] }
 0x3ca   : > { %v8325_v43 = vpop.f32.mrf.mxu2  ;;  %8438 = vmatpush.bf16.msra.mxu3 %v13313_v37  ;;  %v14878_v37 = vld [vmem:[%s15357_s17 + $0xbec] sm:$0xf] }
 0x3cc   : > { %8577 = vmatpush.bf16.msrb.mxu2 %v13101_v56  ;;  %v8180_v56 = vpop.f32.mrf.mxu3 }
 0x3cd   : > { %8552 = vmatpush.bf16.msrb.mxu0 %v12149_v10  ;;  %8565 = vmatpush.bf16.msrb.mxu1 %v12597_v27  ;;  %v17573_v60 = vadd.f32 %v8180_v56, %v17331_v45  ;;  %v12377_v10 = vor.u32 %v14607_v47, %v12376_v46  ;;  %v12825_v27 = vor.u32 %v14719_v51, %v12824_v50  ;;  %v12768_v45 = vld [vmem:[%s15357_s17 + $0x648] sm:$0xf]  ;;  %v12152_v46 = vld [vmem:[%s15357_s17 + $0x178] sm:$0xf]  ;;  %v14551_v47 = vld [vmem:[%s15357_s17 + $0x1ac] sm:$0xf0] }
 0x3ce   : > { %8483 = vmatpush.bf16.msrb.mxu3 %v13709_v12  ;;  %v12769_v18 = vor.u32 %v14705_v6, %v12768_v45  ;;  %v12209_v12 = vor.u32 %v14565_v4, %v12208_v25  ;;  %v13485_v51 = vor.u32 %v14878_v37, %v13482_v17  ;;  %v14663_v56 = vld [vmem:[%s15357_s17 + $0x52c] sm:$0xf0]  ;;  %v14649_v6 = vld [vmem:[%s15357_s17 + $0x4bc] sm:$0xf0]  ;;  %v14942_v25 = vld [vmem:[%s15357_s17 + $0xde4] sm:$0xf0] }
 0x3cf   : > { %8815 = vrot.lane.b32.xlu0 %v17573_v60, %s15333_s11  ;;  %8439 = vmatmul.bf16.vlgmr.msra.gmra.mxu3 %v17208_v26  ;;  %v14621_v37 = vld [vmem:[%s15357_s17 + $0x3dc] sm:$0xf0]  ;;  %v12880_v17 = vld [vmem:[%s15357_s17 + $0x728] sm:$0xf] }
 0x3d0   : > { %8578 = vmatpush.bf16.msrb.mxu2 %v13045_v62  ;;  %v8812_v62 = vmax.f32 %v17528_v52, %v17573_v60 }
 0x3d1   : > { %8553 = vmatpush.bf16.msrb.mxu0 %v12093_v63  ;;  %8566 = vmatpush.bf16.msrb.mxu1 %v12541_v54  ;;  %v13217_v63 = vor.u32 %v14817_v7, %v13216_v16  ;;  %v13597_v54 = vor.u32 %v14906_v29, %v13594_v8  ;;  %v12992_v16 = vld [vmem:[%s15357_s17 + $0x808] sm:$0xf]  ;;  %v14761_v29 = vld [vmem:[%s15357_s17 + $0x83c] sm:$0xf0]  ;;  %v14850_v8 = vld [vmem:[%s15357_s17 + $0xb0c] sm:$0xf] }
 0x3d2   : > { %8484 = vmatpush.bf16.msrb.mxu3 %v13653_v5 }
 0x3d4   : > { %8579 = vmatpush.bf16.msrb.mxu2 %v12989_v14  ;;  %v13160_v14 = vld [vmem:[%s15357_s17 + $0x958] sm:$0xf]  ;;  %v8182_v36 = vpop.f32.mrf.mxu3 }
 0x3d5   : > { %8554 = vmatpush.bf16.msrb.mxu0 %v12037_v49  ;;  %8567 = vmatpush.bf16.msrb.mxu1 %v12485_v39  ;;  %v13161_v22 = vor.u32 %v14803_v21, %v13160_v14  ;;  %v13541_v49 = vor.u32 %v14892_v15, %v13538_v33  ;;  %v12656_v39 = vld [vmem:[%s15357_s17 + $0x568] sm:$0xf]  ;;  %v14635_v14 = vld [vmem:[%s15357_s17 + $0x44c] sm:$0xf0]  ;;  %v12936_v36 = vld [vmem:[%s15357_s17 + $0x798] sm:$0xf] }
 0x3d6   : > { %8485 = vmatpush.bf16.msrb.mxu3 %v13597_v54  ;;  %v12657_v44 = vor.u32 %v14677_v23, %v12656_v39  ;;  %v12993_v54 = vor.u32 %v14761_v29, %v12992_v16  ;;  %v14747_v15 = vld [vmem:[%s15357_s17 + $0x7cc] sm:$0xf0]  ;;  %v14836_v33 = vld [vmem:[%s15357_s17 + $0xa9c] sm:$0xf]  ;;  %v14509_v39 = vld [vmem:[%s15357_s17 + $0x5c] sm:$0xf0] }
 0x3d7   : > { %v12937_v23 = vor.u32 %v14747_v15, %v12936_v36  ;;  %v14914_v16 = vld [vmem:[%s15357_s17 + $0xd04] sm:$0xf0]  ;;  %v14558_v36 = vld [vmem:[%s15357_s17 + $0x1ec] sm:$0xf] }
 0x3d8   : > { %8580 = vmatpush.bf16.msrb.mxu2 %v12933_v34  ;;  %v14789_v34 = vld [vmem:[%s15357_s17 + $0x91c] sm:$0xf0] }
 0x3d9   : > { %8555 = vmatpush.bf16.msrb.mxu0 %v11981_v0  ;;  %8568 = vmatpush.bf16.msrb.mxu1 %v12429_v61  ;;  %v8349_v38 = vpop.f32.mrf.mxu0  ;;  %v13105_v50 = vor.u32 %v14789_v34, %v13104_v28  ;;  %v13048_v0 = vld [vmem:[%s15357_s17 + $0x878] sm:$0xf]  ;;  %v13426_v61 = vld [vmem:[%s15357_s17 + $0xbb0] sm:$0xf0]  ;;  %v12432_v34 = vld [vmem:[%s15357_s17 + $0x3a8] sm:$0xf] }
 0x3da   : > { %8486 = vmatpush.bf16.msrb.mxu3 %v13541_v49  ;;  %v13049_v5 = vor.u32 %v14775_v55, %v13048_v0  ;;  %v13429_v45 = vor.u32 %v14864_v57, %v13426_v61  ;;  %v11984_v49 = vld [vmem:[%s15357_s17 + $0x28] sm:$0xf]  ;;  %v14928_v0 = vld [vmem:[%s15357_s17 + $0xd74] sm:$0xf0] }
 0x3db   : > { %v8362_v42 = vpop.f32.mrf.mxu1 }
 0x3dc   : > { %8581 = vmatpush.bf16.msrb.mxu2 %v12877_v2  ;;  %8556 = vmatmul.bf16.vlgmr.msrb.gmra.mxu0 %v16946_v58  ;;  %v8363_v43 = vadd.f32 %v8362_v42, %v8349_v38  ;;  %v8232_v53 = vpop.f32.mrf.mxu3 }
 0x3dd   : > { %8600 = vmatpush.bf16.msra.mxu0 %v12377_v10  ;;  %8613 = vmatpush.bf16.msra.mxu1 %v12825_v27  ;;  %v8233_v2 = vadd.f32 %v8232_v53, %v17401_v13  ;;  %v12153_v10 = vor.u32 %v14551_v47, %v12152_v46  ;;  %v12601_v27 = vor.u32 %v14663_v56, %v12600_v31  ;;  %v12544_v13 = vld [vmem:[%s15357_s17 + $0x488] sm:$0xf]  ;;  %v14712_v46 = vld [vmem:[%s15357_s17 + $0x6bc] sm:$0xf]  ;;  %v12826_v47 = vld [vmem:[%s15357_s17 + $0x6f0] sm:$0xf0] }
 0x3de   : > { %8569 = vmatmul.bf16.vlgmr.msrb.gmra.mxu1 %v16948_v59  ;;  %8487 = vmatpush.bf16.msrb.mxu3 %v13485_v51  ;;  %v12545_v24 = vor.u32 %v14649_v6, %v12544_v13  ;;  %v11985_v51 = vor.u32 %v14509_v39, %v11984_v49  ;;  %v13274_v31 = vld [vmem:[%s15357_s17 + $0xa70] sm:$0xf0]  ;;  %v13656_v56 = vld [vmem:[%s15357_s17 + $0xd40] sm:$0xf]  ;;  %v12433_v53 = vor.u32 %v14621_v37, %v12432_v34  ;;  %v13218_v13 = vld [vmem:[%s15357_s17 + $0xa00] sm:$0xf0] }
 0x3df   : > { %8582 = vmatmul.bf16.vlgmr.msrb.gmra.mxu2 %v16950_v20  ;;  %8821 = vrot.lane.b32.xlu1 %v8233_v2, %s15333_s11  ;;  %v12829_v61 = vor.u32 %v14712_v46, %v12826_v47  ;;  %v13600_v6 = vld [vmem:[%s15357_s17 + $0xcd0] sm:$0xf]  ;;  %v14886_v49 = vld [vmem:[%s15357_s17 + $0xc24] sm:$0xf0]  ;;  %v12602_v46 = vld [vmem:[%s15357_s17 + $0x530] sm:$0xf0] }
 0x3e0   : > { %8626 = vmatpush.bf16.msra.mxu2 %v13273_v40  ;;  %v17621_v40 = vmax.f32 %v8812_v62, %v8233_v2  ;;  %v12097_v62 = vor.u32 %v14537_v3, %v12096_v1  ;;  %v14586_v2 = vld [vmem:[%s15357_s17 + $0x2cc] sm:$0xf]  ;;  %v13657_v1 = vor.u32 %v14928_v0, %v13656_v56  ;;  %v14768_v47 = vld [vmem:[%s15357_s17 + $0x87c] sm:$0xf]  ;;  %v14872_v56 = vld [vmem:[%s15357_s17 + $0xbb4] sm:$0xf0] }
 0x3e1   : > { %8601 = vmatpush.bf16.msra.mxu0 %v12321_v9  ;;  %8614 = vmatpush.bf16.msra.mxu1 %v12769_v18  ;;  %v13370_v9 = vld [vmem:[%s15357_s17 + $0xb40] sm:$0xf0]  ;;  %v8351_v52 = vpop.f32.mrf.mxu0  ;;  %v14698_v3 = vld [vmem:[%s15357_s17 + $0x64c] sm:$0xf] }
 0x3e2   : > { %v8375_v7 = vpop.f32.mrf.mxu2  ;;  %8488 = vmatpush.bf16.msrb.mxu3 %v13429_v45  ;;  %v13373_v41 = vor.u32 %v14850_v8, %v13370_v9  ;;  %v14810_v45 = vld [vmem:[%s15357_s17 + $0x9cc] sm:$0xf]  ;;  %v14572_v8 = vld [vmem:[%s15357_s17 + $0x25c] sm:$0xf]  ;;  %v12266_v9 = vld [vmem:[%s15357_s17 + $0x290] sm:$0xf0] }
 0x3e3   : > { %v17630_v18 = vadd.f32 %v8375_v7, %v8363_v43  ;;  %v8364_v60 = vpop.f32.mrf.mxu1  ;;  %v14733_v43 = vld [vmem:[%s15357_s17 + $0x75c] sm:$0xf0]  ;;  %v13221_v52 = vor.u32 %v14810_v45, %v13218_v13  ;;  %v13376_v45 = vld [vmem:[%s15357_s17 + $0xb10] sm:$0xf]  ;;  %v14858_v13 = vld [vmem:[%s15357_s17 + $0xb44] sm:$0xf0] }
 0x3e4   : > { %8627 = vmatpush.bf16.msra.mxu2 %v13217_v63  ;;  %v14523_v63 = vld [vmem:[%s15357_s17 + $0xcc] sm:$0xf0]  ;;  %v8234_v21 = vpop.f32.mrf.mxu3  ;;  %v12881_v55 = vor.u32 %v14733_v43, %v12880_v17  ;;  %v13601_v60 = vor.u32 %v14914_v16, %v13600_v6  ;;  %v14544_v17 = vld [vmem:[%s15357_s17 + $0x17c] sm:$0xf] }
 0x3e5   : > { %8602 = vmatpush.bf16.msra.mxu0 %v12265_v30  ;;  %8615 = vmatpush.bf16.msra.mxu1 %v12713_v35  ;;  %v13314_v30 = vld [vmem:[%s15357_s17 + $0xad0] sm:$0xf0]  ;;  %v13712_v35 = vld [vmem:[%s15357_s17 + $0xdb0] sm:$0xf]  ;;  %v12041_v4 = vor.u32 %v14523_v63, %v12040_v11  ;;  %v14796_v11 = vld [vmem:[%s15357_s17 + $0x95c] sm:$0xf] }
 0x3e6   : > { %8489 = vmatpush.bf16.msrb.mxu3 %v13373_v41  ;;  %v13317_v28 = vor.u32 %v14836_v33, %v13314_v30  ;;  %v13713_v42 = vor.u32 %v14942_v25, %v13712_v35  ;;  %v13162_v63 = vld [vmem:[%s15357_s17 + $0x990] sm:$0xf0]  ;;  %v14900_v41 = vld [vmem:[%s15357_s17 + $0xc94] sm:$0xf0]  ;;  %v12210_v21 = vld [vmem:[%s15357_s17 + $0x220] sm:$0xf0] }
 0x3e7   : > { %v13165_v15 = vor.u32 %v14796_v11, %v13162_v63  ;;  %v14670_v30 = vld [vmem:[%s15357_s17 + $0x56c] sm:$0xf]  ;;  %v12658_v35 = vld [vmem:[%s15357_s17 + $0x5a0] sm:$0xf0]  ;;  %v12213_v34 = vor.u32 %v14558_v36, %v12210_v21  ;;  %v14628_v11 = vld [vmem:[%s15357_s17 + $0x41c] sm:$0xf] }
 0x3e8   : > { %8628 = vmatpush.bf16.msra.mxu2 %v13161_v22  ;;  %v12489_v22 = vor.u32 %v14635_v14, %v12488_v48  ;;  %v12269_v48 = vor.u32 %v14572_v8, %v12266_v9  ;;  %v14782_v25 = vld [vmem:[%s15357_s17 + $0x8ec] sm:$0xf]  ;;  %v12661_v37 = vor.u32 %v14670_v30, %v12658_v35  ;;  %v14516_v9 = vld [vmem:[%s15357_s17 + $0x9c] sm:$0xf]  ;;  %v12490_v63 = vld [vmem:[%s15357_s17 + $0x450] sm:$0xf0] }
 0x3e9   : > { %8603 = vmatpush.bf16.msra.mxu0 %v12209_v12  ;;  %8616 = vmatpush.bf16.msra.mxu1 %v12657_v44  ;;  %v14600_v12 = vld [vmem:[%s15357_s17 + $0x33c] sm:$0xf]  ;;  %v12378_v44 = vld [vmem:[%s15357_s17 + $0x370] sm:$0xf0]  ;;  %v13714_v21 = vld [vmem:[%s15357_s17 + $0xde8] sm:$0xf0] }
 0x3ea   : > { %v8377_v38 = vpop.f32.mrf.mxu2  ;;  %8490 = vmatpush.bf16.msrb.mxu3 %v13317_v28  ;;  %v12381_v57 = vor.u32 %v14600_v12, %v12378_v44  ;;  %v14656_v44 = vld [vmem:[%s15357_s17 + $0x4fc] sm:$0xf]  ;;  %v14935_v36 = vld [vmem:[%s15357_s17 + $0xdb4] sm:$0xf]  ;;  %v14502_v30 = vld [vmem:[%s15357_s17 + $0x2c] sm:$0xf] }
 0x3eb   : > { %v12154_v38 = vld [vmem:[%s15357_s17 + $0x1b0] sm:$0xf0]  ;;  %v11986_v35 = vld [vmem:[%s15357_s17 + $0x60] sm:$0xf0] }
 0x3ec   : > { %8629 = vmatpush.bf16.msra.mxu2 %v13105_v50  ;;  %v14824_v50 = vld [vmem:[%s15357_s17 + $0xa3c] sm:$0xf] }
 0x3ed   : > { %8604 = vmatpush.bf16.msra.mxu0 %v12153_v10  ;;  %8617 = vmatpush.bf16.msra.mxu1 %v12601_v27  ;;  %v12322_v10 = vld [vmem:[%s15357_s17 + $0x300] sm:$0xf0]  ;;  %v13277_v27 = vor.u32 %v14824_v50, %v13274_v31  ;;  %v13432_v31 = vld [vmem:[%s15357_s17 + $0xb80] sm:$0xf] }
 0x3ee   : > { %8535 = vmatpush.bf16.msra.mxu3 %v13713_v42  ;;  %v12325_v7 = vor.u32 %v14586_v2, %v12322_v10  ;;  %v13433_v2 = vor.u32 %v14872_v56, %v13432_v31  ;;  %v14642_v10 = vld [vmem:[%s15357_s17 + $0x48c] sm:$0xf] }
 0x3ef   : > { %8491 = vmatmul.bf16.vlgmr.msrb.gmra.mxu3 %v17208_v26 }
 0x3f0   : > { %8630 = vmatpush.bf16.msra.mxu2 %v13049_v5  ;;  %v12770_v5 = vld [vmem:[%s15357_s17 + $0x680] sm:$0xf0] }
 0x3f1   : > { %8605 = vmatpush.bf16.msra.mxu0 %v12097_v62  ;;  %8618 = vmatpush.bf16.msra.mxu1 %v12545_v24  ;;  %v12773_v29 = vor.u32 %v14698_v3, %v12770_v5  ;;  %v14684_v62 = vld [vmem:[%s15357_s17 + $0x5dc] sm:$0xf]  ;;  %v12714_v24 = vld [vmem:[%s15357_s17 + $0x610] sm:$0xf0]  ;;  %v12994_v5 = vld [vmem:[%s15357_s17 + $0x840] sm:$0xf0] }
 0x3f2   : > { %8536 = vmatpush.bf16.msra.mxu3 %v13657_v1  ;;  %v12717_v14 = vor.u32 %v14684_v62, %v12714_v24  ;;  %v8284_v12 = vpop.f32.mrf.mxu3  ;;  %v14754_v1 = vld [vmem:[%s15357_s17 + $0x80c] sm:$0xf]  ;;  %v13377_v62 = vor.u32 %v14858_v13, %v13376_v45 }
 0x3f3   : > { %v17690_v50 = vadd.f32 %v8284_v12, %v17471_v32  ;;  %v11989_v12 = vor.u32 %v14502_v30, %v11986_v35  ;;  %v14790_v30 = vld [vmem:[%s15357_s17 + $0x924] sm:$0xf0]  ;;  %v14879_v35 = vld [vmem:[%s15357_s17 + $0xbf4] sm:$0xf] }
 0x3f4   : > { %8631 = vmatpush.bf16.msra.mxu2 %v12993_v54  ;;  %v13544_v54 = vld [vmem:[%s15357_s17 + $0xc60] sm:$0xf] }
 0x3f5   : > { %8606 = vmatpush.bf16.msra.mxu0 %v12041_v4  ;;  %8619 = vmatpush.bf16.msra.mxu1 %v12489_v22  ;;  %v13545_v33 = vor.u32 %v14900_v41, %v13544_v54  ;;  %v13106_v4 = vld [vmem:[%s15357_s17 + $0x920] sm:$0xf0]  ;;  %v13488_v22 = vld [vmem:[%s15357_s17 + $0xbf0] sm:$0xf]  ;;  %v8818_v0 = vmax.f32 %v17621_v40, %v17690_v50  ;;  %v14740_v54 = vld [vmem:[%s15357_s17 + $0x79c] sm:$0xf] }
 0x3f6   : > { %8537 = vmatpush.bf16.msra.mxu3 %v13601_v60  ;;  %v13109_v42 = vor.u32 %v14782_v25, %v13106_v4  ;;  %v13489_v43 = vor.u32 %v14886_v49, %v13488_v22  ;;  %8827 = vrot.lane.b32.xlu1 %v17690_v50, %s15333_s11  ;;  %v12997_v60 = vor.u32 %v14754_v1, %v12994_v5  ;;  %v12938_v41 = vld [vmem:[%s15357_s17 + $0x7d0] sm:$0xf0]  ;;  %v14614_v22 = vld [vmem:[%s15357_s17 + $0x3ac] sm:$0xf]  ;;  %v12434_v49 = vld [vmem:[%s15357_s17 + $0x3e0] sm:$0xf0] }
 0x3f7   : > { %v12941_v25 = vor.u32 %v14740_v54, %v12938_v41  ;;  %v14818_v1 = vld [vmem:[%s15357_s17 + $0xa04] sm:$0xf0]  ;;  %v13602_v5 = vld [vmem:[%s15357_s17 + $0xd08] sm:$0xf0]  ;;  %v12216_v41 = vld [vmem:[%s15357_s17 + $0x1f0] sm:$0xf] }
 0x3f8   : > { %8632 = vmatpush.bf16.msra.mxu2 %v12937_v23  ;;  %v14762_v40 = vld [vmem:[%s15357_s17 + $0x844] sm:$0xf0]  ;;  %v14851_v50 = vld [vmem:[%s15357_s17 + $0xb14] sm:$0xf] }
 0x3f9   : > { %8607 = vmatpush.bf16.msra.mxu0 %v11985_v51  ;;  %8620 = vmatpush.bf16.msra.mxu1 %v12433_v53  ;;  %v8401_v39 = vpop.f32.mrf.mxu0  ;;  %v13050_v51 = vld [vmem:[%s15357_s17 + $0x8b0] sm:$0xf0]  ;;  %v12157_v53 = vor.u32 %v14544_v17, %v12154_v38  ;;  %v14608_v17 = vld [vmem:[%s15357_s17 + $0x374] sm:$0xf0]  ;;  %v12832_v38 = vld [vmem:[%s15357_s17 + $0x6c0] sm:$0xf] }
 0x3fa   : > { %8538 = vmatpush.bf16.msra.mxu3 %v13545_v33  ;;  %v13053_v32 = vor.u32 %v14768_v47, %v13050_v51  ;;  %v8286_v24 = vpop.f32.mrf.mxu3  ;;  %v12493_v33 = vor.u32 %v14628_v11, %v12490_v63  ;;  %v13658_v47 = vld [vmem:[%s15357_s17 + $0xd78] sm:$0xf0]  ;;  %v12437_v51 = vor.u32 %v14614_v22, %v12434_v49 }
 0x3fb   : > { %v8414_v23 = vpop.f32.mrf.mxu1  ;;  %v14893_v24 = vld [vmem:[%s15357_s17 + $0xc64] sm:$0xf]  ;;  %v13546_v11 = vld [vmem:[%s15357_s17 + $0xc98] sm:$0xf0] }
 0x3fc   : > { %8633 = vmatpush.bf16.msra.mxu2 %v12881_v55  ;;  %8608 = vmatmul.bf16.vlgmr.msra.gmra.mxu0 %v16946_v58  ;;  %v8415_v28 = vadd.f32 %v8414_v23, %v8401_v39  ;;  %v12605_v55 = vor.u32 %v14656_v44, %v12602_v46  ;;  %v14726_v39 = vld [vmem:[%s15357_s17 + $0x72c] sm:$0xf]  ;;  %v14832_v44 = vld [vmem:[%s15357_s17 + $0xa74] sm:$0xf0]  ;;  %v14921_v46 = vld [vmem:[%s15357_s17 + $0xd44] sm:$0xf] }
 0x3fd   : > { %8652 = vmatpush.bf16.msrb.mxu0 %v12381_v57  ;;  %8665 = vmatpush.bf16.msrb.mxu1 %v12829_v61  ;;  %v14530_v57 = vld [vmem:[%s15357_s17 + $0x10c] sm:$0xf]  ;;  %v12098_v61 = vld [vmem:[%s15357_s17 + $0x140] sm:$0xf0] }
 0x3fe   : > { %8621 = vmatmul.bf16.vlgmr.msra.gmra.mxu1 %v16948_v59  ;;  %8539 = vmatpush.bf16.msra.mxu3 %v13489_v43  ;;  %v13280_v43 = vld [vmem:[%s15357_s17 + $0xa40] sm:$0xf] }
 0x3ff   : > { %8634 = vmatmul.bf16.vlgmr.msra.gmra.mxu2 %v16950_v20 }
 0x400   : > { %8678 = vmatpush.bf16.msrb.mxu2 %v13277_v27  ;;  %v12546_v27 = vld [vmem:[%s15357_s17 + $0x4c0] sm:$0xf0] }
 0x401   : > { %8653 = vmatpush.bf16.msrb.mxu0 %v12325_v7  ;;  %8666 = vmatpush.bf16.msrb.mxu1 %v12773_v29  ;;  %v8403_v16 = vpop.f32.mrf.mxu0  ;;  %v12101_v29 = vor.u32 %v14530_v57, %v12098_v61  ;;  %v12549_v8 = vor.u32 %v14642_v10, %v12546_v27  ;;  %v14594_v57 = vld [vmem:[%s15357_s17 + $0x304] sm:$0xf0]  ;;  %v13281_v61 = vor.u32 %v14832_v44, %v13280_v43  ;;  %v13224_v27 = vld [vmem:[%s15357_s17 + $0x9d0] sm:$0xf]  ;;  %v14664_v43 = vld [vmem:[%s15357_s17 + $0x534] sm:$0xf0] }
 0x402   : > { %v8427_v3 = vpop.f32.mrf.mxu2  ;;  %8540 = vmatpush.bf16.msra.mxu3 %v13433_v2  ;;  %v12776_v2 = vld [vmem:[%s15357_s17 + $0x650] sm:$0xf]  ;;  %v14706_v10 = vld [vmem:[%s15357_s17 + $0x684] sm:$0xf0]  ;;  %v12272_v16 = vld [vmem:[%s15357_s17 + $0x260] sm:$0xf] }
 0x403   : > { %v17707_v6 = vadd.f32 %v8427_v3, %v8415_v28  ;;  %v8416_v7 = vpop.f32.mrf.mxu1  ;;  %v13717_v28 = vor.u32 %v14935_v36, %v13714_v21  ;;  %v14907_v3 = vld [vmem:[%s15357_s17 + $0xcd4] sm:$0xf]  ;;  %v12777_v13 = vor.u32 %v14706_v10, %v12776_v2  ;;  %v13549_v36 = vor.u32 %v14893_v24, %v13546_v11  ;;  %v12664_v21 = vld [vmem:[%s15357_s17 + $0x570] sm:$0xf]  ;;  %v14650_v2 = vld [vmem:[%s15357_s17 + $0x4c4] sm:$0xf0] }
 0x404   : > { %8679 = vmatpush.bf16.msrb.mxu2 %v13221_v52  ;;  %v12042_v52 = vld [vmem:[%s15357_s17 + $0xd0] sm:$0xf0]  ;;  %v14580_v7 = vld [vmem:[%s15357_s17 + $0x294] sm:$0xf0]  ;;  %v13000_v10 = vld [vmem:[%s15357_s17 + $0x810] sm:$0xf] }
 0x405   : > { %8654 = vmatpush.bf16.msrb.mxu0 %v12269_v48  ;;  %8667 = vmatpush.bf16.msrb.mxu1 %v12717_v14  ;;  %v13320_v48 = vld [vmem:[%s15357_s17 + $0xaa0] sm:$0xf]  ;;  %v14844_v14 = vld [vmem:[%s15357_s17 + $0xad4] sm:$0xf0]  ;;  %v12273_v63 = vor.u32 %v14580_v7, %v12272_v16  ;;  %v14837_v11 = vld [vmem:[%s15357_s17 + $0xaa4] sm:$0xf] }
 0x406   : > { %8541 = vmatpush.bf16.msra.mxu3 %v13377_v62  ;;  %v13321_v4 = vor.u32 %v14844_v14, %v13320_v48  ;;  %v14804_v62 = vld [vmem:[%s15357_s17 + $0x994] sm:$0xf0]  ;;  %v14566_v48 = vld [vmem:[%s15357_s17 + $0x224] sm:$0xf0]  ;;  %v12048_v16 = vld [vmem:[%s15357_s17 + $0xa0] sm:$0xf] }
 0x407   : > { %v14524_v7 = vld [vmem:[%s15357_s17 + $0xd4] sm:$0xf0] }
 0x408   : > { %8680 = vmatpush.bf16.msrb.mxu2 %v13165_v15  ;;  %v12045_v15 = vor.u32 %v14516_v9, %v12042_v52  ;;  %v12720_v9 = vld [vmem:[%s15357_s17 + $0x5e0] sm:$0xf]  ;;  %v14692_v52 = vld [vmem:[%s15357_s17 + $0x614] sm:$0xf0] }
 0x409   : > { %8655 = vmatpush.bf16.msrb.mxu0 %v12213_v34  ;;  %8668 = vmatpush.bf16.msrb.mxu1 %v12661_v37  ;;  %v12882_v34 = vld [vmem:[%s15357_s17 + $0x760] sm:$0xf0]  ;;  %v12384_v37 = vld [vmem:[%s15357_s17 + $0x340] sm:$0xf]  ;;  %v12721_v54 = vor.u32 %v14692_v52, %v12720_v9  ;;  %v14748_v24 = vld [vmem:[%s15357_s17 + $0x7d4] sm:$0xf0] }
 0x40a   : > { %v8429_v23 = vpop.f32.mrf.mxu2  ;;  %8542 = vmatpush.bf16.msra.mxu3 %v13321_v4  ;;  %v12885_v31 = vor.u32 %v14726_v39, %v12882_v34  ;;  %v12385_v56 = vor.u32 %v14608_v17, %v12384_v37  ;;  %v12217_v39 = vor.u32 %v14566_v48, %v12216_v41  ;;  %v14552_v34 = vld [vmem:[%s15357_s17 + $0x1b4] sm:$0xf0]  ;;  %v12496_v52 = vld [vmem:[%s15357_s17 + $0x420] sm:$0xf]  ;;  %v14943_v41 = vld [vmem:[%s15357_s17 + $0xdec] sm:$0xf0]  ;;  %v12049_v48 = vor.u32 %v14524_v7, %v12048_v16 }
 0x40b   : > { %v14797_v16 = vld [vmem:[%s15357_s17 + $0x964] sm:$0xf]  ;;  %v13170_v7 = vld [vmem:[%s15357_s17 + $0x998] sm:$0xf0] }
 0x40c   : > { %8681 = vmatpush.bf16.msrb.mxu2 %v13109_v42  ;;  %v14720_v42 = vld [vmem:[%s15357_s17 + $0x6f4] sm:$0xf0] }
 0x40d   : > { %8656 = vmatpush.bf16.msrb.mxu0 %v12157_v53  ;;  %8669 = vmatpush.bf16.msrb.mxu1 %v12605_v55  ;;  %v12833_v53 = vor.u32 %v14720_v42, %v12832_v38  ;;  %v12328_v55 = vld [vmem:[%s15357_s17 + $0x2d0] sm:$0xf]  ;;  %v12608_v42 = vld [vmem:[%s15357_s17 + $0x500] sm:$0xf] }
 0x40e   : > { %8587 = vmatpush.bf16.msrb.mxu3 %v13717_v28  ;;  %v12329_v45 = vor.u32 %v14594_v57, %v12328_v55  ;;  %v12160_v28 = vld [vmem:[%s15357_s17 + $0x180] sm:$0xf]  ;;  %v12104_v55 = vld [vmem:[%s15357_s17 + $0x110] sm:$0xf]  ;;  %v14538_v57 = vld [vmem:[%s15357_s17 + $0x144] sm:$0xf0] }
 0x40f   : > { %8543 = vmatmul.bf16.vlgmr.msra.gmra.mxu3 %v17208_v26 }
 0x410   : > { %8682 = vmatpush.bf16.msrb.mxu2 %v13053_v32  ;;  %v13661_v32 = vor.u32 %v14921_v46, %v13658_v47  ;;  %v14776_v46 = vld [vmem:[%s15357_s17 + $0x8b4] sm:$0xf0]  ;;  %v14865_v47 = vld [vmem:[%s15357_s17 + $0xb84] sm:$0xf] }
 0x411   : > { %8657 = vmatpush.bf16.msrb.mxu0 %v12101_v29  ;;  %8670 = vmatpush.bf16.msrb.mxu1 %v12549_v8  ;;  %v13225_v29 = vor.u32 %v14818_v1, %v13224_v27  ;;  %v13605_v8 = vor.u32 %v14907_v3, %v13602_v5 }
 0x412   : > { %8588 = vmatpush.bf16.msrb.mxu3 %v13661_v32  ;;  %v8336_v38 = vpop.f32.mrf.mxu3  ;;  %v12552_v32 = vld [vmem:[%s15357_s17 + $0x490] sm:$0xf] }
 0x413   : > { %v8337_v44 = vadd.f32 %v8336_v38, %v17546_v19  ;;  %v13282_v38 = vld [vmem:[%s15357_s17 + $0xa78] sm:$0xf0] }
 0x414   : > { %8683 = vmatpush.bf16.msrb.mxu2 %v12997_v60  ;;  %v13168_v60 = vld [vmem:[%s15357_s17 + $0x960] sm:$0xf] }
 0x415   : > { %8658 = vmatpush.bf16.msrb.mxu0 %v12045_v15  ;;  %8671 = vmatpush.bf16.msrb.mxu1 %v12493_v33  ;;  %v13169_v14 = vor.u32 %v14804_v62, %v13168_v60  ;;  %v14678_v15 = vld [vmem:[%s15357_s17 + $0x5a4] sm:$0xf0]  ;;  %v13112_v33 = vld [vmem:[%s15357_s17 + $0x8f0] sm:$0xf]  ;;  %v14636_v60 = vld [vmem:[%s15357_s17 + $0x454] sm:$0xf0] }
 0x416   : > { %8589 = vmatpush.bf16.msrb.mxu3 %v13605_v8  ;;  %v12665_v23 = vor.u32 %v14678_v15, %v12664_v21  ;;  %v13113_v37 = vor.u32 %v14790_v30, %v13112_v33  ;;  %8833 = vrot.lane.b32.xlu2 %v8337_v44, %s15333_s11  ;;  %v12944_v62 = vld [vmem:[%s15357_s17 + $0x7a0] sm:$0xf]  ;;  %v14510_v21 = vld [vmem:[%s15357_s17 + $0x64] sm:$0xf0]  ;;  %v12440_v30 = vld [vmem:[%s15357_s17 + $0x3b0] sm:$0xf] }
 0x417   : > { %v12945_v15 = vor.u32 %v14748_v24, %v12944_v62  ;;  %v12218_v62 = vld [vmem:[%s15357_s17 + $0x228] sm:$0xf0]  ;;  %v13173_v24 = vor.u32 %v14797_v16, %v13170_v7  ;;  %v14629_v7 = vld [vmem:[%s15357_s17 + $0x424] sm:$0xf] }
 0x418   : > { %8684 = vmatpush.bf16.msrb.mxu2 %v12941_v25  ;;  %v13490_v25 = vld [vmem:[%s15357_s17 + $0xc28] sm:$0xf0] }
 0x419   : > { %8659 = vmatpush.bf16.msrb.mxu0 %v11989_v12  ;;  %8672 = vmatpush.bf16.msrb.mxu1 %v12437_v51  ;;  %v8453_v4 = vpop.f32.mrf.mxu0  ;;  %v13493_v17 = vor.u32 %v14879_v35, %v13490_v25  ;;  %v13056_v12 = vld [vmem:[%s15357_s17 + $0x880] sm:$0xf]  ;;  %v13434_v51 = vld [vmem:[%s15357_s17 + $0xbb8] sm:$0xf0]  ;;  %v14622_v35 = vld [vmem:[%s15357_s17 + $0x3e4] sm:$0xf0] }
 0x41a   : > { %8590 = vmatpush.bf16.msrb.mxu3 %v13549_v36  ;;  %v13057_v19 = vor.u32 %v14776_v46, %v13056_v12  ;;  %v8338_v9 = vpop.f32.mrf.mxu3  ;;  %v11992_v36 = vld [vmem:[%s15357_s17 + $0x30] sm:$0xf]  ;;  %v12441_v12 = vor.u32 %v14622_v35, %v12440_v30 }
 0x41b   : > { %v8466_v22 = vpop.f32.mrf.mxu1  ;;  %v12888_v25 = vld [vmem:[%s15357_s17 + $0x730] sm:$0xf] }
 0x41c   : > { %8685 = vmatpush.bf16.msrb.mxu2 %v12885_v31  ;;  %8660 = vmatmul.bf16.vlgmr.msrb.gmra.mxu0 %v16946_v58  ;;  %v8467_v49 = vadd.f32 %v8466_v22, %v8453_v4  ;;  %v17773_v31 = vmax.f32 %v8818_v0, %v8337_v44  ;;  %v13378_v0 = vld [vmem:[%s15357_s17 + $0xb48] sm:$0xf0] }
 0x41d   : > { %8704 = vmatpush.bf16.msra.mxu0 %v12385_v56  ;;  %8717 = vmatpush.bf16.msra.mxu1 %v12833_v53  ;;  %v12161_v56 = vor.u32 %v14552_v34, %v12160_v28  ;;  %v12609_v53 = vor.u32 %v14664_v43, %v12608_v42  ;;  %v13381_v8 = vor.u32 %v14851_v50, %v13378_v0  ;;  %v14713_v28 = vld [vmem:[%s15357_s17 + $0x6c4] sm:$0xf]  ;;  %v12834_v34 = vld [vmem:[%s15357_s17 + $0x6f8] sm:$0xf0]  ;;  %v13664_v42 = vld [vmem:[%s15357_s17 + $0xd48] sm:$0xf] }
 0x41e   : > { %8673 = vmatmul.bf16.vlgmr.msrb.gmra.mxu1 %v16948_v59  ;;  %8591 = vmatpush.bf16.msrb.mxu3 %v13493_v17  ;;  %v11993_v17 = vor.u32 %v14510_v21, %v11992_v36  ;;  %v14929_v43 = vld [vmem:[%s15357_s17 + $0xd7c] sm:$0xf0]  ;;  %v14573_v50 = vld [vmem:[%s15357_s17 + $0x264] sm:$0xf]  ;;  %v12274_v0 = vld [vmem:[%s15357_s17 + $0x298] sm:$0xf0] }
 0x41f   : > { %8686 = vmatmul.bf16.vlgmr.msrb.gmra.mxu2 %v16950_v20  ;;  %v12277_v9 = vor.u32 %v14573_v50, %v12274_v0  ;;  %v13496_v36 = vld [vmem:[%s15357_s17 + $0xbf8] sm:$0xf]  ;;  %v14887_v21 = vld [vmem:[%s15357_s17 + $0xc2c] sm:$0xf0] }
 0x420   : > { %8730 = vmatpush.bf16.msra.mxu2 %v13281_v61  ;;  %v13437_v61 = vor.u32 %v14865_v47, %v13434_v51  ;;  %v12837_v47 = vor.u32 %v14713_v28, %v12834_v34  ;;  %v14587_v51 = vld [vmem:[%s15357_s17 + $0x2d4] sm:$0xf]  ;;  %v14657_v34 = vld [vmem:[%s15357_s17 + $0x504] sm:$0xf] }
 0x421   : > { %8705 = vmatpush.bf16.msra.mxu0 %v12329_v45  ;;  %8718 = vmatpush.bf16.msra.mxu1 %v12777_v13  ;;  %v8455_v3 = vpop.f32.mrf.mxu0  ;;  %v12105_v45 = vor.u32 %v14538_v57, %v12104_v55  ;;  %v12553_v13 = vor.u32 %v14650_v2, %v12552_v32  ;;  %v13665_v55 = vor.u32 %v14929_v43, %v13664_v42  ;;  %v14699_v57 = vld [vmem:[%s15357_s17 + $0x654] sm:$0xf]  ;;  %v13226_v32 = vld [vmem:[%s15357_s17 + $0xa08] sm:$0xf0]  ;;  %v13608_v2 = vld [vmem:[%s15357_s17 + $0xcd8] sm:$0xf] }
 0x422   : > { %v8479_v27 = vpop.f32.mrf.mxu2  ;;  %8592 = vmatpush.bf16.msrb.mxu3 %v13437_v61  ;;  %v14811_v61 = vld [vmem:[%s15357_s17 + $0x9d4] sm:$0xf]  ;;  %v13058_v42 = vld [vmem:[%s15357_s17 + $0x8b8] sm:$0xf0]  ;;  %v13440_v43 = vld [vmem:[%s15357_s17 + $0xb88] sm:$0xf] }
 0x423   : > { %v17784_v1 = vadd.f32 %v8479_v27, %v8467_v49  ;;  %v8468_v5 = vpop.f32.mrf.mxu1  ;;  %v14734_v49 = vld [vmem:[%s15357_s17 + $0x764] sm:$0xf0]  ;;  %v13229_v3 = vor.u32 %v14811_v61, %v13226_v32  ;;  %v13002_v61 = vld [vmem:[%s15357_s17 + $0x848] sm:$0xf0]  ;;  %v13384_v32 = vld [vmem:[%s15357_s17 + $0xb18] sm:$0xf] }
 0x424   : > { %8731 = vmatpush.bf16.msra.mxu2 %v13225_v29  ;;  %v13001_v29 = vor.u32 %v14762_v40, %v13000_v10  ;;  %v12889_v44 = vor.u32 %v14734_v49, %v12888_v25  ;;  %v14915_v10 = vld [vmem:[%s15357_s17 + $0xd0c] sm:$0xf0]  ;;  %v12162_v49 = vld [vmem:[%s15357_s17 + $0x1b8] sm:$0xf0] }
 0x425   : > { %8706 = vmatpush.bf16.msra.mxu0 %v12273_v63  ;;  %8719 = vmatpush.bf16.msra.mxu1 %v12721_v54  ;;  %v13322_v63 = vld [vmem:[%s15357_s17 + $0xad8] sm:$0xf0]  ;;  %v13720_v54 = vld [vmem:[%s15357_s17 + $0xdb8] sm:$0xf]  ;;  %v13609_v5 = vor.u32 %v14915_v10, %v13608_v2  ;;  %v14859_v2 = vld [vmem:[%s15357_s17 + $0xb4c] sm:$0xf0] }
 0x426   : > { %8593 = vmatpush.bf16.msrb.mxu3 %v13381_v8  ;;  %v13325_v33 = vor.u32 %v14837_v11, %v13322_v63  ;;  %v13721_v22 = vor.u32 %v14943_v41, %v13720_v54  ;;  %v14901_v8 = vld [vmem:[%s15357_s17 + $0xc9c] sm:$0xf0]  ;;  %v14671_v63 = vld [vmem:[%s15357_s17 + $0x574] sm:$0xf]  ;;  %v12666_v54 = vld [vmem:[%s15357_s17 + $0x5a8] sm:$0xf0] }
 0x427   : > { %v14783_v41 = vld [vmem:[%s15357_s17 + $0x8f4] sm:$0xf]  ;;  %v12669_v25 = vor.u32 %v14671_v63, %v12666_v54 }
 0x428   : > { %8732 = vmatpush.bf16.msra.mxu2 %v13169_v14  ;;  %v12497_v14 = vor.u32 %v14636_v60, %v12496_v52  ;;  %v14559_v60 = vld [vmem:[%s15357_s17 + $0x1f4] sm:$0xf] }
 0x429   : > { %8707 = vmatpush.bf16.msra.mxu0 %v12217_v39  ;;  %8720 = vmatpush.bf16.msra.mxu1 %v12665_v23  ;;  %v14601_v39 = vld [vmem:[%s15357_s17 + $0x344] sm:$0xf]  ;;  %v12386_v23 = vld [vmem:[%s15357_s17 + $0x378] sm:$0xf0]  ;;  %v12221_v30 = vor.u32 %v14559_v60, %v12218_v62  ;;  %v14845_v60 = vld [vmem:[%s15357_s17 + $0xadc] sm:$0xf0] }
 0x42a   : > { %v8481_v4 = vpop.f32.mrf.mxu2  ;;  %8594 = vmatpush.bf16.msrb.mxu3 %v13325_v33  ;;  %v12389_v46 = vor.u32 %v14601_v39, %v12386_v23  ;;  %v13497_v23 = vor.u32 %v14887_v21, %v13496_v36  ;;  %v14936_v62 = vld [vmem:[%s15357_s17 + $0xdbc] sm:$0xf]  ;;  %v14615_v36 = vld [vmem:[%s15357_s17 + $0x3b4] sm:$0xf] }
 0x42c   : > { %8733 = vmatpush.bf16.msra.mxu2 %v13113_v37  ;;  %v14825_v37 = vld [vmem:[%s15357_s17 + $0xa44] sm:$0xf] }
 0x42d   : > { %8708 = vmatpush.bf16.msra.mxu0 %v12161_v56  ;;  %8721 = vmatpush.bf16.msra.mxu1 %v12609_v53  ;;  %v12330_v56 = vld [vmem:[%s15357_s17 + $0x308] sm:$0xf0]  ;;  %v13285_v53 = vor.u32 %v14825_v37, %v13282_v38  ;;  %v12610_v37 = vld [vmem:[%s15357_s17 + $0x538] sm:$0xf0] }
 0x42e   : > { %8639 = vmatpush.bf16.msra.mxu3 %v13721_v22  ;;  %v12333_v27 = vor.u32 %v14587_v51, %v12330_v56  ;;  %v14545_v22 = vld [vmem:[%s15357_s17 + $0x184] sm:$0xf]  ;;  %v12106_v51 = vld [vmem:[%s15357_s17 + $0x148] sm:$0xf0] }
 0x42f   : > { %8595 = vmatmul.bf16.vlgmr.msrb.gmra.mxu3 %v17208_v26 }
 0x430   : > { %8734 = vmatpush.bf16.msra.mxu2 %v13057_v19  ;;  %v12778_v19 = vld [vmem:[%s15357_s17 + $0x688] sm:$0xf0] }
 0x431   : > { %8709 = vmatpush.bf16.msra.mxu0 %v12105_v45  ;;  %8722 = vmatpush.bf16.msra.mxu1 %v12553_v13  ;;  %v12781_v40 = vor.u32 %v14699_v57, %v12778_v19  ;;  %v14685_v45 = vld [vmem:[%s15357_s17 + $0x5e4] sm:$0xf]  ;;  %v12722_v13 = vld [vmem:[%s15357_s17 + $0x618] sm:$0xf0]  ;;  %v14755_v57 = vld [vmem:[%s15357_s17 + $0x814] sm:$0xf] }
 0x432   : > { %8640 = vmatpush.bf16.msra.mxu3 %v13665_v55  ;;  %v12725_v52 = vor.u32 %v14685_v45, %v12722_v13  ;;  %v8388_v28 = vpop.f32.mrf.mxu3  ;;  %v12554_v55 = vld [vmem:[%s15357_s17 + $0x4c8] sm:$0xf0]  ;;  %v13005_v45 = vor.u32 %v14755_v57, %v13002_v61  ;;  %v13385_v13 = vor.u32 %v14859_v2, %v13384_v32  ;;  %v13386_v61 = vld [vmem:[%s15357_s17 + $0xb50] sm:$0xf0] }
 0x433   : > { %v8389_v38 = vadd.f32 %v8388_v28, %v17630_v18  ;;  %v14908_v28 = vld [vmem:[%s15357_s17 + $0xcdc] sm:$0xf] }
 0x434   : > { %8735 = vmatpush.bf16.msra.mxu2 %v13001_v29  ;;  %v13552_v29 = vld [vmem:[%s15357_s17 + $0xc68] sm:$0xf] }
 0x435   : > { %8710 = vmatpush.bf16.msra.mxu0 %v12049_v48  ;;  %8723 = vmatpush.bf16.msra.mxu1 %v12497_v14  ;;  %v13553_v11 = vor.u32 %v14901_v8, %v13552_v29  ;;  %v8810_v48 = vpop.permute.xlu0 %8809  ;;  %v13114_v14 = vld [vmem:[%s15357_s17 + $0x928] sm:$0xf0]  ;;  %v12498_v29 = vld [vmem:[%s15357_s17 + $0x458] sm:$0xf0]  ;;  %v14741_v8 = vld [vmem:[%s15357_s17 + $0x7a4] sm:$0xf] }
 0x436   : > { %8641 = vmatpush.bf16.msra.mxu3 %v13609_v5  ;;  %v8824_v4 = vmax.f32 %v17773_v31, %v8810_v48  ;;  %v13117_v39 = vor.u32 %v14783_v41, %v13114_v14  ;;  %v14873_v31 = vld [vmem:[%s15357_s17 + $0xbbc] sm:$0xf0]  ;;  %8839 = vrot.lane.b32.xlu2 %v8389_v38, %s15333_s11  ;;  %v12050_v5 = vld [vmem:[%s15357_s17 + $0xd8] sm:$0xf0]  ;;  %v12501_v63 = vor.u32 %v14629_v7, %v12498_v29  ;;  %v14503_v48 = vld [vmem:[%s15357_s17 + $0x34] sm:$0xf] }
 0x437   : > { %v13441_v18 = vor.u32 %v14873_v31, %v13440_v43  ;;  %v11994_v14 = vld [vmem:[%s15357_s17 + $0x68] sm:$0xf0]  ;;  %v14880_v43 = vld [vmem:[%s15357_s17 + $0xbfc] sm:$0xf]  ;;  %v13498_v31 = vld [vmem:[%s15357_s17 + $0xc30] sm:$0xf0] }
 0x438   : > { %8736 = vmatpush.bf16.msra.mxu2 %v12945_v15  ;;  %v13672_v7 = vld [vmem:[%s15357_s17 + $0xd50] sm:$0xf]  ;;  %v14930_v29 = vld [vmem:[%s15357_s17 + $0xd84] sm:$0xf0] }
 0x439   : > { %8711 = vmatpush.bf16.msra.mxu0 %v11993_v17  ;;  %8724 = vmatpush.bf16.msra.mxu1 %v12441_v12  ;;  %v8505_v15 = vpop.f32.mrf.mxu0  ;;  %v14769_v17 = vld [vmem:[%s15357_s17 + $0x884] sm:$0xf]  ;;  %v17848_v12 = vmax.f32 %v8824_v4, %v8389_v38 }
 0x43a   : > { %8642 = vmatpush.bf16.msra.mxu3 %v13553_v11  ;;  %v13061_v56 = vor.u32 %v14769_v17, %v13058_v42  ;;  %v8390_v16 = vpop.f32.mrf.mxu3  ;;  %v13666_v4 = vld [vmem:[%s15357_s17 + $0xd80] sm:$0xf0]  ;;  %v14894_v17 = vld [vmem:[%s15357_s17 + $0xc6c] sm:$0xf] }
 0x43b   : > { %v8518_v33 = vpop.f32.mrf.mxu1  ;;  %v13554_v38 = vld [vmem:[%s15357_s17 + $0xca0] sm:$0xf0] }
 0x43c   : > { %8737 = vmatpush.bf16.msra.mxu2 %v12889_v44  ;;  %8712 = vmatmul.bf16.vlgmr.msra.gmra.mxu0 %v16946_v58  ;;  %v8519_v35 = vadd.f32 %v8518_v33, %v8505_v15  ;;  %v12165_v44 = vor.u32 %v14545_v22, %v12162_v49  ;;  %v12442_v33 = vld [vmem:[%s15357_s17 + $0x3e8] sm:$0xf0]  ;;  %v11997_v22 = vor.u32 %v14503_v48, %v11994_v14 }
 0x43d   : > { %8756 = vmatpush.bf16.msrb.mxu0 %v12389_v46  ;;  %8769 = vmatpush.bf16.msrb.mxu1 %v12837_v47  ;;  %v12613_v46 = vor.u32 %v14657_v34, %v12610_v37  ;;  %v14531_v47 = vld [vmem:[%s15357_s17 + $0x114] sm:$0xf]  ;;  %v12445_v49 = vor.u32 %v14615_v36, %v12442_v33  ;;  %v13557_v42 = vor.u32 %v14894_v17, %v13554_v38  ;;  %v14846_v38 = vld [vmem:[%s15357_s17 + $0xae4] sm:$0xf0] }
 0x43e   : > { %8725 = vmatmul.bf16.vlgmr.msra.gmra.mxu1 %v16948_v59  ;;  %8643 = vmatpush.bf16.msra.mxu3 %v13497_v23  ;;  %v12109_v50 = vor.u32 %v14531_v47, %v12106_v51  ;;  %v13610_v34 = vld [vmem:[%s15357_s17 + $0xd10] sm:$0xf0] }
 0x43f   : > { %8738 = vmatmul.bf16.vlgmr.msra.gmra.mxu2 %v16950_v20  ;;  %v13613_v37 = vor.u32 %v14908_v28, %v13610_v34 }
 0x440   : > { %8782 = vmatpush.bf16.msrb.mxu2 %v13285_v53  ;;  %v14643_v53 = vld [vmem:[%s15357_s17 + $0x494] sm:$0xf] }
 0x441   : > { %8757 = vmatpush.bf16.msrb.mxu0 %v12333_v27  ;;  %8770 = vmatpush.bf16.msrb.mxu1 %v12781_v40  ;;  %v8507_v27 = vpop.f32.mrf.mxu0  ;;  %v12557_v0 = vor.u32 %v14643_v53, %v12554_v55  ;;  %v13442_v53 = vld [vmem:[%s15357_s17 + $0xbc0] sm:$0xf0] }
 0x442   : > { %v8531_v19 = vpop.f32.mrf.mxu2  ;;  %8644 = vmatpush.bf16.msra.mxu3 %v13441_v18  ;;  %v14866_v18 = vld [vmem:[%s15357_s17 + $0xb8c] sm:$0xf] }
 0x443   : > { %v17859_v10 = vadd.f32 %v8531_v19, %v8519_v35  ;;  %v8520_v40 = vpop.f32.mrf.mxu1  ;;  %v12890_v35 = vld [vmem:[%s15357_s17 + $0x768] sm:$0xf0]  ;;  %v13445_v57 = vor.u32 %v14866_v18, %v13442_v53  ;;  %v14852_v19 = vld [vmem:[%s15357_s17 + $0xb1c] sm:$0xf]  ;;  %v14909_v18 = vld [vmem:[%s15357_s17 + $0xce4] sm:$0xf] }
 0x444   : > { %8783 = vmatpush.bf16.msrb.mxu2 %v13229_v3  ;;  %v14517_v3 = vld [vmem:[%s15357_s17 + $0xa4] sm:$0xf]  ;;  %v13618_v53 = vld [vmem:[%s15357_s17 + $0xd18] sm:$0xf0] }
 0x445   : > { %8758 = vmatpush.bf16.msrb.mxu0 %v12277_v9  ;;  %8771 = vmatpush.bf16.msrb.mxu1 %v12725_v52  ;;  %v12946_v9 = vld [vmem:[%s15357_s17 + $0x7d8] sm:$0xf0]  ;;  %v13328_v52 = vld [vmem:[%s15357_s17 + $0xaa8] sm:$0xf]  ;;  %v12053_v11 = vor.u32 %v14517_v3, %v12050_v5  ;;  %v13728_v3 = vld [vmem:[%s15357_s17 + $0xdc0] sm:$0xf] }
 0x446   : > { %8645 = vmatpush.bf16.msra.mxu3 %v13385_v13  ;;  %v12949_v54 = vor.u32 %v14741_v8, %v12946_v9  ;;  %v13329_v41 = vor.u32 %v14845_v60, %v13328_v52  ;;  %v14944_v5 = vld [vmem:[%s15357_s17 + $0xdf4] sm:$0xf0]  ;;  %v13673_v8 = vor.u32 %v14930_v29, %v13672_v7  ;;  %v13616_v9 = vld [vmem:[%s15357_s17 + $0xce0] sm:$0xf]  ;;  %v14853_v29 = vld [vmem:[%s15357_s17 + $0xb24] sm:$0xf] }
 0x447   : > { %v13729_v13 = vor.u32 %v14944_v5, %v13728_v3  ;;  %v14916_v52 = vld [vmem:[%s15357_s17 + $0xd14] sm:$0xf0]  ;;  %v13450_v3 = vld [vmem:[%s15357_s17 + $0xbc8] sm:$0xf0] }
 0x448   : > { %8784 = vmatpush.bf16.msrb.mxu2 %v13173_v24  ;;  %v13722_v24 = vld [vmem:[%s15357_s17 + $0xdf0] sm:$0xf0]  ;;  %v13617_v60 = vor.u32 %v14916_v52, %v13616_v9 }
 0x449   : > { %8759 = vmatpush.bf16.msrb.mxu0 %v12221_v30  ;;  %8772 = vmatpush.bf16.msrb.mxu1 %v12669_v25  ;;  %v13725_v15 = vor.u32 %v14936_v62, %v13722_v24  ;;  %v14727_v30 = vld [vmem:[%s15357_s17 + $0x734] sm:$0xf]  ;;  %v14922_v25 = vld [vmem:[%s15357_s17 + $0xd4c] sm:$0xf]  ;;  %v13560_v62 = vld [vmem:[%s15357_s17 + $0xc70] sm:$0xf] }
 0x44a   : > { %v8533_v21 = vpop.f32.mrf.mxu2  ;;  %8646 = vmatpush.bf16.msra.mxu3 %v13329_v41  ;;  %v13669_v23 = vor.u32 %v14922_v25, %v13666_v4  ;;  %v14902_v24 = vld [vmem:[%s15357_s17 + $0xca4] sm:$0xf0] }
 0x44b   : > { %v13448_v21 = vld [vmem:[%s15357_s17 + $0xb90] sm:$0xf] }
 0x44c   : > { %8785 = vmatpush.bf16.msrb.mxu2 %v13117_v39  ;;  %v12893_v39 = vor.u32 %v14727_v30, %v12890_v35 }
 0x44d   : > { %8760 = vmatpush.bf16.msrb.mxu0 %v12165_v44  ;;  %8773 = vmatpush.bf16.msrb.mxu1 %v12613_v46  ;;  %v8816_v44 = vpop.permute.xlu0 %8815 }
 0x44e   : > { %8691 = vmatpush.bf16.msrb.mxu3 %v13725_v15  ;;  %v14874_v15 = vld [vmem:[%s15357_s17 + $0xbc4] sm:$0xf0] }
 0x44f   : > { %8647 = vmatmul.bf16.vlgmr.msra.gmra.mxu3 %v17208_v26  ;;  %v13449_v4 = vor.u32 %v14874_v15, %v13448_v21 }
 0x450   : > { %8786 = vmatpush.bf16.msrb.mxu2 %v13061_v56 }
 0x451   : > { %8761 = vmatpush.bf16.msrb.mxu0 %v12109_v50  ;;  %8774 = vmatpush.bf16.msrb.mxu1 %v12557_v0  ;;  %v14838_v50 = vld [vmem:[%s15357_s17 + $0xaac] sm:$0xf]  ;;  %v13330_v0 = vld [vmem:[%s15357_s17 + $0xae0] sm:$0xf0]  ;;  %v8822_v33 = vpop.permute.xlu1 %8821 }
 0x452   : > { %8692 = vmatpush.bf16.msrb.mxu3 %v13669_v23  ;;  %v8440_v56 = vpop.f32.mrf.mxu3 }
 0x454   : > { %8787 = vmatpush.bf16.msrb.mxu2 %v13005_v45  ;;  %v13333_v45 = vor.u32 %v14838_v50, %v13330_v0  ;;  %v14867_v0 = vld [vmem:[%s15357_s17 + $0xb94] sm:$0xf] }
 0x455   : > { %8762 = vmatpush.bf16.msrb.mxu0 %v12053_v11  ;;  %8775 = vmatpush.bf16.msrb.mxu1 %v12501_v63  ;;  %v13561_v11 = vor.u32 %v14902_v24, %v13560_v62  ;;  %v13504_v63 = vld [vmem:[%s15357_s17 + $0xc00] sm:$0xf]  ;;  %v13453_v7 = vor.u32 %v14867_v0, %v13450_v3  ;;  %v14947_v0 = vld [vmem:[%s15362_s21 + $0x10] sm:$0xff] }
 0x456   : > { %8693 = vmatpush.bf16.msrb.mxu3 %v13613_v37 }
 0x458   : > { %8788 = vmatpush.bf16.msrb.mxu2 %v12949_v54  ;;  %v14888_v54 = vld [vmem:[%s15357_s17 + $0xc34] sm:$0xf0] }
 0x459   : > { %8763 = vmatpush.bf16.msrb.mxu0 %v11997_v22  ;;  %8776 = vmatpush.bf16.msrb.mxu1 %v12445_v49  ;;  %v8557_v46 = vpop.f32.mrf.mxu0  ;;  %v13505_v14 = vor.u32 %v14888_v54, %v13504_v63  ;;  %v13392_v49 = vld [vmem:[%s15357_s17 + $0xb20] sm:$0xf]  ;;  %v14839_v63 = vld [vmem:[%s15357_s17 + $0xab4] sm:$0xf]  ;;  %v13338_v54 = vld [vmem:[%s15357_s17 + $0xae8] sm:$0xf0] }
 0x45a   : > { %8694 = vmatpush.bf16.msrb.mxu3 %v13557_v42 }
 0x45b   : > { %v8570_v47 = vpop.f32.mrf.mxu1 }
 0x45c   : > { %8789 = vmatpush.bf16.msrb.mxu2 %v12893_v39  ;;  %8764 = vmatmul.bf16.vlgmr.msrb.gmra.mxu0 %v16946_v58  ;;  %v8571_v51 = vadd.f32 %v8570_v47, %v8557_v46  ;;  %v13501_v58 = vor.u32 %v14880_v43, %v13498_v31  ;;  %v14860_v39 = vld [vmem:[%s15357_s17 + $0xb54] sm:$0xf0]  ;;  %v14937_v43 = vld [vmem:[%s15357_s17 + $0xdc4] sm:$0xf]  ;;  %v13730_v31 = vld [vmem:[%s15357_s17 + $0xdf8] sm:$0xf0] }
 0x45d   : > { %8777 = vmatmul.bf16.vlgmr.msrb.gmra.mxu1 %v16948_v59  ;;  %v8830_v59 = vmax.f32 %v17848_v12, %v8816_v44  ;;  %v13389_v12 = vor.u32 %v14852_v19, %v13386_v61  ;;  %v13393_v17 = vor.u32 %v14860_v39, %v13392_v49  ;;  %v13733_v46 = vor.u32 %v14937_v43, %v13730_v31  ;;  %v14923_v47 = vld [vmem:[%s15357_s17 + $0xd54] sm:$0xf]  ;;  %v14881_v19 = vld [vmem:[%s15357_s17 + $0xc04] sm:$0xf]  ;;  %v13506_v61 = vld [vmem:[%s15357_s17 + $0xc38] sm:$0xf0] }
 0x45e   : > { %8695 = vmatpush.bf16.msrb.mxu3 %v13501_v58 }
 0x45f   : > { %8790 = vmatmul.bf16.vlgmr.msrb.gmra.mxu2 %v16950_v20  ;;  %v8441_v20 = vadd.f32 %v8440_v56, %v17707_v6  ;;  %v8442_v6 = vpop.f32.mrf.mxu3 }
 0x461   : > { %v8831_v55 = vmax.f32 %v8830_v59, %v8441_v20  ;;  %8845 = vrot.lane.b32.xlu0 %v8441_v20, %s15333_s11  ;;  %v8559_v27 = vpop.f32.mrf.mxu0  ;;  %v13621_v59 = vor.u32 %v14909_v18, %v13618_v53  ;;  %v14895_v20 = vld [vmem:[%s15357_s17 + $0xc74] sm:$0xf] }
 0x462   : > { %v8583_v32 = vpop.f32.mrf.mxu2  ;;  %8696 = vmatpush.bf16.msrb.mxu3 %v13445_v57 }
 0x463   : > { %v17896_v2 = vadd.f32 %v8583_v32, %v8571_v51  ;;  %v8572_v40 = vpop.f32.mrf.mxu1  ;;  %v8836_v35 = vmax.f32 %v8831_v55, %v8822_v33  ;;  %v13674_v51 = vld [vmem:[%s15357_s17 + $0xd88] sm:$0xf0] }
 0x464   : > { %v13677_v56 = vor.u32 %v14923_v47, %v13674_v51  ;;  %v13562_v55 = vld [vmem:[%s15357_s17 + $0xca8] sm:$0xf0] }
 0x465   : > { %v13565_v57 = vor.u32 %v14895_v20, %v13562_v55 }
 0x466   : > { %8697 = vmatpush.bf16.msrb.mxu3 %v13389_v12  ;;  %v13509_v12 = vor.u32 %v14881_v19, %v13506_v61 }
 0x468   : > { %v8828_v32 = vpop.permute.xlu1 %8827 }
 0x46a   : > { %v8585_v16 = vpop.f32.mrf.mxu2  ;;  %8698 = vmatpush.bf16.msrb.mxu3 %v13333_v45 }
 0x46d   : > { %8699 = vmatmul.bf16.vlgmr.msrb.gmra.mxu3 %v17208_v26 }
 0x46e   : > { %8743 = vmatpush.bf16.msra.mxu3 %v13729_v13 }
 0x470   : > { %v8834_v40 = vpop.permute.xlu2 %8833 }
 0x472   : > { %8744 = vmatpush.bf16.msra.mxu3 %v13673_v8  ;;  %v8492_v30 = vpop.f32.mrf.mxu3  ;;  %v13394_v8 = vld [vmem:[%s15357_s17 + $0xb58] sm:$0xf0] }
 0x473   : > { %v8493_v25 = vadd.f32 %v8492_v30, %v17784_v1  ;;  %v13336_v1 = vld [vmem:[%s15357_s17 + $0xab0] sm:$0xf] }
 0x474   : > { %v13337_v44 = vor.u32 %v14846_v38, %v13336_v1 }
 0x475   : > { %v8837_v22 = vmax.f32 %v8836_v35, %v8493_v25  ;;  %8851 = vrot.lane.b32.xlu1 %v8493_v25, %s15333_s11 }
 0x476   : > { %8745 = vmatpush.bf16.msra.mxu3 %v13617_v60  ;;  %v13397_v60 = vor.u32 %v14853_v29, %v13394_v8 }
 0x477   : > { %v8842_v27 = vmax.f32 %v8837_v22, %v8828_v32 }
 0x479   : > { %v8609_v41 = vpop.f32.mrf.mxu0  ;;  %v8843_v13 = vmax.f32 %v8842_v27, %v8834_v40 }
 0x47a   : > { %8746 = vmatpush.bf16.msra.mxu3 %v13561_v11  ;;  %v8494_v42 = vpop.f32.mrf.mxu3 }
 0x47b   : > { %v8622_v48 = vpop.f32.mrf.mxu1 }
 0x47c   : > { %v8623_v36 = vadd.f32 %v8622_v48, %v8609_v41  ;;  %v13341_v48 = vor.u32 %v14839_v63, %v13338_v54  ;;  %v14949_v54 = vld [vmem:[%s15372_s29] sm:$0xff] }
 0x47e   : > { %8747 = vmatpush.bf16.msra.mxu3 %v13505_v14 }
 0x481   : > { %v8611_v34 = vpop.f32.mrf.mxu0 }
 0x482   : > { %v8635_v23 = vpop.f32.mrf.mxu2  ;;  %8748 = vmatpush.bf16.msra.mxu3 %v13449_v4 }
 0x483   : > { %v17917_v28 = vadd.f32 %v8635_v23, %v8623_v36  ;;  %v8624_v37 = vpop.f32.mrf.mxu1 }
 0x486   : > { %8749 = vmatpush.bf16.msra.mxu3 %v13393_v17 }
 0x48a   : > { %v8637_v58 = vpop.f32.mrf.mxu2  ;;  %8750 = vmatpush.bf16.msra.mxu3 %v13337_v44 }
 0x48d   : > { %8751 = vmatmul.bf16.vlgmr.msra.gmra.mxu3 %v17208_v26 }
 0x48e   : > { %8795 = vmatpush.bf16.msrb.mxu3 %v13733_v46 }
 0x492   : > { %8796 = vmatpush.bf16.msrb.mxu3 %v13677_v56  ;;  %v8544_v45 = vpop.f32.mrf.mxu3 }
 0x493   : > { %v8545_v16 = vadd.f32 %v8544_v45, %v17859_v10  ;;  %v8840_v10 = vpop.permute.xlu2 %8839  ;;  %v14945_v45 = vld [vmem:[%s15362_s21] sm:$0xff] }
 0x495   : > { %v8848_v9 = vmax.f32 %v8843_v13, %v8545_v16  ;;  %8857 = vrot.lane.b32.xlu2 %v8545_v16, %s15333_s11  ;;  %v14952_v13 = vld [vmem:[%s15372_s29 + $0x18] sm:$0xff]  ;;  %v14951_v16 = vld [vmem:[%s15372_s29 + $0x10] sm:$0xff] }
 0x496   : > { %8797 = vmatpush.bf16.msrb.mxu3 %v13621_v59  ;;  %8979 = vmatpush.bf16.msra.mxu1 %v14952_v13 }
 0x497   : > { %v8849_v30 = vmax.f32 %v8848_v9, %v8840_v10 }
 0x499   : > { %v8661_v6 = vpop.f32.mrf.mxu0 }
 0x49a   : > { %8798 = vmatpush.bf16.msrb.mxu3 %v13565_v57  ;;  %v8546_v41 = vpop.f32.mrf.mxu3  ;;  %8980 = vmatpush.bf16.msra.mxu1 %v14951_v16  ;;  %v14971_v16 = vld [vmem:[%s18149_s28] sm:$0xff]  ;;  %s18160_s28 = sld [smem:[#allocation30_spill]] }
 0x49b   : > { %v8674_v50 = vpop.f32.mrf.mxu1  ;;  %v14956_v41 = vld [vmem:[%s18129_s8 + $0x18] sm:$0xff] }
 0x49c   : > { %v8675_v5 = vadd.f32 %v8674_v50, %v8661_v6  ;;  %v14948_v50 = vld [vmem:[%s15362_s21 + $0x18] sm:$0xff]  ;;  %9031 = vmatpush.bf16.msra.mxu2 %v14956_v41 }
 0x49d   : > { %8928 = vmatpush.bf16.msra.mxu0 %v14948_v50 }
 0x49e   : > { %8799 = vmatpush.bf16.msrb.mxu3 %v13509_v12 }
 0x4a1   : > { %v8663_v24 = vpop.f32.mrf.mxu0  ;;  %8929 = vmatpush.bf16.msra.mxu0 %v14947_v0 }
 0x4a2   : > { %v8687_v52 = vpop.f32.mrf.mxu2  ;;  %8800 = vmatpush.bf16.msrb.mxu3 %v13453_v7  ;;  %v14950_v7 = vld [vmem:[%s15372_s29 + $0x8] sm:$0xff] }
 0x4a3   : > { %v8688_v62 = vadd.f32 %v8687_v52, %v8675_v5  ;;  %v8676_v11 = vpop.f32.mrf.mxu1  ;;  %v14946_v5 = vld [vmem:[%s15362_s21 + $0x8] sm:$0xff]  ;;  %8981 = vmatpush.bf16.msra.mxu1 %v14950_v7  ;;  %v9179_v7 = vld [vmem:[%s18150_s10] sm:$0x1]  ;;  %s18161_s10 = sld [smem:[#allocation28_spill]] }
 0x4a5   : > { %8930 = vmatpush.bf16.msra.mxu0 %v14946_v5 }
 0x4a6   : > { %8801 = vmatpush.bf16.msrb.mxu3 %v13397_v60 }
 0x4a7   : > { %8982 = vmatpush.bf16.msra.mxu1 %v14949_v54  ;;  %v9222_v54 = vld [vmem:[%s18153_s18] sm:$0x1]  ;;  %s18164_s18 = sld [smem:[#allocation39_spill]] }
 0x4a9   : > { %8931 = vmatpush.bf16.msra.mxu0 %v14945_v45 }
 0x4aa   : > { %v8689_v14 = vpop.f32.mrf.mxu2  ;;  %8802 = vmatpush.bf16.msrb.mxu3 %v13341_v48  ;;  %v14955_v48 = vld [vmem:[%s18129_s8 + $0x10] sm:$0xff] }
 0x4ab   : > { %9032 = vmatpush.bf16.msra.mxu2 %v14955_v48  ;;  %v8895_v14 = vld [vmem:[%s15367_s25] sm:$0x1] }
 0x4ad   : > { %8803 = vmatmul.bf16.vlgmr.msrb.gmra.mxu3 %v17208_v26 }
 0x4b2   : > { %v8596_v33 = vpop.f32.mrf.mxu3 }
 0x4b3   : > { %v8597_v35 = vadd.f32 %v8596_v33, %v17896_v2 }
 0x4b5   : > { %v8854_v25 = vmax.f32 %v8849_v30, %v8597_v35  ;;  %8863 = vrot.lane.b32.xlu0 %v8597_v35, %s15333_s11  ;;  %v14954_v30 = vld [vmem:[%s18129_s8 + $0x8] sm:$0xff]  ;;  %v14953_v35 = vld [vmem:[%s18129_s8] sm:$0xff] }
 0x4b6   : > { %9033 = vmatpush.bf16.msra.mxu2 %v14954_v30 }
 0x4b9   : > { %v8713_v36 = vpop.f32.mrf.mxu0 }
 0x4ba   : > { %v8598_v23 = vpop.f32.mrf.mxu3  ;;  %9034 = vmatpush.bf16.msra.mxu2 %v14953_v35 }
 0x4bb   : > { %v8726_v21 = vpop.f32.mrf.mxu1 }
 0x4bc   : > { %v8727_v15 = vadd.f32 %v8726_v21, %v8713_v36 }
 0x4c1   : > { %v8715_v49 = vpop.f32.mrf.mxu0 }
 0x4c2   : > { %v8739_v4 = vpop.f32.mrf.mxu2  ;;  %v8947_v49 = vld [vmem:[%s18144_s3] sm:$0x1]  ;;  %s18168_s3 = sld [smem:[#allocation34_spill]] }
 0x4c3   : > { %v8740_v22 = vadd.f32 %v8739_v4, %v8727_v15  ;;  %v8728_v39 = vpop.f32.mrf.mxu1  ;;  %v14959_v4 = vld [vmem:[%s15392_s19 + $0x10] sm:$0xff] }
 0x4ca   : > { %v8741_v34 = vpop.f32.mrf.mxu2 }
 0x4d2   : > { %v8648_v1 = vpop.f32.mrf.mxu3 }
 0x4d3   : > { %v8649_v38 = vadd.f32 %v8648_v1, %v17917_v28  ;;  %v8846_v51 = vpop.permute.xlu0 %8845  ;;  %v14957_v1 = vld [vmem:[%s15392_s19] sm:$0xff] }
 0x4d5   : > { %v8855_v42 = vmax.f32 %v8854_v25, %v8649_v38  ;;  %8869 = vrot.lane.b32.xlu1 %v8649_v38, %s15333_s11  ;;  %v14960_v25 = vld [vmem:[%s15392_s19 + $0x18] sm:$0xff] }
 0x4d6   : > { %9082 = vmatpush.bf16.msra.mxu3 %v14960_v25  ;;  %v14964_v38 = vld [vmem:[%s15402_s30 + $0x18] sm:$0xff] }
 0x4d7   : > { %v8860_v56 = vmax.f32 %v8855_v42, %v8846_v51  ;;  %v14969_v42 = vld [vmem:[%s15422_s27 + $0x18] sm:$0xff]  ;;  %9134 = vmatpush.bf16.msrb.mxu0 %v14964_v38 }
 0x4d8   : > { %9208 = vmatpush.bf16.msrb.mxu2 %v14969_v42 }
 0x4d9   : > { %v8765_v37 = vpop.f32.mrf.mxu0 }
 0x4da   : > { %v8778_v17 = vpop.f32.mrf.mxu1  ;;  %v8650_v46 = vpop.f32.mrf.mxu3  ;;  %9083 = vmatpush.bf16.msra.mxu3 %v14959_v4 }
 0x4db   : > { %v8779_v26 = vadd.f32 %v8778_v17, %v8765_v37 }
 0x4e1   : > { %v8767_v31 = vpop.f32.mrf.mxu0 }
 0x4e2   : > { %v8791_v43 = vpop.f32.mrf.mxu2  ;;  %v8780_v44 = vpop.f32.mrf.mxu1  ;;  %v8999_v31 = vld [vmem:[%s15387_s14] sm:$0x1] }
 0x4e3   : > { %v8792_v2 = vadd.f32 %v8791_v43, %v8779_v26  ;;  %v14963_v43 = vld [vmem:[%s15402_s30 + $0x10] sm:$0xff] }
 0x4e4   : > { %9135 = vmatpush.bf16.msrb.mxu0 %v14963_v43 }
 0x4e7   : > { %v8852_v28 = vpop.permute.xlu1 %8851 }
 0x4ea   : > { %v8793_v47 = vpop.f32.mrf.mxu2 }
 0x4ef   : > { %v8858_v55 = vpop.permute.xlu2 %8857 }
 0x4f0   : > { %v8700_v58 = vpop.f32.mrf.mxu3 }
 0x4f1   : > { %v8701_v18 = vadd.f32 %v8700_v58, %v8688_v62 }
 0x4f3   : > { %v8861_v53 = vmax.f32 %v8860_v56, %v8701_v18  ;;  %8875 = vrot.lane.b32.xlu2 %v8701_v18, %s15333_s11  ;;  %v14962_v56 = vld [vmem:[%s15402_s30 + $0x8] sm:$0xff] }
 0x4f4   : > { %v14967_v18 = vld [vmem:[%s15422_s27 + $0x8] sm:$0xff]  ;;  %9136 = vmatpush.bf16.msrb.mxu0 %v14962_v56 }
 0x4f5   : > { %v8866_v20 = vmax.f32 %v8861_v53, %v8852_v28  ;;  %v14961_v53 = vld [vmem:[%s15402_s30] sm:$0xff] }
 0x4f6   : > { %v14965_v28 = vld [vmem:[%s18145_s22] sm:$0xff]  ;;  %s18156_s22 = sld [smem:[#allocation24_spill]] }
 0x4f7   : > { %v8867_v19 = vmax.f32 %v8866_v20, %v8858_v55  ;;  %9165 = vmatpush.bf16.msrb.mxu1 %v14965_v28  ;;  %v9050_v20 = vld [vmem:[%s18146_s7] sm:$0x1]  ;;  %s18157_s7 = sld [smem:[#allocation31_spill]] }
 0x4f8   : > { %v8702_v59 = vpop.f32.mrf.mxu3  ;;  %9137 = vmatpush.bf16.msrb.mxu0 %v14961_v53 }
 0x4f9   : > { %v14966_v59 = vld [vmem:[%s15422_s27] sm:$0xff] }
 0x4fc   : > { %v9249_v30 = vld [vmem:[%s18156_s22] sm:$0x1]  ;;  %s18166_s22 = sld [smem:[#allocation37_spill]] }
 0x510   : > { %v8752_v57 = vpop.f32.mrf.mxu3 }
 0x511   : > { %v8753_v61 = vadd.f32 %v8752_v57, %v8740_v22  ;;  %v14958_v22 = vld [vmem:[%s15392_s19 + $0x8] sm:$0xff] }
 0x512   : > { %9084 = vmatpush.bf16.msra.mxu3 %v14958_v22 }
 0x513   : > { %v8872_v32 = vmax.f32 %v8867_v19, %v8753_v61  ;;  %8881 = vrot.lane.b32.xlu0 %v8753_v61, %s15333_s11  ;;  %s18155_s11 = sld [smem:[#allocation27_spill]] }
 0x516   : > { %9085 = vmatpush.bf16.msra.mxu3 %v14957_v1 }
 0x518   : > { %v8754_v27 = vpop.f32.mrf.mxu3 }
 0x527   : > { %v8864_v29 = vpop.permute.xlu0 %8863 }
 0x530   : > { %v8804_v40 = vpop.f32.mrf.mxu3 }
 0x531   : > { %v8805_v12 = vadd.f32 %v8804_v40, %v8792_v2  ;;  %v14968_v2 = vld [vmem:[%s15422_s27 + $0x10] sm:$0xff]  ;;  %v14970_v40 = vld [vmem:[%s18147_s23] sm:$0xff]  ;;  %s18158_s23 = sld [smem:[#allocation26_spill]] }
 0x532   : > { %9209 = vmatpush.bf16.msrb.mxu2 %v14968_v2  ;;  %9239 = vmatpush.bf16.msrb.mxu3 %v14970_v40  ;;  %v14976_v2 = vld [vmem:[%s18157_s7] sm:$0xff]  ;;  %v14987_v40 = vld [vmem:[%s18164_s18 + $0x8] sm:$0xff] }
 0x533   : > { %v8873_v6 = vmax.f32 %v8872_v32, %v8805_v12  ;;  %v9102_v12 = vld [vmem:[%s18148_s1] sm:$0x1]  ;;  %s18159_s1 = sld [smem:[#allocation33_spill]] }
 0x535   : > { %v8878_v9 = vmax.f32 %v8873_v6, %v8864_v29  ;;  %v9147_v29 = vld [vmem:[%s18151_s26] sm:$0x1]  ;;  %s18162_s26 = sld [smem:[#allocation35_spill]] }
 0x536   : > { %9210 = vmatpush.bf16.msrb.mxu2 %v14967_v18 }
 0x538   : > { %v8806_v3 = vpop.f32.mrf.mxu3 }
 0x53a   : > { %9211 = vmatpush.bf16.msrb.mxu2 %v14966_v59 }
 0x547   : > { %v8870_v8 = vpop.permute.xlu1 %8869 }
 0x548   : > { %v8879_v60 = vmax.f32 %v8878_v9, %v8870_v8 }
 0x54d   : > { %v8876_v52 = vpop.permute.xlu2 %8875 }
 0x54e   : > { %v8884_v62 = vmax.f32 %v8879_v60, %v8876_v52 }
 0x585   : > { %v8882_v24 = vpop.permute.xlu0 %8881 }
 0x586   : > { %v8885_v11 = vmax.f32 %v8884_v62, %v8882_v24 }
 0x588   : > { %v8886_v63 = vpack.c.bf16 %v8885_v11, %v8885_v11 }
 0x58a   : > { %13750 = vmatmul.msk.bf16.vlgmr.msra.gmra.mxu0 %vm8920_vm0, %v8886_v63  ;;  %v14972_v63 = vld [vmem:[%s18152_s15] sm:$0xff]  ;;  %s18163_s15 = sld [smem:[#allocation32_spill]] }
 0x58b   : > { %9266 = vmatpush.bf16.msra.mxu0 %v14971_v16 }
 0x607   : > { %v8933_v10 = vpop.f32.mrf.mxu0 }
 0x608   : > { %v8934_v36 = vadd.f32 %v8933_v10, %v8895_v14 }
 0x60a   : > { %v8937_v21 = vmax.f32 %v8934_v36, 0.0 }
 0x60c   : > { %v8938_v15 = vpack.c.bf16 %v8937_v21, %v8937_v21  ;;  %v14975_v21 = vld [vmem:[%s18154_s2] sm:$0xff]  ;;  %s18165_s2 = smov %s18164_s18  ;;  %s18173_s18 = sld [smem:[#allocation38_spill]] }
 0x60e   : > { %13767 = vmatmul.msk.bf16.vlgmr.msra.gmra.mxu1 %vm8920_vm0, %v8938_v15  ;;  %v14974_v15 = vld [vmem:[%s18155_s11 + $0x8] sm:$0xff] }
 0x60f   : > { %v8935_v33 = vpop.f32.mrf.mxu0  ;;  %9294 = vmatpush.bf16.msra.mxu1 %v14972_v63 }
 0x610   : > { %v14973_v33 = vld [vmem:[%s18155_s11] sm:$0xff] }
 0x68b   : > { %v8984_v39 = vpop.f32.mrf.mxu1 }
 0x68c   : > { %v8985_v23 = vadd.f32 %v8984_v39, %v8947_v49 }
 0x68e   : > { %v8988_v34 = vadd.f32 %v8985_v23, %v8885_v11  ;;  %v14977_v23 = vld [vmem:[%s18157_s7 + $0x8] sm:$0xff] }
 0x690   : > { %v8989_v37 = vmax.f32 %v8988_v34, 0.0  ;;  %v9277_v34 = vld [vmem:[%s18158_s23] sm:$0x1]  ;;  %s18167_s23 = smov %s18166_s22 }
 0x692   : > { %v8990_v17 = vpack.c.bf16 %v8989_v37, %v8989_v37 }
 0x693   : > { %v8986_v26 = vpop.f32.mrf.mxu1 }
 0x694   : > { %13784 = vmatmul.msk.bf16.vlgmr.msra.gmra.mxu2 %vm8920_vm0, %v8990_v17 }
 0x695   : > { %9329 = vmatpush.bf16.msra.mxu2 %v14974_v15 }
 0x699   : > { %9330 = vmatpush.bf16.msra.mxu2 %v14973_v33 }
 0x717   : > { %v9036_v44 = vpop.f32.mrf.mxu2 }
 0x718   : > { %v9037_v46 = vadd.f32 %v9036_v44, %v8999_v31  ;;  %v14979_v31 = vld [vmem:[%s18159_s1 + $0x8] sm:$0xff]  ;;  %v14978_v44 = vld [vmem:[%s18159_s1] sm:$0xff]  ;;  %s18176_s1 = sld [smem:[#allocation42_spill]] }
 0x71a   : > { %v9040_v47 = vmax.f32 %v9037_v46, 0.0  ;;  %v9338_v46 = vld [vmem:[%s18160_s28] sm:$0x1]  ;;  %s18169_s28 = sld [smem:[#allocation41_spill]] }
 0x71c   : > { %v9041_v51 = vpack.c.bf16 %v9040_v47, %v9040_v47  ;;  %v9306_v47 = vld [vmem:[%s18161_s10] sm:$0x1]  ;;  %s18170_s10 = sld [smem:[#allocation36_spill]] }
 0x71e   : > { %13801 = vmatmul.msk.bf16.vlgmr.msra.gmra.mxu3 %vm8920_vm0, %v9041_v51 }
 0x71f   : > { %v9038_v58 = vpop.f32.mrf.mxu2  ;;  %9352 = vmatpush.bf16.msra.mxu3 %v14975_v21 }
 0x7a1   : > { %v9087_v55 = vpop.f32.mrf.mxu3 }
 0x7a2   : > { %v9088_v57 = vadd.f32 %v9087_v55, %v9050_v20  ;;  %v14981_v20 = vld [vmem:[%s18162_s26 + $0x8] sm:$0xff]  ;;  %v9365_v55 = vld [vmem:[%s18163_s15] sm:$0x1]  ;;  %s18172_s15 = sld [smem:[#allocation40_spill]] }
 0x7a4   : > { %v9091_v19 = vadd.f32 %v9088_v57, %v8989_v37 }
 0x7a6   : > { %v9092_v61 = vmax.f32 %v9091_v19, 0.0 }
 0x7a8   : > { %v9093_v32 = vpack.c.bf16 %v9092_v61, %v9092_v61 }
 0x7a9   : > { %v9089_v27 = vpop.f32.mrf.mxu3 }
 0x7aa   : > { %13818 = vmatmul.msk.bf16.vlgmr.msrb.gmra.mxu0 %vm8920_vm0, %v9093_v32  ;;  %13840 = vmatmul.msk.bf16.vlgmr.msrb.gmra.mxu2 %vm8920_vm0, %v9093_v32 }
 0x7ab   : > { %9387 = vmatpush.bf16.msrb.mxu0 %v14977_v23  ;;  %9458 = vmatpush.bf16.msrb.mxu2 %v14981_v20 }
 0x7af   : > { %9388 = vmatpush.bf16.msrb.mxu0 %v14976_v2 }
 0x827   : > { %v9139_v6 = vpop.f32.mrf.mxu0 }
 0x828   : > { %v9140_v50 = vadd.f32 %v9139_v6, %v9102_v12  ;;  %v14980_v12 = vld [vmem:[%s18162_s26] sm:$0xff] }
 0x829   : > { %v14986_v6 = vld [vmem:[%s18165_s2] sm:$0xff]  ;;  %9459 = vmatpush.bf16.msrb.mxu2 %v14980_v12 }
 0x82a   : > { %v9143_v0 = vmax.f32 %v9140_v50, 0.0  ;;  %v14985_v50 = vld [vmem:[%s18166_s22 + $0x18] sm:$0xff]  ;;  %s18174_s22 = sld [smem:[#allocation45_spill]] }
 0x82c   : > { %v9144_v3 = vpack.c.bf16 %v9143_v0, %v9143_v0  ;;  %v9400_v0 = vld [vmem:[%s18168_s3] sm:$0x1]  ;;  %s18171_s3 = sld [smem:[#allocation43_spill]] }
 0x82d   : > { %v9213_v5 = vpop.f32.mrf.mxu2 }
 0x82e   : > { %13823 = vmatmul.msk.bf16.vlgmr.msrb.gmra.mxu1 %vm9154_vm1, %v9144_v3  ;;  %v9214_v9 = vadd.f32 %v9213_v5, %v9179_v7 }
 0x82f   : > { %v9141_v45 = vpop.f32.mrf.mxu0  ;;  %9422 = vmatpush.bf16.msrb.mxu1 %v14979_v31 }
 0x832   : > { %v14995_v21 = vld [vmem:[%s18171_s3 + $0x18] sm:$0xff]  ;;  %v14994_v15 = vld [vmem:[%s18171_s3 + $0x10] sm:$0xff]  ;;  %v14993_v33 = vld [vmem:[%s18171_s3 + $0x8] sm:$0xff] }
 0x833   : > { %9423 = vmatpush.bf16.msrb.mxu1 %v14978_v44 }
 0x835   : > { %v9215_v13 = vpop.f32.mrf.mxu2 }
 0x8ab   : > { %v9167_v8 = vpop.f32.mrf.mxu1 }
 0x8ac   : > { %v9168_v52 = vadd.f32 %v9167_v8, %v9147_v29  ;;  %v14984_v29 = vld [vmem:[%s18167_s23 + $0x10] sm:$0xff]  ;;  %v14983_v8 = vld [vmem:[%s18167_s23 + $0x8] sm:$0xff] }
 0x8ae   : > { %v9217_v60 = vadd.f32 %v9214_v9, %v9168_v52  ;;  %v14982_v9 = vld [vmem:[%s18167_s23] sm:$0xff]  ;;  %v14991_v52 = vld [vmem:[%s18169_s28 + $0x18] sm:$0xff] }
 0x8b0   : > { %v9218_v62 = vmax.f32 %v9217_v60, 0.0  ;;  %v14990_v60 = vld [vmem:[%s18169_s28 + $0x10] sm:$0xff] }
 0x8b2   : > { %v9219_v24 = vpack.c.bf16 %v9218_v62, %v9218_v62 }
 0x8b3   : > { %v9169_v11 = vpop.f32.mrf.mxu1 }
 0x8b4   : > { %13845 = vmatmul.msk.bf16.vlgmr.msrb.gmra.mxu3 %vm9154_vm1, %v9219_v24  ;;  %v9436_v24 = vld [vmem:[%s18170_s10] sm:$0x1]  ;;  %s18175_s10 = smov %s18174_s22 }
 0x8b5   : > { %9507 = vmatpush.bf16.msrb.mxu3 %v14985_v50  ;;  %v14997_v44 = vld [vmem:[%s18175_s10 + $0x8] sm:$0xff] }
 0x8b9   : > { %9508 = vmatpush.bf16.msrb.mxu3 %v14984_v29 }
 0x8bd   : > { %9509 = vmatpush.bf16.msrb.mxu3 %v14983_v8 }
 0x8c1   : > { %9510 = vmatpush.bf16.msrb.mxu3 %v14982_v9 }
 0x937   : > { %v9241_v41 = vpop.f32.mrf.mxu3 }
 0x938   : > { %v9242_v48 = vadd.f32 %v9241_v41, %v9222_v54 }
 0x93a   : > { %v9245_v14 = vmax.f32 %v9242_v48, 0.0 }
 0x93c   : > { %v9246_v10 = vpack.c.bf16 %v9245_v14, %v9245_v14 }
 0x93e   : > { %13850 = vmatmul.msk.bf16.vlgmr.msra.gmra.mxu0 %vm9154_vm1, %v9246_v10  ;;  %v14989_v10 = vld [vmem:[%s18169_s28 + $0x8] sm:$0xff] }
 0x93f   : > { %v9243_v36 = vpop.f32.mrf.mxu3  ;;  %9539 = vmatpush.bf16.msra.mxu0 %v14987_v40  ;;  %v9707_v40 = vld [vmem:[#allocation7] sm:$0x1] }
 0x940   : > { %v14988_v36 = vld [vmem:[%s18169_s28] sm:$0xff] }
 0x943   : > { %9540 = vmatpush.bf16.msra.mxu0 %v14986_v6 }
 0x9bb   : > { %v9268_v35 = vpop.f32.mrf.mxu0 }
 0x9bc   : > { %v9269_v25 = vadd.f32 %v9268_v35, %v9249_v30  ;;  %v9520_v30 = vld [vmem:[%s18172_s15] sm:$0x1]  ;;  %s9747_s15 = scalar_lea.hbm %s15572_s6, %s15595_s0  ;;  %s15232_s0 = scalar_lea.hbm %s15572_s6, 2 }
 0x9bd   : > { %v9475_v35 = vld [vmem:[%s18173_s18] sm:$0x1] }
 0x9be   : > { %v9272_v4 = vadd.f32 %v9269_v25, %v9218_v62 }
 0x9c0   : > { %v9273_v22 = vmax.f32 %v9272_v4, 0.0 }
 0x9c2   : > { %v9274_v49 = vpack.c.bf16 %v9273_v22, %v9273_v22 }
 0x9c3   : > { %v9270_v39 = vpop.f32.mrf.mxu0 }
 0x9c4   : > { %13855 = vmatmul.msk.bf16.vlgmr.msra.gmra.mxu1 %vm9154_vm1, %v9274_v49  ;;  %13869 = vmatmul.msk.bf16.vlgmr.msra.gmra.mxu3 %vm9154_vm1, %v9274_v49 }
 0x9c5   : > { %9589 = vmatpush.bf16.msra.mxu1 %v14991_v52 }
 0x9c9   : > { %9590 = vmatpush.bf16.msra.mxu1 %v14990_v60 }
 0x9cd   : > { %9591 = vmatpush.bf16.msra.mxu1 %v14989_v10 }
 0x9d1   : > { %9592 = vmatpush.bf16.msra.mxu1 %v14988_v36 }
 0xa41   : > { %v9296_v37 = vpop.f32.mrf.mxu1 }
 0xa42   : > { %v9297_v17 = vadd.f32 %v9296_v37, %v9277_v34  ;;  %v14992_v37 = vld [vmem:[%s18171_s3] sm:$0xff]  ;;  %s9751_s3 = sshll.u32 %s9747_s15, 4  ;;  %s9752_s3 = int_to_ptr.hbm [resolvable:$true] %s9751_s3 }
 0xa43   : > { %s15226_s5 = sshra.s32 %s9752_s3, 4  ;;  %s15227_s5 = int_to_ptr.hbm [resolvable:$true] %s15226_s5 }
 0xa44   : > { %v9300_v26 = vmax.f32 %v9297_v17, 0.0  ;;  %v14999_v17 = vld [vmem:[%s18174_s22 + $0x18] sm:$0xff]  ;;  %s15228_s7 = scalar_lea.hbm %s15227_s5, 1  ;;  %p15233_p7 = scmp.lt.s32.totalorder %s15227_s5, %s15572_s6 }
 0xa45   : > { %9692 = vmatpush.bf16.msra.mxu3 %v14999_v17  ;;  %p15229_p10 = scmp.ne.s32.totalorder %s15227_s5, %s15228_s7  ;;  %p15234_p8 = scmp.lt.s32.totalorder %s15232_s0, %s15228_s7 }
 0xa46   : > { %v9301_v1 = vpack.c.bf16 %v9300_v26, %v9300_v26  ;;  %v14998_v26 = vld [vmem:[%s18175_s10 + $0x10] sm:$0xff] }
 0xa47   : > { %v9354_v38 = vpop.f32.mrf.mxu3  ;;  %p15230_p12 = pnand %p15229_p10, %p15612_p5  ;;  %p15235_p11 = por %p15234_p8, %p15233_p7 }
 0xa48   : > { %13864 = vmatmul.msk.bf16.vlgmr.msra.gmra.mxu2 %vm9319_vm2, %v9301_v1  ;;  %v9355_v58 = vadd.f32 %v9354_v38, %v9338_v46  ;;  %v9557_v1 = vld [vmem:[%s18176_s1] sm:$0x1]  ;;  %s1411_s1 = sand.u32 1, %s15274_s16  }
 0xa49   : > { %v9298_v42 = vpop.f32.mrf.mxu1  ;;  %9640 = vmatpush.bf16.msra.mxu2 %v14995_v21  ;;  %9693 = vmatpush.bf16.msra.mxu3 %v14998_v26  ;;  %v14996_v46 = vld [vmem:[%s18175_s10] sm:$0xff]  ;;  %s1412_s22 = scalar_lea.vmem [#allocation8], %s1411_s1  ;;  %s9739_s4 = scalar_lea.sflag [#allocation4], %s1411_s1 }
 0xa4a   : > { %s9749_s2 = sshll.u32 %s1412_s22, 4  ;;  %p15231_p0 = pneg %p15230_p12  ;;  %s9750_s2 = int_to_ptr.vmem [resolvable:$true] %s9749_s2 }
 0xa4c   : > { %p15236_p13 = pnand %p15235_p11, %p15231_p0 }
 0xa4d   : > { %9641 = vmatpush.bf16.msra.mxu2 %v14994_v15  ;;  %9694 = vmatpush.bf16.msra.mxu3 %v14997_v44 }
 0xa4f   : > { %v9356_v43 = vpop.f32.mrf.mxu3 }
 0xa51   : > { %9642 = vmatpush.bf16.msra.mxu2 %v14993_v33  ;;  %9695 = vmatpush.bf16.msra.mxu3 %v14996_v46 }
 0xa55   : > { %9643 = vmatpush.bf16.msra.mxu2 %v14992_v37 }
 0xacb   : > { %v9332_v51 = vpop.f32.mrf.mxu2 }
 0xacc   : > { %v9333_v56 = vadd.f32 %v9332_v51, %v9306_v47  ;;  %v15001_v47 = vld [vmem:[%s15562_s24 + $0x8] sm:$0xff]  ;;  %v15000_v51 = vld [vmem:[%s15562_s24] sm:$0xff] }
 0xace   : > { %v9358_v18 = vadd.f32 %v9355_v58, %v9333_v56  ;;  %v9608_v58 = vld [vmem:[#allocation2] sm:$0x1] }
 0xad0   : > { %v9359_v53 = vmax.f32 %v9358_v18, 0.0 }
 0xad2   : > { %v9360_v59 = vpack.c.bf16 %v9359_v53, %v9359_v53 }
 0xad3   : > { %v9334_v28 = vpop.f32.mrf.mxu2 }
 0xad4   : > { %13878 = vmatmul.msk.bf16.vlgmr.msrb.gmra.mxu0 %vm9319_vm2, %v9360_v59 }
 0xad5   : > { %9729 = vmatpush.bf16.msrb.mxu0 %v15001_v47 }
 0xad9   : > { %9730 = vmatpush.bf16.msrb.mxu0 %v15000_v51 }
 0xb51   : > { %v9390_v57 = vpop.f32.mrf.mxu0 }
 0xb52   : > { %v9391_v19 = vadd.f32 %v9390_v57, %v9365_v55  ;;  %v9660_v55 = vld [vmem:[#allocation5] sm:$0x1] }
 0xb54   : > { %v9394_v61 = vmax.f32 %v9391_v19, 0.0 }
 0xb56   : > { %v9395_v32 = vpack.c.bf16 %v9394_v61, %v9394_v61 }
 0xb58   : > { %13887 = vmatmul.msk.bf16.vlgmr.msrb.gmra.mxu1 %vm9319_vm2, %v9395_v32 }
 0xb59   : > { %v9392_v27 = vpop.f32.mrf.mxu0 }
 0xbd5   : > { %v9425_v3 = vpop.f32.mrf.mxu1 }
 0xbd6   : > { %v9426_v5 = vadd.f32 %v9425_v3, %v9400_v0 }
 0xbd8   : > { %v9429_v45 = vadd.f32 %v9426_v5, %v9359_v53 }
 0xbda   : > { %v9430_v13 = vmax.f32 %v9429_v45, 0.0 }
 0xbdc   : > { %v9431_v16 = vpack.c.bf16 %v9430_v13, %v9430_v13 }
 0xbdd   : > { %v9427_v7 = vpop.f32.mrf.mxu1 }
 0xbde   : > { %13896 = vmatmul.msk.bf16.vlgmr.msrb.gmra.mxu2 %vm9319_vm2, %v9431_v16  ;;  %13922 = vmatmul.msk.bf16.vlgmr.msra.gmra.mxu0 %vm9319_vm2, %v9431_v16 }
 0xc5b   : > { %v9542_v62 = vpop.f32.mrf.mxu0 }
 0xc5c   : > { %v9543_v4 = vadd.f32 %v9542_v62, %v9520_v30 }
 0xc61   : > { %v9461_v11 = vpop.f32.mrf.mxu2 }
 0xc62   : > { %v9462_v63 = vadd.f32 %v9461_v11, %v9436_v24 }
 0xc63   : > { %v9544_v54 = vpop.f32.mrf.mxu0 }
 0xc64   : > { %v9465_v41 = vmax.f32 %v9462_v63, 0.0 }
 0xc66   : > { %v9466_v48 = vpack.c.bf16 %v9465_v41, %v9465_v41 }
 0xc68   : > { %13913 = vmatmul.msk.bf16.vlgmr.msrb.gmra.mxu3 %vm8920_vm0, %v9466_v48 }
 0xc69   : > { %v9463_v14 = vpop.f32.mrf.mxu2 }
 0xceb   : > { %v9512_v25 = vpop.f32.mrf.mxu3 }
 0xcec   : > { %v9513_v22 = vadd.f32 %v9512_v25, %v9475_v35 }
 0xcee   : > { %v9546_v49 = vadd.f32 %v9543_v4, %v9513_v22 }
 0xcf0   : > { %v9547_v39 = vmax.f32 %v9546_v49, 0.0 }
 0xcf2   : > { %v9548_v23 = vpack.c.bf16 %v9547_v39, %v9547_v39 }
 0xcf3   : > { %v9514_v34 = vpop.f32.mrf.mxu3 }
 0xcf4   : > { %13939 = vmatmul.msk.bf16.vlgmr.msra.gmra.mxu1 %vm8920_vm0, %v9548_v23 }
 0xd71   : > { %v9594_v38 = vpop.f32.mrf.mxu1 }
 0xd72   : > { %v9595_v42 = vadd.f32 %v9594_v38, %v9557_v1 }
 0xd74   : > { %v9598_v43 = vmax.f32 %v9595_v42, 0.0 }
 0xd76   : > { %v9599_v2 = vpack.c.bf16 %v9598_v43, %v9598_v43 }
 0xd78   : > { %13956 = vmatmul.msk.bf16.vlgmr.msra.gmra.mxu2 %vm8920_vm0, %v9599_v2 }
 0xd79   : > { %v9596_v31 = vpop.f32.mrf.mxu1 }
 0xdfb   : > { %v9645_v56 = vpop.f32.mrf.mxu2 }
 0xdfc   : > { %v9646_v18 = vadd.f32 %v9645_v56, %v9608_v58 }
 0xdfe   : > { %v9649_v53 = vadd.f32 %v9646_v18, %v9547_v39 }
 0xe00   : > { %v9650_v59 = vmax.f32 %v9649_v53, 0.0 }
 0xe02   : > { %v9651_v28 = vpack.c.bf16 %v9650_v59, %v9650_v59 }
 0xe03   : > { %v9647_v20 = vpop.f32.mrf.mxu2 }
 0xe04   : > { %13973 = vmatmul.msk.bf16.vlgmr.msra.gmra.mxu3 %vm8920_vm0, %v9651_v28 }
 0xe87   : > { %v9697_v57 = vpop.f32.mrf.mxu3 }
 0xe88   : > { %v9698_v19 = vadd.f32 %v9697_v57, %v9660_v55 }
 0xe8a   : > { %v9701_v61 = vmax.f32 %v9698_v19, 0.0 }
 0xe8c   : > { %v9702_v32 = vpack.c.bf16 %v9701_v61, %v9701_v61 }
 0xe8e   : > { %13982 = vmatmul.msk.bf16.vlgmr.msrb.gmra.mxu0 %vm9319_vm2, %v9702_v32 }
 0xe8f   : > { %v9699_v27 = vpop.f32.mrf.mxu3 }
 0xf0b   : > { %v9732_v12 = vpop.f32.mrf.mxu0 }
 0xf0c   : > { %v9733_v6 = vadd.f32 %v9732_v12, %v9707_v40 }
 0xf0e   : > { %9737 = vst.msk [vmem:[%s1412_s22] sm:$0x1] %vm9736_vm3, %v9733_v6 }
 0xf0f   : > { %15239 = shalt.err (!%p15236_p13)
}
 0xf10   : > { %15014 = dma.vmem_to_hbm [thread:$0]  (%p15612_p5), %s9750_s2, 16, %s9752_s3, %s9739_s4  }
 0xf13   : > { %v9734_v50 = vpop.f32.mrf.mxu0 }
 0xf14 PF: > { %s18178_s15 = sld [smem:[#allocation48_spill]] }
 0xf15   : > { %s18179_s1 = sld [smem:[#allocation46_spill]] }
 0xf1a   : > { %p15036_p1 = scmp.ge.s32.totalorder %s18178_s15, 2 }
 0xf1b   : > { %s9763_s8 = sand.u32 1, %s18179_s1  }
 0xf1c   : > { %p15027_p2 = pnand %p15036_p1, %p15616_p6  ;;  %s9764_s9 = scalar_lea.sflag [#allocation4], %s9763_s8 }
 0xf1e   : > { %p15028_p3 = pneg %p15027_p2 }
 0xf20   : > { %15265 = dma.done.wait (%p15028_p3), %s9764_s9, 16  }
 0xf21   : > { %15267 = vsyncadd (%p15028_p3), %s9764_s9, 4294967280  ;;  %s18181_s22 = sld [smem:[#allocation49_spill]]  ;;  %s18184_s15 = smov %s15274_s16 }
 0xf22   : > { %s18182_s5 = sld [smem:[#allocation47_spill]] }
 0xf23   : > { %s18183_s18 = sld [smem:[#allocation50_spill]] }
 0xf27   : > { %p105_p4 = scmp.ge.s32.totalorder %s18181_s22, 4  }
 0xf28   : > { %s18185_s16 = smov %s18182_s5 }
 0xf29   :  { %107 = sbr.rel (!%p105_p4) target bundleno = 87 (0x57), region = 298 }
 0xf2e   :  { %9769 = vsyncpa [#allocation3], 1 }
 0xf2f   :  { %9771 = vsyncpa [#allocation3 + $0x1], 1 }
 0xf30   :  { %9772 = vsyncpa [#allocation6], 1 }
 0xf31   :  { %9773 = vsyncpa [#allocation4], 1 }
 0xf32   :  { %9775 = vsyncpa [#allocation4 + $0x1], 1 }

</bundles_post_ra>
